<compile_context>
chip_gen: v7x
topology: tpu7x:2x2x1
jax: 0.10.0
libtpu: 0.0.40
codegen_flags: <defaults>
</compile_context>

<pallas_src>
import math
import numpy as np

import jax
import jax.numpy as jnp
from jax.experimental import pallas as pl
from jax.experimental.pallas import tpu as pltpu

EPS = 1e-5
ROW_ALIGN = 16          # slab row alignment (bf16 sublane tile)
PATCH_MIN_LANES = 128   # use an im2col patch only when lanes >= one vreg row


# ---------------------------------------------------------------------------
# Static helpers (numpy, build time)
# ---------------------------------------------------------------------------

def _bilinear_kernel_2d(k):
    f = math.ceil(k / 2)
    c = (2 * f - 1 - f % 2) / (2.0 * f)
    w = np.zeros((k, k), dtype=np.float64)
    for i in range(k):
        for j in range(k):
            w[i, j] = (1 - abs(i / f - c)) * (1 - abs(j / f - c))
    return w


def make_upsample_matrix(hin, win, ratio, pb=1):
    """M such that  up = x_flat @ M  implements the depthwise bilinear
    ConvTranspose2d(2r, stride=r, pad=r//2, groups=C) of fill_up_weights.
    With pb>1 the layout is batch-packed along the width axis
    (flat index = y*(pb*W) + b*W + x); M is block structured so samples
    never mix."""
    k = 2 * ratio
    pad = ratio // 2
    hout, wout = hin * ratio, win * ratio
    w2d = _bilinear_kernel_2d(k)
    m1 = np.zeros((hin * win, hout * wout), dtype=np.float32)
    for iy in range(hin):
        for ix in range(win):
            for oy in range(hout):
                ky = oy + pad - iy * ratio
                if not 0 <= ky < k:
                    continue
                for ox in range(wout):
                    kx = ox + pad - ix * ratio
                    if not 0 <= kx < k:
                        continue
                    m1[iy * win + ix, oy * wout + ox] = w2d[ky, kx]
    if pb == 1:
        return m1
    mp = np.zeros((hin * pb * win, hout * pb * wout), dtype=np.float32)
    iy = np.arange(hin)
    ix = np.arange(win)
    oy = np.arange(hout)
    ox = np.arange(wout)
    for b in range(pb):
        rin = (iy[:, None] * (pb * win) + b * win + ix[None, :]).reshape(-1)
        rout = (oy[:, None] * (pb * wout) + b * wout + ox[None, :]).reshape(-1)
        mp[np.ix_(rin, rout)] = m1
    return mp


def collect_conv_inputs(channels, configs, spatials):
    """Distinct (Cin, H, W, k) of every conv with k > 1 (for scratch sizing)."""
    keys = []

    def note(c, hw, kk):
        key = (c, hw[0], hw[1], kk)
        if kk > 1 and key not in keys:
            keys.append(key)

    def note_ida(cin, cout, cfg, hw2):
        kproj, kfeat, ratio, knode = cfg
        note(cin, hw2, kproj)
        for kk in kfeat:
            note(cout, hw2, kk)
        hw1 = (hw2[0] * ratio, hw2[1] * ratio)
        for kk in knode:
            note(cout, hw1, kk)

    for lvl in range(3):
        for i, cfg in enumerate(configs[lvl]):
            note_ida(channels[i + 1], channels[i], cfg, spatials[i + 1])
    note_ida(channels[1], channels[0], configs[3], spatials[1])
    note_ida(channels[2], channels[0], configs[4], spatials[2])
    return keys


# ---------------------------------------------------------------------------
# Parameter init (raw, PyTorch-like)
# ---------------------------------------------------------------------------

def init_neck_raw(key, channels, configs):
    keys = iter(jax.random.split(key, 256))

    def conv(cin, cout, ksize):
        k1, k2, k3, k4, k5, k6 = jax.random.split(next(keys), 6)
        w = jax.random.normal(k1, (cout, cin, ksize, ksize), jnp.float32)
        w = w * (1.0 / np.sqrt(cin * ksize * ksize))
        b = 0.1 * jax.random.normal(k2, (cout,), jnp.float32)
        gamma = 1.0 + 0.1 * jax.random.normal(k3, (cout,), jnp.float32)
        beta = 0.1 * jax.random.normal(k4, (cout,), jnp.float32)
        mean = 0.1 * jax.random.normal(k5, (cout,), jnp.float32)
        var = jnp.abs(jax.random.normal(k6, (cout,), jnp.float32)) + 0.5
        return {"w": w, "b": b, "gamma": gamma, "beta": beta,
                "mean": mean, "var": var}

    def ida(cin, cout, cfg):
        kproj, kfeat, ratio, knode = cfg
        return {"project": conv(cin, cout, kproj),
                "feature": [conv(cout, cout, kk) for kk in kfeat],
                "node": [conv(cout, cout, kk) for kk in knode]}

    return {
        "up1": [ida(channels[i + 1], channels[i], configs[0][i])
                for i in range(len(configs[0]))],
        "up2": [ida(channels[i + 1], channels[i], configs[1][i])
                for i in range(len(configs[1]))],
        "up3": [ida(channels[i + 1], channels[i], configs[2][i])
                for i in range(len(configs[2]))],
        "up4": ida(channels[1], channels[0], configs[3]),
        "up5": ida(channels[2], channels[0], configs[4]),
    }


# ---------------------------------------------------------------------------
# BN folding + single bf16 parameter slab
# ---------------------------------------------------------------------------

def _fold_conv_np(p):
    w = np.asarray(p["w"], np.float32)
    b = np.asarray(p["b"], np.float32)
    gamma = np.asarray(p["gamma"], np.float32)
    beta = np.asarray(p["beta"], np.float32)
    mean = np.asarray(p["mean"], np.float32)
    var = np.asarray(p["var"], np.float32)
    cout, cin, k, _ = w.shape
    s = gamma / np.sqrt(var + EPS)
    # columns ordered (dy*k + dx)*cin + ci  -> matches the im2col patch rows
    wm = (w * s[:, None, None, None]).transpose(0, 2, 3, 1).reshape(cout, k * k * cin)
    bias = ((b - mean) * s + beta).reshape(cout, 1)
    return np.concatenate([wm, bias], axis=1), (cout, cin, k)  # bias as last col


def build_param_slab(raw, channels, configs, spatials, pb):
    """Pack every parameter leaf into ONE bf16 2-D slab (single DMA)."""
    entries = []            # (name, np.float32 2-D)
    conv_meta = {}          # name -> (cout, cin, k)

    def add_conv(name, p):
        wb, meta = _fold_conv_np(p)
        entries.append((name, wb))
        conv_meta[name] = meta

    def add_ida(prefix, p):
        add_conv(prefix + ("project",), p["project"])
        for j, q in enumerate(p["feature"]):
            add_conv(prefix + ("feature", j), q)
        for j, q in enumerate(p["node"]):
            add_conv(prefix + ("node", j), q)

    for i, p in enumerate(raw["up1"]):
        add_ida(("up1", i), p)
    for i, p in enumerate(raw["up2"]):
        add_ida(("up2", i), p)
    for i, p in enumerate(raw["up3"]):
        add_ida(("up3", i), p)
    add_ida(("up4",), raw["up4"])
    add_ida(("up5",), raw["up5"])

    upkeys = []

    def note_up(hw, r):
        key = (hw[0], hw[1], r)
        if key not in upkeys:
            upkeys.append(key)

    for lvl in range(3):
        for i, cfg in enumerate(configs[lvl]):
            note_up(spatials[i + 1], cfg[2])
    note_up(spatials[1], configs[3][2])
    note_up(spatials[2], configs[4][2])
    for (h, w, r) in upkeys:
        entries.append((("up", h, w, r), make_upsample_matrix(h, w, r, pb)))

    cmax = max(a.shape[1] for _, a in entries)
    cslab = ((cmax + 127) // 128) * 128
    offsets = {}
    row = 0
    for name, a in entries:
        offsets[name] = (row, a.shape[0], a.shape[1])
        row += ((a.shape[0] + ROW_ALIGN - 1) // ROW_ALIGN) * ROW_ALIGN
    rslab = ((row + ROW_ALIGN - 1) // ROW_ALIGN) * ROW_ALIGN
    slab = np.zeros((rslab, cslab), np.float32)
    for name, a in entries:
        off, r, c = offsets[name]
        slab[off:off + r, :c] = a
    return jnp.asarray(slab, dtype=jnp.bfloat16), offsets, conv_meta


# ---------------------------------------------------------------------------
# Device heuristics for batch-into-lanes packing
# ---------------------------------------------------------------------------

def _tensorcores_per_chip():
    try:
        kind = jax.devices()[0].device_kind.lower()
    except Exception:
        return 1
    return 2 if any(t in kind for t in ("v4", "v5p", "v7")) else 1


def choose_samples_per_step(batch):
    """Pack the whole batch along lanes on single-TC chips (v5e/v6e); keep one
    sample per core on dual-TC chips (v7x/v4/v5p)."""
    tc = _tensorcores_per_chip()
    if tc > 1 and batch % tc == 0:
        return batch // tc
    return batch


# ---------------------------------------------------------------------------
# Fused Pallas kernel for the whole Neck
# ---------------------------------------------------------------------------

def build_neck_forward(slab, offsets, conv_meta, channels, configs, spatials,
                       batch, pb):
    assert batch % pb == 0
    gsteps = batch // pb
    c0 = channels[0]
    h0, w0 = spatials[0]
    n_out = h0 * w0 * pb

    # VMEM scratch geometry per distinct conv input size.
    conv_keys = collect_conv_inputs(channels, configs, spatials)
    halo_info = {}
    halo_shapes = []
    patch_index = {}
    patch_shapes = []
    for key in conv_keys:
        cin, hh, ww, kk = key
        pad = kk // 2
        wp = pb * ww                       # packed width
        n = hh * wp
        base = pad * (wp + 1)              # margin needed for the shifts
        lm = ((base + 127) // 128) * 128   # lane-aligned interior start
        halo_info[key] = (len(halo_shapes), lm, n, wp, base)
        halo_shapes.append((cin, lm + n + base))
        if n >= PATCH_MIN_LANES:
            patch_index[key] = len(patch_shapes)
            patch_shapes.append((kk * kk * cin, n))

    n_halo = len(halo_shapes)

    def kernel(*refs):
        x_refs = refs[:4]
        slab_ref = refs[4]
        o_ref = refs[5]
        halo_refs = refs[6:6 + n_halo]
        patch_refs = refs[6 + n_halo:]

        # Zero ONLY the halo margins (interiors are fully rewritten before
        # every use).  Unconditional so every core initializes its own VMEM.
        for ckey in conv_keys:
            idx, lm, n, wp, base = halo_info[ckey]
            h = halo_refs[idx]
            cin_h = h.shape[0]
            h[:, 0:lm] = jnp.zeros((cin_h, lm), jnp.float32)
            h[:, lm + n:lm + n + base] = jnp.zeros((cin_h, base), jnp.float32)

        def getmat(name):
            off, r, c = offsets[name]
            return slab_ref[off:off + r, 0:c]              # bf16

        # Column-wrap masks, built from an in-kernel iota, one per key.
        mask_cache = {}

        def get_mask(cin, hh, ww, sx):
            mkey = (cin, hh, ww, sx)
            if mkey not in mask_cache:
                n = hh * ww * pb
                col = jax.lax.broadcasted_iota(jnp.int32, (cin, n), 1) % ww
                mask_cache[mkey] = ((col + sx >= 0) & (col + sx < ww)
                                    ).astype(jnp.float32)
            return mask_cache[mkey]

        def conv(name, x, hh, ww):
            """Conv(k, stride=1, pad=k//2) + folded BN + ReLU on (Cin, H*PB*W)."""
            cout, cin, kk = conv_meta[name]
            cols = kk * kk * cin
            wb = getmat(name)                              # bf16 (cout, cols+1)
            wmat = wb[:, :cols]
            bias = wb[:, cols:cols + 1].astype(jnp.float32)
            if kk == 1:
                acc = jnp.dot(wmat, x.astype(jnp.bfloat16),
                              preferred_element_type=jnp.float32)
            else:
                pad = kk // 2
                ckey = (cin, hh, ww, kk)
                hidx, lm, n, wp, base = halo_info[ckey]
                halo = halo_refs[hidx]
                halo[:, lm:lm + n] = x                     # interior; margins 0

                def tap(dy, dx):
                    sy, sx = dy - pad, dx - pad
                    start = lm + sy * wp + sx
                    t = halo[:, start:start + n]
                    if sx != 0:
                        t = t * get_mask(cin, hh, ww, sx)
                    return t

                if ckey in patch_index:
                    # Lane-dense level: one im2col MXU matmul (K = k*k*Cin).
                    patch = patch_refs[patch_index[ckey]]
                    for dy in range(kk):
                        for dx in range(kk):
                            t = dy * kk + dx
                            patch[t * cin:(t + 1) * cin, :] = tap(dy, dx)
                    acc = jnp.dot(wmat, patch[...].astype(jnp.bfloat16),
                                  preferred_element_type=jnp.float32)
                else:
                    # Lane-sparse deep level: skip patch staging, accumulate
                    # k*k small matmuls straight from the halo.
                    acc = jnp.zeros((cout, n), jnp.float32)
                    for dy in range(kk):
                        for dx in range(kk):
                            t = dy * kk + dx
                            wt = wmat[:, t * cin:(t + 1) * cin]
                            acc = acc + jnp.dot(
                                wt, tap(dy, dx).astype(jnp.bfloat16),
                                preferred_element_type=jnp.float32)
            return jnp.maximum(acc + bias, 0.0)

        def bottlerep(names, x, hh, ww):
            y = x
            for nm in names:
                y = conv(nm, y, hh, ww)
            return x + y if len(names) > 1 else y          # BottleRep shortcut

        def idaup(prefix, cfg, x1, x2, hw2):
            ratio = cfg[2]
            h2, w2 = hw2
            x2 = conv(prefix + ("project",), x2, h2, w2)
            nfeat = len(cfg[1])
            if nfeat > 0:
                x2 = bottlerep([prefix + ("feature", j) for j in range(nfeat)],
                               x2, h2, w2)
            m = getmat(("up", h2, w2, ratio))              # bf16 (n2, n1)
            up = jnp.dot(x2.astype(jnp.bfloat16), m,
                         preferred_element_type=jnp.float32)
            s = x1 + up
            return bottlerep([prefix + ("node", j) for j in range(len(cfg[3]))],
                             s, h2 * ratio, w2 * ratio)

        xs = [x_refs[i][...] for i in range(4)]            # (C_i, H_i*PB*W_i)
        o1 = [idaup(("up1", i), configs[0][i], xs[i], xs[i + 1],
                    spatials[i + 1]) for i in range(len(configs[0]))]
        o2 = [idaup(("up2", i), configs[1][i], o1[i], o1[i + 1],
                    spatials[i + 1]) for i in range(len(configs[1]))]
        o3 = [idaup(("up3", i), configs[2][i], o2[i], o2[i + 1],
                    spatials[i + 1]) for i in range(len(configs[2]))]
        out = idaup(("up4",), configs[3], o3[-1], o2[-1], spatials[1])
        out = idaup(("up5",), configs[4], out, o1[-1], spatials[2])
        o_ref[...] = out                                   # lane-dense store

    act_specs = [
        pl.BlockSpec((pl.Squeezed(), channels[i],
                      spatials[i][0] * spatials[i][1] * pb),
                     lambda g: (g, 0, 0))
        for i in range(4)
    ]
    slab_spec = pl.BlockSpec(slab.shape, lambda g: (0, 0))  # resident, 1 DMA
    out_spec = pl.BlockSpec((pl.Squeezed(), c0, n_out), lambda g: (g, 0, 0))

    call = pl.pallas_call(
        kernel,
        out_shape=jax.ShapeDtypeStruct((gsteps, c0, n_out), jnp.float32),
        grid=(gsteps,),
        in_specs=act_specs + [slab_spec],
        out_specs=out_spec,
        scratch_shapes=(
            [pltpu.VMEM(s, jnp.float32) for s in halo_shapes]
            + [pltpu.VMEM(s, jnp.float32) for s in patch_shapes]),
        compiler_params=pltpu.CompilerParams(
            dimension_semantics=("parallel",)),            # both TCs on v7x
    )

    def forward(x1, x2, x3, x4):
        # NCHW inputs -> (gsteps, C, H*PB*W): channels on sublanes, packed
        # spatial (and batch, when PB>1) on lanes.
        packed = []
        for x, (hh, ww) in zip((x1, x2, x3, x4), spatials):
            c = x.shape[1]
            xr = x.reshape(gsteps, pb, c, hh, ww)
            xr = xr.transpose(0, 2, 3, 1, 4).reshape(gsteps, c, hh * pb * ww)
            packed.append(xr)
        out = call(*packed, slab)
        out = out.reshape(gsteps, c0, h0, pb, w0)
        out = out.transpose(0, 3, 1, 2, 4).reshape(batch, c0, h0, w0)  # NCHW
        return out

    return forward


# ---------------------------------------------------------------------------
# Pure-JAX (XLA) reference of Neck.forward, eval-mode BN, NCHW
# ---------------------------------------------------------------------------

def reference_neck(raw, xs, configs):
    hp = jax.lax.Precision.HIGHEST

    def conv_ref(p, x):
        w = p["w"]
        k = w.shape[-1]
        pd = k // 2
        y = jax.lax.conv_general_dilated(
            x, w, window_strides=(1, 1), padding=[(pd, pd), (pd, pd)],
            dimension_numbers=("NCHW", "OIHW", "NCHW"), precision=hp)
        y = y + p["b"][None, :, None, None]
        y = (y - p["mean"][None, :, None, None]) * (
            p["gamma"][None, :, None, None]
            / jnp.sqrt(p["var"][None, :, None, None] + EPS))
        y = y + p["beta"][None, :, None, None]
        return jnp.maximum(y, 0.0)

    def bottlerep_ref(plist, x):
        y = x
        for p in plist:
            y = conv_ref(p, y)
        return x + y if len(plist) > 1 else y

    def up_ref(x, ratio):
        c = x.shape[1]
        k = 2 * ratio
        pd = ratio // 2
        wflip = np.ascontiguousarray(
            _bilinear_kernel_2d(k)[::-1, ::-1]).astype(np.float32)
        w = jnp.broadcast_to(jnp.asarray(wflip), (c, 1, k, k))
        return jax.lax.conv_general_dilated(
            x, w, window_strides=(1, 1),
            padding=[(k - 1 - pd, k - 1 - pd)] * 2,
            lhs_dilation=(ratio, ratio),
            dimension_numbers=("NCHW", "OIHW", "NCHW"),
            feature_group_count=c, precision=hp)

    def ida_ref(p, cfg, x1, x2):
        x2 = conv_ref(p["project"], x2)
        if len(p["feature"]) > 0:
            x2 = bottlerep_ref(p["feature"], x2)
        s = x1 + up_ref(x2, cfg[2])
        return bottlerep_ref(p["node"], s)

    o1 = [ida_ref(raw["up1"][i], configs[0][i], xs[i], xs[i + 1])
          for i in range(len(configs[0]))]
    o2 = [ida_ref(raw["up2"][i], configs[1][i], o1[i], o1[i + 1])
          for i in range(len(configs[1]))]
    o3 = [ida_ref(raw["up3"][i], configs[2][i], o2[i], o2[i + 1])
          for i in range(len(configs[2]))]
    out = ida_ref(raw["up4"], configs[3], o3[-1], o2[-1])
    out = ida_ref(raw["up5"], configs[4], out, o1[-1])
    return out


# ---------------------------------------------------------------------------
# Driver
# ---------------------------------------------------------------------------

if __name__ == "__main__":
    channels = [8, 16, 32, 64]
    # IDAUp config: [kernel_project, kernel_feature_list, up_ratio, kernel_node_list]
    configs = [
        [[1, [3], 2, [3]], [1, [3], 2, [3]], [1, [3], 2, [3]]],   # up_level_1
        [[1, [3], 2, [3]], [1, [3], 2, [3]]],                      # up_level_2
        [[1, [3, 3], 2, [3, 3]]],                                  # up_level_3
        [1, [3], 2, [3]],                                          # up_level_4
        [1, [], 4, [3]],                                           # up_level_5
    ]
    spatials = [(16, 16), (8, 8), (4, 4), (2, 2)]
    B = 2

    key = jax.random.PRNGKey(0)
    kinit, k1, k2, k3, k4 = jax.random.split(key, 5)
    raw = init_neck_raw(kinit, channels, configs)

    pb = choose_samples_per_step(B)          # batch-into-lanes on single-TC chips
    slab, offsets, conv_meta = build_param_slab(raw, channels, configs,
                                                spatials, pb)
    forward = build_neck_forward(slab, offsets, conv_meta, channels, configs,
                                 spatials, B, pb)

    # NCHW inputs (PyTorch layout)
    xs = [jax.random.normal(kk, (B, channels[i],
                                 spatials[i][0], spatials[i][1]), jnp.float32)
          for i, kk in enumerate((k1, k2, k3, k4))]

    out = jax.block_until_ready(jax.jit(forward)(*xs))
    assert out.shape == (B, channels[0], spatials[0][0], spatials[0][1])

    # Correctness check against a pure-JAX reference (bf16 MXU operands in the
    # kernel -> a few % relative error through the 10+ layer deep paths).
    ref = jax.block_until_ready(reference_neck(raw, xs, configs))
    maxerr = float(jnp.max(jnp.abs(out - ref)))
    scale = float(jnp.max(jnp.abs(ref))) + 1e-6
    assert maxerr <= 3e-2 + 3e-2 * scale, \
        f"mismatch: max abs err {maxerr} (scale {scale})"

    print("KERNEL_OK")
</pallas_src>

<mosaic_0001>
module attributes {stable_mosaic.version = 11 : i64} {
  func.func @kernel(%arg0: i32, %arg1: memref<1x8x512xf32, #tpu.memory_space<vmem>>, %arg2: memref<1x16x128xf32, #tpu.memory_space<vmem>>, %arg3: memref<1x32x32xf32, #tpu.memory_space<vmem>>, %arg4: memref<1x64x8xf32, #tpu.memory_space<vmem>>, %arg5: memref<656x512xbf16, #tpu.memory_space<vmem>>, %arg6: memref<1x8x512xf32, #tpu.memory_space<vmem>>, %arg7: memref<8x273xf32, #tpu.memory_space<vmem>>, %arg8: memref<8x673xf32, #tpu.memory_space<vmem>>, %arg9: memref<16x169xf32, #tpu.memory_space<vmem>>, %arg10: memref<16x273xf32, #tpu.memory_space<vmem>>, %arg11: memref<32x141xf32, #tpu.memory_space<vmem>>, %arg12: memref<32x169xf32, #tpu.memory_space<vmem>>, %arg13: memref<72x128xf32, #tpu.memory_space<vmem>>, %arg14: memref<72x512xf32, #tpu.memory_space<vmem>>, %arg15: memref<144x128xf32, #tpu.memory_space<vmem>>) attributes {dimension_semantics = [#tpu.dimension_semantics<parallel>], iteration_bounds = array<i64: 1>, scalar_prefetch = 0 : i64, scratch_operands = 9 : i64, tpu.core_type = #tpu.core_type<tc>, window_params = [{transform_indices = @transform_0, window_bounds = array<i64: 1, 8, 512>}, {transform_indices = @transform_1, window_bounds = array<i64: 1, 16, 128>}, {transform_indices = @transform_2, window_bounds = array<i64: 1, 32, 32>}, {transform_indices = @transform_3, window_bounds = array<i64: 1, 64, 8>}, {pipeline_mode = #tpu.pipeline_mode<synchronous>, transform_indices = @transform_4, window_bounds = array<i64: 656, 512>}, {transform_indices = @transform_5, window_bounds = array<i64: 1, 8, 512>}]} {
    %cst = arith.constant 0.000000e+00 : f32
    %0 = vector.broadcast %cst : f32 to vector<8x128xf32>
    %c0 = arith.constant 0 : index
    %c0_0 = arith.constant 0 : index
    %1 = vector.load %arg7[%c0, %c0_0] : memref<8x273xf32, #tpu.memory_space<vmem>>, vector<8x128xf32>
    tpu.vector_store %arg7[%c0, %c0_0], %0 {strides = array<i32>} : memref<8x273xf32, #tpu.memory_space<vmem>>, vector<8x128xf32>,
    %cst_1 = arith.constant 0.000000e+00 : f32
    %2 = vector.broadcast %cst_1 : f32 to vector<8x17xf32>
    %c0_2 = arith.constant 0 : index
    %c256 = arith.constant 256 : index
    %3 = vector.load %arg7[%c0_2, %c256] : memref<8x273xf32, #tpu.memory_space<vmem>>, vector<8x17xf32>
    tpu.vector_store %arg7[%c0_2, %c256], %2 {strides = array<i32>} : memref<8x273xf32, #tpu.memory_space<vmem>>, vector<8x17xf32>,
    %cst_3 = arith.constant 0.000000e+00 : f32
    %4 = vector.broadcast %cst_3 : f32 to vector<8x128xf32>
    %c0_4 = arith.constant 0 : index
    %c0_5 = arith.constant 0 : index
    %5 = vector.load %arg8[%c0_4, %c0_5] : memref<8x673xf32, #tpu.memory_space<vmem>>, vector<8x128xf32>
    tpu.vector_store %arg8[%c0_4, %c0_5], %4 {strides = array<i32>} : memref<8x673xf32, #tpu.memory_space<vmem>>, vector<8x128xf32>,
    %cst_6 = arith.constant 0.000000e+00 : f32
    %6 = vector.broadcast %cst_6 : f32 to vector<8x33xf32>
    %c0_7 = arith.constant 0 : index
    %c640 = arith.constant 640 : index
    %7 = vector.load %arg8[%c0_7, %c640] : memref<8x673xf32, #tpu.memory_space<vmem>>, vector<8x33xf32>
    tpu.vector_store %arg8[%c0_7, %c640], %6 {strides = array<i32>} : memref<8x673xf32, #tpu.memory_space<vmem>>, vector<8x33xf32>,
    %cst_8 = arith.constant 0.000000e+00 : f32
    %8 = vector.broadcast %cst_8 : f32 to vector<16x128xf32>
    %c0_9 = arith.constant 0 : index
    %c0_10 = arith.constant 0 : index
    %9 = vector.load %arg9[%c0_9, %c0_10] : memref<16x169xf32, #tpu.memory_space<vmem>>, vector<16x128xf32>
    tpu.vector_store %arg9[%c0_9, %c0_10], %8 {strides = array<i32>} : memref<16x169xf32, #tpu.memory_space<vmem>>, vector<16x128xf32>,
    %cst_11 = arith.constant 0.000000e+00 : f32
    %10 = vector.broadcast %cst_11 : f32 to vector<16x9xf32>
    %c0_12 = arith.constant 0 : index
    %c160 = arith.constant 160 : index
    %11 = vector.load %arg9[%c0_12, %c160] : memref<16x169xf32, #tpu.memory_space<vmem>>, vector<16x9xf32>
    tpu.vector_store %arg9[%c0_12, %c160], %10 {strides = array<i32>} : memref<16x169xf32, #tpu.memory_space<vmem>>, vector<16x9xf32>,
    %cst_13 = arith.constant 0.000000e+00 : f32
    %12 = vector.broadcast %cst_13 : f32 to vector<16x128xf32>
    %c0_14 = arith.constant 0 : index
    %c0_15 = arith.constant 0 : index
    %13 = vector.load %arg10[%c0_14, %c0_15] : memref<16x273xf32, #tpu.memory_space<vmem>>, vector<16x128xf32>
    tpu.vector_store %arg10[%c0_14, %c0_15], %12 {strides = array<i32>} : memref<16x273xf32, #tpu.memory_space<vmem>>, vector<16x128xf32>,
    %cst_16 = arith.constant 0.000000e+00 : f32
    %14 = vector.broadcast %cst_16 : f32 to vector<16x17xf32>
    %c0_17 = arith.constant 0 : index
    %c256_18 = arith.constant 256 : index
    %15 = vector.load %arg10[%c0_17, %c256_18] : memref<16x273xf32, #tpu.memory_space<vmem>>, vector<16x17xf32>
    tpu.vector_store %arg10[%c0_17, %c256_18], %14 {strides = array<i32>} : memref<16x273xf32, #tpu.memory_space<vmem>>, vector<16x17xf32>,
    %cst_19 = arith.constant 0.000000e+00 : f32
    %16 = vector.broadcast %cst_19 : f32 to vector<32x128xf32>
    %c0_20 = arith.constant 0 : index
    %c0_21 = arith.constant 0 : index
    %17 = vector.load %arg11[%c0_20, %c0_21] : memref<32x141xf32, #tpu.memory_space<vmem>>, vector<32x128xf32>
    tpu.vector_store %arg11[%c0_20, %c0_21], %16 {strides = array<i32>} : memref<32x141xf32, #tpu.memory_space<vmem>>, vector<32x128xf32>,
    %cst_22 = arith.constant 0.000000e+00 : f32
    %18 = vector.broadcast %cst_22 : f32 to vector<32x5xf32>
    %c0_23 = arith.constant 0 : index
    %c136 = arith.constant 136 : index
    %19 = vector.load %arg11[%c0_23, %c136] : memref<32x141xf32, #tpu.memory_space<vmem>>, vector<32x5xf32>
    tpu.vector_store %arg11[%c0_23, %c136], %18 {strides = array<i32>} : memref<32x141xf32, #tpu.memory_space<vmem>>, vector<32x5xf32>,
    %cst_24 = arith.constant 0.000000e+00 : f32
    %20 = vector.broadcast %cst_24 : f32 to vector<32x128xf32>
    %c0_25 = arith.constant 0 : index
    %c0_26 = arith.constant 0 : index
    %21 = vector.load %arg12[%c0_25, %c0_26] : memref<32x169xf32, #tpu.memory_space<vmem>>, vector<32x128xf32>
    tpu.vector_store %arg12[%c0_25, %c0_26], %20 {strides = array<i32>} : memref<32x169xf32, #tpu.memory_space<vmem>>, vector<32x128xf32>,
    %cst_27 = arith.constant 0.000000e+00 : f32
    %22 = vector.broadcast %cst_27 : f32 to vector<32x9xf32>
    %c0_28 = arith.constant 0 : index
    %c160_29 = arith.constant 160 : index
    %23 = vector.load %arg12[%c0_28, %c160_29] : memref<32x169xf32, #tpu.memory_space<vmem>>, vector<32x9xf32>
    tpu.vector_store %arg12[%c0_28, %c160_29], %22 {strides = array<i32>} : memref<32x169xf32, #tpu.memory_space<vmem>>, vector<32x9xf32>,
    %c0_30 = arith.constant 0 : index
    %c0_31 = arith.constant 0 : index
    %c0_32 = arith.constant 0 : index
    %24 = vector.load %arg1[%c0_30, %c0_31, %c0_32] : memref<1x8x512xf32, #tpu.memory_space<vmem>>, vector<1x8x512xf32>
    %25 = vector.shape_cast %24 : vector<1x8x512xf32> to vector<8x512xf32>
    %c0_33 = arith.constant 0 : index
    %c0_34 = arith.constant 0 : index
    %c0_35 = arith.constant 0 : index
    %26 = vector.load %arg2[%c0_33, %c0_34, %c0_35] : memref<1x16x128xf32, #tpu.memory_space<vmem>>, vector<1x16x128xf32>
    %27 = vector.shape_cast %26 : vector<1x16x128xf32> to vector<16x128xf32>
    %c0_36 = arith.constant 0 : index
    %c0_37 = arith.constant 0 : index
    %c0_38 = arith.constant 0 : index
    %28 = vector.load %arg3[%c0_36, %c0_37, %c0_38] : memref<1x32x32xf32, #tpu.memory_space<vmem>>, vector<1x32x32xf32>
    %29 = vector.shape_cast %28 : vector<1x32x32xf32> to vector<32x32xf32>
    %c0_39 = arith.constant 0 : index
    %c0_40 = arith.constant 0 : index
    %c0_41 = arith.constant 0 : index
    %30 = vector.load %arg4[%c0_39, %c0_40, %c0_41] : memref<1x64x8xf32, #tpu.memory_space<vmem>>, vector<1x64x8xf32>
    %31 = vector.shape_cast %30 : vector<1x64x8xf32> to vector<64x8xf32>
    %c0_42 = arith.constant 0 : index
    %c0_43 = arith.constant 0 : index
    %32 = vector.load %arg5[%c0_42, %c0_43] : memref<656x512xbf16, #tpu.memory_space<vmem>>, vector<8x17xbf16>
    %33 = vector.extract_strided_slice %32 {offsets = [0, 0], sizes = [8, 16], strides = [1, 1]} : vector<8x17xbf16> to vector<8x16xbf16>
    %34 = vector.extract_strided_slice %32 {offsets = [0, 16], sizes = [8, 1], strides = [1, 1]} : vector<8x17xbf16> to vector<8x1xbf16>
    %35 = arith.extf %34 : vector<8x1xbf16> to vector<8x1xf32>
    %36 = arith.truncf %27 : vector<16x128xf32> to vector<16x128xbf16>
    %cst_44 = arith.constant dense<0.000000e+00> : vector<8x128xf32>
    %37 = tpu.matmul %33, %36, %cst_44 {dimension_numbers = #tpu.dot_dimension_numbers<[1], [0], [0], [1], [0, 0, 1, 1], [], []>} : vector<8x16xbf16>, vector<16x128xbf16>, vector<8x128xf32> -> vector<8x128xf32>
    %38 = vector.broadcast %35 : vector<8x1xf32> to vector<8x128xf32>
    %39 = arith.addf %37, %38 : vector<8x128xf32>
    %cst_45 = arith.constant 0.000000e+00 : f32
    %40 = vector.broadcast %cst_45 : f32 to vector<8x128xf32>
    %41 = arith.maximumf %39, %40 : vector<8x128xf32>
    %c16 = arith.constant 16 : index
    %c0_46 = arith.constant 0 : index
    %42 = vector.load %arg5[%c16, %c0_46] : memref<656x512xbf16, #tpu.memory_space<vmem>>, vector<8x73xbf16>
    %43 = vector.extract_strided_slice %42 {offsets = [0, 0], sizes = [8, 72], strides = [1, 1]} : vector<8x73xbf16> to vector<8x72xbf16>
    %44 = vector.extract_strided_slice %42 {offsets = [0, 72], sizes = [8, 1], strides = [1, 1]} : vector<8x73xbf16> to vector<8x1xbf16>
    %45 = arith.extf %44 : vector<8x1xbf16> to vector<8x1xf32>
    %c0_47 = arith.constant 0 : index
    %c128 = arith.constant 128 : index
    %46 = vector.load %arg7[%c0_47, %c128] : memref<8x273xf32, #tpu.memory_space<vmem>>, vector<8x128xf32>
    tpu.vector_store %arg7[%c0_47, %c128], %41 {strides = array<i32>} : memref<8x273xf32, #tpu.memory_space<vmem>>, vector<8x128xf32>,
    %c0_48 = arith.constant 0 : index
    %c111 = arith.constant 111 : index
    %47 = vector.load %arg7[%c0_48, %c111] : memref<8x273xf32, #tpu.memory_space<vmem>>, vector<8x128xf32>
    %48 = tpu.iota {dimensions = array<i32: 1>} : vector<8x128xi32>
    %c8_i32 = arith.constant 8 : i32
    %c0_i32 = arith.constant 0 : i32
    %49 = arith.cmpi eq, %c8_i32, %c0_i32 : i32
    %c1_i32 = arith.constant 1 : i32
    %50 = arith.select %49, %c1_i32, %c8_i32 : i32
    %51 = vector.broadcast %50 : i32 to vector<8x128xi32>
    %52 = arith.remsi %48, %51 : vector<8x128xi32>
    %c0_i32_49 = arith.constant 0 : i32
    %53 = vector.broadcast %c0_i32_49 : i32 to vector<8x128xi32>
    %54 = arith.cmpi ne, %52, %53 : vector<8x128xi32>
    %c0_i32_50 = arith.constant 0 : i32
    %55 = vector.broadcast %c0_i32_50 : i32 to vector<8x128xi32>
    %56 = arith.cmpi slt, %52, %55 : vector<8x128xi32>
    %c0_i32_51 = arith.constant 0 : i32
    %57 = arith.cmpi slt, %50, %c0_i32_51 : i32
    %58 = vector.broadcast %57 : i1 to vector<8x128xi1>
    %59 = vector.broadcast %58 : vector<8x128xi1> to vector<8x128xi1>
    %60 = arith.xori %56, %59 : vector<8x128xi1>
    %61 = arith.andi %60, %54 : vector<8x128xi1>
    %62 = vector.broadcast %50 : i32 to vector<8x128xi32>
    %63 = arith.addi %52, %62 : vector<8x128xi32>
    %64 = arith.select %61, %63, %52 : vector<8x128xi1>, vector<8x128xi32>
    %c-1_i32 = arith.constant -1 : i32
    %65 = vector.broadcast %c-1_i32 : i32 to vector<8x128xi32>
    %66 = arith.addi %64, %65 : vector<8x128xi32>
    %c0_i32_52 = arith.constant 0 : i32
    %67 = vector.broadcast %c0_i32_52 : i32 to vector<8x128xi32>
    %68 = arith.cmpi sge, %66, %67 : vector<8x128xi32>
    %c-1_i32_53 = arith.constant -1 : i32
    %69 = vector.broadcast %c-1_i32_53 : i32 to vector<8x128xi32>
    %70 = arith.addi %64, %69 : vector<8x128xi32>
    %c8_i32_54 = arith.constant 8 : i32
    %71 = vector.broadcast %c8_i32_54 : i32 to vector<8x128xi32>
    %72 = arith.cmpi slt, %70, %71 : vector<8x128xi32>
    %73 = arith.andi %68, %72 : vector<8x128xi1>
    %74 = arith.extui %73 : vector<8x128xi1> to vector<8x128xi32>
    %75 = arith.sitofp %74 : vector<8x128xi32> to vector<8x128xf32>
    %76 = arith.mulf %47, %75 : vector<8x128xf32>
    %c0_55 = arith.constant 0 : index
    %c0_56 = arith.constant 0 : index
    %77 = vector.load %arg13[%c0_55, %c0_56] : memref<72x128xf32, #tpu.memory_space<vmem>>, vector<8x128xf32>
    tpu.vector_store %arg13[%c0_55, %c0_56], %76 {strides = array<i32>} : memref<72x128xf32, #tpu.memory_space<vmem>>, vector<8x128xf32>,
    %c0_57 = arith.constant 0 : index
    %c112 = arith.constant 112 : index
    %78 = vector.load %arg7[%c0_57, %c112] : memref<8x273xf32, #tpu.memory_space<vmem>>, vector<8x128xf32>
    %c8 = arith.constant 8 : index
    %c0_58 = arith.constant 0 : index
    %79 = vector.load %arg13[%c8, %c0_58] : memref<72x128xf32, #tpu.memory_space<vmem>>, vector<8x128xf32>
    tpu.vector_store %arg13[%c8, %c0_58], %78 {strides = array<i32>} : memref<72x128xf32, #tpu.memory_space<vmem>>, vector<8x128xf32>,
    %c0_59 = arith.constant 0 : index
    %c113 = arith.constant 113 : index
    %80 = vector.load %arg7[%c0_59, %c113] : memref<8x273xf32, #tpu.memory_space<vmem>>, vector<8x128xf32>
    %81 = tpu.iota {dimensions = array<i32: 1>} : vector<8x128xi32>
    %c8_i32_60 = arith.constant 8 : i32
    %c0_i32_61 = arith.constant 0 : i32
    %82 = arith.cmpi eq, %c8_i32_60, %c0_i32_61 : i32
    %c1_i32_62 = arith.constant 1 : i32
    %83 = arith.select %82, %c1_i32_62, %c8_i32_60 : i32
    %84 = vector.broadcast %83 : i32 to vector<8x128xi32>
    %85 = arith.remsi %81, %84 : vector<8x128xi32>
    %c0_i32_63 = arith.constant 0 : i32
    %86 = vector.broadcast %c0_i32_63 : i32 to vector<8x128xi32>
    %87 = arith.cmpi ne, %85, %86 : vector<8x128xi32>
    %c0_i32_64 = arith.constant 0 : i32
    %88 = vector.broadcast %c0_i32_64 : i32 to vector<8x128xi32>
    %89 = arith.cmpi slt, %85, %88 : vector<8x128xi32>
    %c0_i32_65 = arith.constant 0 : i32
    %90 = arith.cmpi slt, %83, %c0_i32_65 : i32
    %91 = vector.broadcast %90 : i1 to vector<8x128xi1>
    %92 = vector.broadcast %91 : vector<8x128xi1> to vector<8x128xi1>
    %93 = arith.xori %89, %92 : vector<8x128xi1>
    %94 = arith.andi %93, %87 : vector<8x128xi1>
    %95 = vector.broadcast %83 : i32 to vector<8x128xi32>
    %96 = arith.addi %85, %95 : vector<8x128xi32>
    %97 = arith.select %94, %96, %85 : vector<8x128xi1>, vector<8x128xi32>
    %c1_i32_66 = arith.constant 1 : i32
    %98 = vector.broadcast %c1_i32_66 : i32 to vector<8x128xi32>
    %99 = arith.addi %97, %98 : vector<8x128xi32>
    %c0_i32_67 = arith.constant 0 : i32
    %100 = vector.broadcast %c0_i32_67 : i32 to vector<8x128xi32>
    %101 = arith.cmpi sge, %99, %100 : vector<8x128xi32>
    %c1_i32_68 = arith.constant 1 : i32
    %102 = vector.broadcast %c1_i32_68 : i32 to vector<8x128xi32>
    %103 = arith.addi %97, %102 : vector<8x128xi32>
    %c8_i32_69 = arith.constant 8 : i32
    %104 = vector.broadcast %c8_i32_69 : i32 to vector<8x128xi32>
    %105 = arith.cmpi slt, %103, %104 : vector<8x128xi32>
    %106 = arith.andi %101, %105 : vector<8x128xi1>
    %107 = arith.extui %106 : vector<8x128xi1> to vector<8x128xi32>
    %108 = arith.sitofp %107 : vector<8x128xi32> to vector<8x128xf32>
    %109 = arith.mulf %80, %108 : vector<8x128xf32>
    %c16_70 = arith.constant 16 : index
    %c0_71 = arith.constant 0 : index
    %110 = vector.load %arg13[%c16_70, %c0_71] : memref<72x128xf32, #tpu.memory_space<vmem>>, vector<8x128xf32>
    tpu.vector_store %arg13[%c16_70, %c0_71], %109 {strides = array<i32>} : memref<72x128xf32, #tpu.memory_space<vmem>>, vector<8x128xf32>,
    %c0_72 = arith.constant 0 : index
    %c127 = arith.constant 127 : index
    %111 = vector.load %arg7[%c0_72, %c127] : memref<8x273xf32, #tpu.memory_space<vmem>>, vector<8x128xf32>
    %112 = arith.mulf %111, %75 : vector<8x128xf32>
    %c24 = arith.constant 24 : index
    %c0_73 = arith.constant 0 : index
    %113 = vector.load %arg13[%c24, %c0_73] : memref<72x128xf32, #tpu.memory_space<vmem>>, vector<8x128xf32>
    tpu.vector_store %arg13[%c24, %c0_73], %112 {strides = array<i32>} : memref<72x128xf32, #tpu.memory_space<vmem>>, vector<8x128xf32>,
    %c0_74 = arith.constant 0 : index
    %c128_75 = arith.constant 128 : index
    %114 = vector.load %arg7[%c0_74, %c128_75] : memref<8x273xf32, #tpu.memory_space<vmem>>, vector<8x128xf32>
    %c32 = arith.constant 32 : index
    %c0_76 = arith.constant 0 : index
    %115 = vector.load %arg13[%c32, %c0_76] : memref<72x128xf32, #tpu.memory_space<vmem>>, vector<8x128xf32>
    tpu.vector_store %arg13[%c32, %c0_76], %114 {strides = array<i32>} : memref<72x128xf32, #tpu.memory_space<vmem>>, vector<8x128xf32>,
    %c0_77 = arith.constant 0 : index
    %c129 = arith.constant 129 : index
    %116 = vector.load %arg7[%c0_77, %c129] : memref<8x273xf32, #tpu.memory_space<vmem>>, vector<8x128xf32>
    %117 = arith.mulf %116, %108 : vector<8x128xf32>
    %c40 = arith.constant 40 : index
    %c0_78 = arith.constant 0 : index
    %118 = vector.load %arg13[%c40, %c0_78] : memref<72x128xf32, #tpu.memory_space<vmem>>, vector<8x128xf32>
    tpu.vector_store %arg13[%c40, %c0_78], %117 {strides = array<i32>} : memref<72x128xf32, #tpu.memory_space<vmem>>, vector<8x128xf32>,
    %c0_79 = arith.constant 0 : index
    %c143 = arith.constant 143 : index
    %119 = vector.load %arg7[%c0_79, %c143] : memref<8x273xf32, #tpu.memory_space<vmem>>, vector<8x128xf32>
    %120 = arith.mulf %119, %75 : vector<8x128xf32>
    %c48 = arith.constant 48 : index
    %c0_80 = arith.constant 0 : index
    %121 = vector.load %arg13[%c48, %c0_80] : memref<72x128xf32, #tpu.memory_space<vmem>>, vector<8x128xf32>
    tpu.vector_store %arg13[%c48, %c0_80], %120 {strides = array<i32>} : memref<72x128xf32, #tpu.memory_space<vmem>>, vector<8x128xf32>,
    %c0_81 = arith.constant 0 : index
    %c144 = arith.constant 144 : index
    %122 = vector.load %arg7[%c0_81, %c144] : memref<8x273xf32, #tpu.memory_space<vmem>>, vector<8x128xf32>
    %c56 = arith.constant 56 : index
    %c0_82 = arith.constant 0 : index
    %123 = vector.load %arg13[%c56, %c0_82] : memref<72x128xf32, #tpu.memory_space<vmem>>, vector<8x128xf32>
    tpu.vector_store %arg13[%c56, %c0_82], %122 {strides = array<i32>} : memref<72x128xf32, #tpu.memory_space<vmem>>, vector<8x128xf32>,
    %c0_83 = arith.constant 0 : index
    %c145 = arith.constant 145 : index
    %124 = vector.load %arg7[%c0_83, %c145] : memref<8x273xf32, #tpu.memory_space<vmem>>, vector<8x128xf32>
    %125 = arith.mulf %124, %108 : vector<8x128xf32>
    %c64 = arith.constant 64 : index
    %c0_84 = arith.constant 0 : index
    %126 = vector.load %arg13[%c64, %c0_84] : memref<72x128xf32, #tpu.memory_space<vmem>>, vector<8x128xf32>
    tpu.vector_store %arg13[%c64, %c0_84], %125 {strides = array<i32>} : memref<72x128xf32, #tpu.memory_space<vmem>>, vector<8x128xf32>,
    %c0_85 = arith.constant 0 : index
    %c0_86 = arith.constant 0 : index
    %127 = vector.load %arg13[%c0_85, %c0_86] : memref<72x128xf32, #tpu.memory_space<vmem>>, vector<72x128xf32>
    %128 = arith.truncf %127 : vector<72x128xf32> to vector<72x128xbf16>
    %cst_87 = arith.constant dense<0.000000e+00> : vector<8x128xf32>
    %129 = tpu.matmul %43, %128, %cst_87 {dimension_numbers = #tpu.dot_dimension_numbers<[1], [0], [0], [1], [0, 0, 1, 1], [], []>} : vector<8x72xbf16>, vector<72x128xbf16>, vector<8x128xf32> -> vector<8x128xf32>
    %130 = vector.broadcast %45 : vector<8x1xf32> to vector<8x128xf32>
    %131 = arith.addf %129, %130 : vector<8x128xf32>
    %cst_88 = arith.constant 0.000000e+00 : f32
    %132 = vector.broadcast %cst_88 : f32 to vector<8x128xf32>
    %133 = arith.maximumf %131, %132 : vector<8x128xf32>
    %c448 = arith.constant 448 : index
    %c0_89 = arith.constant 0 : index
    %134 = vector.load %arg5[%c448, %c0_89] : memref<656x512xbf16, #tpu.memory_space<vmem>>, vector<128x512xbf16>
    %135 = arith.truncf %133 : vector<8x128xf32> to vector<8x128xbf16>
    %cst_90 = arith.constant dense<0.000000e+00> : vector<8x512xf32>
    %136 = tpu.matmul %135, %134, %cst_90 {dimension_numbers = #tpu.dot_dimension_numbers<[1], [0], [0], [1], [0, 0, 1, 1], [], []>} : vector<8x128xbf16>, vector<128x512xbf16>, vector<8x512xf32> -> vector<8x512xf32>
    %137 = arith.addf %25, %136 : vector<8x512xf32>
    %c32_91 = arith.constant 32 : index
    %c0_92 = arith.constant 0 : index
    %138 = vector.load %arg5[%c32_91, %c0_92] : memref<656x512xbf16, #tpu.memory_space<vmem>>, vector<8x73xbf16>
    %139 = vector.extract_strided_slice %138 {offsets = [0, 0], sizes = [8, 72], strides = [1, 1]} : vector<8x73xbf16> to vector<8x72xbf16>
    %140 = vector.extract_strided_slice %138 {offsets = [0, 72], sizes = [8, 1], strides = [1, 1]} : vector<8x73xbf16> to vector<8x1xbf16>
    %141 = arith.extf %140 : vector<8x1xbf16> to vector<8x1xf32>
    %c0_93 = arith.constant 0 : index
    %c128_94 = arith.constant 128 : index
    %142 = vector.load %arg8[%c0_93, %c128_94] : memref<8x673xf32, #tpu.memory_space<vmem>>, vector<8x512xf32>
    tpu.vector_store %arg8[%c0_93, %c128_94], %137 {strides = array<i32>} : memref<8x673xf32, #tpu.memory_space<vmem>>, vector<8x512xf32>,
    %c0_95 = arith.constant 0 : index
    %c95 = arith.constant 95 : index
    %143 = vector.load %arg8[%c0_95, %c95] : memref<8x673xf32, #tpu.memory_space<vmem>>, vector<8x512xf32>
    %144 = tpu.iota {dimensions = array<i32: 1>} : vector<8x512xi32>
    %c16_i32 = arith.constant 16 : i32
    %c0_i32_96 = arith.constant 0 : i32
    %145 = arith.cmpi eq, %c16_i32, %c0_i32_96 : i32
    %c1_i32_97 = arith.constant 1 : i32
    %146 = arith.select %145, %c1_i32_97, %c16_i32 : i32
    %147 = vector.broadcast %146 : i32 to vector<8x512xi32>
    %148 = arith.remsi %144, %147 : vector<8x512xi32>
    %c0_i32_98 = arith.constant 0 : i32
    %149 = vector.broadcast %c0_i32_98 : i32 to vector<8x512xi32>
    %150 = arith.cmpi ne, %148, %149 : vector<8x512xi32>
    %c0_i32_99 = arith.constant 0 : i32
    %151 = vector.broadcast %c0_i32_99 : i32 to vector<8x512xi32>
    %152 = arith.cmpi slt, %148, %151 : vector<8x512xi32>
    %c0_i32_100 = arith.constant 0 : i32
    %153 = arith.cmpi slt, %146, %c0_i32_100 : i32
    %154 = vector.broadcast %153 : i1 to vector<8x512xi1>
    %155 = vector.broadcast %154 : vector<8x512xi1> to vector<8x512xi1>
    %156 = arith.xori %152, %155 : vector<8x512xi1>
    %157 = arith.andi %156, %150 : vector<8x512xi1>
    %158 = vector.broadcast %146 : i32 to vector<8x512xi32>
    %159 = arith.addi %148, %158 : vector<8x512xi32>
    %160 = arith.select %157, %159, %148 : vector<8x512xi1>, vector<8x512xi32>
    %c-1_i32_101 = arith.constant -1 : i32
    %161 = vector.broadcast %c-1_i32_101 : i32 to vector<8x512xi32>
    %162 = arith.addi %160, %161 : vector<8x512xi32>
    %c0_i32_102 = arith.constant 0 : i32
    %163 = vector.broadcast %c0_i32_102 : i32 to vector<8x512xi32>
    %164 = arith.cmpi sge, %162, %163 : vector<8x512xi32>
    %c-1_i32_103 = arith.constant -1 : i32
    %165 = vector.broadcast %c-1_i32_103 : i32 to vector<8x512xi32>
    %166 = arith.addi %160, %165 : vector<8x512xi32>
    %c16_i32_104 = arith.constant 16 : i32
    %167 = vector.broadcast %c16_i32_104 : i32 to vector<8x512xi32>
    %168 = arith.cmpi slt, %166, %167 : vector<8x512xi32>
    %169 = arith.andi %164, %168 : vector<8x512xi1>
    %170 = arith.extui %169 : vector<8x512xi1> to vector<8x512xi32>
    %171 = arith.sitofp %170 : vector<8x512xi32> to vector<8x512xf32>
    %172 = arith.mulf %143, %171 : vector<8x512xf32>
    %c0_105 = arith.constant 0 : index
    %c0_106 = arith.constant 0 : index
    %173 = vector.load %arg14[%c0_105, %c0_106] : memref<72x512xf32, #tpu.memory_space<vmem>>, vector<8x512xf32>
    tpu.vector_store %arg14[%c0_105, %c0_106], %172 {strides = array<i32>} : memref<72x512xf32, #tpu.memory_space<vmem>>, vector<8x512xf32>,
    %c0_107 = arith.constant 0 : index
    %c96 = arith.constant 96 : index
    %174 = vector.load %arg8[%c0_107, %c96] : memref<8x673xf32, #tpu.memory_space<vmem>>, vector<8x512xf32>
    %c8_108 = arith.constant 8 : index
    %c0_109 = arith.constant 0 : index
    %175 = vector.load %arg14[%c8_108, %c0_109] : memref<72x512xf32, #tpu.memory_space<vmem>>, vector<8x512xf32>
    tpu.vector_store %arg14[%c8_108, %c0_109], %174 {strides = array<i32>} : memref<72x512xf32, #tpu.memory_space<vmem>>, vector<8x512xf32>,
    %c0_110 = arith.constant 0 : index
    %c97 = arith.constant 97 : index
    %176 = vector.load %arg8[%c0_110, %c97] : memref<8x673xf32, #tpu.memory_space<vmem>>, vector<8x512xf32>
    %177 = tpu.iota {dimensions = array<i32: 1>} : vector<8x512xi32>
    %c16_i32_111 = arith.constant 16 : i32
    %c0_i32_112 = arith.constant 0 : i32
    %178 = arith.cmpi eq, %c16_i32_111, %c0_i32_112 : i32
    %c1_i32_113 = arith.constant 1 : i32
    %179 = arith.select %178, %c1_i32_113, %c16_i32_111 : i32
    %180 = vector.broadcast %179 : i32 to vector<8x512xi32>
    %181 = arith.remsi %177, %180 : vector<8x512xi32>
    %c0_i32_114 = arith.constant 0 : i32
    %182 = vector.broadcast %c0_i32_114 : i32 to vector<8x512xi32>
    %183 = arith.cmpi ne, %181, %182 : vector<8x512xi32>
    %c0_i32_115 = arith.constant 0 : i32
    %184 = vector.broadcast %c0_i32_115 : i32 to vector<8x512xi32>
    %185 = arith.cmpi slt, %181, %184 : vector<8x512xi32>
    %c0_i32_116 = arith.constant 0 : i32
    %186 = arith.cmpi slt, %179, %c0_i32_116 : i32
    %187 = vector.broadcast %186 : i1 to vector<8x512xi1>
    %188 = vector.broadcast %187 : vector<8x512xi1> to vector<8x512xi1>
    %189 = arith.xori %185, %188 : vector<8x512xi1>
    %190 = arith.andi %189, %183 : vector<8x512xi1>
    %191 = vector.broadcast %179 : i32 to vector<8x512xi32>
    %192 = arith.addi %181, %191 : vector<8x512xi32>
    %193 = arith.select %190, %192, %181 : vector<8x512xi1>, vector<8x512xi32>
    %c1_i32_117 = arith.constant 1 : i32
    %194 = vector.broadcast %c1_i32_117 : i32 to vector<8x512xi32>
    %195 = arith.addi %193, %194 : vector<8x512xi32>
    %c0_i32_118 = arith.constant 0 : i32
    %196 = vector.broadcast %c0_i32_118 : i32 to vector<8x512xi32>
    %197 = arith.cmpi sge, %195, %196 : vector<8x512xi32>
    %c1_i32_119 = arith.constant 1 : i32
    %198 = vector.broadcast %c1_i32_119 : i32 to vector<8x512xi32>
    %199 = arith.addi %193, %198 : vector<8x512xi32>
    %c16_i32_120 = arith.constant 16 : i32
    %200 = vector.broadcast %c16_i32_120 : i32 to vector<8x512xi32>
    %201 = arith.cmpi slt, %199, %200 : vector<8x512xi32>
    %202 = arith.andi %197, %201 : vector<8x512xi1>
    %203 = arith.extui %202 : vector<8x512xi1> to vector<8x512xi32>
    %204 = arith.sitofp %203 : vector<8x512xi32> to vector<8x512xf32>
    %205 = arith.mulf %176, %204 : vector<8x512xf32>
    %c16_121 = arith.constant 16 : index
    %c0_122 = arith.constant 0 : index
    %206 = vector.load %arg14[%c16_121, %c0_122] : memref<72x512xf32, #tpu.memory_space<vmem>>, vector<8x512xf32>
    tpu.vector_store %arg14[%c16_121, %c0_122], %205 {strides = array<i32>} : memref<72x512xf32, #tpu.memory_space<vmem>>, vector<8x512xf32>,
    %c0_123 = arith.constant 0 : index
    %c127_124 = arith.constant 127 : index
    %207 = vector.load %arg8[%c0_123, %c127_124] : memref<8x673xf32, #tpu.memory_space<vmem>>, vector<8x512xf32>
    %208 = arith.mulf %207, %171 : vector<8x512xf32>
    %c24_125 = arith.constant 24 : index
    %c0_126 = arith.constant 0 : index
    %209 = vector.load %arg14[%c24_125, %c0_126] : memref<72x512xf32, #tpu.memory_space<vmem>>, vector<8x512xf32>
    tpu.vector_store %arg14[%c24_125, %c0_126], %208 {strides = array<i32>} : memref<72x512xf32, #tpu.memory_space<vmem>>, vector<8x512xf32>,
    %c0_127 = arith.constant 0 : index
    %c128_128 = arith.constant 128 : index
    %210 = vector.load %arg8[%c0_127, %c128_128] : memref<8x673xf32, #tpu.memory_space<vmem>>, vector<8x512xf32>
    %c32_129 = arith.constant 32 : index
    %c0_130 = arith.constant 0 : index
    %211 = vector.load %arg14[%c32_129, %c0_130] : memref<72x512xf32, #tpu.memory_space<vmem>>, vector<8x512xf32>
    tpu.vector_store %arg14[%c32_129, %c0_130], %210 {strides = array<i32>} : memref<72x512xf32, #tpu.memory_space<vmem>>, vector<8x512xf32>,
    %c0_131 = arith.constant 0 : index
    %c129_132 = arith.constant 129 : index
    %212 = vector.load %arg8[%c0_131, %c129_132] : memref<8x673xf32, #tpu.memory_space<vmem>>, vector<8x512xf32>
    %213 = arith.mulf %212, %204 : vector<8x512xf32>
    %c40_133 = arith.constant 40 : index
    %c0_134 = arith.constant 0 : index
    %214 = vector.load %arg14[%c40_133, %c0_134] : memref<72x512xf32, #tpu.memory_space<vmem>>, vector<8x512xf32>
    tpu.vector_store %arg14[%c40_133, %c0_134], %213 {strides = array<i32>} : memref<72x512xf32, #tpu.memory_space<vmem>>, vector<8x512xf32>,
    %c0_135 = arith.constant 0 : index
    %c159 = arith.constant 159 : index
    %215 = vector.load %arg8[%c0_135, %c159] : memref<8x673xf32, #tpu.memory_space<vmem>>, vector<8x512xf32>
    %216 = arith.mulf %215, %171 : vector<8x512xf32>
    %c48_136 = arith.constant 48 : index
    %c0_137 = arith.constant 0 : index
    %217 = vector.load %arg14[%c48_136, %c0_137] : memref<72x512xf32, #tpu.memory_space<vmem>>, vector<8x512xf32>
    tpu.vector_store %arg14[%c48_136, %c0_137], %216 {strides = array<i32>} : memref<72x512xf32, #tpu.memory_space<vmem>>, vector<8x512xf32>,
    %c0_138 = arith.constant 0 : index
    %c160_139 = arith.constant 160 : index
    %218 = vector.load %arg8[%c0_138, %c160_139] : memref<8x673xf32, #tpu.memory_space<vmem>>, vector<8x512xf32>
    %c56_140 = arith.constant 56 : index
    %c0_141 = arith.constant 0 : index
    %219 = vector.load %arg14[%c56_140, %c0_141] : memref<72x512xf32, #tpu.memory_space<vmem>>, vector<8x512xf32>
    tpu.vector_store %arg14[%c56_140, %c0_141], %218 {strides = array<i32>} : memref<72x512xf32, #tpu.memory_space<vmem>>, vector<8x512xf32>,
    %c0_142 = arith.constant 0 : index
    %c161 = arith.constant 161 : index
    %220 = vector.load %arg8[%c0_142, %c161] : memref<8x673xf32, #tpu.memory_space<vmem>>, vector<8x512xf32>
    %221 = arith.mulf %220, %204 : vector<8x512xf32>
    %c64_143 = arith.constant 64 : index
    %c0_144 = arith.constant 0 : index
    %222 = vector.load %arg14[%c64_143, %c0_144] : memref<72x512xf32, #tpu.memory_space<vmem>>, vector<8x512xf32>
    tpu.vector_store %arg14[%c64_143, %c0_144], %221 {strides = array<i32>} : memref<72x512xf32, #tpu.memory_space<vmem>>, vector<8x512xf32>,
    %c0_145 = arith.constant 0 : index
    %c0_146 = arith.constant 0 : index
    %223 = vector.load %arg14[%c0_145, %c0_146] : memref<72x512xf32, #tpu.memory_space<vmem>>, vector<72x512xf32>
    %224 = arith.truncf %223 : vector<72x512xf32> to vector<72x512xbf16>
    %cst_147 = arith.constant dense<0.000000e+00> : vector<8x512xf32>
    %225 = tpu.matmul %139, %224, %cst_147 {dimension_numbers = #tpu.dot_dimension_numbers<[1], [0], [0], [1], [0, 0, 1, 1], [], []>} : vector<8x72xbf16>, vector<72x512xbf16>, vector<8x512xf32> -> vector<8x512xf32>
    %226 = vector.broadcast %141 : vector<8x1xf32> to vector<8x512xf32>
    %227 = arith.addf %225, %226 : vector<8x512xf32>
    %cst_148 = arith.constant 0.000000e+00 : f32
    %228 = vector.broadcast %cst_148 : f32 to vector<8x512xf32>
    %229 = arith.maximumf %227, %228 : vector<8x512xf32>
    %c48_149 = arith.constant 48 : index
    %c0_150 = arith.constant 0 : index
    %230 = vector.load %arg5[%c48_149, %c0_150] : memref<656x512xbf16, #tpu.memory_space<vmem>>, vector<16x33xbf16>
    %231 = vector.extract_strided_slice %230 {offsets = [0, 0], sizes = [16, 32], strides = [1, 1]} : vector<16x33xbf16> to vector<16x32xbf16>
    %232 = vector.extract_strided_slice %230 {offsets = [0, 32], sizes = [16, 1], strides = [1, 1]} : vector<16x33xbf16> to vector<16x1xbf16>
    %233 = arith.extf %232 : vector<16x1xbf16> to vector<16x1xf32>
    %234 = arith.truncf %29 : vector<32x32xf32> to vector<32x32xbf16>
    %cst_151 = arith.constant dense<0.000000e+00> : vector<16x32xf32>
    %235 = tpu.matmul %231, %234, %cst_151 {dimension_numbers = #tpu.dot_dimension_numbers<[1], [0], [0], [1], [0, 0, 1, 1], [], []>} : vector<16x32xbf16>, vector<32x32xbf16>, vector<16x32xf32> -> vector<16x32xf32>
    %236 = vector.broadcast %233 : vector<16x1xf32> to vector<16x32xf32>
    %237 = arith.addf %235, %236 : vector<16x32xf32>
    %cst_152 = arith.constant 0.000000e+00 : f32
    %238 = vector.broadcast %cst_152 : f32 to vector<16x32xf32>
    %239 = arith.maximumf %237, %238 : vector<16x32xf32>
    %c64_153 = arith.constant 64 : index
    %c0_154 = arith.constant 0 : index
    %240 = vector.load %arg5[%c64_153, %c0_154] : memref<656x512xbf16, #tpu.memory_space<vmem>>, vector<16x145xbf16>
    %241 = vector.extract_strided_slice %240 {offsets = [0, 0], sizes = [16, 144], strides = [1, 1]} : vector<16x145xbf16> to vector<16x144xbf16>
    %242 = vector.extract_strided_slice %240 {offsets = [0, 144], sizes = [16, 1], strides = [1, 1]} : vector<16x145xbf16> to vector<16x1xbf16>
    %243 = arith.extf %242 : vector<16x1xbf16> to vector<16x1xf32>
    %c0_155 = arith.constant 0 : index
    %c128_156 = arith.constant 128 : index
    %244 = vector.load %arg9[%c0_155, %c128_156] : memref<16x169xf32, #tpu.memory_space<vmem>>, vector<16x32xf32>
    tpu.vector_store %arg9[%c0_155, %c128_156], %239 {strides = array<i32>} : memref<16x169xf32, #tpu.memory_space<vmem>>, vector<16x32xf32>,
    %cst_157 = arith.constant 0.000000e+00 : f32
    %245 = vector.broadcast %cst_157 : f32 to vector<16x32xf32>
    %246 = vector.extract_strided_slice %241 {offsets = [0, 0], sizes = [16, 16], strides = [1, 1]} : vector<16x144xbf16> to vector<16x16xbf16>
    %c0_158 = arith.constant 0 : index
    %c119 = arith.constant 119 : index
    %247 = vector.load %arg9[%c0_158, %c119] : memref<16x169xf32, #tpu.memory_space<vmem>>, vector<16x32xf32>
    %248 = tpu.iota {dimensions = array<i32: 1>} : vector<16x32xi32>
    %c4_i32 = arith.constant 4 : i32
    %c0_i32_159 = arith.constant 0 : i32
    %249 = arith.cmpi eq, %c4_i32, %c0_i32_159 : i32
    %c1_i32_160 = arith.constant 1 : i32
    %250 = arith.select %249, %c1_i32_160, %c4_i32 : i32
    %251 = vector.broadcast %250 : i32 to vector<16x32xi32>
    %252 = arith.remsi %248, %251 : vector<16x32xi32>
    %c0_i32_161 = arith.constant 0 : i32
    %253 = vector.broadcast %c0_i32_161 : i32 to vector<16x32xi32>
    %254 = arith.cmpi ne, %252, %253 : vector<16x32xi32>
    %c0_i32_162 = arith.constant 0 : i32
    %255 = vector.broadcast %c0_i32_162 : i32 to vector<16x32xi32>
    %256 = arith.cmpi slt, %252, %255 : vector<16x32xi32>
    %c0_i32_163 = arith.constant 0 : i32
    %257 = arith.cmpi slt, %250, %c0_i32_163 : i32
    %258 = vector.broadcast %257 : i1 to vector<16x32xi1>
    %259 = vector.broadcast %258 : vector<16x32xi1> to vector<16x32xi1>
    %260 = arith.xori %256, %259 : vector<16x32xi1>
    %261 = arith.andi %260, %254 : vector<16x32xi1>
    %262 = vector.broadcast %250 : i32 to vector<16x32xi32>
    %263 = arith.addi %252, %262 : vector<16x32xi32>
    %264 = arith.select %261, %263, %252 : vector<16x32xi1>, vector<16x32xi32>
    %c-1_i32_164 = arith.constant -1 : i32
    %265 = vector.broadcast %c-1_i32_164 : i32 to vector<16x32xi32>
    %266 = arith.addi %264, %265 : vector<16x32xi32>
    %c0_i32_165 = arith.constant 0 : i32
    %267 = vector.broadcast %c0_i32_165 : i32 to vector<16x32xi32>
    %268 = arith.cmpi sge, %266, %267 : vector<16x32xi32>
    %c-1_i32_166 = arith.constant -1 : i32
    %269 = vector.broadcast %c-1_i32_166 : i32 to vector<16x32xi32>
    %270 = arith.addi %264, %269 : vector<16x32xi32>
    %c4_i32_167 = arith.constant 4 : i32
    %271 = vector.broadcast %c4_i32_167 : i32 to vector<16x32xi32>
    %272 = arith.cmpi slt, %270, %271 : vector<16x32xi32>
    %273 = arith.andi %268, %272 : vector<16x32xi1>
    %274 = arith.extui %273 : vector<16x32xi1> to vector<16x32xi32>
    %275 = arith.sitofp %274 : vector<16x32xi32> to vector<16x32xf32>
    %276 = arith.mulf %247, %275 : vector<16x32xf32>
    %277 = arith.truncf %276 : vector<16x32xf32> to vector<16x32xbf16>
    %cst_168 = arith.constant dense<0.000000e+00> : vector<16x32xf32>
    %278 = tpu.matmul %246, %277, %cst_168 {dimension_numbers = #tpu.dot_dimension_numbers<[1], [0], [0], [1], [0, 0, 1, 1], [], []>} : vector<16x16xbf16>, vector<16x32xbf16>, vector<16x32xf32> -> vector<16x32xf32>
    %279 = arith.addf %245, %278 : vector<16x32xf32>
    %280 = vector.extract_strided_slice %241 {offsets = [0, 16], sizes = [16, 16], strides = [1, 1]} : vector<16x144xbf16> to vector<16x16xbf16>
    %c0_169 = arith.constant 0 : index
    %c120 = arith.constant 120 : index
    %281 = vector.load %arg9[%c0_169, %c120] : memref<16x169xf32, #tpu.memory_space<vmem>>, vector<16x32xf32>
    %282 = arith.truncf %281 : vector<16x32xf32> to vector<16x32xbf16>
    %cst_170 = arith.constant dense<0.000000e+00> : vector<16x32xf32>
    %283 = tpu.matmul %280, %282, %cst_170 {dimension_numbers = #tpu.dot_dimension_numbers<[1], [0], [0], [1], [0, 0, 1, 1], [], []>} : vector<16x16xbf16>, vector<16x32xbf16>, vector<16x32xf32> -> vector<16x32xf32>
    %284 = arith.addf %279, %283 : vector<16x32xf32>
    %285 = vector.extract_strided_slice %241 {offsets = [0, 32], sizes = [16, 16], strides = [1, 1]} : vector<16x144xbf16> to vector<16x16xbf16>
    %c0_171 = arith.constant 0 : index
    %c121 = arith.constant 121 : index
    %286 = vector.load %arg9[%c0_171, %c121] : memref<16x169xf32, #tpu.memory_space<vmem>>, vector<16x32xf32>
    %287 = tpu.iota {dimensions = array<i32: 1>} : vector<16x32xi32>
    %c4_i32_172 = arith.constant 4 : i32
    %c0_i32_173 = arith.constant 0 : i32
    %288 = arith.cmpi eq, %c4_i32_172, %c0_i32_173 : i32
    %c1_i32_174 = arith.constant 1 : i32
    %289 = arith.select %288, %c1_i32_174, %c4_i32_172 : i32
    %290 = vector.broadcast %289 : i32 to vector<16x32xi32>
    %291 = arith.remsi %287, %290 : vector<16x32xi32>
    %c0_i32_175 = arith.constant 0 : i32
    %292 = vector.broadcast %c0_i32_175 : i32 to vector<16x32xi32>
    %293 = arith.cmpi ne, %291, %292 : vector<16x32xi32>
    %c0_i32_176 = arith.constant 0 : i32
    %294 = vector.broadcast %c0_i32_176 : i32 to vector<16x32xi32>
    %295 = arith.cmpi slt, %291, %294 : vector<16x32xi32>
    %c0_i32_177 = arith.constant 0 : i32
    %296 = arith.cmpi slt, %289, %c0_i32_177 : i32
    %297 = vector.broadcast %296 : i1 to vector<16x32xi1>
    %298 = vector.broadcast %297 : vector<16x32xi1> to vector<16x32xi1>
    %299 = arith.xori %295, %298 : vector<16x32xi1>
    %300 = arith.andi %299, %293 : vector<16x32xi1>
    %301 = vector.broadcast %289 : i32 to vector<16x32xi32>
    %302 = arith.addi %291, %301 : vector<16x32xi32>
    %303 = arith.select %300, %302, %291 : vector<16x32xi1>, vector<16x32xi32>
    %c1_i32_178 = arith.constant 1 : i32
    %304 = vector.broadcast %c1_i32_178 : i32 to vector<16x32xi32>
    %305 = arith.addi %303, %304 : vector<16x32xi32>
    %c0_i32_179 = arith.constant 0 : i32
    %306 = vector.broadcast %c0_i32_179 : i32 to vector<16x32xi32>
    %307 = arith.cmpi sge, %305, %306 : vector<16x32xi32>
    %c1_i32_180 = arith.constant 1 : i32
    %308 = vector.broadcast %c1_i32_180 : i32 to vector<16x32xi32>
    %309 = arith.addi %303, %308 : vector<16x32xi32>
    %c4_i32_181 = arith.constant 4 : i32
    %310 = vector.broadcast %c4_i32_181 : i32 to vector<16x32xi32>
    %311 = arith.cmpi slt, %309, %310 : vector<16x32xi32>
    %312 = arith.andi %307, %311 : vector<16x32xi1>
    %313 = arith.extui %312 : vector<16x32xi1> to vector<16x32xi32>
    %314 = arith.sitofp %313 : vector<16x32xi32> to vector<16x32xf32>
    %315 = arith.mulf %286, %314 : vector<16x32xf32>
    %316 = arith.truncf %315 : vector<16x32xf32> to vector<16x32xbf16>
    %cst_182 = arith.constant dense<0.000000e+00> : vector<16x32xf32>
    %317 = tpu.matmul %285, %316, %cst_182 {dimension_numbers = #tpu.dot_dimension_numbers<[1], [0], [0], [1], [0, 0, 1, 1], [], []>} : vector<16x16xbf16>, vector<16x32xbf16>, vector<16x32xf32> -> vector<16x32xf32>
    %318 = arith.addf %284, %317 : vector<16x32xf32>
    %319 = vector.extract_strided_slice %241 {offsets = [0, 48], sizes = [16, 16], strides = [1, 1]} : vector<16x144xbf16> to vector<16x16xbf16>
    %c0_183 = arith.constant 0 : index
    %c127_184 = arith.constant 127 : index
    %320 = vector.load %arg9[%c0_183, %c127_184] : memref<16x169xf32, #tpu.memory_space<vmem>>, vector<16x32xf32>
    %321 = arith.mulf %320, %275 : vector<16x32xf32>
    %322 = arith.truncf %321 : vector<16x32xf32> to vector<16x32xbf16>
    %cst_185 = arith.constant dense<0.000000e+00> : vector<16x32xf32>
    %323 = tpu.matmul %319, %322, %cst_185 {dimension_numbers = #tpu.dot_dimension_numbers<[1], [0], [0], [1], [0, 0, 1, 1], [], []>} : vector<16x16xbf16>, vector<16x32xbf16>, vector<16x32xf32> -> vector<16x32xf32>
    %324 = arith.addf %318, %323 : vector<16x32xf32>
    %325 = vector.extract_strided_slice %241 {offsets = [0, 64], sizes = [16, 16], strides = [1, 1]} : vector<16x144xbf16> to vector<16x16xbf16>
    %c0_186 = arith.constant 0 : index
    %c128_187 = arith.constant 128 : index
    %326 = vector.load %arg9[%c0_186, %c128_187] : memref<16x169xf32, #tpu.memory_space<vmem>>, vector<16x32xf32>
    %327 = arith.truncf %326 : vector<16x32xf32> to vector<16x32xbf16>
    %cst_188 = arith.constant dense<0.000000e+00> : vector<16x32xf32>
    %328 = tpu.matmul %325, %327, %cst_188 {dimension_numbers = #tpu.dot_dimension_numbers<[1], [0], [0], [1], [0, 0, 1, 1], [], []>} : vector<16x16xbf16>, vector<16x32xbf16>, vector<16x32xf32> -> vector<16x32xf32>
    %329 = arith.addf %324, %328 : vector<16x32xf32>
    %330 = vector.extract_strided_slice %241 {offsets = [0, 80], sizes = [16, 16], strides = [1, 1]} : vector<16x144xbf16> to vector<16x16xbf16>
    %c0_189 = arith.constant 0 : index
    %c129_190 = arith.constant 129 : index
    %331 = vector.load %arg9[%c0_189, %c129_190] : memref<16x169xf32, #tpu.memory_space<vmem>>, vector<16x32xf32>
    %332 = arith.mulf %331, %314 : vector<16x32xf32>
    %333 = arith.truncf %332 : vector<16x32xf32> to vector<16x32xbf16>
    %cst_191 = arith.constant dense<0.000000e+00> : vector<16x32xf32>
    %334 = tpu.matmul %330, %333, %cst_191 {dimension_numbers = #tpu.dot_dimension_numbers<[1], [0], [0], [1], [0, 0, 1, 1], [], []>} : vector<16x16xbf16>, vector<16x32xbf16>, vector<16x32xf32> -> vector<16x32xf32>
    %335 = arith.addf %329, %334 : vector<16x32xf32>
    %336 = vector.extract_strided_slice %241 {offsets = [0, 96], sizes = [16, 16], strides = [1, 1]} : vector<16x144xbf16> to vector<16x16xbf16>
    %c0_192 = arith.constant 0 : index
    %c135 = arith.constant 135 : index
    %337 = vector.load %arg9[%c0_192, %c135] : memref<16x169xf32, #tpu.memory_space<vmem>>, vector<16x32xf32>
    %338 = arith.mulf %337, %275 : vector<16x32xf32>
    %339 = arith.truncf %338 : vector<16x32xf32> to vector<16x32xbf16>
    %cst_193 = arith.constant dense<0.000000e+00> : vector<16x32xf32>
    %340 = tpu.matmul %336, %339, %cst_193 {dimension_numbers = #tpu.dot_dimension_numbers<[1], [0], [0], [1], [0, 0, 1, 1], [], []>} : vector<16x16xbf16>, vector<16x32xbf16>, vector<16x32xf32> -> vector<16x32xf32>
    %341 = arith.addf %335, %340 : vector<16x32xf32>
    %342 = vector.extract_strided_slice %241 {offsets = [0, 112], sizes = [16, 16], strides = [1, 1]} : vector<16x144xbf16> to vector<16x16xbf16>
    %c0_194 = arith.constant 0 : index
    %c136_195 = arith.constant 136 : index
    %343 = vector.load %arg9[%c0_194, %c136_195] : memref<16x169xf32, #tpu.memory_space<vmem>>, vector<16x32xf32>
    %344 = arith.truncf %343 : vector<16x32xf32> to vector<16x32xbf16>
    %cst_196 = arith.constant dense<0.000000e+00> : vector<16x32xf32>
    %345 = tpu.matmul %342, %344, %cst_196 {dimension_numbers = #tpu.dot_dimension_numbers<[1], [0], [0], [1], [0, 0, 1, 1], [], []>} : vector<16x16xbf16>, vector<16x32xbf16>, vector<16x32xf32> -> vector<16x32xf32>
    %346 = arith.addf %341, %345 : vector<16x32xf32>
    %347 = vector.extract_strided_slice %241 {offsets = [0, 128], sizes = [16, 16], strides = [1, 1]} : vector<16x144xbf16> to vector<16x16xbf16>
    %c0_197 = arith.constant 0 : index
    %c137 = arith.constant 137 : index
    %348 = vector.load %arg9[%c0_197, %c137] : memref<16x169xf32, #tpu.memory_space<vmem>>, vector<16x32xf32>
    %349 = arith.mulf %348, %314 : vector<16x32xf32>
    %350 = arith.truncf %349 : vector<16x32xf32> to vector<16x32xbf16>
    %cst_198 = arith.constant dense<0.000000e+00> : vector<16x32xf32>
    %351 = tpu.matmul %347, %350, %cst_198 {dimension_numbers = #tpu.dot_dimension_numbers<[1], [0], [0], [1], [0, 0, 1, 1], [], []>} : vector<16x16xbf16>, vector<16x32xbf16>, vector<16x32xf32> -> vector<16x32xf32>
    %352 = arith.addf %346, %351 : vector<16x32xf32>
    %353 = vector.broadcast %243 : vector<16x1xf32> to vector<16x32xf32>
    %354 = arith.addf %352, %353 : vector<16x32xf32>
    %cst_199 = arith.constant 0.000000e+00 : f32
    %355 = vector.broadcast %cst_199 : f32 to vector<16x32xf32>
    %356 = arith.maximumf %354, %355 : vector<16x32xf32>
    %c576 = arith.constant 576 : index
    %c0_200 = arith.constant 0 : index
    %357 = vector.load %arg5[%c576, %c0_200] : memref<656x512xbf16, #tpu.memory_space<vmem>>, vector<32x128xbf16>
    %358 = arith.truncf %356 : vector<16x32xf32> to vector<16x32xbf16>
    %cst_201 = arith.constant dense<0.000000e+00> : vector<16x128xf32>
    %359 = tpu.matmul %358, %357, %cst_201 {dimension_numbers = #tpu.dot_dimension_numbers<[1], [0], [0], [1], [0, 0, 1, 1], [], []>} : vector<16x32xbf16>, vector<32x128xbf16>, vector<16x128xf32> -> vector<16x128xf32>
    %360 = arith.addf %27, %359 : vector<16x128xf32>
    %c80 = arith.constant 80 : index
    %c0_202 = arith.constant 0 : index
    %361 = vector.load %arg5[%c80, %c0_202] : memref<656x512xbf16, #tpu.memory_space<vmem>>, vector<16x145xbf16>
    %362 = vector.extract_strided_slice %361 {offsets = [0, 0], sizes = [16, 144], strides = [1, 1]} : vector<16x145xbf16> to vector<16x144xbf16>
    %363 = vector.extract_strided_slice %361 {offsets = [0, 144], sizes = [16, 1], strides = [1, 1]} : vector<16x145xbf16> to vector<16x1xbf16>
    %364 = arith.extf %363 : vector<16x1xbf16> to vector<16x1xf32>
    %c0_203 = arith.constant 0 : index
    %c128_204 = arith.constant 128 : index
    %365 = vector.load %arg10[%c0_203, %c128_204] : memref<16x273xf32, #tpu.memory_space<vmem>>, vector<16x128xf32>
    tpu.vector_store %arg10[%c0_203, %c128_204], %360 {strides = array<i32>} : memref<16x273xf32, #tpu.memory_space<vmem>>, vector<16x128xf32>,
    %c0_205 = arith.constant 0 : index
    %c111_206 = arith.constant 111 : index
    %366 = vector.load %arg10[%c0_205, %c111_206] : memref<16x273xf32, #tpu.memory_space<vmem>>, vector<16x128xf32>
    %367 = tpu.iota {dimensions = array<i32: 1>} : vector<16x128xi32>
    %c8_i32_207 = arith.constant 8 : i32
    %c0_i32_208 = arith.constant 0 : i32
    %368 = arith.cmpi eq, %c8_i32_207, %c0_i32_208 : i32
    %c1_i32_209 = arith.constant 1 : i32
    %369 = arith.select %368, %c1_i32_209, %c8_i32_207 : i32
    %370 = vector.broadcast %369 : i32 to vector<16x128xi32>
    %371 = arith.remsi %367, %370 : vector<16x128xi32>
    %c0_i32_210 = arith.constant 0 : i32
    %372 = vector.broadcast %c0_i32_210 : i32 to vector<16x128xi32>
    %373 = arith.cmpi ne, %371, %372 : vector<16x128xi32>
    %c0_i32_211 = arith.constant 0 : i32
    %374 = vector.broadcast %c0_i32_211 : i32 to vector<16x128xi32>
    %375 = arith.cmpi slt, %371, %374 : vector<16x128xi32>
    %c0_i32_212 = arith.constant 0 : i32
    %376 = arith.cmpi slt, %369, %c0_i32_212 : i32
    %377 = vector.broadcast %376 : i1 to vector<16x128xi1>
    %378 = vector.broadcast %377 : vector<16x128xi1> to vector<16x128xi1>
    %379 = arith.xori %375, %378 : vector<16x128xi1>
    %380 = arith.andi %379, %373 : vector<16x128xi1>
    %381 = vector.broadcast %369 : i32 to vector<16x128xi32>
    %382 = arith.addi %371, %381 : vector<16x128xi32>
    %383 = arith.select %380, %382, %371 : vector<16x128xi1>, vector<16x128xi32>
    %c-1_i32_213 = arith.constant -1 : i32
    %384 = vector.broadcast %c-1_i32_213 : i32 to vector<16x128xi32>
    %385 = arith.addi %383, %384 : vector<16x128xi32>
    %c0_i32_214 = arith.constant 0 : i32
    %386 = vector.broadcast %c0_i32_214 : i32 to vector<16x128xi32>
    %387 = arith.cmpi sge, %385, %386 : vector<16x128xi32>
    %c-1_i32_215 = arith.constant -1 : i32
    %388 = vector.broadcast %c-1_i32_215 : i32 to vector<16x128xi32>
    %389 = arith.addi %383, %388 : vector<16x128xi32>
    %c8_i32_216 = arith.constant 8 : i32
    %390 = vector.broadcast %c8_i32_216 : i32 to vector<16x128xi32>
    %391 = arith.cmpi slt, %389, %390 : vector<16x128xi32>
    %392 = arith.andi %387, %391 : vector<16x128xi1>
    %393 = arith.extui %392 : vector<16x128xi1> to vector<16x128xi32>
    %394 = arith.sitofp %393 : vector<16x128xi32> to vector<16x128xf32>
    %395 = arith.mulf %366, %394 : vector<16x128xf32>
    %c0_217 = arith.constant 0 : index
    %c0_218 = arith.constant 0 : index
    %396 = vector.load %arg15[%c0_217, %c0_218] : memref<144x128xf32, #tpu.memory_space<vmem>>, vector<16x128xf32>
    tpu.vector_store %arg15[%c0_217, %c0_218], %395 {strides = array<i32>} : memref<144x128xf32, #tpu.memory_space<vmem>>, vector<16x128xf32>,
    %c0_219 = arith.constant 0 : index
    %c112_220 = arith.constant 112 : index
    %397 = vector.load %arg10[%c0_219, %c112_220] : memref<16x273xf32, #tpu.memory_space<vmem>>, vector<16x128xf32>
    %c16_221 = arith.constant 16 : index
    %c0_222 = arith.constant 0 : index
    %398 = vector.load %arg15[%c16_221, %c0_222] : memref<144x128xf32, #tpu.memory_space<vmem>>, vector<16x128xf32>
    tpu.vector_store %arg15[%c16_221, %c0_222], %397 {strides = array<i32>} : memref<144x128xf32, #tpu.memory_space<vmem>>, vector<16x128xf32>,
    %c0_223 = arith.constant 0 : index
    %c113_224 = arith.constant 113 : index
    %399 = vector.load %arg10[%c0_223, %c113_224] : memref<16x273xf32, #tpu.memory_space<vmem>>, vector<16x128xf32>
    %400 = tpu.iota {dimensions = array<i32: 1>} : vector<16x128xi32>
    %c8_i32_225 = arith.constant 8 : i32
    %c0_i32_226 = arith.constant 0 : i32
    %401 = arith.cmpi eq, %c8_i32_225, %c0_i32_226 : i32
    %c1_i32_227 = arith.constant 1 : i32
    %402 = arith.select %401, %c1_i32_227, %c8_i32_225 : i32
    %403 = vector.broadcast %402 : i32 to vector<16x128xi32>
    %404 = arith.remsi %400, %403 : vector<16x128xi32>
    %c0_i32_228 = arith.constant 0 : i32
    %405 = vector.broadcast %c0_i32_228 : i32 to vector<16x128xi32>
    %406 = arith.cmpi ne, %404, %405 : vector<16x128xi32>
    %c0_i32_229 = arith.constant 0 : i32
    %407 = vector.broadcast %c0_i32_229 : i32 to vector<16x128xi32>
    %408 = arith.cmpi slt, %404, %407 : vector<16x128xi32>
    %c0_i32_230 = arith.constant 0 : i32
    %409 = arith.cmpi slt, %402, %c0_i32_230 : i32
    %410 = vector.broadcast %409 : i1 to vector<16x128xi1>
    %411 = vector.broadcast %410 : vector<16x128xi1> to vector<16x128xi1>
    %412 = arith.xori %408, %411 : vector<16x128xi1>
    %413 = arith.andi %412, %406 : vector<16x128xi1>
    %414 = vector.broadcast %402 : i32 to vector<16x128xi32>
    %415 = arith.addi %404, %414 : vector<16x128xi32>
    %416 = arith.select %413, %415, %404 : vector<16x128xi1>, vector<16x128xi32>
    %c1_i32_231 = arith.constant 1 : i32
    %417 = vector.broadcast %c1_i32_231 : i32 to vector<16x128xi32>
    %418 = arith.addi %416, %417 : vector<16x128xi32>
    %c0_i32_232 = arith.constant 0 : i32
    %419 = vector.broadcast %c0_i32_232 : i32 to vector<16x128xi32>
    %420 = arith.cmpi sge, %418, %419 : vector<16x128xi32>
    %c1_i32_233 = arith.constant 1 : i32
    %421 = vector.broadcast %c1_i32_233 : i32 to vector<16x128xi32>
    %422 = arith.addi %416, %421 : vector<16x128xi32>
    %c8_i32_234 = arith.constant 8 : i32
    %423 = vector.broadcast %c8_i32_234 : i32 to vector<16x128xi32>
    %424 = arith.cmpi slt, %422, %423 : vector<16x128xi32>
    %425 = arith.andi %420, %424 : vector<16x128xi1>
    %426 = arith.extui %425 : vector<16x128xi1> to vector<16x128xi32>
    %427 = arith.sitofp %426 : vector<16x128xi32> to vector<16x128xf32>
    %428 = arith.mulf %399, %427 : vector<16x128xf32>
    %c32_235 = arith.constant 32 : index
    %c0_236 = arith.constant 0 : index
    %429 = vector.load %arg15[%c32_235, %c0_236] : memref<144x128xf32, #tpu.memory_space<vmem>>, vector<16x128xf32>
    tpu.vector_store %arg15[%c32_235, %c0_236], %428 {strides = array<i32>} : memref<144x128xf32, #tpu.memory_space<vmem>>, vector<16x128xf32>,
    %c0_237 = arith.constant 0 : index
    %c127_238 = arith.constant 127 : index
    %430 = vector.load %arg10[%c0_237, %c127_238] : memref<16x273xf32, #tpu.memory_space<vmem>>, vector<16x128xf32>
    %431 = arith.mulf %430, %394 : vector<16x128xf32>
    %c48_239 = arith.constant 48 : index
    %c0_240 = arith.constant 0 : index
    %432 = vector.load %arg15[%c48_239, %c0_240] : memref<144x128xf32, #tpu.memory_space<vmem>>, vector<16x128xf32>
    tpu.vector_store %arg15[%c48_239, %c0_240], %431 {strides = array<i32>} : memref<144x128xf32, #tpu.memory_space<vmem>>, vector<16x128xf32>,
    %c0_241 = arith.constant 0 : index
    %c128_242 = arith.constant 128 : index
    %433 = vector.load %arg10[%c0_241, %c128_242] : memref<16x273xf32, #tpu.memory_space<vmem>>, vector<16x128xf32>
    %c64_243 = arith.constant 64 : index
    %c0_244 = arith.constant 0 : index
    %434 = vector.load %arg15[%c64_243, %c0_244] : memref<144x128xf32, #tpu.memory_space<vmem>>, vector<16x128xf32>
    tpu.vector_store %arg15[%c64_243, %c0_244], %433 {strides = array<i32>} : memref<144x128xf32, #tpu.memory_space<vmem>>, vector<16x128xf32>,
    %c0_245 = arith.constant 0 : index
    %c129_246 = arith.constant 129 : index
    %435 = vector.load %arg10[%c0_245, %c129_246] : memref<16x273xf32, #tpu.memory_space<vmem>>, vector<16x128xf32>
    %436 = arith.mulf %435, %427 : vector<16x128xf32>
    %c80_247 = arith.constant 80 : index
    %c0_248 = arith.constant 0 : index
    %437 = vector.load %arg15[%c80_247, %c0_248] : memref<144x128xf32, #tpu.memory_space<vmem>>, vector<16x128xf32>
    tpu.vector_store %arg15[%c80_247, %c0_248], %436 {strides = array<i32>} : memref<144x128xf32, #tpu.memory_space<vmem>>, vector<16x128xf32>,
    %c0_249 = arith.constant 0 : index
    %c143_250 = arith.constant 143 : index
    %438 = vector.load %arg10[%c0_249, %c143_250] : memref<16x273xf32, #tpu.memory_space<vmem>>, vector<16x128xf32>
    %439 = arith.mulf %438, %394 : vector<16x128xf32>
    %c96_251 = arith.constant 96 : index
    %c0_252 = arith.constant 0 : index
    %440 = vector.load %arg15[%c96_251, %c0_252] : memref<144x128xf32, #tpu.memory_space<vmem>>, vector<16x128xf32>
    tpu.vector_store %arg15[%c96_251, %c0_252], %439 {strides = array<i32>} : memref<144x128xf32, #tpu.memory_space<vmem>>, vector<16x128xf32>,
    %c0_253 = arith.constant 0 : index
    %c144_254 = arith.constant 144 : index
    %441 = vector.load %arg10[%c0_253, %c144_254] : memref<16x273xf32, #tpu.memory_space<vmem>>, vector<16x128xf32>
    %c112_255 = arith.constant 112 : index
    %c0_256 = arith.constant 0 : index
    %442 = vector.load %arg15[%c112_255, %c0_256] : memref<144x128xf32, #tpu.memory_space<vmem>>, vector<16x128xf32>
    tpu.vector_store %arg15[%c112_255, %c0_256], %441 {strides = array<i32>} : memref<144x128xf32, #tpu.memory_space<vmem>>, vector<16x128xf32>,
    %c0_257 = arith.constant 0 : index
    %c145_258 = arith.constant 145 : index
    %443 = vector.load %arg10[%c0_257, %c145_258] : memref<16x273xf32, #tpu.memory_space<vmem>>, vector<16x128xf32>
    %444 = arith.mulf %443, %427 : vector<16x128xf32>
    %c128_259 = arith.constant 128 : index
    %c0_260 = arith.constant 0 : index
    %445 = vector.load %arg15[%c128_259, %c0_260] : memref<144x128xf32, #tpu.memory_space<vmem>>, vector<16x128xf32>
    tpu.vector_store %arg15[%c128_259, %c0_260], %444 {strides = array<i32>} : memref<144x128xf32, #tpu.memory_space<vmem>>, vector<16x128xf32>,
    %c0_261 = arith.constant 0 : index
    %c0_262 = arith.constant 0 : index
    %446 = vector.load %arg15[%c0_261, %c0_262] : memref<144x128xf32, #tpu.memory_space<vmem>>, vector<144x128xf32>
    %447 = arith.truncf %446 : vector<144x128xf32> to vector<144x128xbf16>
    %cst_263 = arith.constant dense<0.000000e+00> : vector<16x128xf32>
    %448 = tpu.matmul %362, %447, %cst_263 {dimension_numbers = #tpu.dot_dimension_numbers<[1], [0], [0], [1], [0, 0, 1, 1], [], []>} : vector<16x144xbf16>, vector<144x128xbf16>, vector<16x128xf32> -> vector<16x128xf32>
    %449 = vector.broadcast %364 : vector<16x1xf32> to vector<16x128xf32>
    %450 = arith.addf %448, %449 : vector<16x128xf32>
    %cst_264 = arith.constant 0.000000e+00 : f32
    %451 = vector.broadcast %cst_264 : f32 to vector<16x128xf32>
    %452 = arith.maximumf %450, %451 : vector<16x128xf32>
    %c96_265 = arith.constant 96 : index
    %c0_266 = arith.constant 0 : index
    %453 = vector.load %arg5[%c96_265, %c0_266] : memref<656x512xbf16, #tpu.memory_space<vmem>>, vector<32x65xbf16>
    %454 = vector.extract_strided_slice %453 {offsets = [0, 0], sizes = [32, 64], strides = [1, 1]} : vector<32x65xbf16> to vector<32x64xbf16>
    %455 = vector.extract_strided_slice %453 {offsets = [0, 64], sizes = [32, 1], strides = [1, 1]} : vector<32x65xbf16> to vector<32x1xbf16>
    %456 = arith.extf %455 : vector<32x1xbf16> to vector<32x1xf32>
    %457 = arith.truncf %31 : vector<64x8xf32> to vector<64x8xbf16>
    %cst_267 = arith.constant dense<0.000000e+00> : vector<32x8xf32>
    %458 = tpu.matmul %454, %457, %cst_267 {dimension_numbers = #tpu.dot_dimension_numbers<[1], [0], [0], [1], [0, 0, 1, 1], [], []>} : vector<32x64xbf16>, vector<64x8xbf16>, vector<32x8xf32> -> vector<32x8xf32>
    %459 = vector.broadcast %456 : vector<32x1xf32> to vector<32x8xf32>
    %460 = arith.addf %458, %459 : vector<32x8xf32>
    %cst_268 = arith.constant 0.000000e+00 : f32
    %461 = vector.broadcast %cst_268 : f32 to vector<32x8xf32>
    %462 = arith.maximumf %460, %461 : vector<32x8xf32>
    %c128_269 = arith.constant 128 : index
    %c0_270 = arith.constant 0 : index
    %463 = vector.load %arg5[%c128_269, %c0_270] : memref<656x512xbf16, #tpu.memory_space<vmem>>, vector<32x289xbf16>
    %464 = vector.extract_strided_slice %463 {offsets = [0, 0], sizes = [32, 288], strides = [1, 1]} : vector<32x289xbf16> to vector<32x288xbf16>
    %465 = vector.extract_strided_slice %463 {offsets = [0, 288], sizes = [32, 1], strides = [1, 1]} : vector<32x289xbf16> to vector<32x1xbf16>
    %466 = arith.extf %465 : vector<32x1xbf16> to vector<32x1xf32>
    %c0_271 = arith.constant 0 : index
    %c128_272 = arith.constant 128 : index
    %467 = vector.load %arg11[%c0_271, %c128_272] : memref<32x141xf32, #tpu.memory_space<vmem>>, vector<32x8xf32>
    tpu.vector_store %arg11[%c0_271, %c128_272], %462 {strides = array<i32>} : memref<32x141xf32, #tpu.memory_space<vmem>>, vector<32x8xf32>,
    %cst_273 = arith.constant 0.000000e+00 : f32
    %468 = vector.broadcast %cst_273 : f32 to vector<32x8xf32>
    %469 = vector.extract_strided_slice %464 {offsets = [0, 0], sizes = [32, 32], strides = [1, 1]} : vector<32x288xbf16> to vector<32x32xbf16>
    %c0_274 = arith.constant 0 : index
    %c123 = arith.constant 123 : index
    %470 = vector.load %arg11[%c0_274, %c123] : memref<32x141xf32, #tpu.memory_space<vmem>>, vector<32x8xf32>
    %471 = tpu.iota {dimensions = array<i32: 1>} : vector<32x8xi32>
    %c2_i32 = arith.constant 2 : i32
    %c0_i32_275 = arith.constant 0 : i32
    %472 = arith.cmpi eq, %c2_i32, %c0_i32_275 : i32
    %c1_i32_276 = arith.constant 1 : i32
    %473 = arith.select %472, %c1_i32_276, %c2_i32 : i32
    %474 = vector.broadcast %473 : i32 to vector<32x8xi32>
    %475 = arith.remsi %471, %474 : vector<32x8xi32>
    %c0_i32_277 = arith.constant 0 : i32
    %476 = vector.broadcast %c0_i32_277 : i32 to vector<32x8xi32>
    %477 = arith.cmpi ne, %475, %476 : vector<32x8xi32>
    %c0_i32_278 = arith.constant 0 : i32
    %478 = vector.broadcast %c0_i32_278 : i32 to vector<32x8xi32>
    %479 = arith.cmpi slt, %475, %478 : vector<32x8xi32>
    %c0_i32_279 = arith.constant 0 : i32
    %480 = arith.cmpi slt, %473, %c0_i32_279 : i32
    %481 = vector.broadcast %480 : i1 to vector<32x8xi1>
    %482 = vector.broadcast %481 : vector<32x8xi1> to vector<32x8xi1>
    %483 = arith.xori %479, %482 : vector<32x8xi1>
    %484 = arith.andi %483, %477 : vector<32x8xi1>
    %485 = vector.broadcast %473 : i32 to vector<32x8xi32>
    %486 = arith.addi %475, %485 : vector<32x8xi32>
    %487 = arith.select %484, %486, %475 : vector<32x8xi1>, vector<32x8xi32>
    %c-1_i32_280 = arith.constant -1 : i32
    %488 = vector.broadcast %c-1_i32_280 : i32 to vector<32x8xi32>
    %489 = arith.addi %487, %488 : vector<32x8xi32>
    %c0_i32_281 = arith.constant 0 : i32
    %490 = vector.broadcast %c0_i32_281 : i32 to vector<32x8xi32>
    %491 = arith.cmpi sge, %489, %490 : vector<32x8xi32>
    %c-1_i32_282 = arith.constant -1 : i32
    %492 = vector.broadcast %c-1_i32_282 : i32 to vector<32x8xi32>
    %493 = arith.addi %487, %492 : vector<32x8xi32>
    %c2_i32_283 = arith.constant 2 : i32
    %494 = vector.broadcast %c2_i32_283 : i32 to vector<32x8xi32>
    %495 = arith.cmpi slt, %493, %494 : vector<32x8xi32>
    %496 = arith.andi %491, %495 : vector<32x8xi1>
    %497 = arith.extui %496 : vector<32x8xi1> to vector<32x8xi32>
    %498 = arith.sitofp %497 : vector<32x8xi32> to vector<32x8xf32>
    %499 = arith.mulf %470, %498 : vector<32x8xf32>
    %500 = arith.truncf %499 : vector<32x8xf32> to vector<32x8xbf16>
    %cst_284 = arith.constant dense<0.000000e+00> : vector<32x8xf32>
    %501 = tpu.matmul %469, %500, %cst_284 {dimension_numbers = #tpu.dot_dimension_numbers<[1], [0], [0], [1], [0, 0, 1, 1], [], []>} : vector<32x32xbf16>, vector<32x8xbf16>, vector<32x8xf32> -> vector<32x8xf32>
    %502 = arith.addf %468, %501 : vector<32x8xf32>
    %503 = vector.extract_strided_slice %464 {offsets = [0, 32], sizes = [32, 32], strides = [1, 1]} : vector<32x288xbf16> to vector<32x32xbf16>
    %c0_285 = arith.constant 0 : index
    %c124 = arith.constant 124 : index
    %504 = vector.load %arg11[%c0_285, %c124] : memref<32x141xf32, #tpu.memory_space<vmem>>, vector<32x8xf32>
    %505 = arith.truncf %504 : vector<32x8xf32> to vector<32x8xbf16>
    %cst_286 = arith.constant dense<0.000000e+00> : vector<32x8xf32>
    %506 = tpu.matmul %503, %505, %cst_286 {dimension_numbers = #tpu.dot_dimension_numbers<[1], [0], [0], [1], [0, 0, 1, 1], [], []>} : vector<32x32xbf16>, vector<32x8xbf16>, vector<32x8xf32> -> vector<32x8xf32>
    %507 = arith.addf %502, %506 : vector<32x8xf32>
    %508 = vector.extract_strided_slice %464 {offsets = [0, 64], sizes = [32, 32], strides = [1, 1]} : vector<32x288xbf16> to vector<32x32xbf16>
    %c0_287 = arith.constant 0 : index
    %c125 = arith.constant 125 : index
    %509 = vector.load %arg11[%c0_287, %c125] : memref<32x141xf32, #tpu.memory_space<vmem>>, vector<32x8xf32>
    %510 = tpu.iota {dimensions = array<i32: 1>} : vector<32x8xi32>
    %c2_i32_288 = arith.constant 2 : i32
    %c0_i32_289 = arith.constant 0 : i32
    %511 = arith.cmpi eq, %c2_i32_288, %c0_i32_289 : i32
    %c1_i32_290 = arith.constant 1 : i32
    %512 = arith.select %511, %c1_i32_290, %c2_i32_288 : i32
    %513 = vector.broadcast %512 : i32 to vector<32x8xi32>
    %514 = arith.remsi %510, %513 : vector<32x8xi32>
    %c0_i32_291 = arith.constant 0 : i32
    %515 = vector.broadcast %c0_i32_291 : i32 to vector<32x8xi32>
    %516 = arith.cmpi ne, %514, %515 : vector<32x8xi32>
    %c0_i32_292 = arith.constant 0 : i32
    %517 = vector.broadcast %c0_i32_292 : i32 to vector<32x8xi32>
    %518 = arith.cmpi slt, %514, %517 : vector<32x8xi32>
    %c0_i32_293 = arith.constant 0 : i32
    %519 = arith.cmpi slt, %512, %c0_i32_293 : i32
    %520 = vector.broadcast %519 : i1 to vector<32x8xi1>
    %521 = vector.broadcast %520 : vector<32x8xi1> to vector<32x8xi1>
    %522 = arith.xori %518, %521 : vector<32x8xi1>
    %523 = arith.andi %522, %516 : vector<32x8xi1>
    %524 = vector.broadcast %512 : i32 to vector<32x8xi32>
    %525 = arith.addi %514, %524 : vector<32x8xi32>
    %526 = arith.select %523, %525, %514 : vector<32x8xi1>, vector<32x8xi32>
    %c1_i32_294 = arith.constant 1 : i32
    %527 = vector.broadcast %c1_i32_294 : i32 to vector<32x8xi32>
    %528 = arith.addi %526, %527 : vector<32x8xi32>
    %c0_i32_295 = arith.constant 0 : i32
    %529 = vector.broadcast %c0_i32_295 : i32 to vector<32x8xi32>
    %530 = arith.cmpi sge, %528, %529 : vector<32x8xi32>
    %c1_i32_296 = arith.constant 1 : i32
    %531 = vector.broadcast %c1_i32_296 : i32 to vector<32x8xi32>
    %532 = arith.addi %526, %531 : vector<32x8xi32>
    %c2_i32_297 = arith.constant 2 : i32
    %533 = vector.broadcast %c2_i32_297 : i32 to vector<32x8xi32>
    %534 = arith.cmpi slt, %532, %533 : vector<32x8xi32>
    %535 = arith.andi %530, %534 : vector<32x8xi1>
    %536 = arith.extui %535 : vector<32x8xi1> to vector<32x8xi32>
    %537 = arith.sitofp %536 : vector<32x8xi32> to vector<32x8xf32>
    %538 = arith.mulf %509, %537 : vector<32x8xf32>
    %539 = arith.truncf %538 : vector<32x8xf32> to vector<32x8xbf16>
    %cst_298 = arith.constant dense<0.000000e+00> : vector<32x8xf32>
    %540 = tpu.matmul %508, %539, %cst_298 {dimension_numbers = #tpu.dot_dimension_numbers<[1], [0], [0], [1], [0, 0, 1, 1], [], []>} : vector<32x32xbf16>, vector<32x8xbf16>, vector<32x8xf32> -> vector<32x8xf32>
    %541 = arith.addf %507, %540 : vector<32x8xf32>
    %542 = vector.extract_strided_slice %464 {offsets = [0, 96], sizes = [32, 32], strides = [1, 1]} : vector<32x288xbf16> to vector<32x32xbf16>
    %c0_299 = arith.constant 0 : index
    %c127_300 = arith.constant 127 : index
    %543 = vector.load %arg11[%c0_299, %c127_300] : memref<32x141xf32, #tpu.memory_space<vmem>>, vector<32x8xf32>
    %544 = arith.mulf %543, %498 : vector<32x8xf32>
    %545 = arith.truncf %544 : vector<32x8xf32> to vector<32x8xbf16>
    %cst_301 = arith.constant dense<0.000000e+00> : vector<32x8xf32>
    %546 = tpu.matmul %542, %545, %cst_301 {dimension_numbers = #tpu.dot_dimension_numbers<[1], [0], [0], [1], [0, 0, 1, 1], [], []>} : vector<32x32xbf16>, vector<32x8xbf16>, vector<32x8xf32> -> vector<32x8xf32>
    %547 = arith.addf %541, %546 : vector<32x8xf32>
    %548 = vector.extract_strided_slice %464 {offsets = [0, 128], sizes = [32, 32], strides = [1, 1]} : vector<32x288xbf16> to vector<32x32xbf16>
    %c0_302 = arith.constant 0 : index
    %c128_303 = arith.constant 128 : index
    %549 = vector.load %arg11[%c0_302, %c128_303] : memref<32x141xf32, #tpu.memory_space<vmem>>, vector<32x8xf32>
    %550 = arith.truncf %549 : vector<32x8xf32> to vector<32x8xbf16>
    %cst_304 = arith.constant dense<0.000000e+00> : vector<32x8xf32>
    %551 = tpu.matmul %548, %550, %cst_304 {dimension_numbers = #tpu.dot_dimension_numbers<[1], [0], [0], [1], [0, 0, 1, 1], [], []>} : vector<32x32xbf16>, vector<32x8xbf16>, vector<32x8xf32> -> vector<32x8xf32>
    %552 = arith.addf %547, %551 : vector<32x8xf32>
    %553 = vector.extract_strided_slice %464 {offsets = [0, 160], sizes = [32, 32], strides = [1, 1]} : vector<32x288xbf16> to vector<32x32xbf16>
    %c0_305 = arith.constant 0 : index
    %c129_306 = arith.constant 129 : index
    %554 = vector.load %arg11[%c0_305, %c129_306] : memref<32x141xf32, #tpu.memory_space<vmem>>, vector<32x8xf32>
    %555 = arith.mulf %554, %537 : vector<32x8xf32>
    %556 = arith.truncf %555 : vector<32x8xf32> to vector<32x8xbf16>
    %cst_307 = arith.constant dense<0.000000e+00> : vector<32x8xf32>
    %557 = tpu.matmul %553, %556, %cst_307 {dimension_numbers = #tpu.dot_dimension_numbers<[1], [0], [0], [1], [0, 0, 1, 1], [], []>} : vector<32x32xbf16>, vector<32x8xbf16>, vector<32x8xf32> -> vector<32x8xf32>
    %558 = arith.addf %552, %557 : vector<32x8xf32>
    %559 = vector.extract_strided_slice %464 {offsets = [0, 192], sizes = [32, 32], strides = [1, 1]} : vector<32x288xbf16> to vector<32x32xbf16>
    %c0_308 = arith.constant 0 : index
    %c131 = arith.constant 131 : index
    %560 = vector.load %arg11[%c0_308, %c131] : memref<32x141xf32, #tpu.memory_space<vmem>>, vector<32x8xf32>
    %561 = arith.mulf %560, %498 : vector<32x8xf32>
    %562 = arith.truncf %561 : vector<32x8xf32> to vector<32x8xbf16>
    %cst_309 = arith.constant dense<0.000000e+00> : vector<32x8xf32>
    %563 = tpu.matmul %559, %562, %cst_309 {dimension_numbers = #tpu.dot_dimension_numbers<[1], [0], [0], [1], [0, 0, 1, 1], [], []>} : vector<32x32xbf16>, vector<32x8xbf16>, vector<32x8xf32> -> vector<32x8xf32>
    %564 = arith.addf %558, %563 : vector<32x8xf32>
    %565 = vector.extract_strided_slice %464 {offsets = [0, 224], sizes = [32, 32], strides = [1, 1]} : vector<32x288xbf16> to vector<32x32xbf16>
    %c0_310 = arith.constant 0 : index
    %c132 = arith.constant 132 : index
    %566 = vector.load %arg11[%c0_310, %c132] : memref<32x141xf32, #tpu.memory_space<vmem>>, vector<32x8xf32>
    %567 = arith.truncf %566 : vector<32x8xf32> to vector<32x8xbf16>
    %cst_311 = arith.constant dense<0.000000e+00> : vector<32x8xf32>
    %568 = tpu.matmul %565, %567, %cst_311 {dimension_numbers = #tpu.dot_dimension_numbers<[1], [0], [0], [1], [0, 0, 1, 1], [], []>} : vector<32x32xbf16>, vector<32x8xbf16>, vector<32x8xf32> -> vector<32x8xf32>
    %569 = arith.addf %564, %568 : vector<32x8xf32>
    %570 = vector.extract_strided_slice %464 {offsets = [0, 256], sizes = [32, 32], strides = [1, 1]} : vector<32x288xbf16> to vector<32x32xbf16>
    %c0_312 = arith.constant 0 : index
    %c133 = arith.constant 133 : index
    %571 = vector.load %arg11[%c0_312, %c133] : memref<32x141xf32, #tpu.memory_space<vmem>>, vector<32x8xf32>
    %572 = arith.mulf %571, %537 : vector<32x8xf32>
    %573 = arith.truncf %572 : vector<32x8xf32> to vector<32x8xbf16>
    %cst_313 = arith.constant dense<0.000000e+00> : vector<32x8xf32>
    %574 = tpu.matmul %570, %573, %cst_313 {dimension_numbers = #tpu.dot_dimension_numbers<[1], [0], [0], [1], [0, 0, 1, 1], [], []>} : vector<32x32xbf16>, vector<32x8xbf16>, vector<32x8xf32> -> vector<32x8xf32>
    %575 = arith.addf %569, %574 : vector<32x8xf32>
    %576 = vector.broadcast %466 : vector<32x1xf32> to vector<32x8xf32>
    %577 = arith.addf %575, %576 : vector<32x8xf32>
    %cst_314 = arith.constant 0.000000e+00 : f32
    %578 = vector.broadcast %cst_314 : f32 to vector<32x8xf32>
    %579 = arith.maximumf %577, %578 : vector<32x8xf32>
    %c608 = arith.constant 608 : index
    %c0_315 = arith.constant 0 : index
    %580 = vector.load %arg5[%c608, %c0_315] : memref<656x512xbf16, #tpu.memory_space<vmem>>, vector<8x32xbf16>
    %581 = arith.truncf %579 : vector<32x8xf32> to vector<32x8xbf16>
    %cst_316 = arith.constant dense<0.000000e+00> : vector<32x32xf32>
    %582 = tpu.matmul %581, %580, %cst_316 {dimension_numbers = #tpu.dot_dimension_numbers<[1], [0], [0], [1], [0, 0, 1, 1], [], []>} : vector<32x8xbf16>, vector<8x32xbf16>, vector<32x32xf32> -> vector<32x32xf32>
    %583 = arith.addf %29, %582 : vector<32x32xf32>
    %c160_317 = arith.constant 160 : index
    %c0_318 = arith.constant 0 : index
    %584 = vector.load %arg5[%c160_317, %c0_318] : memref<656x512xbf16, #tpu.memory_space<vmem>>, vector<32x289xbf16>
    %585 = vector.extract_strided_slice %584 {offsets = [0, 0], sizes = [32, 288], strides = [1, 1]} : vector<32x289xbf16> to vector<32x288xbf16>
    %586 = vector.extract_strided_slice %584 {offsets = [0, 288], sizes = [32, 1], strides = [1, 1]} : vector<32x289xbf16> to vector<32x1xbf16>
    %587 = arith.extf %586 : vector<32x1xbf16> to vector<32x1xf32>
    %c0_319 = arith.constant 0 : index
    %c128_320 = arith.constant 128 : index
    %588 = vector.load %arg12[%c0_319, %c128_320] : memref<32x169xf32, #tpu.memory_space<vmem>>, vector<32x32xf32>
    tpu.vector_store %arg12[%c0_319, %c128_320], %583 {strides = array<i32>} : memref<32x169xf32, #tpu.memory_space<vmem>>, vector<32x32xf32>,
    %cst_321 = arith.constant 0.000000e+00 : f32
    %589 = vector.broadcast %cst_321 : f32 to vector<32x32xf32>
    %590 = vector.extract_strided_slice %585 {offsets = [0, 0], sizes = [32, 32], strides = [1, 1]} : vector<32x288xbf16> to vector<32x32xbf16>
    %c0_322 = arith.constant 0 : index
    %c119_323 = arith.constant 119 : index
    %591 = vector.load %arg12[%c0_322, %c119_323] : memref<32x169xf32, #tpu.memory_space<vmem>>, vector<32x32xf32>
    %592 = tpu.iota {dimensions = array<i32: 1>} : vector<32x32xi32>
    %c4_i32_324 = arith.constant 4 : i32
    %c0_i32_325 = arith.constant 0 : i32
    %593 = arith.cmpi eq, %c4_i32_324, %c0_i32_325 : i32
    %c1_i32_326 = arith.constant 1 : i32
    %594 = arith.select %593, %c1_i32_326, %c4_i32_324 : i32
    %595 = vector.broadcast %594 : i32 to vector<32x32xi32>
    %596 = arith.remsi %592, %595 : vector<32x32xi32>
    %c0_i32_327 = arith.constant 0 : i32
    %597 = vector.broadcast %c0_i32_327 : i32 to vector<32x32xi32>
    %598 = arith.cmpi ne, %596, %597 : vector<32x32xi32>
    %c0_i32_328 = arith.constant 0 : i32
    %599 = vector.broadcast %c0_i32_328 : i32 to vector<32x32xi32>
    %600 = arith.cmpi slt, %596, %599 : vector<32x32xi32>
    %c0_i32_329 = arith.constant 0 : i32
    %601 = arith.cmpi slt, %594, %c0_i32_329 : i32
    %602 = vector.broadcast %601 : i1 to vector<32x32xi1>
    %603 = vector.broadcast %602 : vector<32x32xi1> to vector<32x32xi1>
    %604 = arith.xori %600, %603 : vector<32x32xi1>
    %605 = arith.andi %604, %598 : vector<32x32xi1>
    %606 = vector.broadcast %594 : i32 to vector<32x32xi32>
    %607 = arith.addi %596, %606 : vector<32x32xi32>
    %608 = arith.select %605, %607, %596 : vector<32x32xi1>, vector<32x32xi32>
    %c-1_i32_330 = arith.constant -1 : i32
    %609 = vector.broadcast %c-1_i32_330 : i32 to vector<32x32xi32>
    %610 = arith.addi %608, %609 : vector<32x32xi32>
    %c0_i32_331 = arith.constant 0 : i32
    %611 = vector.broadcast %c0_i32_331 : i32 to vector<32x32xi32>
    %612 = arith.cmpi sge, %610, %611 : vector<32x32xi32>
    %c-1_i32_332 = arith.constant -1 : i32
    %613 = vector.broadcast %c-1_i32_332 : i32 to vector<32x32xi32>
    %614 = arith.addi %608, %613 : vector<32x32xi32>
    %c4_i32_333 = arith.constant 4 : i32
    %615 = vector.broadcast %c4_i32_333 : i32 to vector<32x32xi32>
    %616 = arith.cmpi slt, %614, %615 : vector<32x32xi32>
    %617 = arith.andi %612, %616 : vector<32x32xi1>
    %618 = arith.extui %617 : vector<32x32xi1> to vector<32x32xi32>
    %619 = arith.sitofp %618 : vector<32x32xi32> to vector<32x32xf32>
    %620 = arith.mulf %591, %619 : vector<32x32xf32>
    %621 = arith.truncf %620 : vector<32x32xf32> to vector<32x32xbf16>
    %cst_334 = arith.constant dense<0.000000e+00> : vector<32x32xf32>
    %622 = tpu.matmul %590, %621, %cst_334 {dimension_numbers = #tpu.dot_dimension_numbers<[1], [0], [0], [1], [0, 0, 1, 1], [], []>} : vector<32x32xbf16>, vector<32x32xbf16>, vector<32x32xf32> -> vector<32x32xf32>
    %623 = arith.addf %589, %622 : vector<32x32xf32>
    %624 = vector.extract_strided_slice %585 {offsets = [0, 32], sizes = [32, 32], strides = [1, 1]} : vector<32x288xbf16> to vector<32x32xbf16>
    %c0_335 = arith.constant 0 : index
    %c120_336 = arith.constant 120 : index
    %625 = vector.load %arg12[%c0_335, %c120_336] : memref<32x169xf32, #tpu.memory_space<vmem>>, vector<32x32xf32>
    %626 = arith.truncf %625 : vector<32x32xf32> to vector<32x32xbf16>
    %cst_337 = arith.constant dense<0.000000e+00> : vector<32x32xf32>
    %627 = tpu.matmul %624, %626, %cst_337 {dimension_numbers = #tpu.dot_dimension_numbers<[1], [0], [0], [1], [0, 0, 1, 1], [], []>} : vector<32x32xbf16>, vector<32x32xbf16>, vector<32x32xf32> -> vector<32x32xf32>
    %628 = arith.addf %623, %627 : vector<32x32xf32>
    %629 = vector.extract_strided_slice %585 {offsets = [0, 64], sizes = [32, 32], strides = [1, 1]} : vector<32x288xbf16> to vector<32x32xbf16>
    %c0_338 = arith.constant 0 : index
    %c121_339 = arith.constant 121 : index
    %630 = vector.load %arg12[%c0_338, %c121_339] : memref<32x169xf32, #tpu.memory_space<vmem>>, vector<32x32xf32>
    %631 = tpu.iota {dimensions = array<i32: 1>} : vector<32x32xi32>
    %c4_i32_340 = arith.constant 4 : i32
    %c0_i32_341 = arith.constant 0 : i32
    %632 = arith.cmpi eq, %c4_i32_340, %c0_i32_341 : i32
    %c1_i32_342 = arith.constant 1 : i32
    %633 = arith.select %632, %c1_i32_342, %c4_i32_340 : i32
    %634 = vector.broadcast %633 : i32 to vector<32x32xi32>
    %635 = arith.remsi %631, %634 : vector<32x32xi32>
    %c0_i32_343 = arith.constant 0 : i32
    %636 = vector.broadcast %c0_i32_343 : i32 to vector<32x32xi32>
    %637 = arith.cmpi ne, %635, %636 : vector<32x32xi32>
    %c0_i32_344 = arith.constant 0 : i32
    %638 = vector.broadcast %c0_i32_344 : i32 to vector<32x32xi32>
    %639 = arith.cmpi slt, %635, %638 : vector<32x32xi32>
    %c0_i32_345 = arith.constant 0 : i32
    %640 = arith.cmpi slt, %633, %c0_i32_345 : i32
    %641 = vector.broadcast %640 : i1 to vector<32x32xi1>
    %642 = vector.broadcast %641 : vector<32x32xi1> to vector<32x32xi1>
    %643 = arith.xori %639, %642 : vector<32x32xi1>
    %644 = arith.andi %643, %637 : vector<32x32xi1>
    %645 = vector.broadcast %633 : i32 to vector<32x32xi32>
    %646 = arith.addi %635, %645 : vector<32x32xi32>
    %647 = arith.select %644, %646, %635 : vector<32x32xi1>, vector<32x32xi32>
    %c1_i32_346 = arith.constant 1 : i32
    %648 = vector.broadcast %c1_i32_346 : i32 to vector<32x32xi32>
    %649 = arith.addi %647, %648 : vector<32x32xi32>
    %c0_i32_347 = arith.constant 0 : i32
    %650 = vector.broadcast %c0_i32_347 : i32 to vector<32x32xi32>
    %651 = arith.cmpi sge, %649, %650 : vector<32x32xi32>
    %c1_i32_348 = arith.constant 1 : i32
    %652 = vector.broadcast %c1_i32_348 : i32 to vector<32x32xi32>
    %653 = arith.addi %647, %652 : vector<32x32xi32>
    %c4_i32_349 = arith.constant 4 : i32
    %654 = vector.broadcast %c4_i32_349 : i32 to vector<32x32xi32>
    %655 = arith.cmpi slt, %653, %654 : vector<32x32xi32>
    %656 = arith.andi %651, %655 : vector<32x32xi1>
    %657 = arith.extui %656 : vector<32x32xi1> to vector<32x32xi32>
    %658 = arith.sitofp %657 : vector<32x32xi32> to vector<32x32xf32>
    %659 = arith.mulf %630, %658 : vector<32x32xf32>
    %660 = arith.truncf %659 : vector<32x32xf32> to vector<32x32xbf16>
    %cst_350 = arith.constant dense<0.000000e+00> : vector<32x32xf32>
    %661 = tpu.matmul %629, %660, %cst_350 {dimension_numbers = #tpu.dot_dimension_numbers<[1], [0], [0], [1], [0, 0, 1, 1], [], []>} : vector<32x32xbf16>, vector<32x32xbf16>, vector<32x32xf32> -> vector<32x32xf32>
    %662 = arith.addf %628, %661 : vector<32x32xf32>
    %663 = vector.extract_strided_slice %585 {offsets = [0, 96], sizes = [32, 32], strides = [1, 1]} : vector<32x288xbf16> to vector<32x32xbf16>
    %c0_351 = arith.constant 0 : index
    %c127_352 = arith.constant 127 : index
    %664 = vector.load %arg12[%c0_351, %c127_352] : memref<32x169xf32, #tpu.memory_space<vmem>>, vector<32x32xf32>
    %665 = arith.mulf %664, %619 : vector<32x32xf32>
    %666 = arith.truncf %665 : vector<32x32xf32> to vector<32x32xbf16>
    %cst_353 = arith.constant dense<0.000000e+00> : vector<32x32xf32>
    %667 = tpu.matmul %663, %666, %cst_353 {dimension_numbers = #tpu.dot_dimension_numbers<[1], [0], [0], [1], [0, 0, 1, 1], [], []>} : vector<32x32xbf16>, vector<32x32xbf16>, vector<32x32xf32> -> vector<32x32xf32>
    %668 = arith.addf %662, %667 : vector<32x32xf32>
    %669 = vector.extract_strided_slice %585 {offsets = [0, 128], sizes = [32, 32], strides = [1, 1]} : vector<32x288xbf16> to vector<32x32xbf16>
    %c0_354 = arith.constant 0 : index
    %c128_355 = arith.constant 128 : index
    %670 = vector.load %arg12[%c0_354, %c128_355] : memref<32x169xf32, #tpu.memory_space<vmem>>, vector<32x32xf32>
    %671 = arith.truncf %670 : vector<32x32xf32> to vector<32x32xbf16>
    %cst_356 = arith.constant dense<0.000000e+00> : vector<32x32xf32>
    %672 = tpu.matmul %669, %671, %cst_356 {dimension_numbers = #tpu.dot_dimension_numbers<[1], [0], [0], [1], [0, 0, 1, 1], [], []>} : vector<32x32xbf16>, vector<32x32xbf16>, vector<32x32xf32> -> vector<32x32xf32>
    %673 = arith.addf %668, %672 : vector<32x32xf32>
    %674 = vector.extract_strided_slice %585 {offsets = [0, 160], sizes = [32, 32], strides = [1, 1]} : vector<32x288xbf16> to vector<32x32xbf16>
    %c0_357 = arith.constant 0 : index
    %c129_358 = arith.constant 129 : index
    %675 = vector.load %arg12[%c0_357, %c129_358] : memref<32x169xf32, #tpu.memory_space<vmem>>, vector<32x32xf32>
    %676 = arith.mulf %675, %658 : vector<32x32xf32>
    %677 = arith.truncf %676 : vector<32x32xf32> to vector<32x32xbf16>
    %cst_359 = arith.constant dense<0.000000e+00> : vector<32x32xf32>
    %678 = tpu.matmul %674, %677, %cst_359 {dimension_numbers = #tpu.dot_dimension_numbers<[1], [0], [0], [1], [0, 0, 1, 1], [], []>} : vector<32x32xbf16>, vector<32x32xbf16>, vector<32x32xf32> -> vector<32x32xf32>
    %679 = arith.addf %673, %678 : vector<32x32xf32>
    %680 = vector.extract_strided_slice %585 {offsets = [0, 192], sizes = [32, 32], strides = [1, 1]} : vector<32x288xbf16> to vector<32x32xbf16>
    %c0_360 = arith.constant 0 : index
    %c135_361 = arith.constant 135 : index
    %681 = vector.load %arg12[%c0_360, %c135_361] : memref<32x169xf32, #tpu.memory_space<vmem>>, vector<32x32xf32>
    %682 = arith.mulf %681, %619 : vector<32x32xf32>
    %683 = arith.truncf %682 : vector<32x32xf32> to vector<32x32xbf16>
    %cst_362 = arith.constant dense<0.000000e+00> : vector<32x32xf32>
    %684 = tpu.matmul %680, %683, %cst_362 {dimension_numbers = #tpu.dot_dimension_numbers<[1], [0], [0], [1], [0, 0, 1, 1], [], []>} : vector<32x32xbf16>, vector<32x32xbf16>, vector<32x32xf32> -> vector<32x32xf32>
    %685 = arith.addf %679, %684 : vector<32x32xf32>
    %686 = vector.extract_strided_slice %585 {offsets = [0, 224], sizes = [32, 32], strides = [1, 1]} : vector<32x288xbf16> to vector<32x32xbf16>
    %c0_363 = arith.constant 0 : index
    %c136_364 = arith.constant 136 : index
    %687 = vector.load %arg12[%c0_363, %c136_364] : memref<32x169xf32, #tpu.memory_space<vmem>>, vector<32x32xf32>
    %688 = arith.truncf %687 : vector<32x32xf32> to vector<32x32xbf16>
    %cst_365 = arith.constant dense<0.000000e+00> : vector<32x32xf32>
    %689 = tpu.matmul %686, %688, %cst_365 {dimension_numbers = #tpu.dot_dimension_numbers<[1], [0], [0], [1], [0, 0, 1, 1], [], []>} : vector<32x32xbf16>, vector<32x32xbf16>, vector<32x32xf32> -> vector<32x32xf32>
    %690 = arith.addf %685, %689 : vector<32x32xf32>
    %691 = vector.extract_strided_slice %585 {offsets = [0, 256], sizes = [32, 32], strides = [1, 1]} : vector<32x288xbf16> to vector<32x32xbf16>
    %c0_366 = arith.constant 0 : index
    %c137_367 = arith.constant 137 : index
    %692 = vector.load %arg12[%c0_366, %c137_367] : memref<32x169xf32, #tpu.memory_space<vmem>>, vector<32x32xf32>
    %693 = arith.mulf %692, %658 : vector<32x32xf32>
    %694 = arith.truncf %693 : vector<32x32xf32> to vector<32x32xbf16>
    %cst_368 = arith.constant dense<0.000000e+00> : vector<32x32xf32>
    %695 = tpu.matmul %691, %694, %cst_368 {dimension_numbers = #tpu.dot_dimension_numbers<[1], [0], [0], [1], [0, 0, 1, 1], [], []>} : vector<32x32xbf16>, vector<32x32xbf16>, vector<32x32xf32> -> vector<32x32xf32>
    %696 = arith.addf %690, %695 : vector<32x32xf32>
    %697 = vector.broadcast %587 : vector<32x1xf32> to vector<32x32xf32>
    %698 = arith.addf %696, %697 : vector<32x32xf32>
    %cst_369 = arith.constant 0.000000e+00 : f32
    %699 = vector.broadcast %cst_369 : f32 to vector<32x32xf32>
    %700 = arith.maximumf %698, %699 : vector<32x32xf32>
    %c192 = arith.constant 192 : index
    %c0_370 = arith.constant 0 : index
    %701 = vector.load %arg5[%c192, %c0_370] : memref<656x512xbf16, #tpu.memory_space<vmem>>, vector<8x17xbf16>
    %702 = vector.extract_strided_slice %701 {offsets = [0, 0], sizes = [8, 16], strides = [1, 1]} : vector<8x17xbf16> to vector<8x16xbf16>
    %703 = vector.extract_strided_slice %701 {offsets = [0, 16], sizes = [8, 1], strides = [1, 1]} : vector<8x17xbf16> to vector<8x1xbf16>
    %704 = arith.extf %703 : vector<8x1xbf16> to vector<8x1xf32>
    %705 = arith.truncf %452 : vector<16x128xf32> to vector<16x128xbf16>
    %cst_371 = arith.constant dense<0.000000e+00> : vector<8x128xf32>
    %706 = tpu.matmul %702, %705, %cst_371 {dimension_numbers = #tpu.dot_dimension_numbers<[1], [0], [0], [1], [0, 0, 1, 1], [], []>} : vector<8x16xbf16>, vector<16x128xbf16>, vector<8x128xf32> -> vector<8x128xf32>
    %707 = vector.broadcast %704 : vector<8x1xf32> to vector<8x128xf32>
    %708 = arith.addf %706, %707 : vector<8x128xf32>
    %cst_372 = arith.constant 0.000000e+00 : f32
    %709 = vector.broadcast %cst_372 : f32 to vector<8x128xf32>
    %710 = arith.maximumf %708, %709 : vector<8x128xf32>
    %c208 = arith.constant 208 : index
    %c0_373 = arith.constant 0 : index
    %711 = vector.load %arg5[%c208, %c0_373] : memref<656x512xbf16, #tpu.memory_space<vmem>>, vector<8x73xbf16>
    %712 = vector.extract_strided_slice %711 {offsets = [0, 0], sizes = [8, 72], strides = [1, 1]} : vector<8x73xbf16> to vector<8x72xbf16>
    %713 = vector.extract_strided_slice %711 {offsets = [0, 72], sizes = [8, 1], strides = [1, 1]} : vector<8x73xbf16> to vector<8x1xbf16>
    %714 = arith.extf %713 : vector<8x1xbf16> to vector<8x1xf32>
    %c0_374 = arith.constant 0 : index
    %c128_375 = arith.constant 128 : index
    %715 = vector.load %arg7[%c0_374, %c128_375] : memref<8x273xf32, #tpu.memory_space<vmem>>, vector<8x128xf32>
    tpu.vector_store %arg7[%c0_374, %c128_375], %710 {strides = array<i32>} : memref<8x273xf32, #tpu.memory_space<vmem>>, vector<8x128xf32>,
    %c0_376 = arith.constant 0 : index
    %c111_377 = arith.constant 111 : index
    %716 = vector.load %arg7[%c0_376, %c111_377] : memref<8x273xf32, #tpu.memory_space<vmem>>, vector<8x128xf32>
    %717 = arith.mulf %716, %75 : vector<8x128xf32>
    %c0_378 = arith.constant 0 : index
    %c0_379 = arith.constant 0 : index
    %718 = vector.load %arg13[%c0_378, %c0_379] : memref<72x128xf32, #tpu.memory_space<vmem>>, vector<8x128xf32>
    tpu.vector_store %arg13[%c0_378, %c0_379], %717 {strides = array<i32>} : memref<72x128xf32, #tpu.memory_space<vmem>>, vector<8x128xf32>,
    %c0_380 = arith.constant 0 : index
    %c112_381 = arith.constant 112 : index
    %719 = vector.load %arg7[%c0_380, %c112_381] : memref<8x273xf32, #tpu.memory_space<vmem>>, vector<8x128xf32>
    %c8_382 = arith.constant 8 : index
    %c0_383 = arith.constant 0 : index
    %720 = vector.load %arg13[%c8_382, %c0_383] : memref<72x128xf32, #tpu.memory_space<vmem>>, vector<8x128xf32>
    tpu.vector_store %arg13[%c8_382, %c0_383], %719 {strides = array<i32>} : memref<72x128xf32, #tpu.memory_space<vmem>>, vector<8x128xf32>,
    %c0_384 = arith.constant 0 : index
    %c113_385 = arith.constant 113 : index
    %721 = vector.load %arg7[%c0_384, %c113_385] : memref<8x273xf32, #tpu.memory_space<vmem>>, vector<8x128xf32>
    %722 = arith.mulf %721, %108 : vector<8x128xf32>
    %c16_386 = arith.constant 16 : index
    %c0_387 = arith.constant 0 : index
    %723 = vector.load %arg13[%c16_386, %c0_387] : memref<72x128xf32, #tpu.memory_space<vmem>>, vector<8x128xf32>
    tpu.vector_store %arg13[%c16_386, %c0_387], %722 {strides = array<i32>} : memref<72x128xf32, #tpu.memory_space<vmem>>, vector<8x128xf32>,
    %c0_388 = arith.constant 0 : index
    %c127_389 = arith.constant 127 : index
    %724 = vector.load %arg7[%c0_388, %c127_389] : memref<8x273xf32, #tpu.memory_space<vmem>>, vector<8x128xf32>
    %725 = arith.mulf %724, %75 : vector<8x128xf32>
    %c24_390 = arith.constant 24 : index
    %c0_391 = arith.constant 0 : index
    %726 = vector.load %arg13[%c24_390, %c0_391] : memref<72x128xf32, #tpu.memory_space<vmem>>, vector<8x128xf32>
    tpu.vector_store %arg13[%c24_390, %c0_391], %725 {strides = array<i32>} : memref<72x128xf32, #tpu.memory_space<vmem>>, vector<8x128xf32>,
    %c0_392 = arith.constant 0 : index
    %c128_393 = arith.constant 128 : index
    %727 = vector.load %arg7[%c0_392, %c128_393] : memref<8x273xf32, #tpu.memory_space<vmem>>, vector<8x128xf32>
    %c32_394 = arith.constant 32 : index
    %c0_395 = arith.constant 0 : index
    %728 = vector.load %arg13[%c32_394, %c0_395] : memref<72x128xf32, #tpu.memory_space<vmem>>, vector<8x128xf32>
    tpu.vector_store %arg13[%c32_394, %c0_395], %727 {strides = array<i32>} : memref<72x128xf32, #tpu.memory_space<vmem>>, vector<8x128xf32>,
    %c0_396 = arith.constant 0 : index
    %c129_397 = arith.constant 129 : index
    %729 = vector.load %arg7[%c0_396, %c129_397] : memref<8x273xf32, #tpu.memory_space<vmem>>, vector<8x128xf32>
    %730 = arith.mulf %729, %108 : vector<8x128xf32>
    %c40_398 = arith.constant 40 : index
    %c0_399 = arith.constant 0 : index
    %731 = vector.load %arg13[%c40_398, %c0_399] : memref<72x128xf32, #tpu.memory_space<vmem>>, vector<8x128xf32>
    tpu.vector_store %arg13[%c40_398, %c0_399], %730 {strides = array<i32>} : memref<72x128xf32, #tpu.memory_space<vmem>>, vector<8x128xf32>,
    %c0_400 = arith.constant 0 : index
    %c143_401 = arith.constant 143 : index
    %732 = vector.load %arg7[%c0_400, %c143_401] : memref<8x273xf32, #tpu.memory_space<vmem>>, vector<8x128xf32>
    %733 = arith.mulf %732, %75 : vector<8x128xf32>
    %c48_402 = arith.constant 48 : index
    %c0_403 = arith.constant 0 : index
    %734 = vector.load %arg13[%c48_402, %c0_403] : memref<72x128xf32, #tpu.memory_space<vmem>>, vector<8x128xf32>
    tpu.vector_store %arg13[%c48_402, %c0_403], %733 {strides = array<i32>} : memref<72x128xf32, #tpu.memory_space<vmem>>, vector<8x128xf32>,
    %c0_404 = arith.constant 0 : index
    %c144_405 = arith.constant 144 : index
    %735 = vector.load %arg7[%c0_404, %c144_405] : memref<8x273xf32, #tpu.memory_space<vmem>>, vector<8x128xf32>
    %c56_406 = arith.constant 56 : index
    %c0_407 = arith.constant 0 : index
    %736 = vector.load %arg13[%c56_406, %c0_407] : memref<72x128xf32, #tpu.memory_space<vmem>>, vector<8x128xf32>
    tpu.vector_store %arg13[%c56_406, %c0_407], %735 {strides = array<i32>} : memref<72x128xf32, #tpu.memory_space<vmem>>, vector<8x128xf32>,
    %c0_408 = arith.constant 0 : index
    %c145_409 = arith.constant 145 : index
    %737 = vector.load %arg7[%c0_408, %c145_409] : memref<8x273xf32, #tpu.memory_space<vmem>>, vector<8x128xf32>
    %738 = arith.mulf %737, %108 : vector<8x128xf32>
    %c64_410 = arith.constant 64 : index
    %c0_411 = arith.constant 0 : index
    %739 = vector.load %arg13[%c64_410, %c0_411] : memref<72x128xf32, #tpu.memory_space<vmem>>, vector<8x128xf32>
    tpu.vector_store %arg13[%c64_410, %c0_411], %738 {strides = array<i32>} : memref<72x128xf32, #tpu.memory_space<vmem>>, vector<8x128xf32>,
    %c0_412 = arith.constant 0 : index
    %c0_413 = arith.constant 0 : index
    %740 = vector.load %arg13[%c0_412, %c0_413] : memref<72x128xf32, #tpu.memory_space<vmem>>, vector<72x128xf32>
    %741 = arith.truncf %740 : vector<72x128xf32> to vector<72x128xbf16>
    %cst_414 = arith.constant dense<0.000000e+00> : vector<8x128xf32>
    %742 = tpu.matmul %712, %741, %cst_414 {dimension_numbers = #tpu.dot_dimension_numbers<[1], [0], [0], [1], [0, 0, 1, 1], [], []>} : vector<8x72xbf16>, vector<72x128xbf16>, vector<8x128xf32> -> vector<8x128xf32>
    %743 = vector.broadcast %714 : vector<8x1xf32> to vector<8x128xf32>
    %744 = arith.addf %742, %743 : vector<8x128xf32>
    %cst_415 = arith.constant 0.000000e+00 : f32
    %745 = vector.broadcast %cst_415 : f32 to vector<8x128xf32>
    %746 = arith.maximumf %744, %745 : vector<8x128xf32>
    %c448_416 = arith.constant 448 : index
    %c0_417 = arith.constant 0 : index
    %747 = vector.load %arg5[%c448_416, %c0_417] : memref<656x512xbf16, #tpu.memory_space<vmem>>, vector<128x512xbf16>
    %748 = arith.truncf %746 : vector<8x128xf32> to vector<8x128xbf16>
    %cst_418 = arith.constant dense<0.000000e+00> : vector<8x512xf32>
    %749 = tpu.matmul %748, %747, %cst_418 {dimension_numbers = #tpu.dot_dimension_numbers<[1], [0], [0], [1], [0, 0, 1, 1], [], []>} : vector<8x128xbf16>, vector<128x512xbf16>, vector<8x512xf32> -> vector<8x512xf32>
    %750 = arith.addf %229, %749 : vector<8x512xf32>
    %c224 = arith.constant 224 : index
    %c0_419 = arith.constant 0 : index
    %751 = vector.load %arg5[%c224, %c0_419] : memref<656x512xbf16, #tpu.memory_space<vmem>>, vector<8x73xbf16>
    %752 = vector.extract_strided_slice %751 {offsets = [0, 0], sizes = [8, 72], strides = [1, 1]} : vector<8x73xbf16> to vector<8x72xbf16>
    %753 = vector.extract_strided_slice %751 {offsets = [0, 72], sizes = [8, 1], strides = [1, 1]} : vector<8x73xbf16> to vector<8x1xbf16>
    %754 = arith.extf %753 : vector<8x1xbf16> to vector<8x1xf32>
    %c0_420 = arith.constant 0 : index
    %c128_421 = arith.constant 128 : index
    %755 = vector.load %arg8[%c0_420, %c128_421] : memref<8x673xf32, #tpu.memory_space<vmem>>, vector<8x512xf32>
    tpu.vector_store %arg8[%c0_420, %c128_421], %750 {strides = array<i32>} : memref<8x673xf32, #tpu.memory_space<vmem>>, vector<8x512xf32>,
    %c0_422 = arith.constant 0 : index
    %c95_423 = arith.constant 95 : index
    %756 = vector.load %arg8[%c0_422, %c95_423] : memref<8x673xf32, #tpu.memory_space<vmem>>, vector<8x512xf32>
    %757 = arith.mulf %756, %171 : vector<8x512xf32>
    %c0_424 = arith.constant 0 : index
    %c0_425 = arith.constant 0 : index
    %758 = vector.load %arg14[%c0_424, %c0_425] : memref<72x512xf32, #tpu.memory_space<vmem>>, vector<8x512xf32>
    tpu.vector_store %arg14[%c0_424, %c0_425], %757 {strides = array<i32>} : memref<72x512xf32, #tpu.memory_space<vmem>>, vector<8x512xf32>,
    %c0_426 = arith.constant 0 : index
    %c96_427 = arith.constant 96 : index
    %759 = vector.load %arg8[%c0_426, %c96_427] : memref<8x673xf32, #tpu.memory_space<vmem>>, vector<8x512xf32>
    %c8_428 = arith.constant 8 : index
    %c0_429 = arith.constant 0 : index
    %760 = vector.load %arg14[%c8_428, %c0_429] : memref<72x512xf32, #tpu.memory_space<vmem>>, vector<8x512xf32>
    tpu.vector_store %arg14[%c8_428, %c0_429], %759 {strides = array<i32>} : memref<72x512xf32, #tpu.memory_space<vmem>>, vector<8x512xf32>,
    %c0_430 = arith.constant 0 : index
    %c97_431 = arith.constant 97 : index
    %761 = vector.load %arg8[%c0_430, %c97_431] : memref<8x673xf32, #tpu.memory_space<vmem>>, vector<8x512xf32>
    %762 = arith.mulf %761, %204 : vector<8x512xf32>
    %c16_432 = arith.constant 16 : index
    %c0_433 = arith.constant 0 : index
    %763 = vector.load %arg14[%c16_432, %c0_433] : memref<72x512xf32, #tpu.memory_space<vmem>>, vector<8x512xf32>
    tpu.vector_store %arg14[%c16_432, %c0_433], %762 {strides = array<i32>} : memref<72x512xf32, #tpu.memory_space<vmem>>, vector<8x512xf32>,
    %c0_434 = arith.constant 0 : index
    %c127_435 = arith.constant 127 : index
    %764 = vector.load %arg8[%c0_434, %c127_435] : memref<8x673xf32, #tpu.memory_space<vmem>>, vector<8x512xf32>
    %765 = arith.mulf %764, %171 : vector<8x512xf32>
    %c24_436 = arith.constant 24 : index
    %c0_437 = arith.constant 0 : index
    %766 = vector.load %arg14[%c24_436, %c0_437] : memref<72x512xf32, #tpu.memory_space<vmem>>, vector<8x512xf32>
    tpu.vector_store %arg14[%c24_436, %c0_437], %765 {strides = array<i32>} : memref<72x512xf32, #tpu.memory_space<vmem>>, vector<8x512xf32>,
    %c0_438 = arith.constant 0 : index
    %c128_439 = arith.constant 128 : index
    %767 = vector.load %arg8[%c0_438, %c128_439] : memref<8x673xf32, #tpu.memory_space<vmem>>, vector<8x512xf32>
    %c32_440 = arith.constant 32 : index
    %c0_441 = arith.constant 0 : index
    %768 = vector.load %arg14[%c32_440, %c0_441] : memref<72x512xf32, #tpu.memory_space<vmem>>, vector<8x512xf32>
    tpu.vector_store %arg14[%c32_440, %c0_441], %767 {strides = array<i32>} : memref<72x512xf32, #tpu.memory_space<vmem>>, vector<8x512xf32>,
    %c0_442 = arith.constant 0 : index
    %c129_443 = arith.constant 129 : index
    %769 = vector.load %arg8[%c0_442, %c129_443] : memref<8x673xf32, #tpu.memory_space<vmem>>, vector<8x512xf32>
    %770 = arith.mulf %769, %204 : vector<8x512xf32>
    %c40_444 = arith.constant 40 : index
    %c0_445 = arith.constant 0 : index
    %771 = vector.load %arg14[%c40_444, %c0_445] : memref<72x512xf32, #tpu.memory_space<vmem>>, vector<8x512xf32>
    tpu.vector_store %arg14[%c40_444, %c0_445], %770 {strides = array<i32>} : memref<72x512xf32, #tpu.memory_space<vmem>>, vector<8x512xf32>,
    %c0_446 = arith.constant 0 : index
    %c159_447 = arith.constant 159 : index
    %772 = vector.load %arg8[%c0_446, %c159_447] : memref<8x673xf32, #tpu.memory_space<vmem>>, vector<8x512xf32>
    %773 = arith.mulf %772, %171 : vector<8x512xf32>
    %c48_448 = arith.constant 48 : index
    %c0_449 = arith.constant 0 : index
    %774 = vector.load %arg14[%c48_448, %c0_449] : memref<72x512xf32, #tpu.memory_space<vmem>>, vector<8x512xf32>
    tpu.vector_store %arg14[%c48_448, %c0_449], %773 {strides = array<i32>} : memref<72x512xf32, #tpu.memory_space<vmem>>, vector<8x512xf32>,
    %c0_450 = arith.constant 0 : index
    %c160_451 = arith.constant 160 : index
    %775 = vector.load %arg8[%c0_450, %c160_451] : memref<8x673xf32, #tpu.memory_space<vmem>>, vector<8x512xf32>
    %c56_452 = arith.constant 56 : index
    %c0_453 = arith.constant 0 : index
    %776 = vector.load %arg14[%c56_452, %c0_453] : memref<72x512xf32, #tpu.memory_space<vmem>>, vector<8x512xf32>
    tpu.vector_store %arg14[%c56_452, %c0_453], %775 {strides = array<i32>} : memref<72x512xf32, #tpu.memory_space<vmem>>, vector<8x512xf32>,
    %c0_454 = arith.constant 0 : index
    %c161_455 = arith.constant 161 : index
    %777 = vector.load %arg8[%c0_454, %c161_455] : memref<8x673xf32, #tpu.memory_space<vmem>>, vector<8x512xf32>
    %778 = arith.mulf %777, %204 : vector<8x512xf32>
    %c64_456 = arith.constant 64 : index
    %c0_457 = arith.constant 0 : index
    %779 = vector.load %arg14[%c64_456, %c0_457] : memref<72x512xf32, #tpu.memory_space<vmem>>, vector<8x512xf32>
    tpu.vector_store %arg14[%c64_456, %c0_457], %778 {strides = array<i32>} : memref<72x512xf32, #tpu.memory_space<vmem>>, vector<8x512xf32>,
    %c0_458 = arith.constant 0 : index
    %c0_459 = arith.constant 0 : index
    %780 = vector.load %arg14[%c0_458, %c0_459] : memref<72x512xf32, #tpu.memory_space<vmem>>, vector<72x512xf32>
    %781 = arith.truncf %780 : vector<72x512xf32> to vector<72x512xbf16>
    %cst_460 = arith.constant dense<0.000000e+00> : vector<8x512xf32>
    %782 = tpu.matmul %752, %781, %cst_460 {dimension_numbers = #tpu.dot_dimension_numbers<[1], [0], [0], [1], [0, 0, 1, 1], [], []>} : vector<8x72xbf16>, vector<72x512xbf16>, vector<8x512xf32> -> vector<8x512xf32>
    %783 = vector.broadcast %754 : vector<8x1xf32> to vector<8x512xf32>
    %784 = arith.addf %782, %783 : vector<8x512xf32>
    %cst_461 = arith.constant 0.000000e+00 : f32
    %785 = vector.broadcast %cst_461 : f32 to vector<8x512xf32>
    %786 = arith.maximumf %784, %785 : vector<8x512xf32>
    %c240 = arith.constant 240 : index
    %c0_462 = arith.constant 0 : index
    %787 = vector.load %arg5[%c240, %c0_462] : memref<656x512xbf16, #tpu.memory_space<vmem>>, vector<16x33xbf16>
    %788 = vector.extract_strided_slice %787 {offsets = [0, 0], sizes = [16, 32], strides = [1, 1]} : vector<16x33xbf16> to vector<16x32xbf16>
    %789 = vector.extract_strided_slice %787 {offsets = [0, 32], sizes = [16, 1], strides = [1, 1]} : vector<16x33xbf16> to vector<16x1xbf16>
    %790 = arith.extf %789 : vector<16x1xbf16> to vector<16x1xf32>
    %791 = arith.truncf %700 : vector<32x32xf32> to vector<32x32xbf16>
    %cst_463 = arith.constant dense<0.000000e+00> : vector<16x32xf32>
    %792 = tpu.matmul %788, %791, %cst_463 {dimension_numbers = #tpu.dot_dimension_numbers<[1], [0], [0], [1], [0, 0, 1, 1], [], []>} : vector<16x32xbf16>, vector<32x32xbf16>, vector<16x32xf32> -> vector<16x32xf32>
    %793 = vector.broadcast %790 : vector<16x1xf32> to vector<16x32xf32>
    %794 = arith.addf %792, %793 : vector<16x32xf32>
    %cst_464 = arith.constant 0.000000e+00 : f32
    %795 = vector.broadcast %cst_464 : f32 to vector<16x32xf32>
    %796 = arith.maximumf %794, %795 : vector<16x32xf32>
    %c256_465 = arith.constant 256 : index
    %c0_466 = arith.constant 0 : index
    %797 = vector.load %arg5[%c256_465, %c0_466] : memref<656x512xbf16, #tpu.memory_space<vmem>>, vector<16x145xbf16>
    %798 = vector.extract_strided_slice %797 {offsets = [0, 0], sizes = [16, 144], strides = [1, 1]} : vector<16x145xbf16> to vector<16x144xbf16>
    %799 = vector.extract_strided_slice %797 {offsets = [0, 144], sizes = [16, 1], strides = [1, 1]} : vector<16x145xbf16> to vector<16x1xbf16>
    %800 = arith.extf %799 : vector<16x1xbf16> to vector<16x1xf32>
    %c0_467 = arith.constant 0 : index
    %c128_468 = arith.constant 128 : index
    %801 = vector.load %arg9[%c0_467, %c128_468] : memref<16x169xf32, #tpu.memory_space<vmem>>, vector<16x32xf32>
    tpu.vector_store %arg9[%c0_467, %c128_468], %796 {strides = array<i32>} : memref<16x169xf32, #tpu.memory_space<vmem>>, vector<16x32xf32>,
    %cst_469 = arith.constant 0.000000e+00 : f32
    %802 = vector.broadcast %cst_469 : f32 to vector<16x32xf32>
    %803 = vector.extract_strided_slice %798 {offsets = [0, 0], sizes = [16, 16], strides = [1, 1]} : vector<16x144xbf16> to vector<16x16xbf16>
    %c0_470 = arith.constant 0 : index
    %c119_471 = arith.constant 119 : index
    %804 = vector.load %arg9[%c0_470, %c119_471] : memref<16x169xf32, #tpu.memory_space<vmem>>, vector<16x32xf32>
    %805 = arith.mulf %804, %275 : vector<16x32xf32>
    %806 = arith.truncf %805 : vector<16x32xf32> to vector<16x32xbf16>
    %cst_472 = arith.constant dense<0.000000e+00> : vector<16x32xf32>
    %807 = tpu.matmul %803, %806, %cst_472 {dimension_numbers = #tpu.dot_dimension_numbers<[1], [0], [0], [1], [0, 0, 1, 1], [], []>} : vector<16x16xbf16>, vector<16x32xbf16>, vector<16x32xf32> -> vector<16x32xf32>
    %808 = arith.addf %802, %807 : vector<16x32xf32>
    %809 = vector.extract_strided_slice %798 {offsets = [0, 16], sizes = [16, 16], strides = [1, 1]} : vector<16x144xbf16> to vector<16x16xbf16>
    %c0_473 = arith.constant 0 : index
    %c120_474 = arith.constant 120 : index
    %810 = vector.load %arg9[%c0_473, %c120_474] : memref<16x169xf32, #tpu.memory_space<vmem>>, vector<16x32xf32>
    %811 = arith.truncf %810 : vector<16x32xf32> to vector<16x32xbf16>
    %cst_475 = arith.constant dense<0.000000e+00> : vector<16x32xf32>
    %812 = tpu.matmul %809, %811, %cst_475 {dimension_numbers = #tpu.dot_dimension_numbers<[1], [0], [0], [1], [0, 0, 1, 1], [], []>} : vector<16x16xbf16>, vector<16x32xbf16>, vector<16x32xf32> -> vector<16x32xf32>
    %813 = arith.addf %808, %812 : vector<16x32xf32>
    %814 = vector.extract_strided_slice %798 {offsets = [0, 32], sizes = [16, 16], strides = [1, 1]} : vector<16x144xbf16> to vector<16x16xbf16>
    %c0_476 = arith.constant 0 : index
    %c121_477 = arith.constant 121 : index
    %815 = vector.load %arg9[%c0_476, %c121_477] : memref<16x169xf32, #tpu.memory_space<vmem>>, vector<16x32xf32>
    %816 = arith.mulf %815, %314 : vector<16x32xf32>
    %817 = arith.truncf %816 : vector<16x32xf32> to vector<16x32xbf16>
    %cst_478 = arith.constant dense<0.000000e+00> : vector<16x32xf32>
    %818 = tpu.matmul %814, %817, %cst_478 {dimension_numbers = #tpu.dot_dimension_numbers<[1], [0], [0], [1], [0, 0, 1, 1], [], []>} : vector<16x16xbf16>, vector<16x32xbf16>, vector<16x32xf32> -> vector<16x32xf32>
    %819 = arith.addf %813, %818 : vector<16x32xf32>
    %820 = vector.extract_strided_slice %798 {offsets = [0, 48], sizes = [16, 16], strides = [1, 1]} : vector<16x144xbf16> to vector<16x16xbf16>
    %c0_479 = arith.constant 0 : index
    %c127_480 = arith.constant 127 : index
    %821 = vector.load %arg9[%c0_479, %c127_480] : memref<16x169xf32, #tpu.memory_space<vmem>>, vector<16x32xf32>
    %822 = arith.mulf %821, %275 : vector<16x32xf32>
    %823 = arith.truncf %822 : vector<16x32xf32> to vector<16x32xbf16>
    %cst_481 = arith.constant dense<0.000000e+00> : vector<16x32xf32>
    %824 = tpu.matmul %820, %823, %cst_481 {dimension_numbers = #tpu.dot_dimension_numbers<[1], [0], [0], [1], [0, 0, 1, 1], [], []>} : vector<16x16xbf16>, vector<16x32xbf16>, vector<16x32xf32> -> vector<16x32xf32>
    %825 = arith.addf %819, %824 : vector<16x32xf32>
    %826 = vector.extract_strided_slice %798 {offsets = [0, 64], sizes = [16, 16], strides = [1, 1]} : vector<16x144xbf16> to vector<16x16xbf16>
    %c0_482 = arith.constant 0 : index
    %c128_483 = arith.constant 128 : index
    %827 = vector.load %arg9[%c0_482, %c128_483] : memref<16x169xf32, #tpu.memory_space<vmem>>, vector<16x32xf32>
    %828 = arith.truncf %827 : vector<16x32xf32> to vector<16x32xbf16>
    %cst_484 = arith.constant dense<0.000000e+00> : vector<16x32xf32>
    %829 = tpu.matmul %826, %828, %cst_484 {dimension_numbers = #tpu.dot_dimension_numbers<[1], [0], [0], [1], [0, 0, 1, 1], [], []>} : vector<16x16xbf16>, vector<16x32xbf16>, vector<16x32xf32> -> vector<16x32xf32>
    %830 = arith.addf %825, %829 : vector<16x32xf32>
    %831 = vector.extract_strided_slice %798 {offsets = [0, 80], sizes = [16, 16], strides = [1, 1]} : vector<16x144xbf16> to vector<16x16xbf16>
    %c0_485 = arith.constant 0 : index
    %c129_486 = arith.constant 129 : index
    %832 = vector.load %arg9[%c0_485, %c129_486] : memref<16x169xf32, #tpu.memory_space<vmem>>, vector<16x32xf32>
    %833 = arith.mulf %832, %314 : vector<16x32xf32>
    %834 = arith.truncf %833 : vector<16x32xf32> to vector<16x32xbf16>
    %cst_487 = arith.constant dense<0.000000e+00> : vector<16x32xf32>
    %835 = tpu.matmul %831, %834, %cst_487 {dimension_numbers = #tpu.dot_dimension_numbers<[1], [0], [0], [1], [0, 0, 1, 1], [], []>} : vector<16x16xbf16>, vector<16x32xbf16>, vector<16x32xf32> -> vector<16x32xf32>
    %836 = arith.addf %830, %835 : vector<16x32xf32>
    %837 = vector.extract_strided_slice %798 {offsets = [0, 96], sizes = [16, 16], strides = [1, 1]} : vector<16x144xbf16> to vector<16x16xbf16>
    %c0_488 = arith.constant 0 : index
    %c135_489 = arith.constant 135 : index
    %838 = vector.load %arg9[%c0_488, %c135_489] : memref<16x169xf32, #tpu.memory_space<vmem>>, vector<16x32xf32>
    %839 = arith.mulf %838, %275 : vector<16x32xf32>
    %840 = arith.truncf %839 : vector<16x32xf32> to vector<16x32xbf16>
    %cst_490 = arith.constant dense<0.000000e+00> : vector<16x32xf32>
    %841 = tpu.matmul %837, %840, %cst_490 {dimension_numbers = #tpu.dot_dimension_numbers<[1], [0], [0], [1], [0, 0, 1, 1], [], []>} : vector<16x16xbf16>, vector<16x32xbf16>, vector<16x32xf32> -> vector<16x32xf32>
    %842 = arith.addf %836, %841 : vector<16x32xf32>
    %843 = vector.extract_strided_slice %798 {offsets = [0, 112], sizes = [16, 16], strides = [1, 1]} : vector<16x144xbf16> to vector<16x16xbf16>
    %c0_491 = arith.constant 0 : index
    %c136_492 = arith.constant 136 : index
    %844 = vector.load %arg9[%c0_491, %c136_492] : memref<16x169xf32, #tpu.memory_space<vmem>>, vector<16x32xf32>
    %845 = arith.truncf %844 : vector<16x32xf32> to vector<16x32xbf16>
    %cst_493 = arith.constant dense<0.000000e+00> : vector<16x32xf32>
    %846 = tpu.matmul %843, %845, %cst_493 {dimension_numbers = #tpu.dot_dimension_numbers<[1], [0], [0], [1], [0, 0, 1, 1], [], []>} : vector<16x16xbf16>, vector<16x32xbf16>, vector<16x32xf32> -> vector<16x32xf32>
    %847 = arith.addf %842, %846 : vector<16x32xf32>
    %848 = vector.extract_strided_slice %798 {offsets = [0, 128], sizes = [16, 16], strides = [1, 1]} : vector<16x144xbf16> to vector<16x16xbf16>
    %c0_494 = arith.constant 0 : index
    %c137_495 = arith.constant 137 : index
    %849 = vector.load %arg9[%c0_494, %c137_495] : memref<16x169xf32, #tpu.memory_space<vmem>>, vector<16x32xf32>
    %850 = arith.mulf %849, %314 : vector<16x32xf32>
    %851 = arith.truncf %850 : vector<16x32xf32> to vector<16x32xbf16>
    %cst_496 = arith.constant dense<0.000000e+00> : vector<16x32xf32>
    %852 = tpu.matmul %848, %851, %cst_496 {dimension_numbers = #tpu.dot_dimension_numbers<[1], [0], [0], [1], [0, 0, 1, 1], [], []>} : vector<16x16xbf16>, vector<16x32xbf16>, vector<16x32xf32> -> vector<16x32xf32>
    %853 = arith.addf %847, %852 : vector<16x32xf32>
    %854 = vector.broadcast %800 : vector<16x1xf32> to vector<16x32xf32>
    %855 = arith.addf %853, %854 : vector<16x32xf32>
    %cst_497 = arith.constant 0.000000e+00 : f32
    %856 = vector.broadcast %cst_497 : f32 to vector<16x32xf32>
    %857 = arith.maximumf %855, %856 : vector<16x32xf32>
    %c576_498 = arith.constant 576 : index
    %c0_499 = arith.constant 0 : index
    %858 = vector.load %arg5[%c576_498, %c0_499] : memref<656x512xbf16, #tpu.memory_space<vmem>>, vector<32x128xbf16>
    %859 = arith.truncf %857 : vector<16x32xf32> to vector<16x32xbf16>
    %cst_500 = arith.constant dense<0.000000e+00> : vector<16x128xf32>
    %860 = tpu.matmul %859, %858, %cst_500 {dimension_numbers = #tpu.dot_dimension_numbers<[1], [0], [0], [1], [0, 0, 1, 1], [], []>} : vector<16x32xbf16>, vector<32x128xbf16>, vector<16x128xf32> -> vector<16x128xf32>
    %861 = arith.addf %452, %860 : vector<16x128xf32>
    %c272 = arith.constant 272 : index
    %c0_501 = arith.constant 0 : index
    %862 = vector.load %arg5[%c272, %c0_501] : memref<656x512xbf16, #tpu.memory_space<vmem>>, vector<16x145xbf16>
    %863 = vector.extract_strided_slice %862 {offsets = [0, 0], sizes = [16, 144], strides = [1, 1]} : vector<16x145xbf16> to vector<16x144xbf16>
    %864 = vector.extract_strided_slice %862 {offsets = [0, 144], sizes = [16, 1], strides = [1, 1]} : vector<16x145xbf16> to vector<16x1xbf16>
    %865 = arith.extf %864 : vector<16x1xbf16> to vector<16x1xf32>
    %c0_502 = arith.constant 0 : index
    %c128_503 = arith.constant 128 : index
    %866 = vector.load %arg10[%c0_502, %c128_503] : memref<16x273xf32, #tpu.memory_space<vmem>>, vector<16x128xf32>
    tpu.vector_store %arg10[%c0_502, %c128_503], %861 {strides = array<i32>} : memref<16x273xf32, #tpu.memory_space<vmem>>, vector<16x128xf32>,
    %c0_504 = arith.constant 0 : index
    %c111_505 = arith.constant 111 : index
    %867 = vector.load %arg10[%c0_504, %c111_505] : memref<16x273xf32, #tpu.memory_space<vmem>>, vector<16x128xf32>
    %868 = arith.mulf %867, %394 : vector<16x128xf32>
    %c0_506 = arith.constant 0 : index
    %c0_507 = arith.constant 0 : index
    %869 = vector.load %arg15[%c0_506, %c0_507] : memref<144x128xf32, #tpu.memory_space<vmem>>, vector<16x128xf32>
    tpu.vector_store %arg15[%c0_506, %c0_507], %868 {strides = array<i32>} : memref<144x128xf32, #tpu.memory_space<vmem>>, vector<16x128xf32>,
    %c0_508 = arith.constant 0 : index
    %c112_509 = arith.constant 112 : index
    %870 = vector.load %arg10[%c0_508, %c112_509] : memref<16x273xf32, #tpu.memory_space<vmem>>, vector<16x128xf32>
    %c16_510 = arith.constant 16 : index
    %c0_511 = arith.constant 0 : index
    %871 = vector.load %arg15[%c16_510, %c0_511] : memref<144x128xf32, #tpu.memory_space<vmem>>, vector<16x128xf32>
    tpu.vector_store %arg15[%c16_510, %c0_511], %870 {strides = array<i32>} : memref<144x128xf32, #tpu.memory_space<vmem>>, vector<16x128xf32>,
    %c0_512 = arith.constant 0 : index
    %c113_513 = arith.constant 113 : index
    %872 = vector.load %arg10[%c0_512, %c113_513] : memref<16x273xf32, #tpu.memory_space<vmem>>, vector<16x128xf32>
    %873 = arith.mulf %872, %427 : vector<16x128xf32>
    %c32_514 = arith.constant 32 : index
    %c0_515 = arith.constant 0 : index
    %874 = vector.load %arg15[%c32_514, %c0_515] : memref<144x128xf32, #tpu.memory_space<vmem>>, vector<16x128xf32>
    tpu.vector_store %arg15[%c32_514, %c0_515], %873 {strides = array<i32>} : memref<144x128xf32, #tpu.memory_space<vmem>>, vector<16x128xf32>,
    %c0_516 = arith.constant 0 : index
    %c127_517 = arith.constant 127 : index
    %875 = vector.load %arg10[%c0_516, %c127_517] : memref<16x273xf32, #tpu.memory_space<vmem>>, vector<16x128xf32>
    %876 = arith.mulf %875, %394 : vector<16x128xf32>
    %c48_518 = arith.constant 48 : index
    %c0_519 = arith.constant 0 : index
    %877 = vector.load %arg15[%c48_518, %c0_519] : memref<144x128xf32, #tpu.memory_space<vmem>>, vector<16x128xf32>
    tpu.vector_store %arg15[%c48_518, %c0_519], %876 {strides = array<i32>} : memref<144x128xf32, #tpu.memory_space<vmem>>, vector<16x128xf32>,
    %c0_520 = arith.constant 0 : index
    %c128_521 = arith.constant 128 : index
    %878 = vector.load %arg10[%c0_520, %c128_521] : memref<16x273xf32, #tpu.memory_space<vmem>>, vector<16x128xf32>
    %c64_522 = arith.constant 64 : index
    %c0_523 = arith.constant 0 : index
    %879 = vector.load %arg15[%c64_522, %c0_523] : memref<144x128xf32, #tpu.memory_space<vmem>>, vector<16x128xf32>
    tpu.vector_store %arg15[%c64_522, %c0_523], %878 {strides = array<i32>} : memref<144x128xf32, #tpu.memory_space<vmem>>, vector<16x128xf32>,
    %c0_524 = arith.constant 0 : index
    %c129_525 = arith.constant 129 : index
    %880 = vector.load %arg10[%c0_524, %c129_525] : memref<16x273xf32, #tpu.memory_space<vmem>>, vector<16x128xf32>
    %881 = arith.mulf %880, %427 : vector<16x128xf32>
    %c80_526 = arith.constant 80 : index
    %c0_527 = arith.constant 0 : index
    %882 = vector.load %arg15[%c80_526, %c0_527] : memref<144x128xf32, #tpu.memory_space<vmem>>, vector<16x128xf32>
    tpu.vector_store %arg15[%c80_526, %c0_527], %881 {strides = array<i32>} : memref<144x128xf32, #tpu.memory_space<vmem>>, vector<16x128xf32>,
    %c0_528 = arith.constant 0 : index
    %c143_529 = arith.constant 143 : index
    %883 = vector.load %arg10[%c0_528, %c143_529] : memref<16x273xf32, #tpu.memory_space<vmem>>, vector<16x128xf32>
    %884 = arith.mulf %883, %394 : vector<16x128xf32>
    %c96_530 = arith.constant 96 : index
    %c0_531 = arith.constant 0 : index
    %885 = vector.load %arg15[%c96_530, %c0_531] : memref<144x128xf32, #tpu.memory_space<vmem>>, vector<16x128xf32>
    tpu.vector_store %arg15[%c96_530, %c0_531], %884 {strides = array<i32>} : memref<144x128xf32, #tpu.memory_space<vmem>>, vector<16x128xf32>,
    %c0_532 = arith.constant 0 : index
    %c144_533 = arith.constant 144 : index
    %886 = vector.load %arg10[%c0_532, %c144_533] : memref<16x273xf32, #tpu.memory_space<vmem>>, vector<16x128xf32>
    %c112_534 = arith.constant 112 : index
    %c0_535 = arith.constant 0 : index
    %887 = vector.load %arg15[%c112_534, %c0_535] : memref<144x128xf32, #tpu.memory_space<vmem>>, vector<16x128xf32>
    tpu.vector_store %arg15[%c112_534, %c0_535], %886 {strides = array<i32>} : memref<144x128xf32, #tpu.memory_space<vmem>>, vector<16x128xf32>,
    %c0_536 = arith.constant 0 : index
    %c145_537 = arith.constant 145 : index
    %888 = vector.load %arg10[%c0_536, %c145_537] : memref<16x273xf32, #tpu.memory_space<vmem>>, vector<16x128xf32>
    %889 = arith.mulf %888, %427 : vector<16x128xf32>
    %c128_538 = arith.constant 128 : index
    %c0_539 = arith.constant 0 : index
    %890 = vector.load %arg15[%c128_538, %c0_539] : memref<144x128xf32, #tpu.memory_space<vmem>>, vector<16x128xf32>
    tpu.vector_store %arg15[%c128_538, %c0_539], %889 {strides = array<i32>} : memref<144x128xf32, #tpu.memory_space<vmem>>, vector<16x128xf32>,
    %c0_540 = arith.constant 0 : index
    %c0_541 = arith.constant 0 : index
    %891 = vector.load %arg15[%c0_540, %c0_541] : memref<144x128xf32, #tpu.memory_space<vmem>>, vector<144x128xf32>
    %892 = arith.truncf %891 : vector<144x128xf32> to vector<144x128xbf16>
    %cst_542 = arith.constant dense<0.000000e+00> : vector<16x128xf32>
    %893 = tpu.matmul %863, %892, %cst_542 {dimension_numbers = #tpu.dot_dimension_numbers<[1], [0], [0], [1], [0, 0, 1, 1], [], []>} : vector<16x144xbf16>, vector<144x128xbf16>, vector<16x128xf32> -> vector<16x128xf32>
    %894 = vector.broadcast %865 : vector<16x1xf32> to vector<16x128xf32>
    %895 = arith.addf %893, %894 : vector<16x128xf32>
    %cst_543 = arith.constant 0.000000e+00 : f32
    %896 = vector.broadcast %cst_543 : f32 to vector<16x128xf32>
    %897 = arith.maximumf %895, %896 : vector<16x128xf32>
    %c288 = arith.constant 288 : index
    %c0_544 = arith.constant 0 : index
    %898 = vector.load %arg5[%c288, %c0_544] : memref<656x512xbf16, #tpu.memory_space<vmem>>, vector<8x17xbf16>
    %899 = vector.extract_strided_slice %898 {offsets = [0, 0], sizes = [8, 16], strides = [1, 1]} : vector<8x17xbf16> to vector<8x16xbf16>
    %900 = vector.extract_strided_slice %898 {offsets = [0, 16], sizes = [8, 1], strides = [1, 1]} : vector<8x17xbf16> to vector<8x1xbf16>
    %901 = arith.extf %900 : vector<8x1xbf16> to vector<8x1xf32>
    %902 = arith.truncf %897 : vector<16x128xf32> to vector<16x128xbf16>
    %cst_545 = arith.constant dense<0.000000e+00> : vector<8x128xf32>
    %903 = tpu.matmul %899, %902, %cst_545 {dimension_numbers = #tpu.dot_dimension_numbers<[1], [0], [0], [1], [0, 0, 1, 1], [], []>} : vector<8x16xbf16>, vector<16x128xbf16>, vector<8x128xf32> -> vector<8x128xf32>
    %904 = vector.broadcast %901 : vector<8x1xf32> to vector<8x128xf32>
    %905 = arith.addf %903, %904 : vector<8x128xf32>
    %cst_546 = arith.constant 0.000000e+00 : f32
    %906 = vector.broadcast %cst_546 : f32 to vector<8x128xf32>
    %907 = arith.maximumf %905, %906 : vector<8x128xf32>
    %c304 = arith.constant 304 : index
    %c0_547 = arith.constant 0 : index
    %908 = vector.load %arg5[%c304, %c0_547] : memref<656x512xbf16, #tpu.memory_space<vmem>>, vector<8x73xbf16>
    %909 = vector.extract_strided_slice %908 {offsets = [0, 0], sizes = [8, 72], strides = [1, 1]} : vector<8x73xbf16> to vector<8x72xbf16>
    %910 = vector.extract_strided_slice %908 {offsets = [0, 72], sizes = [8, 1], strides = [1, 1]} : vector<8x73xbf16> to vector<8x1xbf16>
    %911 = arith.extf %910 : vector<8x1xbf16> to vector<8x1xf32>
    %c0_548 = arith.constant 0 : index
    %c128_549 = arith.constant 128 : index
    %912 = vector.load %arg7[%c0_548, %c128_549] : memref<8x273xf32, #tpu.memory_space<vmem>>, vector<8x128xf32>
    tpu.vector_store %arg7[%c0_548, %c128_549], %907 {strides = array<i32>} : memref<8x273xf32, #tpu.memory_space<vmem>>, vector<8x128xf32>,
    %c0_550 = arith.constant 0 : index
    %c111_551 = arith.constant 111 : index
    %913 = vector.load %arg7[%c0_550, %c111_551] : memref<8x273xf32, #tpu.memory_space<vmem>>, vector<8x128xf32>
    %914 = arith.mulf %913, %75 : vector<8x128xf32>
    %c0_552 = arith.constant 0 : index
    %c0_553 = arith.constant 0 : index
    %915 = vector.load %arg13[%c0_552, %c0_553] : memref<72x128xf32, #tpu.memory_space<vmem>>, vector<8x128xf32>
    tpu.vector_store %arg13[%c0_552, %c0_553], %914 {strides = array<i32>} : memref<72x128xf32, #tpu.memory_space<vmem>>, vector<8x128xf32>,
    %c0_554 = arith.constant 0 : index
    %c112_555 = arith.constant 112 : index
    %916 = vector.load %arg7[%c0_554, %c112_555] : memref<8x273xf32, #tpu.memory_space<vmem>>, vector<8x128xf32>
    %c8_556 = arith.constant 8 : index
    %c0_557 = arith.constant 0 : index
    %917 = vector.load %arg13[%c8_556, %c0_557] : memref<72x128xf32, #tpu.memory_space<vmem>>, vector<8x128xf32>
    tpu.vector_store %arg13[%c8_556, %c0_557], %916 {strides = array<i32>} : memref<72x128xf32, #tpu.memory_space<vmem>>, vector<8x128xf32>,
    %c0_558 = arith.constant 0 : index
    %c113_559 = arith.constant 113 : index
    %918 = vector.load %arg7[%c0_558, %c113_559] : memref<8x273xf32, #tpu.memory_space<vmem>>, vector<8x128xf32>
    %919 = arith.mulf %918, %108 : vector<8x128xf32>
    %c16_560 = arith.constant 16 : index
    %c0_561 = arith.constant 0 : index
    %920 = vector.load %arg13[%c16_560, %c0_561] : memref<72x128xf32, #tpu.memory_space<vmem>>, vector<8x128xf32>
    tpu.vector_store %arg13[%c16_560, %c0_561], %919 {strides = array<i32>} : memref<72x128xf32, #tpu.memory_space<vmem>>, vector<8x128xf32>,
    %c0_562 = arith.constant 0 : index
    %c127_563 = arith.constant 127 : index
    %921 = vector.load %arg7[%c0_562, %c127_563] : memref<8x273xf32, #tpu.memory_space<vmem>>, vector<8x128xf32>
    %922 = arith.mulf %921, %75 : vector<8x128xf32>
    %c24_564 = arith.constant 24 : index
    %c0_565 = arith.constant 0 : index
    %923 = vector.load %arg13[%c24_564, %c0_565] : memref<72x128xf32, #tpu.memory_space<vmem>>, vector<8x128xf32>
    tpu.vector_store %arg13[%c24_564, %c0_565], %922 {strides = array<i32>} : memref<72x128xf32, #tpu.memory_space<vmem>>, vector<8x128xf32>,
    %c0_566 = arith.constant 0 : index
    %c128_567 = arith.constant 128 : index
    %924 = vector.load %arg7[%c0_566, %c128_567] : memref<8x273xf32, #tpu.memory_space<vmem>>, vector<8x128xf32>
    %c32_568 = arith.constant 32 : index
    %c0_569 = arith.constant 0 : index
    %925 = vector.load %arg13[%c32_568, %c0_569] : memref<72x128xf32, #tpu.memory_space<vmem>>, vector<8x128xf32>
    tpu.vector_store %arg13[%c32_568, %c0_569], %924 {strides = array<i32>} : memref<72x128xf32, #tpu.memory_space<vmem>>, vector<8x128xf32>,
    %c0_570 = arith.constant 0 : index
    %c129_571 = arith.constant 129 : index
    %926 = vector.load %arg7[%c0_570, %c129_571] : memref<8x273xf32, #tpu.memory_space<vmem>>, vector<8x128xf32>
    %927 = arith.mulf %926, %108 : vector<8x128xf32>
    %c40_572 = arith.constant 40 : index
    %c0_573 = arith.constant 0 : index
    %928 = vector.load %arg13[%c40_572, %c0_573] : memref<72x128xf32, #tpu.memory_space<vmem>>, vector<8x128xf32>
    tpu.vector_store %arg13[%c40_572, %c0_573], %927 {strides = array<i32>} : memref<72x128xf32, #tpu.memory_space<vmem>>, vector<8x128xf32>,
    %c0_574 = arith.constant 0 : index
    %c143_575 = arith.constant 143 : index
    %929 = vector.load %arg7[%c0_574, %c143_575] : memref<8x273xf32, #tpu.memory_space<vmem>>, vector<8x128xf32>
    %930 = arith.mulf %929, %75 : vector<8x128xf32>
    %c48_576 = arith.constant 48 : index
    %c0_577 = arith.constant 0 : index
    %931 = vector.load %arg13[%c48_576, %c0_577] : memref<72x128xf32, #tpu.memory_space<vmem>>, vector<8x128xf32>
    tpu.vector_store %arg13[%c48_576, %c0_577], %930 {strides = array<i32>} : memref<72x128xf32, #tpu.memory_space<vmem>>, vector<8x128xf32>,
    %c0_578 = arith.constant 0 : index
    %c144_579 = arith.constant 144 : index
    %932 = vector.load %arg7[%c0_578, %c144_579] : memref<8x273xf32, #tpu.memory_space<vmem>>, vector<8x128xf32>
    %c56_580 = arith.constant 56 : index
    %c0_581 = arith.constant 0 : index
    %933 = vector.load %arg13[%c56_580, %c0_581] : memref<72x128xf32, #tpu.memory_space<vmem>>, vector<8x128xf32>
    tpu.vector_store %arg13[%c56_580, %c0_581], %932 {strides = array<i32>} : memref<72x128xf32, #tpu.memory_space<vmem>>, vector<8x128xf32>,
    %c0_582 = arith.constant 0 : index
    %c145_583 = arith.constant 145 : index
    %934 = vector.load %arg7[%c0_582, %c145_583] : memref<8x273xf32, #tpu.memory_space<vmem>>, vector<8x128xf32>
    %935 = arith.mulf %934, %108 : vector<8x128xf32>
    %c64_584 = arith.constant 64 : index
    %c0_585 = arith.constant 0 : index
    %936 = vector.load %arg13[%c64_584, %c0_585] : memref<72x128xf32, #tpu.memory_space<vmem>>, vector<8x128xf32>
    tpu.vector_store %arg13[%c64_584, %c0_585], %935 {strides = array<i32>} : memref<72x128xf32, #tpu.memory_space<vmem>>, vector<8x128xf32>,
    %c0_586 = arith.constant 0 : index
    %c0_587 = arith.constant 0 : index
    %937 = vector.load %arg13[%c0_586, %c0_587] : memref<72x128xf32, #tpu.memory_space<vmem>>, vector<72x128xf32>
    %938 = arith.truncf %937 : vector<72x128xf32> to vector<72x128xbf16>
    %cst_588 = arith.constant dense<0.000000e+00> : vector<8x128xf32>
    %939 = tpu.matmul %909, %938, %cst_588 {dimension_numbers = #tpu.dot_dimension_numbers<[1], [0], [0], [1], [0, 0, 1, 1], [], []>} : vector<8x72xbf16>, vector<72x128xbf16>, vector<8x128xf32> -> vector<8x128xf32>
    %940 = vector.broadcast %911 : vector<8x1xf32> to vector<8x128xf32>
    %941 = arith.addf %939, %940 : vector<8x128xf32>
    %cst_589 = arith.constant 0.000000e+00 : f32
    %942 = vector.broadcast %cst_589 : f32 to vector<8x128xf32>
    %943 = arith.maximumf %941, %942 : vector<8x128xf32>
    %c320 = arith.constant 320 : index
    %c0_590 = arith.constant 0 : index
    %944 = vector.load %arg5[%c320, %c0_590] : memref<656x512xbf16, #tpu.memory_space<vmem>>, vector<8x73xbf16>
    %945 = vector.extract_strided_slice %944 {offsets = [0, 0], sizes = [8, 72], strides = [1, 1]} : vector<8x73xbf16> to vector<8x72xbf16>
    %946 = vector.extract_strided_slice %944 {offsets = [0, 72], sizes = [8, 1], strides = [1, 1]} : vector<8x73xbf16> to vector<8x1xbf16>
    %947 = arith.extf %946 : vector<8x1xbf16> to vector<8x1xf32>
    %c0_591 = arith.constant 0 : index
    %c128_592 = arith.constant 128 : index
    %948 = vector.load %arg7[%c0_591, %c128_592] : memref<8x273xf32, #tpu.memory_space<vmem>>, vector<8x128xf32>
    tpu.vector_store %arg7[%c0_591, %c128_592], %943 {strides = array<i32>} : memref<8x273xf32, #tpu.memory_space<vmem>>, vector<8x128xf32>,
    %c0_593 = arith.constant 0 : index
    %c111_594 = arith.constant 111 : index
    %949 = vector.load %arg7[%c0_593, %c111_594] : memref<8x273xf32, #tpu.memory_space<vmem>>, vector<8x128xf32>
    %950 = arith.mulf %949, %75 : vector<8x128xf32>
    %c0_595 = arith.constant 0 : index
    %c0_596 = arith.constant 0 : index
    %951 = vector.load %arg13[%c0_595, %c0_596] : memref<72x128xf32, #tpu.memory_space<vmem>>, vector<8x128xf32>
    tpu.vector_store %arg13[%c0_595, %c0_596], %950 {strides = array<i32>} : memref<72x128xf32, #tpu.memory_space<vmem>>, vector<8x128xf32>,
    %c0_597 = arith.constant 0 : index
    %c112_598 = arith.constant 112 : index
    %952 = vector.load %arg7[%c0_597, %c112_598] : memref<8x273xf32, #tpu.memory_space<vmem>>, vector<8x128xf32>
    %c8_599 = arith.constant 8 : index
    %c0_600 = arith.constant 0 : index
    %953 = vector.load %arg13[%c8_599, %c0_600] : memref<72x128xf32, #tpu.memory_space<vmem>>, vector<8x128xf32>
    tpu.vector_store %arg13[%c8_599, %c0_600], %952 {strides = array<i32>} : memref<72x128xf32, #tpu.memory_space<vmem>>, vector<8x128xf32>,
    %c0_601 = arith.constant 0 : index
    %c113_602 = arith.constant 113 : index
    %954 = vector.load %arg7[%c0_601, %c113_602] : memref<8x273xf32, #tpu.memory_space<vmem>>, vector<8x128xf32>
    %955 = arith.mulf %954, %108 : vector<8x128xf32>
    %c16_603 = arith.constant 16 : index
    %c0_604 = arith.constant 0 : index
    %956 = vector.load %arg13[%c16_603, %c0_604] : memref<72x128xf32, #tpu.memory_space<vmem>>, vector<8x128xf32>
    tpu.vector_store %arg13[%c16_603, %c0_604], %955 {strides = array<i32>} : memref<72x128xf32, #tpu.memory_space<vmem>>, vector<8x128xf32>,
    %c0_605 = arith.constant 0 : index
    %c127_606 = arith.constant 127 : index
    %957 = vector.load %arg7[%c0_605, %c127_606] : memref<8x273xf32, #tpu.memory_space<vmem>>, vector<8x128xf32>
    %958 = arith.mulf %957, %75 : vector<8x128xf32>
    %c24_607 = arith.constant 24 : index
    %c0_608 = arith.constant 0 : index
    %959 = vector.load %arg13[%c24_607, %c0_608] : memref<72x128xf32, #tpu.memory_space<vmem>>, vector<8x128xf32>
    tpu.vector_store %arg13[%c24_607, %c0_608], %958 {strides = array<i32>} : memref<72x128xf32, #tpu.memory_space<vmem>>, vector<8x128xf32>,
    %c0_609 = arith.constant 0 : index
    %c128_610 = arith.constant 128 : index
    %960 = vector.load %arg7[%c0_609, %c128_610] : memref<8x273xf32, #tpu.memory_space<vmem>>, vector<8x128xf32>
    %c32_611 = arith.constant 32 : index
    %c0_612 = arith.constant 0 : index
    %961 = vector.load %arg13[%c32_611, %c0_612] : memref<72x128xf32, #tpu.memory_space<vmem>>, vector<8x128xf32>
    tpu.vector_store %arg13[%c32_611, %c0_612], %960 {strides = array<i32>} : memref<72x128xf32, #tpu.memory_space<vmem>>, vector<8x128xf32>,
    %c0_613 = arith.constant 0 : index
    %c129_614 = arith.constant 129 : index
    %962 = vector.load %arg7[%c0_613, %c129_614] : memref<8x273xf32, #tpu.memory_space<vmem>>, vector<8x128xf32>
    %963 = arith.mulf %962, %108 : vector<8x128xf32>
    %c40_615 = arith.constant 40 : index
    %c0_616 = arith.constant 0 : index
    %964 = vector.load %arg13[%c40_615, %c0_616] : memref<72x128xf32, #tpu.memory_space<vmem>>, vector<8x128xf32>
    tpu.vector_store %arg13[%c40_615, %c0_616], %963 {strides = array<i32>} : memref<72x128xf32, #tpu.memory_space<vmem>>, vector<8x128xf32>,
    %c0_617 = arith.constant 0 : index
    %c143_618 = arith.constant 143 : index
    %965 = vector.load %arg7[%c0_617, %c143_618] : memref<8x273xf32, #tpu.memory_space<vmem>>, vector<8x128xf32>
    %966 = arith.mulf %965, %75 : vector<8x128xf32>
    %c48_619 = arith.constant 48 : index
    %c0_620 = arith.constant 0 : index
    %967 = vector.load %arg13[%c48_619, %c0_620] : memref<72x128xf32, #tpu.memory_space<vmem>>, vector<8x128xf32>
    tpu.vector_store %arg13[%c48_619, %c0_620], %966 {strides = array<i32>} : memref<72x128xf32, #tpu.memory_space<vmem>>, vector<8x128xf32>,
    %c0_621 = arith.constant 0 : index
    %c144_622 = arith.constant 144 : index
    %968 = vector.load %arg7[%c0_621, %c144_622] : memref<8x273xf32, #tpu.memory_space<vmem>>, vector<8x128xf32>
    %c56_623 = arith.constant 56 : index
    %c0_624 = arith.constant 0 : index
    %969 = vector.load %arg13[%c56_623, %c0_624] : memref<72x128xf32, #tpu.memory_space<vmem>>, vector<8x128xf32>
    tpu.vector_store %arg13[%c56_623, %c0_624], %968 {strides = array<i32>} : memref<72x128xf32, #tpu.memory_space<vmem>>, vector<8x128xf32>,
    %c0_625 = arith.constant 0 : index
    %c145_626 = arith.constant 145 : index
    %970 = vector.load %arg7[%c0_625, %c145_626] : memref<8x273xf32, #tpu.memory_space<vmem>>, vector<8x128xf32>
    %971 = arith.mulf %970, %108 : vector<8x128xf32>
    %c64_627 = arith.constant 64 : index
    %c0_628 = arith.constant 0 : index
    %972 = vector.load %arg13[%c64_627, %c0_628] : memref<72x128xf32, #tpu.memory_space<vmem>>, vector<8x128xf32>
    tpu.vector_store %arg13[%c64_627, %c0_628], %971 {strides = array<i32>} : memref<72x128xf32, #tpu.memory_space<vmem>>, vector<8x128xf32>,
    %c0_629 = arith.constant 0 : index
    %c0_630 = arith.constant 0 : index
    %973 = vector.load %arg13[%c0_629, %c0_630] : memref<72x128xf32, #tpu.memory_space<vmem>>, vector<72x128xf32>
    %974 = arith.truncf %973 : vector<72x128xf32> to vector<72x128xbf16>
    %cst_631 = arith.constant dense<0.000000e+00> : vector<8x128xf32>
    %975 = tpu.matmul %945, %974, %cst_631 {dimension_numbers = #tpu.dot_dimension_numbers<[1], [0], [0], [1], [0, 0, 1, 1], [], []>} : vector<8x72xbf16>, vector<72x128xbf16>, vector<8x128xf32> -> vector<8x128xf32>
    %976 = vector.broadcast %947 : vector<8x1xf32> to vector<8x128xf32>
    %977 = arith.addf %975, %976 : vector<8x128xf32>
    %cst_632 = arith.constant 0.000000e+00 : f32
    %978 = vector.broadcast %cst_632 : f32 to vector<8x128xf32>
    %979 = arith.maximumf %977, %978 : vector<8x128xf32>
    %980 = arith.addf %907, %979 : vector<8x128xf32>
    %c448_633 = arith.constant 448 : index
    %c0_634 = arith.constant 0 : index
    %981 = vector.load %arg5[%c448_633, %c0_634] : memref<656x512xbf16, #tpu.memory_space<vmem>>, vector<128x512xbf16>
    %982 = arith.truncf %980 : vector<8x128xf32> to vector<8x128xbf16>
    %cst_635 = arith.constant dense<0.000000e+00> : vector<8x512xf32>
    %983 = tpu.matmul %982, %981, %cst_635 {dimension_numbers = #tpu.dot_dimension_numbers<[1], [0], [0], [1], [0, 0, 1, 1], [], []>} : vector<8x128xbf16>, vector<128x512xbf16>, vector<8x512xf32> -> vector<8x512xf32>
    %984 = arith.addf %786, %983 : vector<8x512xf32>
    %c336 = arith.constant 336 : index
    %c0_636 = arith.constant 0 : index
    %985 = vector.load %arg5[%c336, %c0_636] : memref<656x512xbf16, #tpu.memory_space<vmem>>, vector<8x73xbf16>
    %986 = vector.extract_strided_slice %985 {offsets = [0, 0], sizes = [8, 72], strides = [1, 1]} : vector<8x73xbf16> to vector<8x72xbf16>
    %987 = vector.extract_strided_slice %985 {offsets = [0, 72], sizes = [8, 1], strides = [1, 1]} : vector<8x73xbf16> to vector<8x1xbf16>
    %988 = arith.extf %987 : vector<8x1xbf16> to vector<8x1xf32>
    %c0_637 = arith.constant 0 : index
    %c128_638 = arith.constant 128 : index
    %989 = vector.load %arg8[%c0_637, %c128_638] : memref<8x673xf32, #tpu.memory_space<vmem>>, vector<8x512xf32>
    tpu.vector_store %arg8[%c0_637, %c128_638], %984 {strides = array<i32>} : memref<8x673xf32, #tpu.memory_space<vmem>>, vector<8x512xf32>,
    %c0_639 = arith.constant 0 : index
    %c95_640 = arith.constant 95 : index
    %990 = vector.load %arg8[%c0_639, %c95_640] : memref<8x673xf32, #tpu.memory_space<vmem>>, vector<8x512xf32>
    %991 = arith.mulf %990, %171 : vector<8x512xf32>
    %c0_641 = arith.constant 0 : index
    %c0_642 = arith.constant 0 : index
    %992 = vector.load %arg14[%c0_641, %c0_642] : memref<72x512xf32, #tpu.memory_space<vmem>>, vector<8x512xf32>
    tpu.vector_store %arg14[%c0_641, %c0_642], %991 {strides = array<i32>} : memref<72x512xf32, #tpu.memory_space<vmem>>, vector<8x512xf32>,
    %c0_643 = arith.constant 0 : index
    %c96_644 = arith.constant 96 : index
    %993 = vector.load %arg8[%c0_643, %c96_644] : memref<8x673xf32, #tpu.memory_space<vmem>>, vector<8x512xf32>
    %c8_645 = arith.constant 8 : index
    %c0_646 = arith.constant 0 : index
    %994 = vector.load %arg14[%c8_645, %c0_646] : memref<72x512xf32, #tpu.memory_space<vmem>>, vector<8x512xf32>
    tpu.vector_store %arg14[%c8_645, %c0_646], %993 {strides = array<i32>} : memref<72x512xf32, #tpu.memory_space<vmem>>, vector<8x512xf32>,
    %c0_647 = arith.constant 0 : index
    %c97_648 = arith.constant 97 : index
    %995 = vector.load %arg8[%c0_647, %c97_648] : memref<8x673xf32, #tpu.memory_space<vmem>>, vector<8x512xf32>
    %996 = arith.mulf %995, %204 : vector<8x512xf32>
    %c16_649 = arith.constant 16 : index
    %c0_650 = arith.constant 0 : index
    %997 = vector.load %arg14[%c16_649, %c0_650] : memref<72x512xf32, #tpu.memory_space<vmem>>, vector<8x512xf32>
    tpu.vector_store %arg14[%c16_649, %c0_650], %996 {strides = array<i32>} : memref<72x512xf32, #tpu.memory_space<vmem>>, vector<8x512xf32>,
    %c0_651 = arith.constant 0 : index
    %c127_652 = arith.constant 127 : index
    %998 = vector.load %arg8[%c0_651, %c127_652] : memref<8x673xf32, #tpu.memory_space<vmem>>, vector<8x512xf32>
    %999 = arith.mulf %998, %171 : vector<8x512xf32>
    %c24_653 = arith.constant 24 : index
    %c0_654 = arith.constant 0 : index
    %1000 = vector.load %arg14[%c24_653, %c0_654] : memref<72x512xf32, #tpu.memory_space<vmem>>, vector<8x512xf32>
    tpu.vector_store %arg14[%c24_653, %c0_654], %999 {strides = array<i32>} : memref<72x512xf32, #tpu.memory_space<vmem>>, vector<8x512xf32>,
    %c0_655 = arith.constant 0 : index
    %c128_656 = arith.constant 128 : index
    %1001 = vector.load %arg8[%c0_655, %c128_656] : memref<8x673xf32, #tpu.memory_space<vmem>>, vector<8x512xf32>
    %c32_657 = arith.constant 32 : index
    %c0_658 = arith.constant 0 : index
    %1002 = vector.load %arg14[%c32_657, %c0_658] : memref<72x512xf32, #tpu.memory_space<vmem>>, vector<8x512xf32>
    tpu.vector_store %arg14[%c32_657, %c0_658], %1001 {strides = array<i32>} : memref<72x512xf32, #tpu.memory_space<vmem>>, vector<8x512xf32>,
    %c0_659 = arith.constant 0 : index
    %c129_660 = arith.constant 129 : index
    %1003 = vector.load %arg8[%c0_659, %c129_660] : memref<8x673xf32, #tpu.memory_space<vmem>>, vector<8x512xf32>
    %1004 = arith.mulf %1003, %204 : vector<8x512xf32>
    %c40_661 = arith.constant 40 : index
    %c0_662 = arith.constant 0 : index
    %1005 = vector.load %arg14[%c40_661, %c0_662] : memref<72x512xf32, #tpu.memory_space<vmem>>, vector<8x512xf32>
    tpu.vector_store %arg14[%c40_661, %c0_662], %1004 {strides = array<i32>} : memref<72x512xf32, #tpu.memory_space<vmem>>, vector<8x512xf32>,
    %c0_663 = arith.constant 0 : index
    %c159_664 = arith.constant 159 : index
    %1006 = vector.load %arg8[%c0_663, %c159_664] : memref<8x673xf32, #tpu.memory_space<vmem>>, vector<8x512xf32>
    %1007 = arith.mulf %1006, %171 : vector<8x512xf32>
    %c48_665 = arith.constant 48 : index
    %c0_666 = arith.constant 0 : index
    %1008 = vector.load %arg14[%c48_665, %c0_666] : memref<72x512xf32, #tpu.memory_space<vmem>>, vector<8x512xf32>
    tpu.vector_store %arg14[%c48_665, %c0_666], %1007 {strides = array<i32>} : memref<72x512xf32, #tpu.memory_space<vmem>>, vector<8x512xf32>,
    %c0_667 = arith.constant 0 : index
    %c160_668 = arith.constant 160 : index
    %1009 = vector.load %arg8[%c0_667, %c160_668] : memref<8x673xf32, #tpu.memory_space<vmem>>, vector<8x512xf32>
    %c56_669 = arith.constant 56 : index
    %c0_670 = arith.constant 0 : index
    %1010 = vector.load %arg14[%c56_669, %c0_670] : memref<72x512xf32, #tpu.memory_space<vmem>>, vector<8x512xf32>
    tpu.vector_store %arg14[%c56_669, %c0_670], %1009 {strides = array<i32>} : memref<72x512xf32, #tpu.memory_space<vmem>>, vector<8x512xf32>,
    %c0_671 = arith.constant 0 : index
    %c161_672 = arith.constant 161 : index
    %1011 = vector.load %arg8[%c0_671, %c161_672] : memref<8x673xf32, #tpu.memory_space<vmem>>, vector<8x512xf32>
    %1012 = arith.mulf %1011, %204 : vector<8x512xf32>
    %c64_673 = arith.constant 64 : index
    %c0_674 = arith.constant 0 : index
    %1013 = vector.load %arg14[%c64_673, %c0_674] : memref<72x512xf32, #tpu.memory_space<vmem>>, vector<8x512xf32>
    tpu.vector_store %arg14[%c64_673, %c0_674], %1012 {strides = array<i32>} : memref<72x512xf32, #tpu.memory_space<vmem>>, vector<8x512xf32>,
    %c0_675 = arith.constant 0 : index
    %c0_676 = arith.constant 0 : index
    %1014 = vector.load %arg14[%c0_675, %c0_676] : memref<72x512xf32, #tpu.memory_space<vmem>>, vector<72x512xf32>
    %1015 = arith.truncf %1014 : vector<72x512xf32> to vector<72x512xbf16>
    %cst_677 = arith.constant dense<0.000000e+00> : vector<8x512xf32>
    %1016 = tpu.matmul %986, %1015, %cst_677 {dimension_numbers = #tpu.dot_dimension_numbers<[1], [0], [0], [1], [0, 0, 1, 1], [], []>} : vector<8x72xbf16>, vector<72x512xbf16>, vector<8x512xf32> -> vector<8x512xf32>
    %1017 = vector.broadcast %988 : vector<8x1xf32> to vector<8x512xf32>
    %1018 = arith.addf %1016, %1017 : vector<8x512xf32>
    %cst_678 = arith.constant 0.000000e+00 : f32
    %1019 = vector.broadcast %cst_678 : f32 to vector<8x512xf32>
    %1020 = arith.maximumf %1018, %1019 : vector<8x512xf32>
    %c352 = arith.constant 352 : index
    %c0_679 = arith.constant 0 : index
    %1021 = vector.load %arg5[%c352, %c0_679] : memref<656x512xbf16, #tpu.memory_space<vmem>>, vector<8x73xbf16>
    %1022 = vector.extract_strided_slice %1021 {offsets = [0, 0], sizes = [8, 72], strides = [1, 1]} : vector<8x73xbf16> to vector<8x72xbf16>
    %1023 = vector.extract_strided_slice %1021 {offsets = [0, 72], sizes = [8, 1], strides = [1, 1]} : vector<8x73xbf16> to vector<8x1xbf16>
    %1024 = arith.extf %1023 : vector<8x1xbf16> to vector<8x1xf32>
    %c0_680 = arith.constant 0 : index
    %c128_681 = arith.constant 128 : index
    %1025 = vector.load %arg8[%c0_680, %c128_681] : memref<8x673xf32, #tpu.memory_space<vmem>>, vector<8x512xf32>
    tpu.vector_store %arg8[%c0_680, %c128_681], %1020 {strides = array<i32>} : memref<8x673xf32, #tpu.memory_space<vmem>>, vector<8x512xf32>,
    %c0_682 = arith.constant 0 : index
    %c95_683 = arith.constant 95 : index
    %1026 = vector.load %arg8[%c0_682, %c95_683] : memref<8x673xf32, #tpu.memory_space<vmem>>, vector<8x512xf32>
    %1027 = arith.mulf %1026, %171 : vector<8x512xf32>
    %c0_684 = arith.constant 0 : index
    %c0_685 = arith.constant 0 : index
    %1028 = vector.load %arg14[%c0_684, %c0_685] : memref<72x512xf32, #tpu.memory_space<vmem>>, vector<8x512xf32>
    tpu.vector_store %arg14[%c0_684, %c0_685], %1027 {strides = array<i32>} : memref<72x512xf32, #tpu.memory_space<vmem>>, vector<8x512xf32>,
    %c0_686 = arith.constant 0 : index
    %c96_687 = arith.constant 96 : index
    %1029 = vector.load %arg8[%c0_686, %c96_687] : memref<8x673xf32, #tpu.memory_space<vmem>>, vector<8x512xf32>
    %c8_688 = arith.constant 8 : index
    %c0_689 = arith.constant 0 : index
    %1030 = vector.load %arg14[%c8_688, %c0_689] : memref<72x512xf32, #tpu.memory_space<vmem>>, vector<8x512xf32>
    tpu.vector_store %arg14[%c8_688, %c0_689], %1029 {strides = array<i32>} : memref<72x512xf32, #tpu.memory_space<vmem>>, vector<8x512xf32>,
    %c0_690 = arith.constant 0 : index
    %c97_691 = arith.constant 97 : index
    %1031 = vector.load %arg8[%c0_690, %c97_691] : memref<8x673xf32, #tpu.memory_space<vmem>>, vector<8x512xf32>
    %1032 = arith.mulf %1031, %204 : vector<8x512xf32>
    %c16_692 = arith.constant 16 : index
    %c0_693 = arith.constant 0 : index
    %1033 = vector.load %arg14[%c16_692, %c0_693] : memref<72x512xf32, #tpu.memory_space<vmem>>, vector<8x512xf32>
    tpu.vector_store %arg14[%c16_692, %c0_693], %1032 {strides = array<i32>} : memref<72x512xf32, #tpu.memory_space<vmem>>, vector<8x512xf32>,
    %c0_694 = arith.constant 0 : index
    %c127_695 = arith.constant 127 : index
    %1034 = vector.load %arg8[%c0_694, %c127_695] : memref<8x673xf32, #tpu.memory_space<vmem>>, vector<8x512xf32>
    %1035 = arith.mulf %1034, %171 : vector<8x512xf32>
    %c24_696 = arith.constant 24 : index
    %c0_697 = arith.constant 0 : index
    %1036 = vector.load %arg14[%c24_696, %c0_697] : memref<72x512xf32, #tpu.memory_space<vmem>>, vector<8x512xf32>
    tpu.vector_store %arg14[%c24_696, %c0_697], %1035 {strides = array<i32>} : memref<72x512xf32, #tpu.memory_space<vmem>>, vector<8x512xf32>,
    %c0_698 = arith.constant 0 : index
    %c128_699 = arith.constant 128 : index
    %1037 = vector.load %arg8[%c0_698, %c128_699] : memref<8x673xf32, #tpu.memory_space<vmem>>, vector<8x512xf32>
    %c32_700 = arith.constant 32 : index
    %c0_701 = arith.constant 0 : index
    %1038 = vector.load %arg14[%c32_700, %c0_701] : memref<72x512xf32, #tpu.memory_space<vmem>>, vector<8x512xf32>
    tpu.vector_store %arg14[%c32_700, %c0_701], %1037 {strides = array<i32>} : memref<72x512xf32, #tpu.memory_space<vmem>>, vector<8x512xf32>,
    %c0_702 = arith.constant 0 : index
    %c129_703 = arith.constant 129 : index
    %1039 = vector.load %arg8[%c0_702, %c129_703] : memref<8x673xf32, #tpu.memory_space<vmem>>, vector<8x512xf32>
    %1040 = arith.mulf %1039, %204 : vector<8x512xf32>
    %c40_704 = arith.constant 40 : index
    %c0_705 = arith.constant 0 : index
    %1041 = vector.load %arg14[%c40_704, %c0_705] : memref<72x512xf32, #tpu.memory_space<vmem>>, vector<8x512xf32>
    tpu.vector_store %arg14[%c40_704, %c0_705], %1040 {strides = array<i32>} : memref<72x512xf32, #tpu.memory_space<vmem>>, vector<8x512xf32>,
    %c0_706 = arith.constant 0 : index
    %c159_707 = arith.constant 159 : index
    %1042 = vector.load %arg8[%c0_706, %c159_707] : memref<8x673xf32, #tpu.memory_space<vmem>>, vector<8x512xf32>
    %1043 = arith.mulf %1042, %171 : vector<8x512xf32>
    %c48_708 = arith.constant 48 : index
    %c0_709 = arith.constant 0 : index
    %1044 = vector.load %arg14[%c48_708, %c0_709] : memref<72x512xf32, #tpu.memory_space<vmem>>, vector<8x512xf32>
    tpu.vector_store %arg14[%c48_708, %c0_709], %1043 {strides = array<i32>} : memref<72x512xf32, #tpu.memory_space<vmem>>, vector<8x512xf32>,
    %c0_710 = arith.constant 0 : index
    %c160_711 = arith.constant 160 : index
    %1045 = vector.load %arg8[%c0_710, %c160_711] : memref<8x673xf32, #tpu.memory_space<vmem>>, vector<8x512xf32>
    %c56_712 = arith.constant 56 : index
    %c0_713 = arith.constant 0 : index
    %1046 = vector.load %arg14[%c56_712, %c0_713] : memref<72x512xf32, #tpu.memory_space<vmem>>, vector<8x512xf32>
    tpu.vector_store %arg14[%c56_712, %c0_713], %1045 {strides = array<i32>} : memref<72x512xf32, #tpu.memory_space<vmem>>, vector<8x512xf32>,
    %c0_714 = arith.constant 0 : index
    %c161_715 = arith.constant 161 : index
    %1047 = vector.load %arg8[%c0_714, %c161_715] : memref<8x673xf32, #tpu.memory_space<vmem>>, vector<8x512xf32>
    %1048 = arith.mulf %1047, %204 : vector<8x512xf32>
    %c64_716 = arith.constant 64 : index
    %c0_717 = arith.constant 0 : index
    %1049 = vector.load %arg14[%c64_716, %c0_717] : memref<72x512xf32, #tpu.memory_space<vmem>>, vector<8x512xf32>
    tpu.vector_store %arg14[%c64_716, %c0_717], %1048 {strides = array<i32>} : memref<72x512xf32, #tpu.memory_space<vmem>>, vector<8x512xf32>,
    %c0_718 = arith.constant 0 : index
    %c0_719 = arith.constant 0 : index
    %1050 = vector.load %arg14[%c0_718, %c0_719] : memref<72x512xf32, #tpu.memory_space<vmem>>, vector<72x512xf32>
    %1051 = arith.truncf %1050 : vector<72x512xf32> to vector<72x512xbf16>
    %cst_720 = arith.constant dense<0.000000e+00> : vector<8x512xf32>
    %1052 = tpu.matmul %1022, %1051, %cst_720 {dimension_numbers = #tpu.dot_dimension_numbers<[1], [0], [0], [1], [0, 0, 1, 1], [], []>} : vector<8x72xbf16>, vector<72x512xbf16>, vector<8x512xf32> -> vector<8x512xf32>
    %1053 = vector.broadcast %1024 : vector<8x1xf32> to vector<8x512xf32>
    %1054 = arith.addf %1052, %1053 : vector<8x512xf32>
    %cst_721 = arith.constant 0.000000e+00 : f32
    %1055 = vector.broadcast %cst_721 : f32 to vector<8x512xf32>
    %1056 = arith.maximumf %1054, %1055 : vector<8x512xf32>
    %1057 = arith.addf %984, %1056 : vector<8x512xf32>
    %c368 = arith.constant 368 : index
    %c0_722 = arith.constant 0 : index
    %1058 = vector.load %arg5[%c368, %c0_722] : memref<656x512xbf16, #tpu.memory_space<vmem>>, vector<8x17xbf16>
    %1059 = vector.extract_strided_slice %1058 {offsets = [0, 0], sizes = [8, 16], strides = [1, 1]} : vector<8x17xbf16> to vector<8x16xbf16>
    %1060 = vector.extract_strided_slice %1058 {offsets = [0, 16], sizes = [8, 1], strides = [1, 1]} : vector<8x17xbf16> to vector<8x1xbf16>
    %1061 = arith.extf %1060 : vector<8x1xbf16> to vector<8x1xf32>
    %1062 = arith.truncf %897 : vector<16x128xf32> to vector<16x128xbf16>
    %cst_723 = arith.constant dense<0.000000e+00> : vector<8x128xf32>
    %1063 = tpu.matmul %1059, %1062, %cst_723 {dimension_numbers = #tpu.dot_dimension_numbers<[1], [0], [0], [1], [0, 0, 1, 1], [], []>} : vector<8x16xbf16>, vector<16x128xbf16>, vector<8x128xf32> -> vector<8x128xf32>
    %1064 = vector.broadcast %1061 : vector<8x1xf32> to vector<8x128xf32>
    %1065 = arith.addf %1063, %1064 : vector<8x128xf32>
    %cst_724 = arith.constant 0.000000e+00 : f32
    %1066 = vector.broadcast %cst_724 : f32 to vector<8x128xf32>
    %1067 = arith.maximumf %1065, %1066 : vector<8x128xf32>
    %c384 = arith.constant 384 : index
    %c0_725 = arith.constant 0 : index
    %1068 = vector.load %arg5[%c384, %c0_725] : memref<656x512xbf16, #tpu.memory_space<vmem>>, vector<8x73xbf16>
    %1069 = vector.extract_strided_slice %1068 {offsets = [0, 0], sizes = [8, 72], strides = [1, 1]} : vector<8x73xbf16> to vector<8x72xbf16>
    %1070 = vector.extract_strided_slice %1068 {offsets = [0, 72], sizes = [8, 1], strides = [1, 1]} : vector<8x73xbf16> to vector<8x1xbf16>
    %1071 = arith.extf %1070 : vector<8x1xbf16> to vector<8x1xf32>
    %c0_726 = arith.constant 0 : index
    %c128_727 = arith.constant 128 : index
    %1072 = vector.load %arg7[%c0_726, %c128_727] : memref<8x273xf32, #tpu.memory_space<vmem>>, vector<8x128xf32>
    tpu.vector_store %arg7[%c0_726, %c128_727], %1067 {strides = array<i32>} : memref<8x273xf32, #tpu.memory_space<vmem>>, vector<8x128xf32>,
    %c0_728 = arith.constant 0 : index
    %c111_729 = arith.constant 111 : index
    %1073 = vector.load %arg7[%c0_728, %c111_729] : memref<8x273xf32, #tpu.memory_space<vmem>>, vector<8x128xf32>
    %1074 = arith.mulf %1073, %75 : vector<8x128xf32>
    %c0_730 = arith.constant 0 : index
    %c0_731 = arith.constant 0 : index
    %1075 = vector.load %arg13[%c0_730, %c0_731] : memref<72x128xf32, #tpu.memory_space<vmem>>, vector<8x128xf32>
    tpu.vector_store %arg13[%c0_730, %c0_731], %1074 {strides = array<i32>} : memref<72x128xf32, #tpu.memory_space<vmem>>, vector<8x128xf32>,
    %c0_732 = arith.constant 0 : index
    %c112_733 = arith.constant 112 : index
    %1076 = vector.load %arg7[%c0_732, %c112_733] : memref<8x273xf32, #tpu.memory_space<vmem>>, vector<8x128xf32>
    %c8_734 = arith.constant 8 : index
    %c0_735 = arith.constant 0 : index
    %1077 = vector.load %arg13[%c8_734, %c0_735] : memref<72x128xf32, #tpu.memory_space<vmem>>, vector<8x128xf32>
    tpu.vector_store %arg13[%c8_734, %c0_735], %1076 {strides = array<i32>} : memref<72x128xf32, #tpu.memory_space<vmem>>, vector<8x128xf32>,
    %c0_736 = arith.constant 0 : index
    %c113_737 = arith.constant 113 : index
    %1078 = vector.load %arg7[%c0_736, %c113_737] : memref<8x273xf32, #tpu.memory_space<vmem>>, vector<8x128xf32>
    %1079 = arith.mulf %1078, %108 : vector<8x128xf32>
    %c16_738 = arith.constant 16 : index
    %c0_739 = arith.constant 0 : index
    %1080 = vector.load %arg13[%c16_738, %c0_739] : memref<72x128xf32, #tpu.memory_space<vmem>>, vector<8x128xf32>
    tpu.vector_store %arg13[%c16_738, %c0_739], %1079 {strides = array<i32>} : memref<72x128xf32, #tpu.memory_space<vmem>>, vector<8x128xf32>,
    %c0_740 = arith.constant 0 : index
    %c127_741 = arith.constant 127 : index
    %1081 = vector.load %arg7[%c0_740, %c127_741] : memref<8x273xf32, #tpu.memory_space<vmem>>, vector<8x128xf32>
    %1082 = arith.mulf %1081, %75 : vector<8x128xf32>
    %c24_742 = arith.constant 24 : index
    %c0_743 = arith.constant 0 : index
    %1083 = vector.load %arg13[%c24_742, %c0_743] : memref<72x128xf32, #tpu.memory_space<vmem>>, vector<8x128xf32>
    tpu.vector_store %arg13[%c24_742, %c0_743], %1082 {strides = array<i32>} : memref<72x128xf32, #tpu.memory_space<vmem>>, vector<8x128xf32>,
    %c0_744 = arith.constant 0 : index
    %c128_745 = arith.constant 128 : index
    %1084 = vector.load %arg7[%c0_744, %c128_745] : memref<8x273xf32, #tpu.memory_space<vmem>>, vector<8x128xf32>
    %c32_746 = arith.constant 32 : index
    %c0_747 = arith.constant 0 : index
    %1085 = vector.load %arg13[%c32_746, %c0_747] : memref<72x128xf32, #tpu.memory_space<vmem>>, vector<8x128xf32>
    tpu.vector_store %arg13[%c32_746, %c0_747], %1084 {strides = array<i32>} : memref<72x128xf32, #tpu.memory_space<vmem>>, vector<8x128xf32>,
    %c0_748 = arith.constant 0 : index
    %c129_749 = arith.constant 129 : index
    %1086 = vector.load %arg7[%c0_748, %c129_749] : memref<8x273xf32, #tpu.memory_space<vmem>>, vector<8x128xf32>
    %1087 = arith.mulf %1086, %108 : vector<8x128xf32>
    %c40_750 = arith.constant 40 : index
    %c0_751 = arith.constant 0 : index
    %1088 = vector.load %arg13[%c40_750, %c0_751] : memref<72x128xf32, #tpu.memory_space<vmem>>, vector<8x128xf32>
    tpu.vector_store %arg13[%c40_750, %c0_751], %1087 {strides = array<i32>} : memref<72x128xf32, #tpu.memory_space<vmem>>, vector<8x128xf32>,
    %c0_752 = arith.constant 0 : index
    %c143_753 = arith.constant 143 : index
    %1089 = vector.load %arg7[%c0_752, %c143_753] : memref<8x273xf32, #tpu.memory_space<vmem>>, vector<8x128xf32>
    %1090 = arith.mulf %1089, %75 : vector<8x128xf32>
    %c48_754 = arith.constant 48 : index
    %c0_755 = arith.constant 0 : index
    %1091 = vector.load %arg13[%c48_754, %c0_755] : memref<72x128xf32, #tpu.memory_space<vmem>>, vector<8x128xf32>
    tpu.vector_store %arg13[%c48_754, %c0_755], %1090 {strides = array<i32>} : memref<72x128xf32, #tpu.memory_space<vmem>>, vector<8x128xf32>,
    %c0_756 = arith.constant 0 : index
    %c144_757 = arith.constant 144 : index
    %1092 = vector.load %arg7[%c0_756, %c144_757] : memref<8x273xf32, #tpu.memory_space<vmem>>, vector<8x128xf32>
    %c56_758 = arith.constant 56 : index
    %c0_759 = arith.constant 0 : index
    %1093 = vector.load %arg13[%c56_758, %c0_759] : memref<72x128xf32, #tpu.memory_space<vmem>>, vector<8x128xf32>
    tpu.vector_store %arg13[%c56_758, %c0_759], %1092 {strides = array<i32>} : memref<72x128xf32, #tpu.memory_space<vmem>>, vector<8x128xf32>,
    %c0_760 = arith.constant 0 : index
    %c145_761 = arith.constant 145 : index
    %1094 = vector.load %arg7[%c0_760, %c145_761] : memref<8x273xf32, #tpu.memory_space<vmem>>, vector<8x128xf32>
    %1095 = arith.mulf %1094, %108 : vector<8x128xf32>
    %c64_762 = arith.constant 64 : index
    %c0_763 = arith.constant 0 : index
    %1096 = vector.load %arg13[%c64_762, %c0_763] : memref<72x128xf32, #tpu.memory_space<vmem>>, vector<8x128xf32>
    tpu.vector_store %arg13[%c64_762, %c0_763], %1095 {strides = array<i32>} : memref<72x128xf32, #tpu.memory_space<vmem>>, vector<8x128xf32>,
    %c0_764 = arith.constant 0 : index
    %c0_765 = arith.constant 0 : index
    %1097 = vector.load %arg13[%c0_764, %c0_765] : memref<72x128xf32, #tpu.memory_space<vmem>>, vector<72x128xf32>
    %1098 = arith.truncf %1097 : vector<72x128xf32> to vector<72x128xbf16>
    %cst_766 = arith.constant dense<0.000000e+00> : vector<8x128xf32>
    %1099 = tpu.matmul %1069, %1098, %cst_766 {dimension_numbers = #tpu.dot_dimension_numbers<[1], [0], [0], [1], [0, 0, 1, 1], [], []>} : vector<8x72xbf16>, vector<72x128xbf16>, vector<8x128xf32> -> vector<8x128xf32>
    %1100 = vector.broadcast %1071 : vector<8x1xf32> to vector<8x128xf32>
    %1101 = arith.addf %1099, %1100 : vector<8x128xf32>
    %cst_767 = arith.constant 0.000000e+00 : f32
    %1102 = vector.broadcast %cst_767 : f32 to vector<8x128xf32>
    %1103 = arith.maximumf %1101, %1102 : vector<8x128xf32>
    %c448_768 = arith.constant 448 : index
    %c0_769 = arith.constant 0 : index
    %1104 = vector.load %arg5[%c448_768, %c0_769] : memref<656x512xbf16, #tpu.memory_space<vmem>>, vector<128x512xbf16>
    %1105 = arith.truncf %1103 : vector<8x128xf32> to vector<8x128xbf16>
    %cst_770 = arith.constant dense<0.000000e+00> : vector<8x512xf32>
    %1106 = tpu.matmul %1105, %1104, %cst_770 {dimension_numbers = #tpu.dot_dimension_numbers<[1], [0], [0], [1], [0, 0, 1, 1], [], []>} : vector<8x128xbf16>, vector<128x512xbf16>, vector<8x512xf32> -> vector<8x512xf32>
    %1107 = arith.addf %1057, %1106 : vector<8x512xf32>
    %c400 = arith.constant 400 : index
    %c0_771 = arith.constant 0 : index
    %1108 = vector.load %arg5[%c400, %c0_771] : memref<656x512xbf16, #tpu.memory_space<vmem>>, vector<8x73xbf16>
    %1109 = vector.extract_strided_slice %1108 {offsets = [0, 0], sizes = [8, 72], strides = [1, 1]} : vector<8x73xbf16> to vector<8x72xbf16>
    %1110 = vector.extract_strided_slice %1108 {offsets = [0, 72], sizes = [8, 1], strides = [1, 1]} : vector<8x73xbf16> to vector<8x1xbf16>
    %1111 = arith.extf %1110 : vector<8x1xbf16> to vector<8x1xf32>
    %c0_772 = arith.constant 0 : index
    %c128_773 = arith.constant 128 : index
    %1112 = vector.load %arg8[%c0_772, %c128_773] : memref<8x673xf32, #tpu.memory_space<vmem>>, vector<8x512xf32>
    tpu.vector_store %arg8[%c0_772, %c128_773], %1107 {strides = array<i32>} : memref<8x673xf32, #tpu.memory_space<vmem>>, vector<8x512xf32>,
    %c0_774 = arith.constant 0 : index
    %c95_775 = arith.constant 95 : index
    %1113 = vector.load %arg8[%c0_774, %c95_775] : memref<8x673xf32, #tpu.memory_space<vmem>>, vector<8x512xf32>
    %1114 = arith.mulf %1113, %171 : vector<8x512xf32>
    %c0_776 = arith.constant 0 : index
    %c0_777 = arith.constant 0 : index
    %1115 = vector.load %arg14[%c0_776, %c0_777] : memref<72x512xf32, #tpu.memory_space<vmem>>, vector<8x512xf32>
    tpu.vector_store %arg14[%c0_776, %c0_777], %1114 {strides = array<i32>} : memref<72x512xf32, #tpu.memory_space<vmem>>, vector<8x512xf32>,
    %c0_778 = arith.constant 0 : index
    %c96_779 = arith.constant 96 : index
    %1116 = vector.load %arg8[%c0_778, %c96_779] : memref<8x673xf32, #tpu.memory_space<vmem>>, vector<8x512xf32>
    %c8_780 = arith.constant 8 : index
    %c0_781 = arith.constant 0 : index
    %1117 = vector.load %arg14[%c8_780, %c0_781] : memref<72x512xf32, #tpu.memory_space<vmem>>, vector<8x512xf32>
    tpu.vector_store %arg14[%c8_780, %c0_781], %1116 {strides = array<i32>} : memref<72x512xf32, #tpu.memory_space<vmem>>, vector<8x512xf32>,
    %c0_782 = arith.constant 0 : index
    %c97_783 = arith.constant 97 : index
    %1118 = vector.load %arg8[%c0_782, %c97_783] : memref<8x673xf32, #tpu.memory_space<vmem>>, vector<8x512xf32>
    %1119 = arith.mulf %1118, %204 : vector<8x512xf32>
    %c16_784 = arith.constant 16 : index
    %c0_785 = arith.constant 0 : index
    %1120 = vector.load %arg14[%c16_784, %c0_785] : memref<72x512xf32, #tpu.memory_space<vmem>>, vector<8x512xf32>
    tpu.vector_store %arg14[%c16_784, %c0_785], %1119 {strides = array<i32>} : memref<72x512xf32, #tpu.memory_space<vmem>>, vector<8x512xf32>,
    %c0_786 = arith.constant 0 : index
    %c127_787 = arith.constant 127 : index
    %1121 = vector.load %arg8[%c0_786, %c127_787] : memref<8x673xf32, #tpu.memory_space<vmem>>, vector<8x512xf32>
    %1122 = arith.mulf %1121, %171 : vector<8x512xf32>
    %c24_788 = arith.constant 24 : index
    %c0_789 = arith.constant 0 : index
    %1123 = vector.load %arg14[%c24_788, %c0_789] : memref<72x512xf32, #tpu.memory_space<vmem>>, vector<8x512xf32>
    tpu.vector_store %arg14[%c24_788, %c0_789], %1122 {strides = array<i32>} : memref<72x512xf32, #tpu.memory_space<vmem>>, vector<8x512xf32>,
    %c0_790 = arith.constant 0 : index
    %c128_791 = arith.constant 128 : index
    %1124 = vector.load %arg8[%c0_790, %c128_791] : memref<8x673xf32, #tpu.memory_space<vmem>>, vector<8x512xf32>
    %c32_792 = arith.constant 32 : index
    %c0_793 = arith.constant 0 : index
    %1125 = vector.load %arg14[%c32_792, %c0_793] : memref<72x512xf32, #tpu.memory_space<vmem>>, vector<8x512xf32>
    tpu.vector_store %arg14[%c32_792, %c0_793], %1124 {strides = array<i32>} : memref<72x512xf32, #tpu.memory_space<vmem>>, vector<8x512xf32>,
    %c0_794 = arith.constant 0 : index
    %c129_795 = arith.constant 129 : index
    %1126 = vector.load %arg8[%c0_794, %c129_795] : memref<8x673xf32, #tpu.memory_space<vmem>>, vector<8x512xf32>
    %1127 = arith.mulf %1126, %204 : vector<8x512xf32>
    %c40_796 = arith.constant 40 : index
    %c0_797 = arith.constant 0 : index
    %1128 = vector.load %arg14[%c40_796, %c0_797] : memref<72x512xf32, #tpu.memory_space<vmem>>, vector<8x512xf32>
    tpu.vector_store %arg14[%c40_796, %c0_797], %1127 {strides = array<i32>} : memref<72x512xf32, #tpu.memory_space<vmem>>, vector<8x512xf32>,
    %c0_798 = arith.constant 0 : index
    %c159_799 = arith.constant 159 : index
    %1129 = vector.load %arg8[%c0_798, %c159_799] : memref<8x673xf32, #tpu.memory_space<vmem>>, vector<8x512xf32>
    %1130 = arith.mulf %1129, %171 : vector<8x512xf32>
    %c48_800 = arith.constant 48 : index
    %c0_801 = arith.constant 0 : index
    %1131 = vector.load %arg14[%c48_800, %c0_801] : memref<72x512xf32, #tpu.memory_space<vmem>>, vector<8x512xf32>
    tpu.vector_store %arg14[%c48_800, %c0_801], %1130 {strides = array<i32>} : memref<72x512xf32, #tpu.memory_space<vmem>>, vector<8x512xf32>,
    %c0_802 = arith.constant 0 : index
    %c160_803 = arith.constant 160 : index
    %1132 = vector.load %arg8[%c0_802, %c160_803] : memref<8x673xf32, #tpu.memory_space<vmem>>, vector<8x512xf32>
    %c56_804 = arith.constant 56 : index
    %c0_805 = arith.constant 0 : index
    %1133 = vector.load %arg14[%c56_804, %c0_805] : memref<72x512xf32, #tpu.memory_space<vmem>>, vector<8x512xf32>
    tpu.vector_store %arg14[%c56_804, %c0_805], %1132 {strides = array<i32>} : memref<72x512xf32, #tpu.memory_space<vmem>>, vector<8x512xf32>,
    %c0_806 = arith.constant 0 : index
    %c161_807 = arith.constant 161 : index
    %1134 = vector.load %arg8[%c0_806, %c161_807] : memref<8x673xf32, #tpu.memory_space<vmem>>, vector<8x512xf32>
    %1135 = arith.mulf %1134, %204 : vector<8x512xf32>
    %c64_808 = arith.constant 64 : index
    %c0_809 = arith.constant 0 : index
    %1136 = vector.load %arg14[%c64_808, %c0_809] : memref<72x512xf32, #tpu.memory_space<vmem>>, vector<8x512xf32>
    tpu.vector_store %arg14[%c64_808, %c0_809], %1135 {strides = array<i32>} : memref<72x512xf32, #tpu.memory_space<vmem>>, vector<8x512xf32>,
    %c0_810 = arith.constant 0 : index
    %c0_811 = arith.constant 0 : index
    %1137 = vector.load %arg14[%c0_810, %c0_811] : memref<72x512xf32, #tpu.memory_space<vmem>>, vector<72x512xf32>
    %1138 = arith.truncf %1137 : vector<72x512xf32> to vector<72x512xbf16>
    %cst_812 = arith.constant dense<0.000000e+00> : vector<8x512xf32>
    %1139 = tpu.matmul %1109, %1138, %cst_812 {dimension_numbers = #tpu.dot_dimension_numbers<[1], [0], [0], [1], [0, 0, 1, 1], [], []>} : vector<8x72xbf16>, vector<72x512xbf16>, vector<8x512xf32> -> vector<8x512xf32>
    %1140 = vector.broadcast %1111 : vector<8x1xf32> to vector<8x512xf32>
    %1141 = arith.addf %1139, %1140 : vector<8x512xf32>
    %cst_813 = arith.constant 0.000000e+00 : f32
    %1142 = vector.broadcast %cst_813 : f32 to vector<8x512xf32>
    %1143 = arith.maximumf %1141, %1142 : vector<8x512xf32>
    %c416 = arith.constant 416 : index
    %c0_814 = arith.constant 0 : index
    %1144 = vector.load %arg5[%c416, %c0_814] : memref<656x512xbf16, #tpu.memory_space<vmem>>, vector<8x33xbf16>
    %1145 = vector.extract_strided_slice %1144 {offsets = [0, 0], sizes = [8, 32], strides = [1, 1]} : vector<8x33xbf16> to vector<8x32xbf16>
    %1146 = vector.extract_strided_slice %1144 {offsets = [0, 32], sizes = [8, 1], strides = [1, 1]} : vector<8x33xbf16> to vector<8x1xbf16>
    %1147 = arith.extf %1146 : vector<8x1xbf16> to vector<8x1xf32>
    %1148 = arith.truncf %700 : vector<32x32xf32> to vector<32x32xbf16>
    %cst_815 = arith.constant dense<0.000000e+00> : vector<8x32xf32>
    %1149 = tpu.matmul %1145, %1148, %cst_815 {dimension_numbers = #tpu.dot_dimension_numbers<[1], [0], [0], [1], [0, 0, 1, 1], [], []>} : vector<8x32xbf16>, vector<32x32xbf16>, vector<8x32xf32> -> vector<8x32xf32>
    %1150 = vector.broadcast %1147 : vector<8x1xf32> to vector<8x32xf32>
    %1151 = arith.addf %1149, %1150 : vector<8x32xf32>
    %cst_816 = arith.constant 0.000000e+00 : f32
    %1152 = vector.broadcast %cst_816 : f32 to vector<8x32xf32>
    %1153 = arith.maximumf %1151, %1152 : vector<8x32xf32>
    %c624 = arith.constant 624 : index
    %c0_817 = arith.constant 0 : index
    %1154 = vector.load %arg5[%c624, %c0_817] : memref<656x512xbf16, #tpu.memory_space<vmem>>, vector<32x512xbf16>
    %1155 = arith.truncf %1153 : vector<8x32xf32> to vector<8x32xbf16>
    %cst_818 = arith.constant dense<0.000000e+00> : vector<8x512xf32>
    %1156 = tpu.matmul %1155, %1154, %cst_818 {dimension_numbers = #tpu.dot_dimension_numbers<[1], [0], [0], [1], [0, 0, 1, 1], [], []>} : vector<8x32xbf16>, vector<32x512xbf16>, vector<8x512xf32> -> vector<8x512xf32>
    %1157 = arith.addf %1143, %1156 : vector<8x512xf32>
    %c432 = arith.constant 432 : index
    %c0_819 = arith.constant 0 : index
    %1158 = vector.load %arg5[%c432, %c0_819] : memref<656x512xbf16, #tpu.memory_space<vmem>>, vector<8x73xbf16>
    %1159 = vector.extract_strided_slice %1158 {offsets = [0, 0], sizes = [8, 72], strides = [1, 1]} : vector<8x73xbf16> to vector<8x72xbf16>
    %1160 = vector.extract_strided_slice %1158 {offsets = [0, 72], sizes = [8, 1], strides = [1, 1]} : vector<8x73xbf16> to vector<8x1xbf16>
    %1161 = arith.extf %1160 : vector<8x1xbf16> to vector<8x1xf32>
    %c0_820 = arith.constant 0 : index
    %c128_821 = arith.constant 128 : index
    %1162 = vector.load %arg8[%c0_820, %c128_821] : memref<8x673xf32, #tpu.memory_space<vmem>>, vector<8x512xf32>
    tpu.vector_store %arg8[%c0_820, %c128_821], %1157 {strides = array<i32>} : memref<8x673xf32, #tpu.memory_space<vmem>>, vector<8x512xf32>,
    %c0_822 = arith.constant 0 : index
    %c95_823 = arith.constant 95 : index
    %1163 = vector.load %arg8[%c0_822, %c95_823] : memref<8x673xf32, #tpu.memory_space<vmem>>, vector<8x512xf32>
    %1164 = arith.mulf %1163, %171 : vector<8x512xf32>
    %c0_824 = arith.constant 0 : index
    %c0_825 = arith.constant 0 : index
    %1165 = vector.load %arg14[%c0_824, %c0_825] : memref<72x512xf32, #tpu.memory_space<vmem>>, vector<8x512xf32>
    tpu.vector_store %arg14[%c0_824, %c0_825], %1164 {strides = array<i32>} : memref<72x512xf32, #tpu.memory_space<vmem>>, vector<8x512xf32>,
    %c0_826 = arith.constant 0 : index
    %c96_827 = arith.constant 96 : index
    %1166 = vector.load %arg8[%c0_826, %c96_827] : memref<8x673xf32, #tpu.memory_space<vmem>>, vector<8x512xf32>
    %c8_828 = arith.constant 8 : index
    %c0_829 = arith.constant 0 : index
    %1167 = vector.load %arg14[%c8_828, %c0_829] : memref<72x512xf32, #tpu.memory_space<vmem>>, vector<8x512xf32>
    tpu.vector_store %arg14[%c8_828, %c0_829], %1166 {strides = array<i32>} : memref<72x512xf32, #tpu.memory_space<vmem>>, vector<8x512xf32>,
    %c0_830 = arith.constant 0 : index
    %c97_831 = arith.constant 97 : index
    %1168 = vector.load %arg8[%c0_830, %c97_831] : memref<8x673xf32, #tpu.memory_space<vmem>>, vector<8x512xf32>
    %1169 = arith.mulf %1168, %204 : vector<8x512xf32>
    %c16_832 = arith.constant 16 : index
    %c0_833 = arith.constant 0 : index
    %1170 = vector.load %arg14[%c16_832, %c0_833] : memref<72x512xf32, #tpu.memory_space<vmem>>, vector<8x512xf32>
    tpu.vector_store %arg14[%c16_832, %c0_833], %1169 {strides = array<i32>} : memref<72x512xf32, #tpu.memory_space<vmem>>, vector<8x512xf32>,
    %c0_834 = arith.constant 0 : index
    %c127_835 = arith.constant 127 : index
    %1171 = vector.load %arg8[%c0_834, %c127_835] : memref<8x673xf32, #tpu.memory_space<vmem>>, vector<8x512xf32>
    %1172 = arith.mulf %1171, %171 : vector<8x512xf32>
    %c24_836 = arith.constant 24 : index
    %c0_837 = arith.constant 0 : index
    %1173 = vector.load %arg14[%c24_836, %c0_837] : memref<72x512xf32, #tpu.memory_space<vmem>>, vector<8x512xf32>
    tpu.vector_store %arg14[%c24_836, %c0_837], %1172 {strides = array<i32>} : memref<72x512xf32, #tpu.memory_space<vmem>>, vector<8x512xf32>,
    %c0_838 = arith.constant 0 : index
    %c128_839 = arith.constant 128 : index
    %1174 = vector.load %arg8[%c0_838, %c128_839] : memref<8x673xf32, #tpu.memory_space<vmem>>, vector<8x512xf32>
    %c32_840 = arith.constant 32 : index
    %c0_841 = arith.constant 0 : index
    %1175 = vector.load %arg14[%c32_840, %c0_841] : memref<72x512xf32, #tpu.memory_space<vmem>>, vector<8x512xf32>
    tpu.vector_store %arg14[%c32_840, %c0_841], %1174 {strides = array<i32>} : memref<72x512xf32, #tpu.memory_space<vmem>>, vector<8x512xf32>,
    %c0_842 = arith.constant 0 : index
    %c129_843 = arith.constant 129 : index
    %1176 = vector.load %arg8[%c0_842, %c129_843] : memref<8x673xf32, #tpu.memory_space<vmem>>, vector<8x512xf32>
    %1177 = arith.mulf %1176, %204 : vector<8x512xf32>
    %c40_844 = arith.constant 40 : index
    %c0_845 = arith.constant 0 : index
    %1178 = vector.load %arg14[%c40_844, %c0_845] : memref<72x512xf32, #tpu.memory_space<vmem>>, vector<8x512xf32>
    tpu.vector_store %arg14[%c40_844, %c0_845], %1177 {strides = array<i32>} : memref<72x512xf32, #tpu.memory_space<vmem>>, vector<8x512xf32>,
    %c0_846 = arith.constant 0 : index
    %c159_847 = arith.constant 159 : index
    %1179 = vector.load %arg8[%c0_846, %c159_847] : memref<8x673xf32, #tpu.memory_space<vmem>>, vector<8x512xf32>
    %1180 = arith.mulf %1179, %171 : vector<8x512xf32>
    %c48_848 = arith.constant 48 : index
    %c0_849 = arith.constant 0 : index
    %1181 = vector.load %arg14[%c48_848, %c0_849] : memref<72x512xf32, #tpu.memory_space<vmem>>, vector<8x512xf32>
    tpu.vector_store %arg14[%c48_848, %c0_849], %1180 {strides = array<i32>} : memref<72x512xf32, #tpu.memory_space<vmem>>, vector<8x512xf32>,
    %c0_850 = arith.constant 0 : index
    %c160_851 = arith.constant 160 : index
    %1182 = vector.load %arg8[%c0_850, %c160_851] : memref<8x673xf32, #tpu.memory_space<vmem>>, vector<8x512xf32>
    %c56_852 = arith.constant 56 : index
    %c0_853 = arith.constant 0 : index
    %1183 = vector.load %arg14[%c56_852, %c0_853] : memref<72x512xf32, #tpu.memory_space<vmem>>, vector<8x512xf32>
    tpu.vector_store %arg14[%c56_852, %c0_853], %1182 {strides = array<i32>} : memref<72x512xf32, #tpu.memory_space<vmem>>, vector<8x512xf32>,
    %c0_854 = arith.constant 0 : index
    %c161_855 = arith.constant 161 : index
    %1184 = vector.load %arg8[%c0_854, %c161_855] : memref<8x673xf32, #tpu.memory_space<vmem>>, vector<8x512xf32>
    %1185 = arith.mulf %1184, %204 : vector<8x512xf32>
    %c64_856 = arith.constant 64 : index
    %c0_857 = arith.constant 0 : index
    %1186 = vector.load %arg14[%c64_856, %c0_857] : memref<72x512xf32, #tpu.memory_space<vmem>>, vector<8x512xf32>
    tpu.vector_store %arg14[%c64_856, %c0_857], %1185 {strides = array<i32>} : memref<72x512xf32, #tpu.memory_space<vmem>>, vector<8x512xf32>,
    %c0_858 = arith.constant 0 : index
    %c0_859 = arith.constant 0 : index
    %1187 = vector.load %arg14[%c0_858, %c0_859] : memref<72x512xf32, #tpu.memory_space<vmem>>, vector<72x512xf32>
    %1188 = arith.truncf %1187 : vector<72x512xf32> to vector<72x512xbf16>
    %cst_860 = arith.constant dense<0.000000e+00> : vector<8x512xf32>
    %1189 = tpu.matmul %1159, %1188, %cst_860 {dimension_numbers = #tpu.dot_dimension_numbers<[1], [0], [0], [1], [0, 0, 1, 1], [], []>} : vector<8x72xbf16>, vector<72x512xbf16>, vector<8x512xf32> -> vector<8x512xf32>
    %1190 = vector.broadcast %1161 : vector<8x1xf32> to vector<8x512xf32>
    %1191 = arith.addf %1189, %1190 : vector<8x512xf32>
    %cst_861 = arith.constant 0.000000e+00 : f32
    %1192 = vector.broadcast %cst_861 : f32 to vector<8x512xf32>
    %1193 = arith.maximumf %1191, %1192 : vector<8x512xf32>
    %c0_862 = arith.constant 0 : index
    %c0_863 = arith.constant 0 : index
    %c0_864 = arith.constant 0 : index
    %1194 = vector.load %arg6[%c0_862, %c0_863, %c0_864] : memref<1x8x512xf32, #tpu.memory_space<vmem>>, vector<1x8x512xf32>
    %1195 = vector.shape_cast %1194 : vector<1x8x512xf32> to vector<8x512xf32>
    %1196 = vector.shape_cast %1193 : vector<8x512xf32> to vector<1x8x512xf32>
    tpu.vector_store %arg6[%c0_862, %c0_863, %c0_864], %1196 {strides = array<i32>} : memref<1x8x512xf32, #tpu.memory_space<vmem>>, vector<1x8x512xf32>,
    return
  }
  func.func @transform_0(%arg0: i32) -> (i32, i32, i32) {
    %c0_i32 = arith.constant 0 : i32
    %c0_i32_0 = arith.constant 0 : i32
    %c0_i32_1 = arith.constant 0 : i32
    return %arg0, %c0_i32, %c0_i32_0 : i32, i32, i32
  }
  func.func @transform_1(%arg0: i32) -> (i32, i32, i32) {
    %c0_i32 = arith.constant 0 : i32
    %c0_i32_0 = arith.constant 0 : i32
    %c0_i32_1 = arith.constant 0 : i32
    return %arg0, %c0_i32, %c0_i32_0 : i32, i32, i32
  }
  func.func @transform_2(%arg0: i32) -> (i32, i32, i32) {
    %c0_i32 = arith.constant 0 : i32
    %c0_i32_0 = arith.constant 0 : i32
    %c0_i32_1 = arith.constant 0 : i32
    return %arg0, %c0_i32, %c0_i32_0 : i32, i32, i32
  }
  func.func @transform_3(%arg0: i32) -> (i32, i32, i32) {
    %c0_i32 = arith.constant 0 : i32
    %c0_i32_0 = arith.constant 0 : i32
    %c0_i32_1 = arith.constant 0 : i32
    return %arg0, %c0_i32, %c0_i32_0 : i32, i32, i32
  }
  func.func @transform_4(%arg0: i32) -> (i32, i32) {
    %c0_i32 = arith.constant 0 : i32
    %c0_i32_0 = arith.constant 0 : i32
    %c0_i32_1 = arith.constant 0 : i32
    return %c0_i32, %c0_i32_0 : i32, i32
  }
  func.func @transform_5(%arg0: i32) -> (i32, i32, i32) {
    %c0_i32 = arith.constant 0 : i32
    %c0_i32_0 = arith.constant 0 : i32
    %c0_i32_1 = arith.constant 0 : i32
    return %arg0, %c0_i32, %c0_i32_0 : i32, i32, i32
  }
}

</mosaic_0001>

<bundles_post_ra>
// kernel: forward.1
= control target key start
LH: loop header
LB: loop body
LE: loop exit
PB: predicated region body
PF: predicated region fallthrough
CT: control target
= control target key end

     0   :  { %v11441_v0 = vmov 0.0   ;;  %vm11442_vm0 = vmmov 0   ;;  %v129_v4 = vlaneseq  ;;  %v14897_v6 = vmov 16   ;;  %s11444_s24 = smov 113   ;;  %s11445_s25 = smov 111   ;;  %s14889_s1 = inlined_call_operand.vmem [shape: f32[1,16,128], index: 1, kind: input, shape index: {}]   ;;  %s14890_s4 = inlined_call_operand.vmem [shape: bf16[656,512], index: 4, kind: input, shape index: {}]   ;;  %s14891_s0 = inlined_call_operand.vmem [shape: f32[1,8,512], index: 0, kind: input, shape index: {}]   ;;  %s14892_s2 = inlined_call_operand.vmem [shape: f32[1,32,32], index: 2, kind: input, shape index: {}]   ;;  %s14893_s3 = inlined_call_operand.vmem [shape: f32[1,64,8], index: 3, kind: input, shape index: {}]   ;;  %s14894_s5 = inlined_call_operand.vmem [shape: f32[1,8,512], index: 5, kind: output, shape index: {}]  }
   0x1   :  { %9711 = vmatprep.subr.bf16.mxu1 %v11441_v0  ;;  %21 = vst [vmem:[#allocation2] sm:$0xff] %v11441_v0  ;;  %v57_v1 = vld [vmem:[%s14889_s1] sm:$0xff]  ;;  %v58_v2 = vld [vmem:[%s14889_s1 + $0x8] sm:$0xff]  ;;  %9713 = vmatprep.mubr.msk.bf16.mxu1 %vm11442_vm0, %v11441_v0  ;;  %vm79_vm1 = vcmask 130048   ;;  %s11446_s26 = smov 127   ;;  %s11447_s27 = smov 1  }
   0x2   :  { %v71_v3 = vld [vmem:[%s14890_s4] sm:$0xf]  ;;  %v73_v5 = vpack.c.bf16 %v58_v2, %v57_v1  ;;  %10216 = vset.pattern.permute.xlu0 %v14897_v6  ;;  %v11521_v8 = vand.u32 127, %v129_v4  ;;  %s11448_s28 = smov 15   ;;  %s11449_s29 = smov 17   ;;  %vm22_vm4 = vcmask 138240  }
   0x3   :  { %v72_v7 = vunpack.c.l.bf16 %v71_v3  ;;  %23 = vst.msk [vmem:[#allocation2 + $0x10] sm:$0xff] %vm22_vm4, %v11441_v0  ;;  %34 = vst.msk [vmem:[#allocation5 + $0x10] sm:$0xff] %vm22_vm4, %v11441_v0  ;;  %s11450_s30 = smov 16   ;;  %v11587_v48 = vld [vmem:[%s14890_s4 + $0x20] sm:$0xf]  ;;  %s11451_s10 = smov 112  }
   0x4   :  { %9712 = vmatpush3.bf16.msra.mxu1 %v73_v5  ;;  %v135_v9 = vand.u32 7, %v11521_v8  ;;  %35 = vst.msk [vmem:[#allocation5 + $0x28] sm:$0xff] %vm22_vm4, %v11441_v0  ;;  %v11168_v49 = vld [vmem:[%s14890_s4 + $0x384] ss:$16 sps:$4 sm:$0xff]   ;;  %v125_v50 = vunpack.c.l.bf16 %v11587_v48  ;;  %v11173_v51 = vld [vmem:[%s14890_s4 + $0x380] ss:$16 sps:$4 sm:$0xff]  }
   0x5   :  { %76 = vperm.xlu0 %10216, %v72_v7   ;;  %9717 = vmatprep.subr.bf16.mxu1 %v11441_v0  ;;  %v11174_v52 = vld [vmem:[%s14890_s4 + $0x3a4] ss:$16 sps:$4 sm:$0xff]   ;;  %v14899_v53 = vmov 72   ;;  %v11179_v54 = vld [vmem:[%s14890_s4 + $0x3a0] ss:$16 sps:$4 sm:$0xff]   ;;  %vm212_vm5 = vcmask 7168  }
   0x6   :  { %v177_v10 = vadd.s32 1, %v135_v9  ;;  %v143_v11 = vadd.s32 4294967295, %v135_v9  ;;  %10257 = vset.pattern.permute.xlu1 %v14899_v53  ;;  %542 = vmatprep.subr.bf16.mxu0 %v11168_v49  ;;  %v11180_v55 = vld [vmem:[%s14890_s4 + $0x3c4] ss:$16 sps:$4 sm:$0xff]   ;;  %v11185_v56 = vld [vmem:[%s14890_s4 + $0x3c0] ss:$16 sps:$4 sm:$0xff]  }
   0x7   :  { %9714 = vmatmul.mubr.msk.bf16.vlgmr.msra.gmra.mrb[0].mxu1 %vm79_vm1, %v71_v3  ;;  %543 = vmatpush1.bf16.msra.mxu0 %v11173_v51  ;;  %v11186_v57 = vld [vmem:[%s14890_s4 + $0x3e4] ss:$16 sps:$4 sm:$0xff]   ;;  %v11191_v58 = vld [vmem:[%s14890_s4 + $0x3e0] ss:$16 sps:$4 sm:$0xff]   ;;  %vm195_vm6 = vcmask 121856   ;;  %vm231_vm7 = vcmask 1039360  }
   0x8   :  { %9727 = vmatprep.mubr.msk.bf16.mxu1 %vm11442_vm0, %v11441_v0  ;;  %vm179_vm2 = vcmp.lt.s32.totalorder %v177_v10, 8  ;;  %vm144_vm3 = vcmp.ge.s32.totalorder %v143_v11, 0  ;;  %544 = vmatprep.subr.bf16.mxu0 %v11174_v52  ;;  %v11192_v59 = vld [vmem:[%s14890_s4 + $0x404] ss:$16 sps:$4 sm:$0xff]   ;;  %v11197_v60 = vld [vmem:[%s14890_s4 + $0x400] ss:$16 sps:$4 sm:$0xff]  }
   0x9   :  { %v9265_v12 = vsel %vm179_vm2, 1.0, %v11441_v0  ;;  %v9264_v13 = vsel %vm144_vm3, 1.0, %v11441_v0  ;;  %v11198_v61 = vld [vmem:[%s14890_s4 + $0x424] ss:$16 sps:$4 sm:$0xff]   ;;  %v11203_v62 = vld [vmem:[%s14890_s4 + $0x420] ss:$16 sps:$4 sm:$0xff]  }
   0xa   :  { %184 = vrot.lane.b32.xlu1 %v9265_v12, %s11444_s24  ;;  %150 = vrot.lane.b32.xlu0 %v9264_v13, %s11445_s25  ;;  %v236_v31 = vld [vmem:[#allocation2 + $0x10] sm:$0xff]  ;;  %vm14895_vm8 = vcmask 908288   ;;  %vm14981_vm9 = vcmask 924672   ;;  %vm14896_vm10 = vcmask 916480   ;;  %vm304_vm11 = vcmask 1043456   ;;  %s14946_s22 = smov 95  }
   0xb   :  { %545 = vmatpush1.bf16.msra.mxu0 %v11179_v54  ;;  %v11204_v63 = vld [vmem:[%s14890_s4 + $0x444] ss:$16 sps:$4 sm:$0xff]   ;;  %v11209_v1 = vld [vmem:[%s14890_s4 + $0x440] ss:$16 sps:$4 sm:$0xff]   ;;  %vm300_vm12 = vcmask 588800   ;;  %s14948_s23 = smov 97  }
   0xc   :  { %546 = vmatprep.subr.bf16.mxu0 %v11180_v55  ;;  %v11178_v51 = vld [vmem:[%s14890_s4 + $0x3ac] ss:$16 sps:$4 sm:$0xff]   ;;  %v11176_v52 = vld [vmem:[%s14890_s4 + $0x3a8] ss:$16 sps:$4 sm:$0xff]   ;;  %s14950_s6 = smov 31   ;;  %s14960_s7 = smov 33  }
   0xd   :  { %v11184_v54 = vld [vmem:[%s14890_s4 + $0x3cc] ss:$16 sps:$4 sm:$0xff]   ;;  %v11182_v55 = vld [vmem:[%s14890_s4 + $0x3c8] ss:$16 sps:$4 sm:$0xff]   ;;  %s11458_s8 = smov 32   ;;  %s11460_s20 = smov 96  }
   0xe   :  { %201 = vrot.lane.b32.xlu1 %v9264_v13, %s11446_s26  ;;  %220 = vrot.lane.b32.xlu0 %v9265_v12, %s11447_s27  ;;  %s14962_s21 = smov 119   ;;  %s11462_s9 = smov 121  }
   0xf   :  { %547 = vmatpush1.bf16.msra.mxu0 %v11185_v56  ;;  %v11188_v56 = vld [vmem:[%s14890_s4 + $0x3e8] ss:$16 sps:$4 sm:$0xff]   ;;  %s11463_s13 = smov 7   ;;  %s11464_s14 = smov 9  }
  0x10   :  { %548 = vmatprep.subr.bf16.mxu0 %v11186_v57  ;;  %v11196_v57 = vld [vmem:[%s14890_s4 + $0x40c] ss:$16 sps:$4 sm:$0xff]   ;;  %s11465_s11 = smov 8   ;;  %s14945_s12 = smov 80  }
  0x11   :  { %s14944_s15 = smov 48   ;;  %s11469_s16 = smov 120  }
  0x12   :  { %237 = vrot.lane.b32.xlu1 %v9264_v13, %s11448_s28  ;;  %266 = vrot.lane.b32.xlu0 %v9265_v12, %s11449_s29  ;;  %s11471_s17 = smov 125   ;;  %s11472_s18 = smov 123  }
  0x13   :  { %549 = vmatpush1.bf16.msra.mxu0 %v11191_v58  ;;  %v11194_v58 = vld [vmem:[%s14890_s4 + $0x408] ss:$16 sps:$4 sm:$0xff]  }
  0x14   :  { %550 = vmatprep.subr.bf16.mxu0 %v11192_v59  ;;  %v11202_v59 = vld [vmem:[%s14890_s4 + $0x42c] ss:$16 sps:$4 sm:$0xff]  }
  0x17   :  { %551 = vmatpush1.bf16.msra.mxu0 %v11197_v60  ;;  %v11200_v60 = vld [vmem:[%s14890_s4 + $0x428] ss:$16 sps:$4 sm:$0xff]  }
  0x18   :  { %552 = vmatprep.subr.bf16.mxu0 %v11198_v61  ;;  %v11208_v61 = vld [vmem:[%s14890_s4 + $0x44c] ss:$16 sps:$4 sm:$0xff]  }
  0x1b   :  { %553 = vmatpush1.bf16.msra.mxu0 %v11203_v62  ;;  %v11206_v62 = vld [vmem:[%s14890_s4 + $0x448] ss:$16 sps:$4 sm:$0xff]  }
  0x1c   :  { %554 = vmatprep.subr.bf16.mxu0 %v11204_v63  ;;  %v11210_v63 = vld [vmem:[%s14890_s4 + $0x464] ss:$16 sps:$4 sm:$0xff]  }
  0x1f   :  { %555 = vmatpush1.bf16.msra.mxu0 %v11209_v1  ;;  %v11214_v1 = vld [vmem:[%s14890_s4 + $0x46c] ss:$16 sps:$4 sm:$0xff]  }
  0x20   :  { %556 = vmatprep.subr.bf16.mxu0 %v11210_v63 }
  0x7c   :  { %v11542_v15 = vpop.permute.xlu1 %184 }
  0x7d   :  { %v187_v33 = vmul.f32 0.0, %v11542_v15 }
  0x80   :  { %v11546_v18 = vpop.permute.xlu1 %201 }
  0x81   :  { %v204_v28 = vmul.f32 0.0, %v11546_v18 }
  0x84   :  { %v77_v14 = vpop.permute.xlu0 %76  ;;  %v11560_v30 = vpop.permute.xlu1 %237 }
  0x85   :  { %v241_v37 = vmul.f32 %v11560_v30, %v236_v31 }
  0x88   :  { %v11544_v16 = vpop.permute.xlu0 %150 }
  0x89   :  { %v153_v24 = vmul.f32 0.0, %v11544_v16 }
  0x8c   :  { %v11551_v25 = vpop.permute.xlu0 %220 }
  0x8d   :  { %v224_v41 = vmul.f32 %v236_v31, %v11551_v25 }
  0x90   :  { %v11570_v38 = vpop.permute.xlu0 %266 }
  0x91   :  { %15014 = vst [vmem:[#allocation11_spill] sm:$0xff] %v11570_v38  ;;  %v270_v44 = vmul.f32 %v11570_v38, %v236_v31 }
  0xda   :  { %v117_v17 = vpop.f32.mrb[0].mxu1 }
  0xdb   :  { %v118_v19 = vadd.f32 %v117_v17, %v77_v14  ;;  %v9715_v20 = vpop.f32.mrb[1].mxu1 }
  0xdc   :  { %v120_v21 = vpop.f32.mrb[2].mxu1 }
  0xdd   :  { %v11548_v22 = vmax.f32 %v118_v19, 0.0  ;;  %v9716_v23 = vpop.f32.mrb[3].mxu1 }
  0xdf   :  { %v10217_v26 = vpack.i.bf16 %v11548_v22, %v11441_v0  ;;  %v154_v27 = vmul.f32 %v11544_v16, %v11548_v22  ;;  %v205_v29 = vmul.f32 %v11546_v18, %v11548_v22  ;;  %v188_v34 = vmul.f32 %v11542_v15, %v11548_v22 }
  0xe0   :  { %v240_v36 = vmul.f32 %v11560_v30, %v11548_v22  ;;  %v223_v40 = vmul.f32 %v11551_v25, %v11548_v22  ;;  %v269_v43 = vmul.f32 %v11570_v38, %v11548_v22  ;;  %v10242_v47 = vpack.i.bf16 %v236_v31, %v11548_v22 }
  0xe1   :  { %10218 = vrot.lane.b32.xlu0 %v10217_v26, %s11450_s30  ;;  %v10222_v32 = vpack.i.bf16 %v154_v27, %v153_v24  ;;  %v10232_v35 = vpack.i.bf16 %v205_v29, %v204_v28  ;;  %v10227_v39 = vpack.i.bf16 %v188_v34, %v187_v33 }
  0xe2   :  { %v10247_v42 = vpack.i.bf16 %v241_v37, %v240_v36  ;;  %v10237_v45 = vpack.i.bf16 %v224_v41, %v223_v40  ;;  %v10252_v46 = vpack.i.bf16 %v270_v44, %v269_v43 }
  0xe3   :  { %10223 = vrot.lane.b32.xlu1 %v10222_v32, %s11449_s29 }
  0xe5   :  { %10233 = vrot.lane.b32.xlu0 %v10232_v35, %s11447_s27 }
  0xe7   :  { %10228 = vrot.lane.b32.xlu1 %v10227_v39, %s11448_s28 }
  0xe9   :  { %10248 = vrot.lane.b32.xlu0 %v10247_v42, %s11444_s24 }
  0xeb   :  { %10238 = vrot.lane.b32.xlu1 %v10237_v45, %s11446_s26 }
  0xed   :  { %10253 = vrot.lane.b32.xlu0 %v10252_v46, %s11445_s25 }
  0xef   :  { %10243 = vrot.lane.b32.xlu1 %v10242_v47, %s11451_s10 }
  0xf3   :  { %297 = vperm.xlu1 %10257, %v125_v50   ;;  %v11170_v50 = vld [vmem:[%s14890_s4 + $0x388] ss:$16 sps:$4 sm:$0xff]  }
 0x153   :  { %v10219_v2 = vpop.permute.xlu0 %10218 }
 0x154   :  { %v10221_v3 = vunpack.i.h.bf16 %v10219_v2  ;;  %v10220_v4 = vunpack.i.l.bf16 %v10219_v2  ;;  %v11212_v2 = vld [vmem:[%s14890_s4 + $0x468] ss:$16 sps:$4 sm:$0xff]  }
 0x155   :  { %v10224_v5 = vpop.permute.xlu1 %10223 }
 0x156   :  { %v10226_v7 = vunpack.i.h.bf16 %v10224_v5  ;;  %v10225_v9 = vunpack.i.l.bf16 %v10224_v5  ;;  %v172_v11 = vsel %vm79_vm1, %v10220_v4, %v10221_v3  ;;  %v11215_v3 = vld [vmem:[%s14890_s4 + $0x460] ss:$16 sps:$4 sm:$0xff]   ;;  %v14903_v4 = vmov 0  }
 0x157   :  { %v10234_v10 = vpop.permute.xlu0 %10233  ;;  %557 = vmatpush1.bf16.msra.mxu0 %v11215_v3  ;;  %574 = vmatprep.mubr.bf16.mxu0 %v14903_v4  ;;  %v639_v5 = vadd.s32 128, %v11521_v8 }
 0x158   :  { %v161_v12 = vsel %vm22_vm4, %v10225_v9, %v10226_v7  ;;  %v10236_v13 = vunpack.i.h.bf16 %v10234_v10  ;;  %v10235_v14 = vunpack.i.l.bf16 %v10234_v10  ;;  %v646_v7 = vand.u32 15, %v11521_v8  ;;  %10374 = vset.pattern.permute.xlu1 %v14903_v4 }
 0x159   :  { %v10229_v17 = vpop.permute.xlu1 %10228  ;;  %v290_v19 = vpack.c.bf16 %v172_v11, %v161_v12  ;;  %v640_v9 = vadd.s32 256, %v11521_v8  ;;  %v653_v10 = vand.u32 15, %v639_v5 }
 0x15a   :  { %v10231_v20 = vunpack.i.h.bf16 %v10229_v17  ;;  %v10230_v21 = vunpack.i.l.bf16 %v10229_v17  ;;  %v213_v24 = vsel %vm212_vm5, %v10235_v14, %v10236_v13  ;;  %v690_v11 = vadd.s32 4294967295, %v646_v7 }
 0x15b   :  { %v10249_v23 = vpop.permute.xlu0 %10248  ;;  %9718 = vmatpush3.bf16.msra.mxu1 %v290_v19  ;;  %v660_v12 = vand.u32 15, %v640_v9  ;;  %v805_v13 = vadd.s32 1, %v646_v7  ;;  %v691_v14 = vadd.s32 4294967295, %v653_v10  ;;  %v806_v19 = vadd.s32 1, %v653_v10 }
 0x15c   :  { %v196_v26 = vsel %vm195_vm6, %v10230_v21, %v10231_v20  ;;  %9719 = vmatprep.subr.bf16.mxu1 %v11441_v0  ;;  %v10251_v32 = vunpack.i.h.bf16 %v10249_v23  ;;  %v10250_v34 = vunpack.i.l.bf16 %v10249_v23  ;;  %vm694_vm13 = vcmp.ge.s32.totalorder %v690_v11, 0 }
 0x15d   :  { %v10239_v27 = vpop.permute.xlu1 %10238  ;;  %v291_v28 = vpack.c.bf16 %v213_v24, %v196_v26  ;;  %v692_v17 = vadd.s32 4294967295, %v660_v12  ;;  %v9299_v20 = vsel %vm694_vm13, 1.0, %v11441_v0  ;;  %vm813_vm14 = vcmp.lt.s32.totalorder %v805_v13, 16 }
 0x15e   :  { %v10241_v29 = vunpack.i.h.bf16 %v10239_v27  ;;  %v10240_v31 = vunpack.i.l.bf16 %v10239_v27  ;;  %v249_v44 = vsel %vm14981_vm9, %v10250_v34, %v10251_v32  ;;  %v807_v21 = vadd.s32 1, %v660_v12 }
 0x15f   :  { %v10254_v33 = vpop.permute.xlu0 %10253  ;;  %9720 = vmatpush3.bf16.msra.mxu1 %v291_v28  ;;  %vm695_vm15 = vcmp.ge.s32.totalorder %v691_v14, 0  ;;  %vm696_vm2 = vcmp.ge.s32.totalorder %v692_v17, 0  ;;  %vm814_vm3 = vcmp.lt.s32.totalorder %v806_v19, 16  ;;  %v9303_v23 = vsel %vm813_vm14, 1.0, %v11441_v0 }
 0x160   :  { %v232_v35 = vsel %vm231_vm7, %v10240_v31, %v10241_v29  ;;  %v10256_v36 = vunpack.i.h.bf16 %v10254_v33  ;;  %v10255_v37 = vunpack.i.l.bf16 %v10254_v33  ;;  %9721 = vmatprep.subr.bf16.mxu1 %v11441_v0  ;;  %v9300_v24 = vsel %vm695_vm15, 1.0, %v11441_v0 }
 0x161   :  { %v10244_v39 = vpop.permute.xlu1 %10243  ;;  %v292_v40 = vpack.c.bf16 %v232_v35, %v11548_v22  ;;  %v11172_v22 = vld [vmem:[%s14890_s4 + $0x38c] ss:$16 sps:$4 sm:$0xff]   ;;  %v9301_v26 = vsel %vm696_vm2, 1.0, %v11441_v0  ;;  %v9304_v27 = vsel %vm814_vm3, 1.0, %v11441_v0  ;;  %v10258_v28 = vpack.i.bf16 %v9300_v24, %v9299_v20 }
 0x162   :  { %v10246_v41 = vunpack.i.h.bf16 %v10244_v39  ;;  %v10245_v42 = vunpack.i.l.bf16 %v10244_v39  ;;  %v278_v43 = vsel %vm14895_vm8, %v10255_v37, %v10256_v36  ;;  %vm815_vm8 = vcmp.lt.s32.totalorder %v807_v21, 16  ;;  %722 = vrot.lane.b32.xlu1 %v9301_v26, %s14946_s22 }
 0x163   :  { %9722 = vmatpush3.bf16.msra.mxu1 %v292_v40  ;;  %v294_v47 = vpack.c.bf16 %v278_v43, %v278_v43  ;;  %v9305_v29 = vsel %vm815_vm8, 1.0, %v11441_v0  ;;  %10259 = vrot.lane.b32.xlu0 %v10258_v28, %s14946_s22  ;;  %v10263_v31 = vpack.i.bf16 %v9304_v27, %v9303_v23  ;;  %vm14968_vm8 = vcmask 269312  }
 0x164   :  { %v261_v45 = vsel %vm14896_vm10, %v10245_v42, %v10246_v41  ;;  %9723 = vmatprep.subr.bf16.mxu1 %v11441_v0  ;;  %26 = vst.msk [vmem:[#allocation3 + $0x28] sm:$0xff] %vm14968_vm8, %v11441_v0  ;;  %vm14942_vm13 = vcmask 777216   ;;  %vm14952_vm14 = vcmask 793600   ;;  %vm14953_vm15 = vcmask 252928  }
 0x165   :  { %v293_v46 = vpack.c.bf16 %v261_v45, %v249_v44  ;;  %v306_v49 = vsel %vm304_vm11, %v294_v47, 0 }
 0x166   :  { %837 = vrot.lane.b32.xlu1 %v9305_v29, %s14948_s23 }
 0x167   :  { %9724 = vmatpush3.bf16.msra.mxu1 %v293_v46  ;;  %10264 = vrot.lane.b32.xlu0 %v10263_v31, %s14948_s23 }
 0x168   :  { %9725 = vmatprep.subr.bf16.mxu1 %v11441_v0 }
 0x16a   :  { %892 = vrot.lane.b32.xlu1 %v9301_v26, %s11446_s26 }
 0x16b   :  { %9726 = vmatpush3.bf16.msra.mxu1 %v306_v49  ;;  %10269 = vrot.lane.b32.xlu0 %v10258_v28, %s11446_s26 }
 0x16c   :  { %583 = vmatprep.subr.bf16.mxu1 %v11172_v22 }
 0x16e   :  { %9728 = vmatmul.mubr.msk.bf16.vlgmr.msra.gmra.mrb[4].mxu1 %vm300_vm12, %v11587_v48  ;;  %v11190_v48 = vld [vmem:[%s14890_s4 + $0x3ec] ss:$16 sps:$4 sm:$0xff]   ;;  %953 = vrot.lane.b32.xlu1 %v9305_v29, %s11447_s27 }
 0x16f   :  { %584 = vmatpush1.bf16.msra.mxu1 %v11170_v50  ;;  %615 = vmatprep.mubr.bf16.mxu1 %v14903_v4  ;;  %v11749_v50 = vld [vmem:[%s14890_s4 + $0x60] sm:$0xf] }
 0x170   :  { %585 = vmatprep.subr.bf16.mxu1 %v11178_v51  ;;  %10274 = vrot.lane.b32.xlu0 %v10263_v31, %s11447_s27  ;;  %v11754_v51 = vld [vmem:[%s14890_s4 + $0x70] sm:$0xf] }
 0x172   :  { %1006 = vrot.lane.b32.xlu1 %v9301_v26, %s14950_s6  ;;  %v298_v32 = vpop.permute.xlu1 %297 }
 0x173   :  { %586 = vmatpush1.bf16.msra.mxu1 %v11176_v52  ;;  %v14901_v52 = vmov 32  }
 0x174   :  { %587 = vmatprep.subr.bf16.mxu1 %v11184_v54  ;;  %10279 = vrot.lane.b32.xlu0 %v10258_v28, %s14950_s6 }
 0x175   :  { %10328 = vset.pattern.permute.xlu0 %v14901_v52 }
 0x176   :  { %1092 = vrot.lane.b32.xlu1 %v9305_v29, %s14960_s7 }
 0x177   :  { %588 = vmatpush1.bf16.msra.mxu1 %v11182_v55 }
 0x178   :  { %589 = vmatprep.subr.bf16.mxu1 %v11190_v48  ;;  %10284 = vrot.lane.b32.xlu0 %v10263_v31, %s14960_s7 }
 0x17a   :  { %777 = vrot.lane.b32.xlu1 %v11441_v0, %s11458_s8  ;;  %v9311_v0 = vcombine.low %v11749_v50, %v11754_v51 }
 0x17b   :  { %590 = vmatpush1.bf16.msra.mxu1 %v11188_v56  ;;  %v53_v56 = vld [vmem:[%s14891_s0] sm:$0xff] }
 0x17c   :  { %591 = vmatprep.subr.bf16.mxu1 %v11196_v57 }
 0x17f   :  { %592 = vmatpush1.bf16.msra.mxu1 %v11194_v58 }
 0x180   :  { %593 = vmatprep.subr.bf16.mxu1 %v11202_v59  ;;  %v54_v59 = vld [vmem:[%s14891_s0 + $0x8] sm:$0xff] }
 0x183   :  { %594 = vmatpush1.bf16.msra.mxu1 %v11200_v60 }
 0x184   :  { %595 = vmatprep.subr.bf16.mxu1 %v11208_v61 }
 0x187   :  { %596 = vmatpush1.bf16.msra.mxu1 %v11206_v62 }
 0x188   :  { %597 = vmatprep.subr.bf16.mxu1 %v11214_v1 }
 0x18b   :  { %598 = vmatpush1.bf16.msra.mxu1 %v11212_v2 }
 0x1d4   :  { %v11759_v54 = vpop.permute.xlu1 %722 }
 0x1d5   :  { %v10260_v41 = vpop.permute.xlu0 %10259 }
 0x1d6   :  { %v11730_v43 = vunpack.i.l.bf16 %v10260_v41  ;;  %v10262_v48 = vunpack.i.h.bf16 %v10260_v41 }
 0x1d8   :  { %15015 = vst [vmem:[#allocation12_spill] sm:$0xff] %v11730_v43  ;;  %v735_v45 = vmul.f32 0.0, %v11730_v43  ;;  %v11761_v55 = vpop.permute.xlu1 %837  ;;  %v11777_v5 = vsel %vm14942_vm13, %v11730_v43, %v10262_v48  ;;  %v11783_v11 = vsel %vm14942_vm13, %v10262_v48, %v11759_v54 }
 0x1d9   :  { %v10265_v42 = vpop.permute.xlu0 %10264 }
 0x1da   :  { %v11732_v44 = vunpack.i.l.bf16 %v10265_v42  ;;  %745 = vrot.lane.b32.xlu0 %v735_v45, %s14960_s7  ;;  %v10267_v62 = vunpack.i.h.bf16 %v10265_v42 }
 0x1dc   :  { %15016 = vst [vmem:[#allocation13_spill] sm:$0xff] %v11732_v44  ;;  %v850_v22 = vmul.f32 0.0, %v11732_v44  ;;  %v11766_v57 = vpop.permute.xlu1 %892  ;;  %v11795_v21 = vsel %vm14952_vm14, %v11732_v44, %v10267_v62  ;;  %v11799_v23 = vsel %vm14952_vm14, %v10267_v62, %v11761_v55 }
 0x1dd   :  { %v10270_v46 = vpop.permute.xlu0 %10269 }
 0x1de   :  { %v11735_v47 = vunpack.i.l.bf16 %v10270_v46  ;;  %860 = vrot.lane.b32.xlu0 %v850_v22, %s14950_s6  ;;  %v10272_v63 = vunpack.i.h.bf16 %v10270_v46 }
 0x1e0   :  { %15017 = vst [vmem:[#allocation14_spill] sm:$0xff] %v11735_v47  ;;  %v904_v49 = vmul.f32 0.0, %v11735_v47  ;;  %v11803_v24 = vsel %vm231_vm7, %v11735_v47, %v10272_v63  ;;  %v11807_v26 = vsel %vm231_vm7, %v10272_v63, %v11766_v57  ;;  %v11809_v27 = vpop.permute.xlu1 %953 }
 0x1e1   :  { %15019 = vst [vmem:[#allocation16_spill] sm:$0xff] %v11803_v24  ;;  %15020 = vst [vmem:[#allocation17_spill] sm:$0xff] %v11807_v26 }
 0x1e2   :  { %914 = vrot.lane.b32.xlu1 %v904_v49, %s11447_s27  ;;  %v10275_v58 = vpop.permute.xlu0 %10274 }
 0x1e3   :  { %v11787_v17 = vunpack.i.l.bf16 %v10275_v58 }
 0x1e4   :  { %v11839_v22 = vpop.permute.xlu1 %1006 }
 0x1e5   :  { %15018 = vst [vmem:[#allocation15_spill] sm:$0xff] %v11787_v17 }
 0x1e6   :  { %v10280_v28 = vpop.permute.xlu0 %10279 }
 0x1e7   :  { %v10282_v46 = vunpack.i.h.bf16 %v10280_v28 }
 0x1e9   :  { %v11856_v62 = vsel %vm14953_vm15, %v10282_v46, %v11839_v22 }
 0x1ea   :  { %v10285_v49 = vpop.permute.xlu0 %10284  ;;  %15025 = vst [vmem:[#allocation22_spill] sm:$0xff] %v11856_v62 }
 0x1eb   :  { %v10287_v63 = vunpack.i.h.bf16 %v10285_v49 }
 0x241   :  { %v342_v33 = vpop.f32.mrb[4].mxu1 }
 0x242   :  { %v343_v34 = vadd.f32 %v342_v33, %v298_v32  ;;  %v9729_v35 = vpop.f32.mrb[5].mxu1  ;;  %v10277_v33 = vunpack.i.h.bf16 %v10275_v58 }
 0x243   :  { %v345_v36 = vpop.f32.mrb[6].mxu1 }
 0x244   :  { %v348_v37 = vmax.f32 %v343_v34, 0.0  ;;  %v9730_v39 = vpop.f32.mrb[7].mxu1  ;;  %v55_v34 = vld [vmem:[%s14891_s0 + $0x10] sm:$0xff]  ;;  %v11833_v42 = vsel %vm212_vm5, %v11787_v17, %v10277_v33  ;;  %v11837_v45 = vsel %vm212_vm5, %v10277_v33, %v11809_v27 }
 0x245   :  { %15022 = vst [vmem:[#allocation19_spill] sm:$0xff] %v11833_v42  ;;  %15023 = vst [vmem:[#allocation20_spill] sm:$0xff] %v11837_v45 }
 0x246   :  { %v381_v40 = vpack.c.bf16 %v348_v37, %v348_v37 }
 0x248   :  { %575 = vmatmul.mubr.bf16.vlgmr.msra.gmra.mrb[0].mxu0 %v381_v40  ;;  %616 = vmatmul.mubr.bf16.vlgmr.msra.gmra.mrb[8].mxu1 %v381_v40  ;;  %v11828_v40 = vunpack.i.l.bf16 %v10280_v28 }
 0x249   :  { %1244 = vmatprep.mubr.bf16.mxu0 %v14903_v4  ;;  %1285 = vmatprep.mubr.bf16.mxu1 %v14903_v4 }
 0x24a   :  { %15021 = vst [vmem:[#allocation18_spill] sm:$0xff] %v11828_v40 }
 0x31b   :  { %v576_v60 = vpop.f32.mrb[0].mxu0  ;;  %v617_v61 = vpop.f32.mrb[8].mxu1 }
 0x31c   :  { %v11771_v1 = vadd.f32 %v576_v60, %v53_v56  ;;  %v578_v2 = vpop.f32.mrb[1].mxu0  ;;  %v11773_v3 = vpop.f32.mrb[9].mxu1  ;;  %v11826_v39 = vadd.f32 %v617_v61, %v55_v34  ;;  %v641_v56 = vadd.s32 384, %v11521_v8  ;;  %v11852_v61 = vsel %vm14953_vm15, %v11828_v40, %v10282_v46  ;;  %v11891_v46 = vld [vmem:[#allocation2] sm:$0xff] }
 0x31d   :  { %v11779_v7 = vadd.f32 %v578_v2, %v54_v59  ;;  %v580_v9 = vpop.f32.mrb[2].mxu0  ;;  %v621_v10 = vpop.f32.mrb[10].mxu1  ;;  %15024 = vst [vmem:[#allocation21_spill] sm:$0xff] %v11852_v61  ;;  %v11858_v2 = vunpack.i.l.bf16 %v10285_v49  ;;  %v1300_v34 = vunpack.c.l.bf16 %v11749_v50 }
 0x31e   :  { %v581_v12 = vpop.f32.mrb[3].mxu0  ;;  %v622_v13 = vpop.f32.mrb[11].mxu1  ;;  %v736_v14 = vmul.f32 %v11777_v5, %v11771_v1  ;;  %v851_v31 = vmul.f32 %v11795_v21, %v11771_v1  ;;  %v965_v35 = vmul.f32 %v11787_v17, %v11771_v1  ;;  %v905_v36 = vmul.f32 %v11803_v24, %v11771_v1 }
 0x31f   :  { %v10288_v19 = vpack.i.bf16 %v11779_v7, %v11771_v1  ;;  %v737_v20 = vmul.f32 %v11783_v11, %v11779_v7  ;;  %v852_v32 = vmul.f32 %v11799_v23, %v11779_v7  ;;  %v906_v37 = vmul.f32 %v11807_v26, %v11779_v7  ;;  %15026 = vst [vmem:[#allocation23_spill] sm:$0xff] %v11858_v2  ;;  %v11863_v12 = vpop.permute.xlu1 %1092 }
 0x320   :  { %v1018_v58 = vmul.f32 %v11828_v40, %v11771_v1  ;;  %v966_v59 = vmul.f32 %v11833_v42, %v11779_v7  ;;  %v967_v60 = vmul.f32 %v11837_v45, %v11826_v39  ;;  %v10308_v9 = vpack.i.bf16 %v11826_v39, %v11779_v7 }
 0x321   :  { %10289 = vrot.lane.b32.xlu1 %v10288_v19, %s11458_s8  ;;  %v10293_v29 = vpack.i.bf16 %v737_v20, %v736_v14  ;;  %v10298_v41 = vpack.i.bf16 %v852_v32, %v851_v31  ;;  %v10303_v48 = vpack.i.bf16 %v906_v37, %v905_v36  ;;  %v667_v10 = vand.u32 15, %v641_v56 }
 0x322   :  { %v10313_v13 = vpack.i.bf16 %v967_v60, %v966_v59  ;;  %v1019_v14 = vmul.f32 %v11852_v61, %v11779_v7  ;;  %v1020_v19 = vmul.f32 %v11856_v62, %v11826_v39  ;;  %v11872_v20 = vsel %vm14968_vm8, %v11858_v2, %v10287_v63 }
 0x323   :  { %10294 = vrot.lane.b32.xlu0 %v10293_v29, %s14960_s7  ;;  %15027 = vst [vmem:[#allocation24_spill] sm:$0xff] %v11872_v20  ;;  %v693_v28 = vadd.s32 4294967295, %v667_v10  ;;  %v11877_v29 = vsel %vm14968_vm8, %v10287_v63, %v11863_v12  ;;  %v1104_v32 = vmul.f32 %v11858_v2, %v11771_v1  ;;  %v1105_v33 = vmul.f32 %v11872_v20, %v11779_v7 }
 0x324   :  { %15028 = vst [vmem:[#allocation25_spill] sm:$0xff] %v11877_v29  ;;  %v10318_v31 = vpack.i.bf16 %v1020_v19, %v1019_v14  ;;  %v1301_v36 = vunpack.c.l.bf16 %v11754_v51  ;;  %v808_v37 = vadd.s32 1, %v667_v10  ;;  %v56_v10 = vld [vmem:[%s14891_s0 + $0x18] sm:$0xff]  ;;  %v778_v19 = vpop.permute.xlu1 %777  ;;  %s11467_s0 = smov 64  }
 0x325   :  { %975 = vrot.lane.b32.xlu1 %v965_v35, %s11446_s26  ;;  %v1106_v35 = vmul.f32 %v11877_v29, %v11826_v39  ;;  %vm697_vm2 = vcmp.ge.s32.totalorder %v693_v28, 0  ;;  %v746_v28 = vpop.permute.xlu0 %745 }
 0x326   :  { %v9302_v49 = vsel %vm697_vm2, 1.0, %v11891_v46  ;;  %vm816_vm3 = vcmp.lt.s32.totalorder %v808_v37, 16 }
 0x327   :  { %10299 = vrot.lane.b32.xlu0 %v10298_v41, %s14950_s6  ;;  %v10323_v41 = vpack.i.bf16 %v1105_v33, %v1104_v32  ;;  %v9306_v56 = vsel %vm816_vm3, 1.0, %v11891_v46  ;;  %vm14943_vm3 = vcmask 785408  }
 0x329   :  { %10304 = vrot.lane.b32.xlu1 %v10303_v48, %s11447_s27  ;;  %v10329_v48 = vpack.i.bf16 %v1301_v36, %v1300_v34  ;;  %v861_v32 = vpop.permute.xlu0 %860 }
 0x32b   :  { %1028 = vrot.lane.b32.xlu0 %v1018_v58, %s14948_s23  ;;  %v1389_v58 = vand.u32 3, %v11521_v8 }
 0x32d   :  { %10309 = vrot.lane.b32.xlu1 %v10308_v9, %s11460_s20  ;;  %v1397_v59 = vadd.s32 4294967295, %v1389_v58  ;;  %v1526_v60 = vadd.s32 1, %v1389_v58 }
 0x32f   :  { %10314 = vrot.lane.b32.xlu0 %v10313_v13, %s11446_s26  ;;  %vm1398_vm2 = vcmp.ge.s32.totalorder %v1397_v59, 0  ;;  %vm1528_vm10 = vcmp.lt.s32.totalorder %v1526_v60, 4  ;;  %v11913_v13 = vadd.f32 %v11773_v3, %v56_v10 }
 0x330   :  { %v9313_v63 = vsel %vm1398_vm2, 1.0, %v11891_v46  ;;  %v9317_v9 = vsel %vm1528_vm10, 1.0, %v11891_v46  ;;  %vm787_vm10 = vcmask 261120   ;;  %vm29_vm2 = vcmask 335104  }
 0x331   :  { %1060 = vrot.lane.b32.xlu1 %v11771_v1, %s11460_s20  ;;  %v10334_v14 = vpack.i.bf16 %v11913_v13, %v11826_v39  ;;  %30 = vst.msk [vmem:[#allocation4 + $0x8] sm:$0xff] %vm29_vm2, %v11891_v46  ;;  %31 = vst.msk [vmem:[#allocation4 + $0x18] sm:$0xff] %vm29_vm2, %v11891_v46 }
 0x332   :  { %49 = vst.msk [vmem:[#allocation7 + $0x8] sm:$0xff] %vm29_vm2, %v11891_v46  ;;  %50 = vst.msk [vmem:[#allocation7 + $0x18] sm:$0xff] %vm29_vm2, %v11891_v46 }
 0x333   :  { %10319 = vrot.lane.b32.xlu0 %v10318_v31, %s14948_s23  ;;  %v915_v31 = vpop.permute.xlu1 %914  ;;  %51 = vst.msk [vmem:[#allocation7 + $0x28] sm:$0xff] %vm29_vm2, %v11891_v46  ;;  %52 = vst.msk [vmem:[#allocation7 + $0x38] sm:$0xff] %vm29_vm2, %v11891_v46  ;;  %vm1426_vm2 = vcmask 64512  }
 0x335   :  { %1118 = vrot.lane.b32.xlu1 %v1106_v35, %s14946_s22 }
 0x337   :  { %10324 = vrot.lane.b32.xlu0 %v10323_v41, %s14946_s22 }
 0x339   :  { %724 = vrot.lane.b32.xlu1 %v9302_v49, %s14946_s22 }
 0x33b   :  { %10330 = vperm.xlu0 %10328, %v10329_v48  }
 0x33d   :  { %839 = vrot.lane.b32.xlu1 %v9306_v56, %s14948_s23 }
 0x33f   :  { %894 = vrot.lane.b32.xlu0 %v9302_v49, %s11446_s26 }
 0x341   :  { %955 = vrot.lane.b32.xlu1 %v9306_v56, %s11447_s27 }
 0x343   :  { %1008 = vrot.lane.b32.xlu0 %v9302_v49, %s14950_s6 }
 0x345   :  { %1094 = vrot.lane.b32.xlu1 %v9306_v56, %s14960_s7 }
 0x347   :  { %1404 = vrot.lane.b32.xlu0 %v9313_v63, %s14962_s21 }
 0x349   :  { %1533 = vrot.lane.b32.xlu1 %v9317_v9, %s11462_s9 }
 0x34b   :  { %1599 = vrot.lane.b32.xlu0 %v9313_v63, %s11446_s26 }
 0x34d   :  { %1713 = vrot.lane.b32.xlu1 %v9317_v9, %s11447_s27 }
 0x34f   :  { %1771 = vrot.lane.b32.xlu0 %v9313_v63, %s11463_s13 }
 0x351   :  { %1880 = vrot.lane.b32.xlu1 %v9317_v9, %s11464_s14 }
 0x355   :  { %10335 = vrot.lane.b32.xlu1 %v10334_v14, %s11458_s8 }
 0x393   :  { %v11920_v33 = vpop.permute.xlu1 %10289 }
 0x394   :  { %v14911_v3 = vunpack.i.h.bf16 %v11920_v33  ;;  %v10291_v34 = vunpack.i.l.bf16 %v11920_v33 }
 0x395   :  { %v11924_v35 = vpop.permute.xlu0 %10294 }
 0x396   :  { %v14908_v36 = vunpack.i.h.bf16 %v11924_v35  ;;  %v10296_v37 = vunpack.i.l.bf16 %v11924_v35  ;;  %v788_v49 = vsel %vm787_vm10, %v778_v19, %v10291_v34  ;;  %v789_v58 = vsel %vm787_vm10, %v10291_v34, %v14911_v3 }
 0x397   :  { %v976_v41 = vpop.permute.xlu1 %975 }
 0x398   :  { %v755_v48 = vsel %vm14968_vm8, %v746_v28, %v10296_v37  ;;  %v756_v56 = vsel %vm14968_vm8, %v10296_v37, %v14908_v36 }
 0x399   :  { %v11936_v59 = vpop.permute.xlu0 %10299  ;;  %v1173_v60 = vpack.c.bf16 %v789_v58, %v756_v56  ;;  %v1172_v63 = vpack.c.bf16 %v788_v49, %v755_v48 }
 0x39a   :  { %v14907_v9 = vunpack.i.h.bf16 %v11936_v59  ;;  %v10301_v10 = vunpack.i.l.bf16 %v11936_v59 }
 0x39b   :  { %v11940_v14 = vpop.permute.xlu1 %10304  ;;  %1212 = vmatprep.subr.bf16.mxu0 %v1173_v60 }
 0x39c   :  { %v14905_v19 = vunpack.i.h.bf16 %v11940_v14  ;;  %v10306_v28 = vunpack.i.l.bf16 %v11940_v14  ;;  %1213 = vmatpush1.bf16.msra.mxu0 %v1172_v63  ;;  %v871_v6 = vsel %vm14953_vm15, %v861_v32, %v10301_v10  ;;  %v872_v49 = vsel %vm14953_vm15, %v10301_v10, %v14907_v9 }
 0x39d   :  { %v1029_v37 = vpop.permute.xlu0 %1028 }
 0x39e   :  { %v924_v34 = vsel %vm212_vm5, %v915_v31, %v10306_v28  ;;  %v925_v48 = vsel %vm212_vm5, %v10306_v28, %v14905_v19 }
 0x39f   :  { %v11952_v56 = vpop.permute.xlu1 %10309  ;;  %v1177_v58 = vpack.c.bf16 %v925_v48, %v872_v49  ;;  %v1176_v60 = vpack.c.bf16 %v924_v34, %v871_v6 }
 0x3a0   :  { %v14909_v52 = vunpack.i.h.bf16 %v11952_v56  ;;  %v10311_v10 = vunpack.i.l.bf16 %v11952_v56 }
 0x3a1   :  { %v11954_v53 = vpop.permute.xlu0 %10314  ;;  %1214 = vmatprep.subr.bf16.mxu0 %v1177_v58 }
 0x3a2   :  { %v14906_v63 = vunpack.i.h.bf16 %v11954_v53  ;;  %v10316_v32 = vunpack.i.l.bf16 %v11954_v53  ;;  %1215 = vmatpush1.bf16.msra.mxu0 %v1176_v60 }
 0x3a3   :  { %v1061_v31 = vpop.permute.xlu1 %1060 }
 0x3a4   :  { %v985_v4 = vsel %vm231_vm7, %v976_v41, %v10316_v32  ;;  %v986_v28 = vsel %vm231_vm7, %v10316_v32, %v14906_v63  ;;  %v1071_v41 = vsel %vm14943_vm3, %v1061_v31, %v10311_v10 }
 0x3a5   :  { %v11964_v6 = vpop.permute.xlu0 %10319  ;;  %v1181_v34 = vpack.c.bf16 %v986_v28, %v11779_v7  ;;  %v1180_v49 = vpack.c.bf16 %v985_v4, %v11771_v1  ;;  %v1072_v4 = vsel %vm14943_vm3, %v10311_v10, %v14909_v52 }
 0x3a6   :  { %v14910_v48 = vunpack.i.h.bf16 %v11964_v6  ;;  %v10321_v58 = vunpack.i.l.bf16 %v11964_v6 }
 0x3a7   :  { %v11970_v60 = vpop.permute.xlu1 %1118  ;;  %1216 = vmatprep.subr.bf16.mxu0 %v1181_v34 }
 0x3a8   :  { %v1038_v19 = vsel %vm14952_vm14, %v1029_v37, %v10321_v58  ;;  %1217 = vmatpush1.bf16.msra.mxu0 %v1180_v49  ;;  %v1039_v32 = vsel %vm14952_vm14, %v10321_v58, %v14910_v48 }
 0x3a9   :  { %v10325_v1 = vpop.permute.xlu0 %10324  ;;  %v1185_v7 = vpack.c.bf16 %v1072_v4, %v1039_v32  ;;  %v1184_v28 = vpack.c.bf16 %v1071_v41, %v1038_v19  ;;  %v59_v41 = vld [vmem:[%s14892_s2] sm:$0xff] }
 0x3aa   :  { %v10327_v63 = vunpack.i.h.bf16 %v10325_v1  ;;  %v10326_v9 = vunpack.i.l.bf16 %v10325_v1  ;;  %v12007_v4 = vld [vmem:[%s14890_s4 + $0x40] sm:$0xf] }
 0x3ab   :  { %v11980_v36 = vpop.permute.xlu1 %724  ;;  %1218 = vmatprep.subr.bf16.mxu0 %v1185_v7 }
 0x3ac   :  { %15029 = vst [vmem:[#allocation26_spill] sm:$0xff] %v11980_v36  ;;  %1219 = vmatpush1.bf16.msra.mxu0 %v1184_v28  ;;  %v1125_v37 = vsel %vm14942_vm13, %v10327_v63, %v11970_v60  ;;  %v1124_v31 = vsel %vm14942_vm13, %v10326_v9, %v10327_v63  ;;  %v11988_v34 = vsel %vm14942_vm13, %v11759_v54, %v11980_v36  ;;  %v60_v9 = vld [vmem:[%s14892_s2 + $0x8] sm:$0xff] }
 0x3ad   :  { %15030 = vst [vmem:[#allocation27_spill] sm:$0xff] %v11988_v34  ;;  %v739_v10 = vmul.f32 %v11980_v36, %v11913_v13  ;;  %v1189_v19 = vpack.c.bf16 %v1125_v37, %v1125_v37  ;;  %v1188_v49 = vpack.c.bf16 %v1124_v31, %v1124_v31  ;;  %v738_v58 = vmul.f32 %v11988_v34, %v11826_v39  ;;  %v61_v31 = vld [vmem:[%s14892_s2 + $0x10] sm:$0xff] }
 0x3ae   :  { %v1302_v1 = vpack.c.bf16 %v60_v9, %v59_v41 }
 0x3af   :  { %v12000_v63 = vpop.permute.xlu1 %839  ;;  %9307 = vmatprep.subr.msk.bf16.mxu0 %vm304_vm11, %v1189_v19  ;;  %v1201_v54 = vsel %vm304_vm11, %v1188_v49, 0  ;;  %v10339_v32 = vpack.i.bf16 %v739_v10, %v738_v58  ;;  %v62_v10 = vld [vmem:[%s14892_s2 + $0x18] sm:$0xff]  ;;  %v948_v49 = vld [vmem:[#allocation3 + $0x28] sm:$0xff] }
 0x3b0   :  { %15031 = vst [vmem:[#allocation28_spill] sm:$0xff] %v12000_v63  ;;  %1221 = vmatpush1.bf16.msra.mxu0 %v1201_v54  ;;  %v12012_v7 = vsel %vm14952_vm14, %v11761_v55, %v12000_v63  ;;  %v854_v28 = vmul.f32 %v12000_v63, %v11913_v13  ;;  %v1303_v58 = vpack.c.bf16 %v62_v10, %v61_v31 }
 0x3b1   :  { %15032 = vst [vmem:[#allocation29_spill] sm:$0xff] %v12012_v7  ;;  %10340 = vrot.lane.b32.xlu0 %v10339_v32, %s14960_s7  ;;  %9731 = vmatprep.subr.bf16.mxu0 %v11891_v46  ;;  %v853_v37 = vmul.f32 %v12012_v7, %v11826_v39 }
 0x3b3   :  { %v12026_v55 = vpop.permute.xlu1 %955  ;;  %9308 = vmatmul.mubr.msk.bf16.vlgmr.msra.gmra.mrb[4].mxu0 %vm300_vm12, %v12007_v4  ;;  %v10344_v19 = vpack.i.bf16 %v854_v28, %v853_v37 }
 0x3b4   :  { %15033 = vst [vmem:[#allocation30_spill] sm:$0xff] %v12026_v55  ;;  %9732 = vmatpush3.bf16.msra.mxu0 %v1302_v1  ;;  %v12033_v41 = vsel %vm212_vm5, %v11809_v27, %v12026_v55  ;;  %v969_v9 = vmul.f32 %v12026_v55, %v948_v49  ;;  %9735 = vmatprep.mubr.msk.bf16.mxu0 %vm11442_vm0, %v11891_v46  ;;  %v15041_v55 = vunpack.i.h.bf16 %v11920_v33 }
 0x3b5   :  { %15034 = vst [vmem:[#allocation31_spill] sm:$0xff] %v12033_v41  ;;  %10345 = vrot.lane.b32.xlu0 %v10344_v19, %s14950_s6  ;;  %9733 = vmatprep.subr.bf16.mxu0 %v11891_v46  ;;  %v968_v54 = vmul.f32 %v12033_v41, %v11913_v13  ;;  %v10359_v1 = vpack.i.bf16 %v948_v49, %v11913_v13  ;;  %v15042_v41 = vunpack.i.h.bf16 %v11924_v35  ;;  %v15043_v35 = vunpack.i.h.bf16 %v11936_v59  ;;  %s15059_s6 = smov 119  }
 0x3b7   :  { %v10354_v32 = vpack.i.bf16 %v969_v9, %v968_v54  ;;  %v12063_v50 = vpop.permute.xlu1 %1094 }
 0x3b8   :  { %9734 = vmatpush3.bf16.msra.mxu0 %v1303_v58  ;;  %15037 = vst [vmem:[#allocation34_spill] sm:$0xff] %v12063_v50 }
 0x3b9   :  { %10355 = vrot.lane.b32.xlu0 %v10354_v32, %s11446_s26  ;;  %9739 = vmatprep.subr.bf16.mxu0 %v11891_v46 }
 0x3ba   :  { %v12044_v27 = vpop.permute.xlu0 %10330 }
 0x3bb   :  { %9736 = vmatmul.mubr.msk.bf16.vlgmr.msra.gmra.mrb[8].mxu0 %vm787_vm10, %v9311_v0 }
 0x3bc   :  { %9741 = vmatprep.mubr.msk.bf16.mxu0 %vm11442_vm0, %v11891_v46 }
 0x3bd   :  { %10360 = vrot.lane.b32.xlu0 %v10359_v1, %s11460_s20  ;;  %v1108_v1 = vmul.f32 %v12063_v50, %v948_v49 }
 0x3be   :  { %v12054_v28 = vpop.permute.xlu0 %894 }
 0x3bf   :  { %15035 = vst [vmem:[#allocation32_spill] sm:$0xff] %v12054_v28  ;;  %v12059_v37 = vsel %vm231_vm7, %v11766_v57, %v12054_v28  ;;  %v908_v31 = vmul.f32 %v12054_v28, %v11913_v13  ;;  %v12078_v57 = vsel %vm14968_vm8, %v11863_v12, %v12063_v50  ;;  %v12094_v12 = vpop.permute.xlu1 %1533 }
 0x3c0   :  { %15036 = vst [vmem:[#allocation33_spill] sm:$0xff] %v12059_v37  ;;  %v907_v51 = vmul.f32 %v12059_v37, %v11826_v39  ;;  %15040 = vst [vmem:[#allocation37_spill] sm:$0xff] %v12078_v57  ;;  %v1107_v32 = vmul.f32 %v12078_v57, %v11913_v13 }
 0x3c2   :  { %v12067_v0 = vpop.permute.xlu0 %1008  ;;  %v10349_v10 = vpack.i.bf16 %v908_v31, %v907_v51  ;;  %v12102_v51 = vpack.c.bf16 %v11891_v46, %v11891_v46 }
 0x3c3   :  { %15038 = vst [vmem:[#allocation35_spill] sm:$0xff] %v12067_v0  ;;  %v12072_v19 = vsel %vm14953_vm15, %v11839_v22, %v12067_v0  ;;  %v1022_v58 = vmul.f32 %v12067_v0, %v948_v49  ;;  %v10369_v22 = vpack.i.bf16 %v1108_v1, %v1107_v32  ;;  %v12098_v31 = vpop.permute.xlu1 %1713 }
 0x3c4   :  { %15039 = vst [vmem:[#allocation36_spill] sm:$0xff] %v12072_v19  ;;  %10350 = vrot.lane.b32.xlu1 %v10349_v10, %s11447_s27  ;;  %v1021_v9 = vmul.f32 %v12072_v19, %v11913_v13  ;;  %v12107_v10 = vld [vmem:[%s14890_s4 + $0x80] sm:$0xff]  ;;  %1422 = vrot.lane.b32.xlu0 %v12102_v51, %s11465_s11 }
 0x3c6   :  { %v10364_v54 = vpack.i.bf16 %v1022_v58, %v1021_v9  ;;  %v12096_v49 = vpop.permute.xlu0 %1404  ;;  %v12112_v58 = vld [vmem:[%s14890_s4 + $0x90] sm:$0xff] }
 0x3c7   :  { %v12122_v32 = vpop.permute.xlu1 %1880 }
 0x3c8   :  { %10365 = vrot.lane.b32.xlu1 %v10364_v54, %s14948_s23  ;;  %v12120_v54 = vcombine.low %v12107_v10, %v12112_v58  ;;  %s11474_s23 = smov 3  }
 0x3ca   :  { %v12114_v9 = vpop.permute.xlu0 %1599  ;;  %1418 = vrot.lane.b32.xlu0 %v12120_v54, %s11451_s10 }
 0x3cc   :  { %10370 = vrot.lane.b32.xlu1 %v10369_v22, %s14946_s22  ;;  %v10336_v22 = vpop.permute.xlu1 %10335  ;;  %s15062_s22 = smov 33  }
 0x3cd   :  { %v10338_v52 = vunpack.i.h.bf16 %v10336_v22  ;;  %v10337_v48 = vunpack.i.l.bf16 %v10336_v22 }
 0x3ce   :  { %v12126_v1 = vpop.permute.xlu0 %1771 }
 0x3cf   :  { %v790_v0 = vsel %vm787_vm10, %v15041_v55, %v10337_v48  ;;  %v791_v7 = vsel %vm787_vm10, %v10337_v48, %v10338_v52  ;;  %v15044_v52 = vunpack.i.h.bf16 %v11940_v14 }
 0x423   :  { %v10341_v3 = vpop.permute.xlu0 %10340 }
 0x424   :  { %v10343_v50 = vunpack.i.h.bf16 %v10341_v3  ;;  %v10342_v57 = vunpack.i.l.bf16 %v10341_v3 }
 0x426   :  { %v757_v19 = vsel %vm14968_vm8, %v15042_v41, %v10342_v57  ;;  %v758_v63 = vsel %vm14968_vm8, %v10342_v57, %v10343_v50  ;;  %vm15055_vm8 = vcmask 908288  }
 0x427   :  { %v1175_v28 = vpack.c.bf16 %v791_v7, %v758_v63  ;;  %v1174_v37 = vpack.c.bf16 %v790_v0, %v757_v19  ;;  %v10346_v22 = vpop.permute.xlu0 %10345 }
 0x428   :  { %v10347_v34 = vunpack.i.l.bf16 %v10346_v22  ;;  %v10348_v3 = vunpack.i.h.bf16 %v10346_v22  ;;  %v15045_v22 = vunpack.i.h.bf16 %v11954_v53 }
 0x429   :  { %1253 = vmatprep.subr.bf16.mxu1 %v1175_v28 }
 0x42a   :  { %1254 = vmatpush1.bf16.msra.mxu1 %v1174_v37  ;;  %v873_v41 = vsel %vm14953_vm15, %v15043_v35, %v10347_v34  ;;  %v874_v63 = vsel %vm14953_vm15, %v10347_v34, %v10348_v3 }
 0x42b   :  { %v10356_v36 = vpop.permute.xlu0 %10355 }
 0x42c   :  { %v10358_v29 = vunpack.i.h.bf16 %v10356_v36  ;;  %v10357_v33 = vunpack.i.l.bf16 %v10356_v36 }
 0x42e   :  { %v988_v28 = vsel %vm231_vm7, %v10357_v33, %v10358_v29  ;;  %v987_v35 = vsel %vm231_vm7, %v15045_v22, %v10357_v33 }
 0x42f   :  { %v10361_v50 = vpop.permute.xlu0 %10360  ;;  %v1183_v14 = vpack.c.bf16 %v988_v28, %v11913_v13 }
 0x430   :  { %v10363_v19 = vunpack.i.h.bf16 %v10361_v50 }
 0x436   :  { %v10351_v20 = vpop.permute.xlu1 %10350 }
 0x437   :  { %v10353_v55 = vunpack.i.h.bf16 %v10351_v20  ;;  %v10352_v2 = vunpack.i.l.bf16 %v10351_v20  ;;  %v10362_v20 = vunpack.i.l.bf16 %v10361_v50  ;;  %v15046_v50 = vunpack.i.h.bf16 %v11964_v6 }
 0x439   :  { %v926_v48 = vsel %vm212_vm5, %v15044_v52, %v10352_v2  ;;  %v927_v7 = vsel %vm212_vm5, %v10352_v2, %v10353_v55  ;;  %v1182_v55 = vpack.c.bf16 %v987_v35, %v11826_v39 }
 0x43a   :  { %v10366_v37 = vpop.permute.xlu1 %10365  ;;  %v1179_v36 = vpack.c.bf16 %v927_v7, %v874_v63  ;;  %v1178_v0 = vpack.c.bf16 %v926_v48, %v873_v41  ;;  %v1074_v41 = vsel %vm14943_vm3, %v10362_v20, %v10363_v19  ;;  %v15047_v48 = vunpack.i.h.bf16 %v11952_v56 }
 0x43b   :  { %v10368_v57 = vunpack.i.h.bf16 %v10366_v37  ;;  %v10367_v59 = vunpack.i.l.bf16 %v10366_v37 }
 0x43c   :  { %1255 = vmatprep.subr.bf16.mxu1 %v1179_v36  ;;  %v1073_v63 = vsel %vm14943_vm3, %v15047_v48, %v10362_v20  ;;  %vm14969_vm3 = vcmask 56320  }
 0x43d   :  { %1256 = vmatpush1.bf16.msra.mxu1 %v1178_v0  ;;  %v1041_v34 = vsel %vm14952_vm14, %v10367_v59, %v10368_v57  ;;  %v1040_v53 = vsel %vm14952_vm14, %v15046_v50, %v10367_v59 }
 0x43e   :  { %v10371_v2 = vpop.permute.xlu1 %10370  ;;  %1257 = vmatprep.subr.bf16.mxu1 %v1183_v14  ;;  %v1187_v52 = vpack.c.bf16 %v1074_v41, %v1041_v34  ;;  %v1186_v7 = vpack.c.bf16 %v1073_v63, %v1040_v53  ;;  %v1407_v34 = vmul.f32 %v11891_v46, %v12096_v49  ;;  %v1536_v53 = vmul.f32 %v11891_v46, %v12094_v12 }
 0x43f   :  { %v10373_v29 = vunpack.i.h.bf16 %v10371_v2  ;;  %v10372_v3 = vunpack.i.l.bf16 %v10371_v2 }
 0x440   :  { %v1411_v41 = vpack.c.bf16 %v1407_v34, %v1407_v34  ;;  %v1540_v48 = vpack.c.bf16 %v1536_v53, %v1536_v53 }
 0x441   :  { %1258 = vmatpush1.bf16.msra.mxu1 %v1182_v55  ;;  %v1127_v33 = vsel %vm14942_vm13, %v10372_v3, %v10373_v29  ;;  %v1126_v13 = vsel %vm14942_vm13, %v11970_v60, %v10372_v3  ;;  %vm1479_vm13 = vcmask 72704  }
 0x442   :  { %1259 = vmatprep.subr.bf16.mxu1 %v1187_v52  ;;  %v1191_v39 = vpack.c.bf16 %v1127_v33, %v1127_v33  ;;  %v1190_v28 = vpack.c.bf16 %v1126_v13, %v1126_v13  ;;  %v1602_v33 = vmul.f32 %v11891_v46, %v12114_v9 }
 0x444   :  { %v1207_v6 = vsel %vm304_vm11, %v1190_v28, 0  ;;  %v1606_v63 = vpack.c.bf16 %v1602_v33, %v1602_v33 }
 0x445   :  { %1260 = vmatpush1.bf16.msra.mxu1 %v1186_v7 }
 0x446   :  { %9309 = vmatprep.subr.msk.bf16.mxu1 %vm304_vm11, %v1191_v39 }
 0x449   :  { %1262 = vmatpush1.bf16.msra.mxu1 %v1207_v6 }
 0x44a   :  { %9751 = vmatprep.subr.bf16.mxu1 %v11891_v46 }
 0x44c   :  { %9310 = vmatmul.mubr.msk.bf16.vlgmr.msra.gmra.mrb[12].mxu1 %vm300_vm12, %v12007_v4 }
 0x44d   :  { %9753 = vmatprep.mubr.msk.bf16.mxu1 %vm11442_vm0, %v11891_v46 }
 0x486   :  { %v12168_v56 = vpop.f32.mrb[4].mxu0 }
 0x487   :  { %v12170_v60 = vpop.f32.mrb[5].mxu0 }
 0x488   :  { %v1250_v37 = vpop.f32.mrb[6].mxu0 }
 0x489   :  { %v1251_v36 = vpop.f32.mrb[7].mxu0 }
 0x48e   :  { %v1356_v0 = vpop.f32.mrb[8].mxu0 }
 0x48f   :  { %v11417_v19 = vadd.low.f32.bf16 %v1356_v0, %v12044_v27  ;;  %v9737_v20 = vpop.f32.mrb[9].mxu0 }
 0x490   :  { %v1359_v57 = vpop.f32.mrb[10].mxu0 }
 0x491   :  { %v1363_v59 = vmax.f32 %v11417_v19, 0.0  ;;  %v11418_v22 = vadd.high.f32.bf16 %v1359_v57, %v12044_v27  ;;  %v9738_v35 = vpop.f32.mrb[11].mxu0 }
 0x492   :  { %v1423_v35 = vpop.permute.xlu0 %1422 }
 0x493   :  { %1379 = vst.msk [vmem:[#allocation4 + $0x8] sm:$0xff] %vm787_vm10, %v1363_v59  ;;  %v1364_v4 = vmax.f32 %v11418_v22, 0.0 }
 0x495   :  { %1380 = vst.msk [vmem:[#allocation4 + $0x18] sm:$0xff] %vm787_vm10, %v1364_v4 }
 0x496   :  { %v1419_v4 = vpop.permute.xlu0 %1418 }
 0x49a   :  { %v1382_v14 = vld [vmem:[#allocation4 + $0x8] sm:$0xff] }
 0x49b   :  { %v1408_v3 = vmul.f32 %v12096_v49, %v1382_v14  ;;  %v1537_v52 = vmul.f32 %v12094_v12, %v1382_v14  ;;  %v1603_v39 = vmul.f32 %v12114_v9, %v1382_v14  ;;  %v1716_v37 = vmul.f32 %v12098_v31, %v1382_v14 }
 0x49c   :  { %v1384_v2 = vld [vmem:[#allocation4 + $0x18] sm:$0xff]  ;;  %v1774_v19 = vmul.f32 %v12126_v1, %v1382_v14  ;;  %v1883_v59 = vmul.f32 %v12122_v32, %v1382_v14 }
 0x49d   :  { %v12178_v29 = vpack.c.bf16 %v1384_v2, %v1382_v14  ;;  %v1410_v55 = vmul.f32 %v12096_v49, %v1384_v2  ;;  %v1539_v50 = vmul.f32 %v12094_v12, %v1384_v2  ;;  %v1605_v7 = vmul.f32 %v12114_v9, %v1384_v2 }
 0x49e   :  { %v1717_v28 = vmul.f32 %v12098_v31, %v1384_v2  ;;  %v1775_v0 = vmul.f32 %v12126_v1, %v1384_v2  ;;  %v1884_v57 = vmul.f32 %v12122_v32, %v1384_v2 }
 0x49f   :  { %1424 = vrot.lane.b32.xlu1 %v12178_v29, %s11465_s11  ;;  %v1412_v27 = vpack.c.bf16 %v1410_v55, %v1408_v3  ;;  %v1541_v13 = vpack.c.bf16 %v1539_v50, %v1537_v52  ;;  %v1607_v6 = vpack.c.bf16 %v1605_v7, %v1603_v39 }
 0x4a0   :  { %v1718_v36 = vpack.c.bf16 %v1717_v28, %v1716_v37  ;;  %v1776_v20 = vpack.c.bf16 %v1775_v0, %v1774_v19  ;;  %v1885_v22 = vpack.c.bf16 %v1884_v57, %v1883_v59  ;;  %v9324_v57 = vcombine.high %v12107_v10, %v12112_v58 }
 0x4a1   :  { %1477 = vrot.lane.b32.xlu0 %v1412_v27, %s11464_s14 }
 0x4a3   :  { %1475 = vrot.lane.b32.xlu1 %v1411_v41, %s11464_s14 }
 0x4a5   :  { %1548 = vrot.lane.b32.xlu0 %v1541_v13, %s11463_s13 }
 0x4a7   :  { %1546 = vrot.lane.b32.xlu1 %v1540_v48, %s11463_s13 }
 0x4a9   :  { %1612 = vrot.lane.b32.xlu0 %v1606_v63, %s11447_s27 }
 0x4ab   :  { %1542 = vrot.lane.b32.xlu1 %v12120_v54, %s11460_s20 }
 0x4ad   :  { %1608 = vrot.lane.b32.xlu0 %v12120_v54, %s14945_s12  ;;  %s15075_s12 = smov 95  }
 0x4af   :  { %1614 = vrot.lane.b32.xlu1 %v1607_v6, %s11447_s27 }
 0x4b1   :  { %1722 = vrot.lane.b32.xlu0 %v1718_v36, %s11446_s26 }
 0x4b3   :  { %1665 = vrot.lane.b32.xlu1 %v12120_v54, %s11467_s0 }
 0x4b5   :  { %1719 = vrot.lane.b32.xlu0 %v12120_v54, %s14944_s15 }
 0x4b7   :  { %1780 = vrot.lane.b32.xlu1 %v1776_v20, %s11462_s9 }
 0x4b9   :  { %1831 = vrot.lane.b32.xlu0 %v12178_v29, %s11469_s16 }
 0x4bb   :  { %1777 = vrot.lane.b32.xlu1 %v12120_v54, %s11458_s8 }
 0x4bd   :  { %1829 = vrot.lane.b32.xlu0 %v12120_v54, %s11450_s30 }
 0x4bf   :  { %1890 = vrot.lane.b32.xlu1 %v1885_v22, %s14962_s21  ;;  %v15048_v22 = vmov 0  }
 0x4c1   :  { %1371 = vrot.lane.b32.xlu0 %v12112_v58, %s11451_s10  ;;  %v11220_v58 = vld [vmem:[%s14890_s4 + $0x4a0] ss:$16 sps:$4 sm:$0xff]  }
 0x4c3   :  { %1369 = vrot.lane.b32.xlu1 %v12107_v10, %s11451_s10  ;;  %v11219_v10 = vld [vmem:[%s14890_s4 + $0x480] ss:$16 sps:$4 sm:$0xff]  }
 0x511   :  { %v1425_v34 = vpop.permute.xlu1 %1424 }
 0x512   :  { %v1427_v2 = vsel %vm1426_vm2, %v1423_v35, %v1425_v34 }
 0x513   :  { %9740 = vmatpush3.bf16.msra.mxu0 %v1427_v2  ;;  %v1478_v14 = vpop.permute.xlu0 %1477 }
 0x514   :  { %9745 = vmatprep.subr.bf16.mxu0 %v11891_v46 }
 0x515   :  { %v1476_v3 = vpop.permute.xlu1 %1475 }
 0x516   :  { %v1480_v55 = vsel %vm1479_vm13, %v1476_v3, %v1478_v14  ;;  %9742 = vmatmul.mubr.msk.bf16.vlgmr.msra.gmra.mrb[12].mxu0 %vm79_vm1, %v1419_v4 }
 0x517   :  { %9746 = vmatpush3.bf16.msra.mxu0 %v1480_v55  ;;  %v1549_v27 = vpop.permute.xlu0 %1548  ;;  %9747 = vmatprep.mubr.msk.bf16.mxu0 %vm11442_vm0, %v11891_v46  ;;  %v63_v55 = vld [vmem:[%s14893_s3] sm:$0xff] }
 0x518   :  { %9757 = vmatprep.subr.bf16.mxu0 %v11891_v46 }
 0x519   :  { %v1547_v41 = vpop.permute.xlu1 %1546 }
 0x51a   :  { %v1551_v50 = vsel %vm14969_vm3, %v1547_v41, %v1549_v27  ;;  %v64_v27 = vld [vmem:[%s14893_s3 + $0x8] sm:$0xff]  ;;  %vm15056_vm3 = vmmov %vm15055_vm8 }
 0x51b   :  { %9752 = vmatpush3.bf16.msra.mxu1 %v1551_v50  ;;  %v1613_v53 = vpop.permute.xlu0 %1612  ;;  %v12284_v41 = vpack.c.bf16 %v64_v27, %v63_v55  ;;  %v12290_v50 = vld [vmem:[%s14890_s4 + $0xc0] sm:$0xf] }
 0x51c   :  { %9763 = vmatprep.subr.bf16.mxu1 %v11891_v46 }
 0x51d   :  { %v1543_v52 = vpop.permute.xlu1 %1542 }
 0x51e   :  { %9748 = vmatmul.mubr.msk.bf16.vlgmr.msra.gmra.mrb[16].mxu0 %vm79_vm1, %v12120_v54  ;;  %9754 = vmatmul.mubr.msk.bf16.vlgmr.msra.gmra.mrb[16].mxu1 %vm79_vm1, %v1543_v52 }
 0x51f   :  { %9764 = vmatpush3.bf16.msra.mxu1 %v12178_v29  ;;  %v1609_v33 = vpop.permute.xlu0 %1608  ;;  %9759 = vmatprep.mubr.msk.bf16.mxu0 %vm11442_vm0, %v11891_v46  ;;  %v12240_v13 = vpop.f32.mrb[12].mxu1 }
 0x520   :  { %9765 = vmatprep.mubr.msk.bf16.mxu1 %vm11442_vm0, %v11891_v46  ;;  %9775 = vmatprep.subr.bf16.mxu1 %v11891_v46  ;;  %v12245_v48 = vpop.f32.mrb[13].mxu1 }
 0x521   :  { %v1615_v63 = vpop.permute.xlu1 %1614  ;;  %v1291_v7 = vpop.f32.mrb[14].mxu1 }
 0x522   :  { %v1617_v54 = vsel %vm212_vm5, %v1613_v53, %v1615_v63  ;;  %v1292_v39 = vpop.f32.mrb[15].mxu1  ;;  %v12295_v53 = vld [vmem:[%s14890_s4 + $0xd0] sm:$0xf] }
 0x523   :  { %9758 = vmatpush3.bf16.msra.mxu0 %v1617_v54  ;;  %v1723_v29 = vpop.permute.xlu0 %1722  ;;  %v12307_v63 = vld [vmem:[%s14890_s4 + $0xf0] sm:$0xf]  ;;  %v2330_v54 = vunpack.c.l.bf16 %v12290_v50  ;;  %v2331_v39 = vunpack.c.l.bf16 %v12295_v53 }
 0x524   :  { %9769 = vmatprep.subr.bf16.mxu0 %v11891_v46 }
 0x525   :  { %v1666_v28 = vpop.permute.xlu1 %1665 }
 0x526   :  { %9760 = vmatmul.mubr.msk.bf16.vlgmr.msra.gmra.mrb[20].mxu0 %vm79_vm1, %v1609_v33  ;;  %9766 = vmatmul.mubr.msk.bf16.vlgmr.msra.gmra.mrb[20].mxu1 %vm79_vm1, %v1666_v28  ;;  %v12302_v33 = vld [vmem:[%s14890_s4 + $0xe0] sm:$0xf]  ;;  %v11470_v28 = vmov 64  }
 0x527   :  { %9770 = vmatpush3.bf16.msra.mxu0 %v1723_v29  ;;  %v1720_v6 = vpop.permute.xlu0 %1719  ;;  %9771 = vmatprep.mubr.msk.bf16.mxu0 %vm11442_vm0, %v11891_v46  ;;  %v2332_v29 = vunpack.c.l.bf16 %v12302_v33 }
 0x528   :  { %9777 = vmatprep.mubr.msk.bf16.mxu1 %vm11442_vm0, %v11891_v46  ;;  %9781 = vmatprep.subr.bf16.mxu0 %v11891_v46 }
 0x529   :  { %v1781_v37 = vpop.permute.xlu1 %1780  ;;  %10380 = vset.pattern.permute.xlu0 %v11470_v28 }
 0x52a   :  { %9776 = vmatpush3.bf16.msra.mxu1 %v1781_v37  ;;  %v2457_v37 = vand.u32 1, %v11521_v8  ;;  %v15049_v8 = vmov 32  }
 0x52b   :  { %v1832_v36 = vpop.permute.xlu0 %1831  ;;  %9787 = vmatprep.subr.bf16.mxu1 %v11891_v46 }
 0x52d   :  { %v1778_v0 = vpop.permute.xlu1 %1777 }
 0x52e   :  { %9772 = vmatmul.mubr.msk.bf16.vlgmr.msra.gmra.mrb[24].mxu0 %vm79_vm1, %v1720_v6  ;;  %9778 = vmatmul.mubr.msk.bf16.vlgmr.msra.gmra.mrb[24].mxu1 %vm79_vm1, %v1778_v0  ;;  %v2333_v6 = vunpack.c.l.bf16 %v12307_v63 }
 0x52f   :  { %9782 = vmatpush3.bf16.msra.mxu0 %v1832_v36  ;;  %9783 = vmatprep.mubr.msk.bf16.mxu0 %vm11442_vm0, %v11891_v46  ;;  %v1830_v19 = vpop.permute.xlu0 %1829  ;;  %v10381_v36 = vpack.i.bf16 %v2331_v39, %v2330_v54 }
 0x530   :  { %9789 = vmatprep.mubr.msk.bf16.mxu1 %vm11442_vm0, %v11891_v46  ;;  %9793 = vmatprep.subr.bf16.mxu0 %v11891_v46  ;;  %v10387_v0 = vpack.i.bf16 %v2333_v6, %v2332_v29 }
 0x531   :  { %v1891_v20 = vpop.permute.xlu1 %1890  ;;  %10382 = vperm.xlu0 %10380, %v10381_v36  }
 0x532   :  { %9788 = vmatpush3.bf16.msra.mxu1 %v1891_v20  ;;  %v2465_v20 = vadd.s32 4294967295, %v2457_v37 }
 0x533   :  { %v1372_v59 = vpop.permute.xlu0 %1371  ;;  %2283 = vmatprep.subr.bf16.mxu1 %v15048_v22 }
 0x534   :  { %v1374_v35 = vrot.slane %v1372_v59, 4  ;;  %vm2466_vm15 = vcmp.ge.s32.totalorder %v2465_v20, 0 }
 0x535   :  { %v1370_v4 = vpop.permute.xlu1 %1369  ;;  %v12320_v59 = vsel %vm2466_vm15, 1.0, %v11891_v46  ;;  %10478 = vset.pattern.permute.xlu0 %v15049_v8  ;;  %vm40_vm15 = vcmask 105536  }
 0x536   :  { %9784 = vmatmul.mubr.msk.bf16.vlgmr.msra.gmra.mrb[28].mxu0 %vm79_vm1, %v1830_v19  ;;  %9790 = vmatmul.mubr.msk.bf16.vlgmr.msra.gmra.mrb[28].mxu1 %vm79_vm1, %v9324_v57  ;;  %v1373_v34 = vrot.slane %v1370_v4, 4  ;;  %v1378_v2 = vunpack.c.l.bf16 %v1374_v35  ;;  %v2649_v19 = vadd.s32 1, %v2457_v37  ;;  %43 = vst.msk [vmem:[#allocation6 + $0x28] sm:$0xff] %vm40_vm15, %v11891_v46  ;;  %41 = vst.msk [vmem:[#allocation6 + $0x8] sm:$0xff] %vm40_vm15, %v11891_v46 }
 0x537   :  { %9797 = vmatprep.mubr.msk.bf16.mxu0 %vm11442_vm0, %v11891_v46  ;;  %9794 = vmatpush3.bf16.msra.mxu0 %v11219_v10  ;;  %42 = vst.msk [vmem:[#allocation6 + $0x18] sm:$0xff] %vm40_vm15, %v11891_v46  ;;  %44 = vst.msk [vmem:[#allocation6 + $0x38] sm:$0xff] %vm40_vm15, %v11891_v46 }
 0x538   :  { %v1377_v14 = vunpack.c.l.bf16 %v1373_v34  ;;  %9795 = vmatprep.subr.bf16.mxu0 %v11891_v46  ;;  %vm2651_vm14 = vcmp.lt.s32.totalorder %v2649_v19, 2 }
 0x539   :  { %v12317_v57 = vsel %vm2651_vm14, 1.0, %v11891_v46  ;;  %vm2368_vm14 = vcmask 523264  }
 0x53a   :  { %v10375_v3 = vpack.i.bf16 %v1378_v2, %v1377_v14  ;;  %2656 = vrot.lane.b32.xlu0 %v12317_v57, %s11471_s17 }
 0x53b   :  { %9796 = vmatpush3.bf16.msra.mxu0 %v11220_v58 }
 0x53c   :  { %10376 = vperm.xlu1 %10374, %v10375_v3   ;;  %9801 = vmatprep.subr.bf16.mxu0 %v12284_v41 }
 0x540   :  { %10386 = vset.pattern.permute.xlu1 %v11470_v28 }
 0x541   :  { %10388 = vperm.xlu1 %10386, %v10387_v0  }
 0x545   :  { %2472 = vrot.lane.b32.xlu1 %v12320_v59, %s11472_s18 }
 0x546   :  { %10472 = vset.pattern.permute.xlu1 %v15048_v22 }
 0x5e9   :  { %v1466_v35 = vpop.f32.mrb[12].mxu0 }
 0x5ea   :  { %v9743_v4 = vpop.f32.mrb[13].mxu0 }
 0x5eb   :  { %v1469_v34 = vpop.f32.mrb[14].mxu0 }
 0x5ec   :  { %v9744_v2 = vpop.f32.mrb[15].mxu0 }
 0x5f1   :  { %v1519_v14 = vpop.f32.mrb[16].mxu0  ;;  %v1590_v3 = vpop.f32.mrb[16].mxu1 }
 0x5f2   :  { %v1520_v10 = vadd.f32 %v1519_v14, %v1466_v35  ;;  %v9749_v58 = vpop.f32.mrb[17].mxu0  ;;  %v9755_v55 = vpop.f32.mrb[17].mxu1 }
 0x5f3   :  { %v1522_v27 = vpop.f32.mrb[18].mxu0  ;;  %v1593_v54 = vpop.f32.mrb[18].mxu1 }
 0x5f4   :  { %v1597_v39 = vadd.f32 %v1590_v3, %v1520_v10  ;;  %v1523_v29 = vadd.f32 %v1522_v27, %v1469_v34  ;;  %v9750_v28 = vpop.f32.mrb[19].mxu0  ;;  %v9756_v6 = vpop.f32.mrb[19].mxu1 }
 0x5f6   :  { %v1598_v37 = vadd.f32 %v1593_v54, %v1523_v29 }
 0x5f9   :  { %v1656_v36 = vpop.f32.mrb[20].mxu0  ;;  %v1704_v0 = vpop.f32.mrb[20].mxu1 }
 0x5fa   :  { %v1663_v19 = vadd.f32 %v1656_v36, %v1597_v39  ;;  %v9761_v20 = vpop.f32.mrb[21].mxu0  ;;  %v9767_v7 = vpop.f32.mrb[21].mxu1 }
 0x5fb   :  { %v1659_v4 = vpop.f32.mrb[22].mxu0  ;;  %v1707_v52 = vpop.f32.mrb[22].mxu1 }
 0x5fc   :  { %v1711_v2 = vadd.f32 %v1704_v0, %v1663_v19  ;;  %v1664_v45 = vadd.f32 %v1659_v4, %v1598_v37  ;;  %v9762_v42 = vpop.f32.mrb[23].mxu0  ;;  %v9768_v35 = vpop.f32.mrb[23].mxu1 }
 0x5fd   :  { %v10377_v7 = vpop.permute.xlu1 %10376 }
 0x5fe   :  { %v1712_v14 = vadd.f32 %v1707_v52, %v1664_v45 }
 0x601   :  { %v1762_v58 = vpop.f32.mrb[24].mxu0  ;;  %v1820_v55 = vpop.f32.mrb[24].mxu1 }
 0x602   :  { %v1769_v62 = vadd.f32 %v1762_v58, %v1711_v2  ;;  %v9773_v3 = vpop.f32.mrb[25].mxu0  ;;  %v9779_v34 = vpop.f32.mrb[25].mxu1 }
 0x603   :  { %v1765_v10 = vpop.f32.mrb[26].mxu0  ;;  %v1823_v27 = vpop.f32.mrb[26].mxu1 }
 0x604   :  { %v1827_v54 = vadd.f32 %v1820_v55, %v1769_v62  ;;  %v1770_v29 = vadd.f32 %v1765_v10, %v1712_v14  ;;  %v9774_v28 = vpop.f32.mrb[27].mxu0  ;;  %v9780_v39 = vpop.f32.mrb[27].mxu1  ;;  %v65_v62 = vld [vmem:[%s14893_s3 + $0x10] sm:$0xff]  ;;  %v66_v14 = vld [vmem:[%s14893_s3 + $0x18] sm:$0xff] }
 0x605   :  { %v68_v28 = vld [vmem:[%s14893_s3 + $0x28] sm:$0xff]  ;;  %v15050_v39 = vcombine.low %v12290_v50, %v12295_v53  ;;  %v11404_v53 = vld [vmem:[%s14889_s1] sm:$0xff] }
 0x606   :  { %v1828_v6 = vadd.f32 %v1823_v27, %v1770_v29  ;;  %v67_v29 = vld [vmem:[%s14893_s3 + $0x20] sm:$0xff] }
 0x609   :  { %v1871_v36 = vpop.f32.mrb[28].mxu0  ;;  %v1930_v20 = vpop.f32.mrb[28].mxu1 }
 0x60a   :  { %v1878_v0 = vadd.f32 %v1871_v36, %v1827_v54  ;;  %v9785_v37 = vpop.f32.mrb[29].mxu0  ;;  %v9791_v42 = vpop.f32.mrb[29].mxu1  ;;  %v2335_v54 = vpack.c.bf16 %v66_v14, %v65_v62  ;;  %v70_v36 = vld [vmem:[%s14893_s3 + $0x38] sm:$0xff] }
 0x60b   :  { %v1933_v19 = vpop.f32.mrb[30].mxu1  ;;  %v1874_v45 = vpop.f32.mrb[30].mxu0 }
 0x60c   :  { %v1937_v52 = vadd.f32 %v1930_v20, %v1878_v0  ;;  %v1879_v4 = vadd.f32 %v1874_v45, %v1828_v6  ;;  %v9786_v2 = vpop.f32.mrb[31].mxu0  ;;  %v9792_v35 = vpop.f32.mrb[31].mxu1  ;;  %v2336_v6 = vpack.c.bf16 %v68_v28, %v67_v29  ;;  %v12370_v45 = vld [vmem:[#allocation2] sm:$0xff] }
 0x60d   :  { %v10389_v62 = vpop.permute.xlu1 %10388  ;;  %v10383_v29 = vpop.permute.xlu0 %10382 }
 0x60e   :  { %v11419_v58 = vadd.low.f32.bf16 %v1937_v52, %v10377_v7  ;;  %v1938_v3 = vadd.f32 %v1933_v19, %v1879_v4  ;;  %v12379_v4 = vmul.f32 %v12370_v45, %v11544_v16 }
 0x610   :  { %v11420_v34 = vadd.high.f32.bf16 %v1938_v3, %v10377_v7  ;;  %v1951_v55 = vmax.f32 %v11419_v58, 0.0  ;;  %v69_v7 = vld [vmem:[%s14893_s3 + $0x30] sm:$0xff]  ;;  %s11475_s3 = smov 5  }
 0x611   :  { %v2337_v20 = vpack.c.bf16 %v70_v36, %v69_v7  ;;  %v12412_v36 = vmul.f32 %v12370_v45, %v11546_v18 }
 0x612   :  { %v1952_v10 = vmax.f32 %v11420_v34, 0.0  ;;  %v12391_v34 = vmul.f32 %v12370_v45, %v11542_v15 }
 0x614   :  { %v1957_v27 = vpack.c.bf16 %v1952_v10, %v1951_v55 }
 0x616   :  { %9798 = vmatmul.mubr.msk.bf16.vlgmr.msra.gmra.mrb[32].mxu0 %vm787_vm10, %v1957_v27 }
 0x617   :  { %9802 = vmatpush3.bf16.msra.mxu0 %v12284_v41  ;;  %9809 = vmatprep.mubr.msk.bf16.mxu0 %vm2368_vm14, %v15050_v39  ;;  %v15051_v41 = vcombine.low %v12302_v33, %v12307_v63  ;;  %v11405_v63 = vld [vmem:[%s14889_s1 + $0x8] sm:$0xff]  ;;  %s11473_s1 = smov 4  }
 0x618   :  { %9803 = vmatprep.subr.bf16.mxu0 %v2335_v54 }
 0x61b   :  { %9804 = vmatpush3.bf16.msra.mxu0 %v2335_v54 }
 0x61c   :  { %9805 = vmatprep.subr.bf16.mxu0 %v2336_v6 }
 0x61f   :  { %9806 = vmatpush3.bf16.msra.mxu0 %v2336_v6 }
 0x620   :  { %9807 = vmatprep.subr.bf16.mxu0 %v2337_v20 }
 0x623   :  { %9808 = vmatpush3.bf16.msra.mxu0 %v2337_v20 }
 0x626   :  { %9810 = vmatmul.mubr.msk.bf16.vlgmr.msra.gmra.mrb[36].mxu0 %vm2368_vm14, %v15051_v41  ;;  %vm15053_vm14 = vcmask 916480  }
 0x627   :  { %vm15054_vm15 = vmmov %vm15053_vm14 }
 0x6e9   :  { %v2007_v50 = vpop.f32.mrb[32].mxu0 }
 0x6ea   :  { %v12363_v0 = vadd.f32 %v11404_v53, %v2007_v50  ;;  %v9799_v37 = vpop.f32.mrb[33].mxu0 }
 0x6eb   :  { %v2010_v33 = vpop.f32.mrb[34].mxu0  ;;  %v2137_v37 = vld [vmem:[#allocation5 + $0x10] sm:$0xff] }
 0x6ec   :  { %v12368_v42 = vadd.f32 %v11405_v63, %v2010_v33  ;;  %v9800_v19 = vpop.f32.mrb[35].mxu0  ;;  %v10392_v46 = vpack.i.bf16 %v12363_v0, %v12370_v45  ;;  %v2037_v52 = vmul.f32 %v12363_v0, %v11544_v16  ;;  %v2085_v3 = vmul.f32 %v12363_v0, %v11542_v15 }
 0x6ed   :  { %v2140_v27 = vmul.f32 %v12363_v0, %v11551_v25  ;;  %v2111_v28 = vmul.f32 %v12363_v0, %v11546_v18 }
 0x6ee   :  { %10393 = vrot.lane.b32.xlu1 %v10392_v46, %s11450_s30  ;;  %v2039_v2 = vmul.f32 %v12368_v42, %v11544_v16  ;;  %v10397_v35 = vpack.i.bf16 %v2037_v52, %v12379_v4  ;;  %v10412_v55 = vpack.i.bf16 %v2085_v3, %v12391_v34  ;;  %v10407_v10 = vpack.i.bf16 %v12368_v42, %v12370_v45 }
 0x6ef   :  { %v2087_v54 = vmul.f32 %v12368_v42, %v11542_v15  ;;  %v10417_v39 = vpack.i.bf16 %v2140_v27, %v12320_v59  ;;  %v2113_v7 = vmul.f32 %v12368_v42, %v11546_v18  ;;  %v10427_v53 = vpack.i.bf16 %v2111_v28, %v12412_v36 }
 0x6f0   :  { %v10402_v58 = vpack.i.bf16 %v2039_v2, %v12379_v4  ;;  %v2142_v52 = vmul.f32 %v12368_v42, %v11551_v25 }
 0x6f1   :  { %v10422_v6 = vpack.i.bf16 %v2087_v54, %v12391_v34  ;;  %v10432_v19 = vpack.i.bf16 %v2113_v7, %v12412_v36  ;;  %v2167_v7 = vmul.f32 %v2137_v37, %v11560_v30 }
 0x6f2   :  { %10398 = vrot.lane.b32.xlu1 %v10397_v35, %s11449_s29  ;;  %10403 = vrot.lane.b32.xlu0 %v10402_v58, %s11449_s29  ;;  %v2139_v58 = vld [vmem:[#allocation5 + $0x28] sm:$0xff] }
 0x6f3   :  { %v2143_v28 = vmul.f32 %v2139_v58, %v11551_v25 }
 0x6f6   :  { %10413 = vrot.lane.b32.xlu1 %v10412_v55, %s11448_s28  ;;  %10408 = vrot.lane.b32.xlu0 %v10407_v10, %s11450_s30  ;;  %v2141_v10 = vmul.f32 %v2137_v37, %v11551_v25 }
 0x6f9   :  { %v9811_v20 = vpop.f32.mrb[36].mxu0 }
 0x6fa   :  { %10418 = vrot.lane.b32.xlu1 %v10417_v39, %s11446_s26  ;;  %10423 = vrot.lane.b32.xlu0 %v10422_v6, %s11448_s28  ;;  %v11421_v41 = vadd.low.f32.bf16 %v9811_v20, %v10389_v62  ;;  %v2409_v50 = vpop.f32.mrb[37].mxu0  ;;  %v10437_v39 = vpack.i.bf16 %v2142_v52, %v2141_v10  ;;  %v2169_v6 = vmul.f32 %v2139_v58, %v11560_v30  ;;  %v12470_v10 = vld [vmem:[%s14890_s4 + $0x100] ss:$16 sps:$4 sm:$0xff]  }
 0x6fb   :  { %v11422_v33 = vadd.low.f32.bf16 %v2409_v50, %v10383_v29  ;;  %v9812_v63 = vpop.f32.mrb[38].mxu0  ;;  %v10457_v50 = vpack.i.bf16 %v2139_v58, %v12368_v42 }
 0x6fc   :  { %v2426_v46 = vmax.f32 %v11421_v41, 0.0  ;;  %v11423_v2 = vadd.high.f32.bf16 %v9812_v63, %v10389_v62  ;;  %v2412_v35 = vpop.f32.mrb[39].mxu0  ;;  %v2168_v62 = vmul.f32 %v12368_v42, %v11560_v30  ;;  %v2214_v63 = vmul.f32 %v12363_v0, %v11570_v38 }
 0x6fd   :  { %v2424_v3 = vmax.f32 %v11422_v33, 0.0  ;;  %v11424_v55 = vadd.high.f32.bf16 %v2412_v35, %v10383_v29  ;;  %v2166_v29 = vmul.f32 %v12363_v0, %v11560_v30  ;;  %v2216_v33 = vmul.f32 %v12368_v42, %v11570_v38 }
 0x6fe   :  { %10433 = vrot.lane.b32.xlu1 %v10432_v19, %s11447_s27  ;;  %10428 = vrot.lane.b32.xlu0 %v10427_v53, %s11447_s27  ;;  %2443 = vst.msk [vmem:[#allocation6 + $0x28] sm:$0xff] %vm1426_vm2, %v2426_v46  ;;  %v2427_v27 = vmax.f32 %v11423_v2, 0.0  ;;  %v10452_v20 = vpack.i.bf16 %v2169_v6, %v2168_v62  ;;  %v10447_v53 = vpack.i.bf16 %v2137_v37, %v12363_v0 }
 0x6ff   :  { %2441 = vst.msk [vmem:[#allocation6 + $0x8] sm:$0xff] %vm1426_vm2, %v2424_v3  ;;  %v2425_v54 = vmax.f32 %v11424_v55, 0.0  ;;  %v10442_v41 = vpack.i.bf16 %v2167_v7, %v2166_v29  ;;  %v2217_v19 = vmul.f32 %v2139_v58, %v11570_v38  ;;  %v2215_v46 = vmul.f32 %v2137_v37, %v11570_v38 }
 0x700   :  { %2444 = vst.msk [vmem:[#allocation6 + $0x38] sm:$0xff] %vm1426_vm2, %v2427_v27 }
 0x701   :  { %2442 = vst.msk [vmem:[#allocation6 + $0x18] sm:$0xff] %vm1426_vm2, %v2425_v54  ;;  %v10467_v52 = vpack.i.bf16 %v2217_v19, %v2216_v33  ;;  %v10462_v2 = vpack.i.bf16 %v2215_v46, %v2214_v63  ;;  %v2473_v54 = vpop.permute.xlu1 %2472 }
 0x702   :  { %2154 = vrot.lane.b32.xlu1 %v2143_v28, %s11446_s26  ;;  %10438 = vrot.lane.b32.xlu0 %v10437_v39, %s11446_s26  ;;  %v2475_v28 = vmul.f32 %v12370_v45, %v2473_v54 }
 0x704   :  { %v2483_v29 = vpack.c.bf16 %v2475_v28, %v2475_v28  ;;  %v12505_v28 = vld [vmem:[%s14890_s4 + $0xa0] sm:$0xff] }
 0x705   :  { %v12461_v37 = vld [vmem:[#allocation6 + $0x28] sm:$0xff] }
 0x706   :  { %10453 = vrot.lane.b32.xlu1 %v10452_v20, %s11444_s24  ;;  %10443 = vrot.lane.b32.xlu0 %v10442_v41, %s11444_s24  ;;  %v12450_v35 = vld [vmem:[#allocation6 + $0x8] sm:$0xff]  ;;  %v2480_v7 = vmul.f32 %v2473_v54, %v12461_v37  ;;  %v2657_v41 = vpop.permute.xlu0 %2656 }
 0x707   :  { %v12463_v55 = vld [vmem:[#allocation6 + $0x38] sm:$0xff]  ;;  %v2476_v39 = vmul.f32 %v2473_v54, %v12450_v35  ;;  %v2660_v33 = vmul.f32 %v2657_v41, %v12450_v35  ;;  %v2664_v46 = vmul.f32 %v2657_v41, %v12461_v37 }
 0x708   :  { %v12452_v3 = vld [vmem:[#allocation6 + $0x18] sm:$0xff]  ;;  %v12474_v27 = vpack.c.bf16 %v12463_v55, %v12461_v37  ;;  %v2482_v20 = vmul.f32 %v2473_v54, %v12463_v55 }
 0x709   :  { %v12459_v58 = vpack.c.bf16 %v12452_v3, %v12450_v35  ;;  %v2478_v62 = vmul.f32 %v2473_v54, %v12452_v3  ;;  %v12500_v54 = vld [vmem:[%s14890_s4 + $0xb0] sm:$0xff] }
 0x70a   :  { %10458 = vrot.lane.b32.xlu1 %v10457_v50, %s11451_s10  ;;  %10448 = vrot.lane.b32.xlu0 %v10447_v53, %s11451_s10  ;;  %v2659_v50 = vmul.f32 %v12370_v45, %v2657_v41  ;;  %v2486_v53 = vpack.c.bf16 %v2482_v20, %v2480_v7 }
 0x70b   :  { %v2484_v6 = vpack.c.bf16 %v2478_v62, %v2476_v39  ;;  %v9330_v39 = vcombine.high %v12505_v28, %v12500_v54 }
 0x70c   :  { %v2667_v63 = vpack.c.bf16 %v2659_v50, %v2659_v50 }
 0x70d   :  { %9331 = vmatprep.mubr.msk.bf16.mxu1 %vm79_vm1, %v9330_v39 }
 0x70e   :  { %10468 = vrot.lane.b32.xlu1 %v10467_v52, %s11445_s25  ;;  %10463 = vrot.lane.b32.xlu0 %v10462_v2, %s11445_s25  ;;  %v2666_v52 = vmul.f32 %v2657_v41, %v12463_v55 }
 0x710   :  { %v2670_v2 = vpack.c.bf16 %v2666_v52, %v2664_v46 }
 0x712   :  { %2509 = vrot.lane.b32.xlu1 %v12102_v51, %s11473_s1  ;;  %2910 = vrot.lane.b32.xlu0 %v12317_v57, %s11447_s27 }
 0x716   :  { %2513 = vrot.lane.b32.xlu1 %v12102_v51, %s11473_s1  ;;  %2511 = vrot.lane.b32.xlu0 %v12459_v58, %s11473_s1  ;;  %v12482_v51 = vld [vmem:[%s14890_s4 + $0x120] ss:$16 sps:$4 sm:$0xff]  }
 0x71a   :  { %2501 = vrot.lane.b32.xlu1 %v12470_v10, %s11460_s20  ;;  %2515 = vrot.lane.b32.xlu0 %v12474_v27, %s11473_s1  ;;  %s15072_s1 = smov 97  }
 0x71e   :  { %2990 = vrot.lane.b32.xlu1 %v12320_v59, %s11474_s23  ;;  %2503 = vrot.lane.b32.xlu0 %v12482_v51, %s11460_s20  ;;  %v2662_v59 = vmul.f32 %v2657_v41, %v12452_v3 }
 0x720   :  { %v2668_v19 = vpack.c.bf16 %v2662_v59, %v2660_v33 }
 0x722   :  { %2581 = vrot.lane.b32.xlu0 %v2483_v29, %s11475_s3  ;;  %2583 = vrot.lane.b32.xlu1 %v2484_v6, %s11475_s3 }
 0x726   :  { %2585 = vrot.lane.b32.xlu0 %v2483_v29, %s11475_s3  ;;  %2587 = vrot.lane.b32.xlu1 %v2486_v53, %s11475_s3 }
 0x72a   :  { %2679 = vrot.lane.b32.xlu0 %v2667_v63, %s11474_s23  ;;  %2681 = vrot.lane.b32.xlu1 %v2668_v19, %s11474_s23 }
 0x72e   :  { %2683 = vrot.lane.b32.xlu0 %v2667_v63, %s11474_s23  ;;  %2685 = vrot.lane.b32.xlu1 %v2670_v2, %s11474_s23  ;;  %s11476_s23 = smov 124  }
 0x732   :  { %2671 = vrot.lane.b32.xlu0 %v12470_v10, %s11467_s0  ;;  %2673 = vrot.lane.b32.xlu1 %v12482_v51, %s11467_s0 }
 0x736   :  { %3139 = vrot.lane.b32.xlu0 %v12317_v57, %s11475_s3 }
 0x760   :  { %v10394_v62 = vpop.permute.xlu1 %10393 }
 0x761   :  { %v10396_v53 = vunpack.i.h.bf16 %v10394_v62  ;;  %v10395_v33 = vunpack.i.l.bf16 %v10394_v62 }
 0x763   :  { %v2074_v61 = vsel %vm79_vm1, %v10395_v33, %v10396_v53 }
 0x764   :  { %v10399_v29 = vpop.permute.xlu1 %10398  ;;  %v10404_v6 = vpop.permute.xlu0 %10403 }
 0x765   :  { %v10401_v7 = vunpack.i.h.bf16 %v10399_v29  ;;  %v10400_v20 = vunpack.i.l.bf16 %v10399_v29  ;;  %v10406_v41 = vunpack.i.h.bf16 %v10404_v6  ;;  %v10405_v50 = vunpack.i.l.bf16 %v10404_v6 }
 0x767   :  { %v2052_v59 = vsel %vm22_vm4, %v10400_v20, %v10401_v7  ;;  %v2053_v63 = vsel %vm22_vm4, %v10405_v50, %v10406_v41 }
 0x768   :  { %v10414_v19 = vpop.permute.xlu1 %10413  ;;  %v10409_v46 = vpop.permute.xlu0 %10408  ;;  %v2254_v52 = vpack.c.bf16 %v2053_v63, %v2052_v59 }
 0x769   :  { %v10411_v2 = vunpack.i.h.bf16 %v10409_v46  ;;  %v10410_v39 = vunpack.i.l.bf16 %v10409_v46  ;;  %v10416_v14 = vunpack.i.h.bf16 %v10414_v19  ;;  %v10415_v57 = vunpack.i.l.bf16 %v10414_v19 }
 0x76a   :  { %2284 = vmatpush1.bf16.msra.mxu1 %v2254_v52 }
 0x76b   :  { %v2075_v29 = vsel %vm79_vm1, %v10410_v39, %v10411_v2  ;;  %2285 = vmatprep.subr.bf16.mxu1 %v15048_v22  ;;  %v2100_v50 = vsel %vm195_vm6, %v10415_v57, %v10416_v14 }
 0x76c   :  { %v10419_v6 = vpop.permute.xlu1 %10418  ;;  %v10424_v62 = vpop.permute.xlu0 %10423  ;;  %v2255_v40 = vpack.c.bf16 %v2075_v29, %v2074_v61 }
 0x76d   :  { %v10420_v7 = vunpack.i.l.bf16 %v10419_v6  ;;  %v10426_v20 = vunpack.i.h.bf16 %v10424_v62  ;;  %v10425_v41 = vunpack.i.l.bf16 %v10424_v62 }
 0x76e   :  { %2286 = vmatpush1.bf16.msra.mxu1 %v2255_v40 }
 0x76f   :  { %v2101_v59 = vsel %vm195_vm6, %v10425_v41, %v10426_v20  ;;  %2287 = vmatprep.subr.bf16.mxu1 %v15048_v22  ;;  %v2755_v63 = vmul.f32 %v10420_v7, %v12450_v35  ;;  %v2757_v53 = vmul.f32 %v10420_v7, %v12452_v3  ;;  %v2754_v33 = vmul.f32 %v12370_v45, %v10420_v7 }
 0x770   :  { %v10434_v19 = vpop.permute.xlu1 %10433  ;;  %v10429_v46 = vpop.permute.xlu0 %10428  ;;  %v2256_v52 = vpack.c.bf16 %v2101_v59, %v2100_v50  ;;  %v2759_v57 = vmul.f32 %v10420_v7, %v12461_v37  ;;  %v2761_v62 = vmul.f32 %v10420_v7, %v12463_v55 }
 0x771   :  { %v10436_v61 = vunpack.i.h.bf16 %v10434_v19  ;;  %v10435_v2 = vunpack.i.l.bf16 %v10434_v19  ;;  %v10431_v39 = vunpack.i.h.bf16 %v10429_v46  ;;  %v10430_v29 = vunpack.i.l.bf16 %v10429_v46 }
 0x772   :  { %2288 = vmatpush1.bf16.msra.mxu1 %v2256_v52  ;;  %v2763_v14 = vpack.c.bf16 %v2757_v53, %v2755_v63  ;;  %v2762_v40 = vpack.c.bf16 %v2754_v33, %v2754_v33  ;;  %v10421_v53 = vunpack.i.h.bf16 %v10419_v6  ;;  %v2765_v33 = vpack.c.bf16 %v2761_v62, %v2759_v57 }
 0x773   :  { %v2127_v20 = vsel %vm212_vm5, %v10435_v2, %v10436_v61  ;;  %v2126_v41 = vsel %vm212_vm5, %v10430_v29, %v10431_v39  ;;  %2289 = vmatprep.subr.bf16.mxu1 %v15048_v22  ;;  %v15052_v6 = vpack.c.bf16 %v12368_v42, %v12363_v0 }
 0x774   :  { %2776 = vrot.lane.b32.xlu0 %v2763_v14, %s11447_s27  ;;  %2774 = vrot.lane.b32.xlu1 %v2762_v40, %s11447_s27  ;;  %v2155_v50 = vpop.permute.xlu1 %2154  ;;  %v10439_v59 = vpop.permute.xlu0 %10438  ;;  %v2257_v19 = vpack.c.bf16 %v2127_v20, %v2126_v41 }
 0x775   :  { %v10441_v46 = vunpack.i.h.bf16 %v10439_v59  ;;  %v10440_v63 = vunpack.i.l.bf16 %v10439_v59 }
 0x776   :  { %2290 = vmatpush1.bf16.msra.mxu1 %v2257_v19 }
 0x777   :  { %2291 = vmatprep.subr.bf16.mxu1 %v15048_v22  ;;  %v2157_v7 = vsel %vm231_vm7, %v10441_v46, %v2155_v50  ;;  %v2156_v52 = vsel %vm231_vm7, %v10421_v53, %v10440_v63 }
 0x778   :  { %2780 = vrot.lane.b32.xlu0 %v2765_v33, %s11447_s27  ;;  %2778 = vrot.lane.b32.xlu1 %v2762_v40, %s11447_s27  ;;  %v10454_v61 = vpop.permute.xlu1 %10453  ;;  %v10444_v2 = vpop.permute.xlu0 %10443  ;;  %v2259_v50 = vpack.c.bf16 %v2157_v7, %v2156_v52 }
 0x779   :  { %v10456_v39 = vunpack.i.h.bf16 %v10454_v61  ;;  %v10455_v29 = vunpack.i.l.bf16 %v10454_v61  ;;  %v10446_v14 = vunpack.i.h.bf16 %v10444_v2  ;;  %v10445_v20 = vunpack.i.l.bf16 %v10444_v2 }
 0x77a   :  { %2292 = vmatpush1.bf16.msra.mxu1 %v15052_v6 }
 0x77b   :  { %2293 = vmatprep.subr.bf16.mxu1 %v15048_v22  ;;  %v2183_v57 = vsel %vm14981_vm9, %v10455_v29, %v10456_v39  ;;  %v2182_v62 = vsel %vm14981_vm9, %v10445_v20, %v10446_v14 }
 0x77c   :  { %2766 = vrot.lane.b32.xlu1 %v12470_v10, %s11458_s8  ;;  %v10459_v40 = vpop.permute.xlu1 %10458  ;;  %v10449_v41 = vpop.permute.xlu0 %10448  ;;  %2768 = vrot.lane.b32.xlu0 %v12482_v51, %s11458_s8  ;;  %v2260_v61 = vpack.c.bf16 %v2183_v57, %v2182_v62 }
 0x77d   :  { %v10461_v59 = vunpack.i.h.bf16 %v10459_v40  ;;  %v10460_v19 = vunpack.i.l.bf16 %v10459_v40  ;;  %v10451_v46 = vunpack.i.h.bf16 %v10449_v41  ;;  %v10450_v0 = vunpack.i.l.bf16 %v10449_v41 }
 0x77e   :  { %2294 = vmatpush1.bf16.msra.mxu1 %v2259_v50 }
 0x77f   :  { %2295 = vmatprep.subr.bf16.mxu1 %v15048_v22  ;;  %v2205_v42 = vsel %vm15053_vm14, %v10460_v19, %v10461_v59  ;;  %v2204_v63 = vsel %vm15054_vm15, %v10450_v0, %v10451_v46  ;;  %vm2517_vm14 = vcmask 31744   ;;  %vm15060_vm15 = vcmask 908288  }
 0x780   :  { %v10469_v53 = vpop.permute.xlu1 %10468  ;;  %v10464_v33 = vpop.permute.xlu0 %10463  ;;  %v2261_v40 = vpack.c.bf16 %v2205_v42, %v2204_v63  ;;  %v12565_v63 = vld [vmem:[%s14890_s4 + $0x124] ss:$16 sps:$4 sm:$0xff]  }
 0x781   :  { %v10471_v2 = vunpack.i.h.bf16 %v10469_v53  ;;  %v10470_v39 = vunpack.i.l.bf16 %v10469_v53  ;;  %v10466_v29 = vunpack.i.h.bf16 %v10464_v33  ;;  %v10465_v14 = vunpack.i.l.bf16 %v10464_v33  ;;  %v12570_v33 = vld [vmem:[%s14890_s4 + $0x104] ss:$16 sps:$4 sm:$0xff]  }
 0x782   :  { %2296 = vmatpush1.bf16.msra.mxu1 %v2260_v61  ;;  %v9329_v61 = vcombine.low %v12505_v28, %v12500_v54 }
 0x783   :  { %2297 = vmatprep.subr.bf16.mxu1 %v15048_v22  ;;  %v2231_v7 = vsel %vm15055_vm8, %v10470_v39, %v10471_v2  ;;  %v2230_v52 = vsel %vm15056_vm3, %v10465_v14, %v10466_v29  ;;  %vm2589_vm8 = vcmask 39936   ;;  %vm2687_vm3 = vcmask 23552  }
 0x784   :  { %v2510_v20 = vpop.permute.xlu1 %2509  ;;  %v2911_v6 = vpop.permute.xlu0 %2910  ;;  %v2262_v53 = vpack.c.bf16 %v2231_v7, %v2230_v52 }
 0x785   :  { %v2913_v41 = vmul.f32 %v2911_v6, %v12450_v35  ;;  %v2914_v50 = vmul.f32 %v2911_v6, %v12452_v3  ;;  %v2915_v57 = vmul.f32 %v2911_v6, %v12461_v37  ;;  %v2916_v62 = vmul.f32 %v2911_v6, %v12463_v55 }
 0x786   :  { %2298 = vmatpush1.bf16.msra.mxu1 %v2261_v40 }
 0x787   :  { %2299 = vmatprep.subr.bf16.mxu1 %v15048_v22  ;;  %v2918_v59 = vpack.c.bf16 %v2916_v62, %v2915_v57  ;;  %v2917_v19 = vpack.c.bf16 %v2914_v50, %v2913_v41 }
 0x788   :  { %v2514_v46 = vpop.permute.xlu1 %2513  ;;  %v2512_v0 = vpop.permute.xlu0 %2511 }
 0x789   :  { %2927 = vrot.lane.b32.xlu0 %v2918_v59, %s11446_s26  ;;  %2925 = vrot.lane.b32.xlu1 %v2917_v19, %s11446_s26  ;;  %v2518_v42 = vsel %vm2517_vm14, %v2510_v20, %v2512_v0 }
 0x78a   :  { %2300 = vmatpush1.bf16.msra.mxu1 %v2262_v53  ;;  %9813 = vmatprep.subr.bf16.mxu0 %v2518_v42 }
 0x78b   :  { %9814 = vmatpush3.bf16.msra.mxu0 %v2518_v42 }
 0x78c   :  { %v2502_v2 = vpop.permute.xlu1 %2501  ;;  %v2516_v39 = vpop.permute.xlu0 %2515 }
 0x78d   :  { %v2519_v29 = vsel %vm2517_vm14, %v2514_v46, %v2516_v39  ;;  %9817 = vmatprep.mubr.msk.bf16.mxu0 %vm787_vm10, %v2502_v2  ;;  %2921 = vrot.lane.b32.xlu0 %v12565_v63, %s11460_s20  ;;  %vm15061_vm14 = vcmask 916480  }
 0x78e   :  { %9815 = vmatprep.subr.bf16.mxu0 %v2519_v29  ;;  %2919 = vrot.lane.b32.xlu1 %v12570_v33, %s11460_s20 }
 0x78f   :  { %9816 = vmatpush3.bf16.msra.mxu0 %v2519_v29  ;;  %2316 = vmatmul.mubr.bf16.vlgmr.msra.gmra.mrb[32].mxu1 %v9329_v61 }
 0x790   :  { %v2991_v14 = vpop.permute.xlu1 %2990  ;;  %v2504_v7 = vpop.permute.xlu0 %2503 }
 0x791   :  { %v2993_v52 = vmul.f32 %v2991_v14, %v12450_v35  ;;  %v2994_v20 = vmul.f32 %v2991_v14, %v12452_v3  ;;  %v2995_v6 = vmul.f32 %v2991_v14, %v12461_v37  ;;  %v2996_v40 = vmul.f32 %v2991_v14, %v12463_v55 }
 0x792   :  { %9818 = vmatmul.mubr.msk.bf16.vlgmr.msra.gmra.mrb[40].mxu0 %vm787_vm10, %v2504_v7 }
 0x793   :  { %v2998_v41 = vpack.c.bf16 %v2996_v40, %v2995_v6  ;;  %v2997_v50 = vpack.c.bf16 %v2994_v20, %v2993_v52  ;;  %9825 = vmatprep.mubr.msk.bf16.mxu0 %vm787_vm10, %v12470_v10  ;;  %v12610_v52 = vld [vmem:[%s14890_s4 + $0x118] sm:$0xf] }
 0x794   :  { %v2582_v57 = vpop.permute.xlu0 %2581  ;;  %v2584_v62 = vpop.permute.xlu1 %2583 }
 0x795   :  { %3007 = vrot.lane.b32.xlu0 %v2998_v41, %s11471_s17  ;;  %3005 = vrot.lane.b32.xlu1 %v2997_v50, %s11471_s17  ;;  %v2590_v59 = vsel %vm2589_vm8, %v2582_v57, %v2584_v62 }
 0x796   :  { %9821 = vmatprep.subr.bf16.mxu0 %v2590_v59 }
 0x797   :  { %9822 = vmatpush3.bf16.msra.mxu0 %v2590_v59 }
 0x798   :  { %v2586_v19 = vpop.permute.xlu0 %2585  ;;  %v2588_v46 = vpop.permute.xlu1 %2587 }
 0x799   :  { %3001 = vrot.lane.b32.xlu0 %v12565_v63, %s11467_s0  ;;  %2999 = vrot.lane.b32.xlu1 %v12570_v33, %s11467_s0  ;;  %v2591_v0 = vsel %vm2589_vm8, %v2586_v19, %v2588_v46  ;;  %vm15064_vm8 = vcmask 56320  }
 0x79a   :  { %9823 = vmatprep.subr.bf16.mxu0 %v2591_v0 }
 0x79b   :  { %9824 = vmatpush3.bf16.msra.mxu0 %v2591_v0 }
 0x79c   :  { %v2680_v10 = vpop.permute.xlu0 %2679  ;;  %v2682_v53 = vpop.permute.xlu1 %2681 }
 0x79d   :  { %3076 = vrot.lane.b32.xlu0 %v12474_v27, %s11476_s23  ;;  %3074 = vrot.lane.b32.xlu1 %v12459_v58, %s11476_s23  ;;  %v2688_v42 = vsel %vm2687_vm3, %v2680_v10, %v2682_v53  ;;  %s15063_s23 = smov 31  }
 0x79e   :  { %9829 = vmatprep.subr.bf16.mxu0 %v2688_v42  ;;  %9826 = vmatmul.mubr.msk.bf16.vlgmr.msra.gmra.mrb[40].mxu0 %vm787_vm10, %v12482_v51  ;;  %v12605_v51 = vld [vmem:[%s14890_s4 + $0x108] sm:$0xf] }
 0x79f   :  { %9830 = vmatpush3.bf16.msra.mxu0 %v2688_v42  ;;  %v9358_v50 = vcombine.low %v12605_v51, %v12610_v52  ;;  %v2436_v59 = vunpack.c.l.bf16 %v12605_v51 }
 0x7a0   :  { %v2684_v61 = vpop.permute.xlu0 %2683  ;;  %v2686_v2 = vpop.permute.xlu1 %2685 }
 0x7a1   :  { %v2689_v39 = vsel %vm2687_vm3, %v2684_v61, %v2686_v2  ;;  %3072 = vrot.lane.b32.xlu0 %v12565_v63, %s11458_s8  ;;  %3070 = vrot.lane.b32.xlu1 %v12570_v33, %s11458_s8  ;;  %vm15065_vm3 = vmmov %vm15064_vm8 }
 0x7a2   :  { %9831 = vmatprep.subr.bf16.mxu0 %v2689_v39 }
 0x7a3   :  { %9832 = vmatpush3.bf16.msra.mxu0 %v2689_v39 }
 0x7a4   :  { %v2672_v29 = vpop.permute.xlu0 %2671  ;;  %v2674_v14 = vpop.permute.xlu1 %2673 }
 0x7a5   :  { %9833 = vmatprep.mubr.msk.bf16.mxu0 %vm787_vm10, %v2672_v29 }
 0x7a8   :  { %v3140_v7 = vpop.permute.xlu0 %3139 }
 0x7a9   :  { %v3142_v20 = vmul.f32 %v3140_v7, %v12450_v35  ;;  %v3143_v6 = vmul.f32 %v3140_v7, %v12452_v3  ;;  %v3144_v40 = vmul.f32 %v3140_v7, %v12461_v37  ;;  %v3145_v41 = vmul.f32 %v3140_v7, %v12463_v55 }
 0x7aa   :  { %9834 = vmatmul.mubr.msk.bf16.vlgmr.msra.gmra.mrb[40].mxu0 %vm787_vm10, %v2674_v14  ;;  %v2437_v35 = vunpack.c.l.bf16 %v12610_v52  ;;  %v15057_v37 = vmov 72  }
 0x7ab   :  { %v3147_v57 = vpack.c.bf16 %v3145_v41, %v3144_v40  ;;  %v3146_v62 = vpack.c.bf16 %v3143_v6, %v3142_v20 }
 0x7ac   :  { %v10479_v3 = vpack.i.bf16 %v2437_v35, %v2436_v59  ;;  %v2433_v35 = vld [vmem:[%s14890_s4 + $0x128] sm:$0xf] }
 0x7ad   :  { %3162 = vrot.lane.b32.xlu0 %v3147_v57, %s11472_s18  ;;  %3160 = vrot.lane.b32.xlu1 %v3146_v62, %s11472_s18  ;;  %v2438_v51 = vunpack.c.l.bf16 %v2433_v35 }
 0x7b1   :  { %2022 = vrot.lane.b32.xlu0 %v12500_v54, %s11451_s10  ;;  %2020 = vrot.lane.b32.xlu1 %v12505_v28, %s11451_s10 }
 0x7b5   :  { %10480 = vperm.xlu0 %10478, %v10479_v3   ;;  %v2435_v3 = vld [vmem:[%s14890_s4 + $0x138] sm:$0xf] }
 0x7b6   :  { %v2439_v52 = vunpack.c.l.bf16 %v2435_v3 }
 0x7b9   :  { %10531 = vset.pattern.permute.xlu0 %v15057_v37 }
 0x7e6   :  { %v2777_v55 = vpop.permute.xlu0 %2776  ;;  %v2775_v19 = vpop.permute.xlu1 %2774 }
 0x7e7   :  { %v2782_v46 = vsel %vm212_vm5, %v2775_v19, %v2777_v55 }
 0x7e8   :  { %9837 = vmatprep.subr.bf16.mxu0 %v2782_v46 }
 0x7e9   :  { %9838 = vmatpush3.bf16.msra.mxu0 %v2782_v46  ;;  %v9359_v46 = vcombine.low %v2433_v35, %v2435_v3 }
 0x7ea   :  { %v2781_v0 = vpop.permute.xlu0 %2780  ;;  %v2779_v10 = vpop.permute.xlu1 %2778 }
 0x7eb   :  { %v2783_v53 = vsel %vm212_vm5, %v2779_v10, %v2781_v0  ;;  %v10485_v0 = vpack.i.bf16 %v2439_v52, %v2438_v51  ;;  %v4095_v10 = vld [vmem:[%s14890_s4 + $0x180] sm:$0xf] }
 0x7ec   :  { %9839 = vmatprep.subr.bf16.mxu0 %v2783_v53 }
 0x7ed   :  { %9840 = vmatpush3.bf16.msra.mxu0 %v2783_v53  ;;  %v4096_v53 = vunpack.c.l.bf16 %v4095_v10 }
 0x7ee   :  { %9845 = vmatprep.subr.bf16.mxu0 %v12459_v58  ;;  %v2767_v54 = vpop.permute.xlu1 %2766  ;;  %v2769_v28 = vpop.permute.xlu0 %2768 }
 0x7ef   :  { %9841 = vmatprep.mubr.msk.bf16.mxu0 %vm787_vm10, %v2767_v54  ;;  %v15058_v54 = vmov 16  }
 0x7f0   :  { %9842 = vmatmul.mubr.msk.bf16.vlgmr.msra.gmra.mrb[40].mxu0 %vm787_vm10, %v2769_v28 }
 0x7f1   :  { %9846 = vmatpush3.bf16.msra.mxu0 %v12459_v58  ;;  %9849 = vmatprep.mubr.msk.bf16.mxu0 %vm787_vm10, %v12570_v33 }
 0x7f2   :  { %9847 = vmatprep.subr.bf16.mxu0 %v12474_v27 }
 0x7f5   :  { %9848 = vmatpush3.bf16.msra.mxu0 %v12474_v27 }
 0x7fb   :  { %v2926_v42 = vpop.permute.xlu1 %2925  ;;  %v2928_v61 = vpop.permute.xlu0 %2927 }
 0x7fc   :  { %9850 = vmatmul.mubr.msk.bf16.vlgmr.msra.gmra.mrb[40].mxu0 %vm787_vm10, %v12565_v63  ;;  %9853 = vmatprep.subr.bf16.mxu0 %v2926_v42 }
 0x7fd   :  { %9854 = vmatpush3.bf16.msra.mxu0 %v2926_v42 }
 0x7fe   :  { %9855 = vmatprep.subr.bf16.mxu0 %v2928_v61 }
 0x7ff   :  { %v2922_v58 = vpop.permute.xlu0 %2921 }
 0x800   :  { %v2920_v2 = vpop.permute.xlu1 %2919 }
 0x801   :  { %9856 = vmatpush3.bf16.msra.mxu0 %v2928_v61  ;;  %9857 = vmatprep.mubr.msk.bf16.mxu0 %vm787_vm10, %v2920_v2 }
 0x807   :  { %v3006_v39 = vpop.permute.xlu1 %3005  ;;  %v3008_v33 = vpop.permute.xlu0 %3007 }
 0x808   :  { %9858 = vmatmul.mubr.msk.bf16.vlgmr.msra.gmra.mrb[40].mxu0 %vm787_vm10, %v2922_v58  ;;  %9861 = vmatprep.subr.bf16.mxu0 %v3006_v39  ;;  %v3253_v58 = vld [vmem:[%s14890_s4 + $0x4c0] sm:$0xf] }
 0x809   :  { %9862 = vmatpush3.bf16.msra.mxu0 %v3006_v39  ;;  %10179 = vmatprep.subr.msk.bf16.mxu1 %vm304_vm11, %v3253_v58  ;;  %v3263_v39 = vsel %vm304_vm11, %v3253_v58, 0 }
 0x80a   :  { %9863 = vmatprep.subr.bf16.mxu0 %v3008_v33  ;;  %9886 = vmatpush3.bf16.msra.mxu1 %v3263_v39 }
 0x80b   :  { %v3000_v27 = vpop.permute.xlu1 %2999  ;;  %v3002_v63 = vpop.permute.xlu0 %3001 }
 0x80c   :  { %9865 = vmatprep.mubr.msk.bf16.mxu0 %vm787_vm10, %v3000_v27 }
 0x80d   :  { %9864 = vmatpush3.bf16.msra.mxu0 %v3008_v33 }
 0x80f   :  { %v3075_v29 = vpop.permute.xlu1 %3074  ;;  %v3077_v7 = vpop.permute.xlu0 %3076 }
 0x810   :  { %9869 = vmatprep.subr.bf16.mxu0 %v3075_v29 }
 0x813   :  { %v3071_v14 = vpop.permute.xlu1 %3070  ;;  %v3073_v20 = vpop.permute.xlu0 %3072 }
 0x814   :  { %9866 = vmatmul.mubr.msk.bf16.vlgmr.msra.gmra.mrb[40].mxu0 %vm787_vm10, %v3002_v63 }
 0x815   :  { %9870 = vmatpush3.bf16.msra.mxu0 %v3075_v29  ;;  %9873 = vmatprep.mubr.msk.bf16.mxu0 %vm787_vm10, %v3071_v14 }
 0x816   :  { %9871 = vmatprep.subr.bf16.mxu0 %v3077_v7 }
 0x819   :  { %9872 = vmatpush3.bf16.msra.mxu0 %v3077_v7 }
 0x81f   :  { %v3163_v6 = vpop.permute.xlu0 %3162  ;;  %v3161_v40 = vpop.permute.xlu1 %3160 }
 0x820   :  { %9874 = vmatmul.mubr.msk.bf16.vlgmr.msra.gmra.mrb[40].mxu0 %vm787_vm10, %v3073_v20  ;;  %9877 = vmatprep.subr.bf16.mxu0 %v3161_v40 }
 0x821   :  { %9878 = vmatpush3.bf16.msra.mxu0 %v3161_v40  ;;  %9881 = vmatprep.mubr.msk.bf16.mxu0 %vm787_vm10, %v9358_v50 }
 0x822   :  { %9879 = vmatprep.subr.bf16.mxu0 %v3163_v6 }
 0x823   :  { %v2023_v41 = vpop.permute.xlu0 %2022  ;;  %v2021_v57 = vpop.permute.xlu1 %2020 }
 0x824   :  { %v2025_v62 = vrot.slane %v2023_v41, 4  ;;  %v2024_v59 = vrot.slane %v2021_v57, 4 }
 0x825   :  { %9880 = vmatpush3.bf16.msra.mxu0 %v3163_v6 }
 0x826   :  { %v2029_v55 = vunpack.c.l.bf16 %v2025_v62  ;;  %v2028_v19 = vunpack.c.l.bf16 %v2024_v59  ;;  %9963 = vmatprep.subr.bf16.mxu0 %v12370_v45 }
 0x828   :  { %v10473_v50 = vpack.i.bf16 %v2029_v55, %v2028_v19 }
 0x82a   :  { %10474 = vperm.xlu1 %10472, %v10473_v50  }
 0x82c   :  { %9882 = vmatmul.mubr.msk.bf16.vlgmr.msra.gmra.mrb[40].mxu0 %vm787_vm10, %v9359_v46 }
 0x82d   :  { %9965 = vmatprep.mubr.msk.bf16.mxu0 %vm11442_vm0, %v12370_v45 }
 0x82e   :  { %10484 = vset.pattern.permute.xlu1 %v15049_v8 }
 0x82f   :  { %10486 = vperm.xlu1 %10484, %v10485_v0  }
 0x833   :  { %10490 = vset.pattern.permute.xlu1 %v15058_v54 }
 0x834   :  { %4100 = vperm.xlu1 %10490, %v4096_v53   ;;  %v10481_v6 = vpop.permute.xlu0 %10480 }
 0x838   :  { %10532 = vset.pattern.permute.xlu1 %v15057_v37 }
 0x862   :  { %v2317_v28 = vpop.f32.mrb[32].mxu1 }
 0x863   :  { %v2319_v42 = vpop.f32.mrb[33].mxu1 }
 0x864   :  { %v2320_v61 = vpop.f32.mrb[34].mxu1 }
 0x865   :  { %v2322_v2 = vpop.f32.mrb[35].mxu1 }
 0x8a9   :  { %v10475_v33 = vpop.permute.xlu1 %10474 }
 0x8aa   :  { %v11425_v27 = vadd.high.f32.bf16 %v2320_v61, %v10475_v33  ;;  %v11426_v63 = vadd.low.f32.bf16 %v2317_v28, %v10475_v33 }
 0x8ac   :  { %v12671_v29 = vmax.f32 %v11425_v27, 0.0  ;;  %v12673_v14 = vmax.f32 %v11426_v63, 0.0 }
 0x8ae   :  { %v4097_v7 = vpack.c.bf16 %v12671_v29, %v12673_v14  ;;  %v10487_v20 = vpop.permute.xlu1 %10486 }
 0x8b0   :  { %9964 = vmatpush3.bf16.msra.mxu0 %v4097_v7 }
 0x8b1   :  { %9969 = vmatprep.subr.bf16.mxu0 %v12370_v45 }
 0x8b3   :  { %9966 = vmatmul.mubr.msk.bf16.vlgmr.msra.gmra.mrb[44].mxu0 %vm79_vm1, %v4095_v10  ;;  %v4101_v10 = vpop.permute.xlu1 %4100 }
 0x8b4   :  { %9979 = vmatprep.mubr.msk.bf16.mxu0 %vm11442_vm0, %v12370_v45 }
 0x8ff   :  { %v9883_v40 = vpop.f32.mrb[40].mxu0 }
 0x900   :  { %v11427_v41 = vadd.low.f32.bf16 %v9883_v40, %v10487_v20  ;;  %v3206_v57 = vpop.f32.mrb[41].mxu0  ;;  %v4216_v40 = vld [vmem:[#allocation2 + $0x10] sm:$0xff] }
 0x901   :  { %v11428_v62 = vadd.low.f32.bf16 %v3206_v57, %v10481_v6  ;;  %v9884_v59 = vpop.f32.mrb[42].mxu0  ;;  %v4218_v57 = vmul.f32 %v4216_v40, %v11560_v30 }
 0x902   :  { %v11429_v35 = vadd.high.f32.bf16 %v9884_v59, %v10487_v20  ;;  %v3209_v3 = vpop.f32.mrb[43].mxu0  ;;  %v3251_v19 = vmax.f32 %v11427_v41, 0.0  ;;  %v4205_v59 = vmul.f32 %v4216_v40, %v11551_v25 }
 0x903   :  { %v11430_v55 = vadd.high.f32.bf16 %v3209_v3, %v10481_v6  ;;  %v3249_v52 = vmax.f32 %v11428_v62, 0.0  ;;  %v4242_v3 = vmul.f32 %v4216_v40, %v11570_v38 }
 0x904   :  { %v3252_v51 = vmax.f32 %v11429_v35, 0.0 }
 0x905   :  { %v3250_v50 = vmax.f32 %v11430_v55, 0.0 }
 0x906   :  { %v3255_v46 = vpack.c.bf16 %v3252_v51, %v3251_v19  ;;  %v3354_v19 = vpack.c.bf16 %v12370_v45, %v12370_v45  ;;  %v12721_v51 = vld [vmem:[%s14890_s4 + $0x140] ss:$16 sps:$4 sm:$0xff]  }
 0x907   :  { %v3254_v0 = vpack.c.bf16 %v3250_v50, %v3249_v52  ;;  %v3342_v52 = vmul.f32 %v12370_v45, %v12096_v49 }
 0x909   :  { %9887 = vmatprep.mubr.msk.bf16.mxu1 %vm1426_vm2, %v3254_v0  ;;  %v3350_v50 = vpack.c.bf16 %v3342_v52, %v3342_v52  ;;  %v12789_v52 = vld [vmem:[%s14890_s4 + $0x160] ss:$16 sps:$4 sm:$0xff]  }
 0x90a   :  { %9888 = vmatmul.mubr.msk.bf16.vlgmr.msra.gmra.mrb[36].mxu1 %vm1426_vm2, %v3255_v46  ;;  %v3514_v46 = vmul.f32 %v12370_v45, %v12094_v12 }
 0x90c   :  { %v3522_v0 = vpack.c.bf16 %v3514_v46, %v3514_v46 }
 0x986   :  { %v4140_v53 = vpop.f32.mrb[44].mxu0 }
 0x987   :  { %v4141_v28 = vadd.f32 %v4140_v53, %v4101_v10  ;;  %v9967_v42 = vpop.f32.mrb[45].mxu0  ;;  %v3605_v10 = vmul.f32 %v12370_v45, %v12114_v9 }
 0x988   :  { %v4143_v61 = vpop.f32.mrb[46].mxu0  ;;  %v11407_v42 = vld [vmem:[%s14892_s2 + $0x10] sm:$0xff] }
 0x989   :  { %v12683_v2 = vmax.f32 %v4141_v28, 0.0  ;;  %v9968_v58 = vpop.f32.mrb[47].mxu0  ;;  %v3613_v53 = vpack.c.bf16 %v3605_v10, %v3605_v10 }
 0x98b   :  { %v10491_v39 = vpack.i.bf16 %v12683_v2, %v12370_v45  ;;  %v4153_v33 = vmul.f32 %v12683_v2, %v11544_v16  ;;  %v4190_v27 = vmul.f32 %v12683_v2, %v11546_v18  ;;  %v4177_v7 = vmul.f32 %v12683_v2, %v11542_v15  ;;  %v11408_v45 = vld [vmem:[%s14892_s2] sm:$0xff] }
 0x98c   :  { %v4217_v6 = vmul.f32 %v12683_v2, %v11560_v30  ;;  %v10516_v55 = vpack.i.bf16 %v4216_v40, %v12683_v2 }
 0x98d   :  { %10492 = vrot.lane.b32.xlu1 %v10491_v39, %s11450_s30  ;;  %v10496_v63 = vpack.i.bf16 %v4153_v33, %v12379_v4  ;;  %v10506_v20 = vpack.i.bf16 %v4190_v27, %v12412_v36  ;;  %v10501_v41 = vpack.i.bf16 %v4177_v7, %v12391_v34  ;;  %v4204_v4 = vmul.f32 %v12683_v2, %v11551_v25  ;;  %v11409_v27 = vld [vmem:[%s14892_s2 + $0x18] sm:$0xff] }
 0x98e   :  { %v10521_v62 = vpack.i.bf16 %v4218_v57, %v4217_v6  ;;  %v4241_v36 = vmul.f32 %v12683_v2, %v11570_v38 }
 0x98f   :  { %10497 = vrot.lane.b32.xlu0 %v10496_v63, %s11449_s29  ;;  %v10511_v35 = vpack.i.bf16 %v4205_v59, %v4204_v4  ;;  %v3318_v59 = vld [vmem:[%s14890_s4 + $0x140] sm:$0xff] }
 0x990   :  { %v10526_v34 = vpack.i.bf16 %v4242_v3, %v4241_v36  ;;  %v3320_v36 = vld [vmem:[%s14890_s4 + $0x150] sm:$0xff] }
 0x991   :  { %10507 = vrot.lane.b32.xlu1 %v10506_v20, %s11447_s27  ;;  %v11410_v20 = vld [vmem:[%s14892_s2 + $0x8] sm:$0xff] }
 0x993   :  { %10502 = vrot.lane.b32.xlu0 %v10501_v41, %s11448_s28 }
 0x995   :  { %10522 = vrot.lane.b32.xlu1 %v10521_v62, %s11444_s24 }
 0x997   :  { %10512 = vrot.lane.b32.xlu0 %v10511_v35, %s11446_s26 }
 0x999   :  { %10527 = vrot.lane.b32.xlu1 %v10526_v34, %s11445_s25 }
 0x99b   :  { %10517 = vrot.lane.b32.xlu0 %v10516_v55, %s11451_s10 }
 0x99f   :  { %3376 = vrot.lane.b32.xlu0 %v3354_v19, %s11465_s11 }
 0x9a3   :  { %3380 = vrot.lane.b32.xlu0 %v3354_v19, %s11465_s11  ;;  %v12782_v19 = vcombine.high %v3318_v59, %v3320_v36 }
 0x9a7   :  { %3368 = vrot.lane.b32.xlu0 %v12721_v51, %s11460_s20 }
 0x9ab   :  { %3447 = vrot.lane.b32.xlu0 %v3350_v50, %s11464_s14 }
 0x9af   :  { %3451 = vrot.lane.b32.xlu0 %v3350_v50, %s11464_s14 }
 0x9b3   :  { %3534 = vrot.lane.b32.xlu0 %v3522_v0, %s11463_s13 }
 0x9b7   :  { %3538 = vrot.lane.b32.xlu0 %v3522_v0, %s11463_s13 }
 0x9bb   :  { %3526 = vrot.lane.b32.xlu0 %v12721_v51, %s11467_s0 }
 0x9bf   :  { %3625 = vrot.lane.b32.xlu0 %v3613_v53, %s11447_s27 }
 0x9c3   :  { %3629 = vrot.lane.b32.xlu0 %v3613_v53, %s11447_s27 }
 0x9c7   :  { %3617 = vrot.lane.b32.xlu0 %v12721_v51, %s11458_s8 }
 0x9dd   :  { %v9889_v28 = vpop.f32.mrb[36].mxu1 }
 0x9de   :  { %v3316_v61 = vadd.f32 %v11407_v42, %v9889_v28  ;;  %v3299_v58 = vpop.f32.mrb[37].mxu1 }
 0x9df   :  { %v3314_v39 = vadd.f32 %v11408_v45, %v3299_v58  ;;  %v9890_v33 = vpop.f32.mrb[38].mxu1 }
 0x9e0   :  { %3332 = vst.msk [vmem:[#allocation7 + $0x28] sm:$0xff] %vm787_vm10, %v3316_v61  ;;  %v3317_v63 = vadd.f32 %v11409_v27, %v9890_v33  ;;  %v3302_v7 = vpop.f32.mrb[39].mxu1 }
 0x9e1   :  { %3330 = vst.msk [vmem:[#allocation7 + $0x8] sm:$0xff] %vm787_vm10, %v3314_v39  ;;  %v3315_v6 = vadd.f32 %v11410_v20, %v3302_v7 }
 0x9e2   :  { %3333 = vst.msk [vmem:[#allocation7 + $0x38] sm:$0xff] %vm787_vm10, %v3317_v63 }
 0x9e3   :  { %3331 = vst.msk [vmem:[#allocation7 + $0x18] sm:$0xff] %vm787_vm10, %v3315_v6 }
 0x9e7   :  { %v12775_v34 = vld [vmem:[#allocation7 + $0x28] sm:$0xff] }
 0x9e8   :  { %v12757_v40 = vld [vmem:[#allocation7 + $0x8] sm:$0xff]  ;;  %v3347_v61 = vmul.f32 %v12775_v34, %v12096_v49  ;;  %v3519_v63 = vmul.f32 %v12775_v34, %v12094_v12 }
 0x9e9   :  { %v3761_v4 = vmul.f32 %v12757_v40, %v12098_v31  ;;  %v12771_v35 = vld [vmem:[#allocation7 + $0x38] sm:$0xff]  ;;  %v3838_v46 = vmul.f32 %v12757_v40, %v12126_v1  ;;  %v3343_v53 = vmul.f32 %v12757_v40, %v12096_v49  ;;  %v3515_v39 = vmul.f32 %v12757_v40, %v12094_v12 }
 0x9ea   :  { %v3337_v41 = vld [vmem:[#allocation7 + $0x18] sm:$0xff]  ;;  %v12780_v55 = vpack.c.bf16 %v12771_v35, %v12775_v34  ;;  %v3349_v42 = vmul.f32 %v12771_v35, %v12096_v49  ;;  %v3521_v27 = vmul.f32 %v12771_v35, %v12094_v12  ;;  %v3984_v59 = vmul.f32 %v12757_v40, %v12122_v32 }
 0x9eb   :  { %v12760_v57 = vpack.c.bf16 %v3337_v41, %v12757_v40  ;;  %v3762_v62 = vmul.f32 %v3337_v41, %v12098_v31  ;;  %v3839_v50 = vmul.f32 %v3337_v41, %v12126_v1  ;;  %v3345_v0 = vmul.f32 %v3337_v41, %v12096_v49 }
 0x9ec   :  { %v3353_v58 = vpack.c.bf16 %v3349_v42, %v3347_v61  ;;  %v3517_v45 = vmul.f32 %v3337_v41, %v12094_v12  ;;  %v3985_v7 = vmul.f32 %v3337_v41, %v12122_v32 }
 0x9ed   :  { %3378 = vrot.lane.b32.xlu1 %v12760_v57, %s11465_s11  ;;  %v3765_v3 = vpack.c.bf16 %v3762_v62, %v3761_v4  ;;  %v3842_v10 = vpack.c.bf16 %v3839_v50, %v3838_v46  ;;  %v3351_v28 = vpack.c.bf16 %v3345_v0, %v3343_v53  ;;  %v3525_v62 = vpack.c.bf16 %v3521_v27, %v3519_v63 }
 0x9ee   :  { %v3523_v33 = vpack.c.bf16 %v3517_v45, %v3515_v39  ;;  %v3988_v0 = vpack.c.bf16 %v3985_v7, %v3984_v59  ;;  %v3608_v45 = vmul.f32 %v3337_v41, %v12114_v9  ;;  %v3606_v7 = vmul.f32 %v12757_v40, %v12114_v9 }
 0x9ef   :  { %3773 = vrot.lane.b32.xlu0 %v3765_v3, %s11446_s26  ;;  %v12828_v3 = vld [vmem:[%s14890_s4 + $0x1a0] sm:$0xf]  ;;  %v3612_v59 = vmul.f32 %v12771_v35, %v12114_v9  ;;  %v3610_v40 = vmul.f32 %v12775_v34, %v12114_v9 }
 0x9f0   :  { %v3614_v41 = vpack.c.bf16 %v3608_v45, %v3606_v7 }
 0x9f1   :  { %3382 = vrot.lane.b32.xlu1 %v12780_v55, %s11465_s11  ;;  %v3616_v45 = vpack.c.bf16 %v3612_v59, %v3610_v40 }
 0x9f3   :  { %3767 = vrot.lane.b32.xlu0 %v12782_v19, %s11460_s20 }
 0x9f5   :  { %3370 = vrot.lane.b32.xlu1 %v12789_v52, %s11460_s20 }
 0x9f7   :  { %3850 = vrot.lane.b32.xlu0 %v3842_v10, %s11462_s9 }
 0x9f9   :  { %3449 = vrot.lane.b32.xlu1 %v3351_v28, %s11464_s14 }
 0x9fb   :  { %3844 = vrot.lane.b32.xlu0 %v12782_v19, %s11467_s0 }
 0x9fd   :  { %3453 = vrot.lane.b32.xlu1 %v3353_v58, %s11464_s14  ;;  %v4148_v58 = vunpack.c.l.bf16 %v12828_v3 }
 0x9ff   :  { %3919 = vrot.lane.b32.xlu0 %v12760_v57, %s11469_s16  ;;  %v10493_v20 = vpop.permute.xlu1 %10492 }
 0xa00   :  { %v10495_v6 = vunpack.i.h.bf16 %v10493_v20  ;;  %v10494_v4 = vunpack.i.l.bf16 %v10493_v20 }
 0xa01   :  { %3536 = vrot.lane.b32.xlu1 %v3523_v33, %s11463_s13  ;;  %v10498_v36 = vpop.permute.xlu0 %10497 }
 0xa02   :  { %v10500_v50 = vunpack.i.h.bf16 %v10498_v36  ;;  %v10499_v46 = vunpack.i.l.bf16 %v10498_v36  ;;  %v4171_v53 = vsel %vm79_vm1, %v10494_v4, %v10495_v6 }
 0xa03   :  { %3915 = vrot.lane.b32.xlu0 %v12782_v19, %s11458_s8  ;;  %v10508_v10 = vpop.permute.xlu1 %10507 }
 0xa04   :  { %v4160_v28 = vsel %vm22_vm4, %v10499_v46, %v10500_v50  ;;  %v10510_v42 = vunpack.i.h.bf16 %v10508_v10  ;;  %v10509_v61 = vunpack.i.l.bf16 %v10508_v10 }
 0xa05   :  { %3540 = vrot.lane.b32.xlu1 %v3525_v62, %s11463_s13  ;;  %v10503_v39 = vpop.permute.xlu0 %10502  ;;  %v4261_v33 = vpack.c.bf16 %v4171_v53, %v4160_v28  ;;  %v12842_v62 = vld [vmem:[#allocation2] sm:$0xff] }
 0xa06   :  { %v10505_v27 = vunpack.i.h.bf16 %v10503_v39  ;;  %v10504_v63 = vunpack.i.l.bf16 %v10503_v39  ;;  %v4197_v6 = vsel %vm212_vm5, %v10509_v61, %v10510_v42  ;;  %v4714_v7 = vmul.f32 %v12842_v62, %v11735_v47 }
 0xa07   :  { %4002 = vrot.lane.b32.xlu0 %v3988_v0, %s15059_s6  ;;  %v10523_v20 = vpop.permute.xlu1 %10522  ;;  %9970 = vmatpush3.bf16.msra.mxu0 %v4261_v33 }
 0xa08   :  { %v4184_v4 = vsel %vm195_vm6, %v10504_v63, %v10505_v27  ;;  %9971 = vmatprep.subr.bf16.mxu0 %v12842_v62  ;;  %v10525_v10 = vunpack.i.h.bf16 %v10523_v20  ;;  %v10524_v28 = vunpack.i.l.bf16 %v10523_v20 }
 0xa09   :  { %3528 = vrot.lane.b32.xlu1 %v12789_v52, %s11467_s0  ;;  %v10513_v36 = vpop.permute.xlu0 %10512  ;;  %v4262_v50 = vpack.c.bf16 %v4197_v6, %v4184_v4 }
 0xa0a   :  { %v10515_v46 = vunpack.i.h.bf16 %v10513_v36  ;;  %v10514_v0 = vunpack.i.l.bf16 %v10513_v36  ;;  %v4225_v6 = vsel %vm14981_vm9, %v10524_v28, %v10525_v10  ;;  %v12880_v10 = vld [vmem:[%s14890_s4 + $0x164] ss:$16 sps:$4 sm:$0xff]  }
 0xa0b   :  { %4268 = vperm.xlu0 %10531, %v4148_v58   ;;  %v10528_v53 = vpop.permute.xlu1 %10527  ;;  %9972 = vmatpush3.bf16.msra.mxu0 %v4262_v50  ;;  %v3763_v50 = vmul.f32 %v12775_v34, %v12098_v31 }
 0xa0c   :  { %v4212_v42 = vsel %vm231_vm7, %v10514_v0, %v10515_v46  ;;  %v10530_v61 = vunpack.i.h.bf16 %v10528_v53  ;;  %v10529_v58 = vunpack.i.l.bf16 %v10528_v53  ;;  %9973 = vmatprep.subr.bf16.mxu0 %v12842_v62  ;;  %v3841_v53 = vmul.f32 %v12771_v35, %v12126_v1 }
 0xa0d   :  { %3627 = vrot.lane.b32.xlu1 %v3614_v41, %s11447_s27  ;;  %v10518_v39 = vpop.permute.xlu0 %10517  ;;  %v4263_v33 = vpack.c.bf16 %v4212_v42, %v12683_v2  ;;  %v3764_v2 = vmul.f32 %v12771_v35, %v12098_v31  ;;  %v3840_v42 = vmul.f32 %v12775_v34, %v12126_v1 }
 0xa0e   :  { %v10520_v27 = vunpack.i.h.bf16 %v10518_v39  ;;  %v10519_v63 = vunpack.i.l.bf16 %v10518_v39  ;;  %v4249_v20 = vsel %vm15060_vm15, %v10529_v58, %v10530_v61  ;;  %v3986_v58 = vmul.f32 %v12775_v34, %v12122_v32  ;;  %v11412_v39 = vld [vmem:[%s14890_s4 + $0x40] sm:$0xf]  ;;  %v12917_v34 = vld [vmem:[%s14890_s4 + $0x148] sm:$0xf] }
 0xa0f   :  { %4650 = vrot.lane.b32.xlu0 %v12842_v62, %s11458_s8  ;;  %9974 = vmatpush3.bf16.msra.mxu0 %v4263_v33  ;;  %v4265_v36 = vpack.c.bf16 %v4249_v20, %v4249_v20  ;;  %v3766_v46 = vpack.c.bf16 %v3764_v2, %v3763_v50  ;;  %v3843_v61 = vpack.c.bf16 %v3841_v53, %v3840_v42  ;;  %v629_v33 = vunpack.c.l.bf16 %v11412_v39  ;;  %v11243_v20 = vld [vmem:[%s14890_s4 + $0x388] ss:$16 sps:$4 sm:$0xff]   ;;  %v11263_v50 = vld [vmem:[%s14890_s4 + $0x3ec] ss:$16 sps:$4 sm:$0xff]  }
 0xa10   :  { %10574 = vset.pattern.permute.xlu0 %v15049_v8  ;;  %v4236_v4 = vsel %vm15061_vm14, %v10519_v63, %v10520_v27  ;;  %9975 = vmatprep.subr.bf16.mxu0 %v12842_v62  ;;  %v4608_v27 = vmul.f32 %v12842_v62, %v11730_v43  ;;  %v12922_v63 = vld [vmem:[%s14890_s4 + $0x158] sm:$0xf]  ;;  %v11275_v42 = vld [vmem:[%s14890_s4 + $0x42c] ss:$16 sps:$4 sm:$0xff]   ;;  %vm15089_vm15 = vcmask 269312  }
 0xa11   :  { %3631 = vrot.lane.b32.xlu1 %v3616_v45, %s11447_s27  ;;  %v12866_v41 = vpop.permute.xlu0 %3376  ;;  %v4264_v59 = vpack.c.bf16 %v4236_v4, %v4225_v6  ;;  %v4275_v40 = vsel %vm304_vm11, %v4265_v36, 0  ;;  %v11245_v6 = vld [vmem:[%s14890_s4 + $0x38c] ss:$16 sps:$4 sm:$0xff]   ;;  %v11249_v2 = vld [vmem:[%s14890_s4 + $0x3a8] ss:$16 sps:$4 sm:$0xff]   ;;  %vm15090_vm14 = vmmov %vm15089_vm15 }
 0xa12   :  { %v11251_v4 = vld [vmem:[%s14890_s4 + $0x3ac] ss:$16 sps:$4 sm:$0xff]   ;;  %v11255_v36 = vld [vmem:[%s14890_s4 + $0x3c8] ss:$16 sps:$4 sm:$0xff]  }
 0xa13   :  { %4724 = vrot.lane.b32.xlu0 %v4714_v7, %s11447_s27  ;;  %9976 = vmatpush3.bf16.msra.mxu0 %v4264_v59  ;;  %v9384_v7 = vcombine.low %v12917_v34, %v12922_v63  ;;  %v11257_v59 = vld [vmem:[%s14890_s4 + $0x3cc] ss:$16 sps:$4 sm:$0xff]  }
 0xa14   :  { %9977 = vmatprep.subr.bf16.mxu0 %v12842_v62 }
 0xa15   :  { %3619 = vrot.lane.b32.xlu1 %v12789_v52, %s11458_s8  ;;  %v12873_v0 = vpop.permute.xlu0 %3380 }
 0xa17   :  { %9978 = vmatpush3.bf16.msra.mxu0 %v4275_v40  ;;  %v11269_v40 = vld [vmem:[%s14890_s4 + $0x40c] ss:$16 sps:$4 sm:$0xff]  }
 0xa18   :  { %4552 = vmatprep.subr.bf16.mxu0 %v11245_v6 }
 0xa19   :  { %3775 = vrot.lane.b32.xlu1 %v3766_v46, %s11446_s26  ;;  %v3369_v28 = vpop.permute.xlu0 %3368  ;;  %v11261_v46 = vld [vmem:[%s14890_s4 + $0x3e8] ss:$16 sps:$4 sm:$0xff]  }
 0xa1a   :  { %9980 = vmatmul.mubr.msk.bf16.vlgmr.msra.gmra.mrb[48].mxu0 %vm300_vm12, %v12828_v3  ;;  %9895 = vmatprep.mubr.msk.bf16.mxu1 %vm787_vm10, %v3369_v28  ;;  %v3987_v3 = vmul.f32 %v12771_v35, %v12122_v32  ;;  %v4677_v35 = vmul.f32 %v12842_v62, %v11732_v44  ;;  %v11267_v28 = vld [vmem:[%s14890_s4 + $0x408] ss:$16 sps:$4 sm:$0xff]  }
 0xa1b   :  { %4584 = vmatprep.mubr.bf16.mxu0 %v15048_v22  ;;  %4553 = vmatpush1.bf16.msra.mxu0 %v11243_v20 }
 0xa1c   :  { %v3989_v45 = vpack.c.bf16 %v3987_v3, %v3986_v58  ;;  %4554 = vmatprep.subr.bf16.mxu0 %v11251_v4 }
 0xa1d   :  { %3769 = vrot.lane.b32.xlu1 %v12880_v10, %s11460_s20  ;;  %v3448_v53 = vpop.permute.xlu0 %3447 }
 0xa1f   :  { %4555 = vmatpush1.bf16.msra.mxu0 %v11249_v2 }
 0xa20   :  { %4556 = vmatprep.subr.bf16.mxu0 %v11257_v59 }
 0xa21   :  { %3852 = vrot.lane.b32.xlu1 %v3843_v61, %s11462_s9  ;;  %v11273_v61 = vld [vmem:[%s14890_s4 + $0x428] ss:$16 sps:$4 sm:$0xff]   ;;  %v3452_v3 = vpop.permute.xlu0 %3451 }
 0xa23   :  { %4557 = vmatpush1.bf16.msra.mxu0 %v11255_v36 }
 0xa24   :  { %4558 = vmatprep.subr.bf16.mxu0 %v11263_v50 }
 0xa25   :  { %3846 = vrot.lane.b32.xlu1 %v12880_v10, %s11467_s0  ;;  %v3535_v20 = vpop.permute.xlu0 %3534 }
 0xa27   :  { %4559 = vmatpush1.bf16.msra.mxu0 %v11261_v46 }
 0xa28   :  { %4560 = vmatprep.subr.bf16.mxu0 %v11269_v40  ;;  %v11285_v40 = vld [vmem:[%s14890_s4 + $0x468] ss:$16 sps:$4 sm:$0xff]  }
 0xa29   :  { %3921 = vrot.lane.b32.xlu1 %v12780_v55, %s11469_s16 }
 0xa2b   :  { %4561 = vmatpush1.bf16.msra.mxu0 %v11267_v28  ;;  %v3327_v28 = vunpack.c.l.bf16 %v12922_v63  ;;  %v11240_v63 = vld [vmem:[%s14890_s4 + $0x380] ss:$16 sps:$4 sm:$0xff]  }
 0xa2c   :  { %4562 = vmatprep.subr.bf16.mxu0 %v11275_v42 }
 0xa2d   :  { %3917 = vrot.lane.b32.xlu1 %v12880_v10, %s11458_s8 }
 0xa2f   :  { %4563 = vmatpush1.bf16.msra.mxu0 %v11273_v61 }
 0xa31   :  { %4004 = vrot.lane.b32.xlu1 %v3989_v45, %s15059_s6  ;;  %v11281_v45 = vld [vmem:[%s14890_s4 + $0x44c] ss:$16 sps:$4 sm:$0xff]  }
 0xa32   :  { %4564 = vmatprep.subr.bf16.mxu0 %v11281_v45 }
 0xa35   :  { %1194 = vperm.xlu1 %10532, %v629_v33   ;;  %v11279_v33 = vld [vmem:[%s14890_s4 + $0x448] ss:$16 sps:$4 sm:$0xff]  }
 0xa36   :  { %4565 = vmatpush1.bf16.msra.mxu0 %v11279_v33 }
 0xa39   :  { %4618 = vrot.lane.b32.xlu1 %v4608_v27, %s15062_s22 }
 0xa3a   :  { %10533 = vset.pattern.permute.xlu1 %v15049_v8 }
 0xa3d   :  { %4687 = vrot.lane.b32.xlu1 %v4677_v35, %s15063_s23 }
 0xa5f   :  { %v3379_v58 = vpop.permute.xlu1 %3378 }
 0xa60   :  { %v3384_v39 = vsel %vm1426_vm2, %v12866_v41, %v3379_v58  ;;  %v3539_v41 = vpop.permute.xlu0 %3538 }
 0xa61   :  { %9891 = vmatprep.subr.bf16.mxu1 %v3384_v39 }
 0xa62   :  { %9892 = vmatpush3.bf16.msra.mxu1 %v3384_v39 }
 0xa63   :  { %v3383_v27 = vpop.permute.xlu1 %3382 }
 0xa64   :  { %v3385_v35 = vsel %vm1426_vm2, %v12873_v0, %v3383_v27  ;;  %v3527_v0 = vpop.permute.xlu0 %3526 }
 0xa65   :  { %9893 = vmatprep.subr.bf16.mxu1 %v3385_v35 }
 0xa66   :  { %9894 = vmatpush3.bf16.msra.mxu1 %v3385_v35 }
 0xa67   :  { %v3371_v6 = vpop.permute.xlu1 %3370 }
 0xa68   :  { %v3626_v42 = vpop.permute.xlu0 %3625 }
 0xa69   :  { %9896 = vmatmul.mubr.msk.bf16.vlgmr.msra.gmra.mrb[40].mxu1 %vm787_vm10, %v3371_v6 }
 0xa6a   :  { %9903 = vmatprep.mubr.msk.bf16.mxu1 %vm787_vm10, %v12721_v51  ;;  %v11287_v51 = vld [vmem:[%s14890_s4 + $0x46c] ss:$16 sps:$4 sm:$0xff]  }
 0xa6b   :  { %v3450_v4 = vpop.permute.xlu1 %3449  ;;  %4566 = vmatprep.subr.bf16.mxu0 %v11287_v51 }
 0xa6c   :  { %v3455_v2 = vsel %vm1479_vm13, %v3448_v53, %v3450_v4  ;;  %v3326_v53 = vunpack.c.l.bf16 %v12917_v34  ;;  %4567 = vmatpush1.bf16.msra.mxu0 %v11285_v40  ;;  %v3630_v45 = vpop.permute.xlu0 %3629 }
 0xa6d   :  { %9899 = vmatprep.subr.bf16.mxu1 %v3455_v2 }
 0xa6e   :  { %9900 = vmatpush3.bf16.msra.mxu1 %v3455_v2  ;;  %v10534_v58 = vpack.i.bf16 %v3327_v28, %v3326_v53  ;;  %v11242_v53 = vld [vmem:[%s14890_s4 + $0x384] ss:$16 sps:$4 sm:$0xff]   ;;  %v13020_v28 = vld [vmem:[%s14890_s4 + $0x168] sm:$0xf] }
 0xa6f   :  { %v3454_v59 = vpop.permute.xlu1 %3453 }
 0xa70   :  { %v3456_v36 = vsel %vm1479_vm13, %v3452_v3, %v3454_v59  ;;  %10535 = vperm.xlu1 %10533, %v10534_v58   ;;  %v3618_v27 = vpop.permute.xlu0 %3617  ;;  %v11252_v58 = vld [vmem:[%s14890_s4 + $0x3c0] ss:$16 sps:$4 sm:$0xff]  }
 0xa71   :  { %9901 = vmatprep.subr.bf16.mxu1 %v3456_v36 }
 0xa72   :  { %9902 = vmatpush3.bf16.msra.mxu1 %v3456_v36 }
 0xa73   :  { %v3537_v50 = vpop.permute.xlu1 %3536 }
 0xa74   :  { %v3542_v46 = vsel %vm15064_vm8, %v3535_v20, %v3537_v50  ;;  %10721 = vset.pattern.permute.xlu1 %v15058_v54  ;;  %vm15091_vm8 = vcmask 252928  }
 0xa75   :  { %9904 = vmatmul.mubr.msk.bf16.vlgmr.msra.gmra.mrb[40].mxu1 %vm787_vm10, %v12789_v52  ;;  %9907 = vmatprep.subr.bf16.mxu1 %v3542_v46 }
 0xa76   :  { %9908 = vmatpush3.bf16.msra.mxu1 %v3542_v46  ;;  %9911 = vmatprep.mubr.msk.bf16.mxu1 %vm787_vm10, %v3527_v0 }
 0xa77   :  { %v3541_v61 = vpop.permute.xlu1 %3540 }
 0xa78   :  { %v3543_v3 = vsel %vm15065_vm3, %v3539_v41, %v3541_v61  ;;  %v3774_v41 = vpop.permute.xlu0 %3773  ;;  %v11246_v61 = vld [vmem:[%s14890_s4 + $0x3a0] ss:$16 sps:$4 sm:$0xff]   ;;  %vm15092_vm3 = vmmov %vm15091_vm8 }
 0xa79   :  { %9909 = vmatprep.subr.bf16.mxu1 %v3543_v3 }
 0xa7a   :  { %9910 = vmatpush3.bf16.msra.mxu1 %v3543_v3  ;;  %v11254_v3 = vld [vmem:[%s14890_s4 + $0x3c4] ss:$16 sps:$4 sm:$0xff]  }
 0xa7b   :  { %v3529_v52 = vpop.permute.xlu1 %3528 }
 0xa7c   :  { %v3768_v4 = vpop.permute.xlu0 %3767 }
 0xa7f   :  { %v3628_v39 = vpop.permute.xlu1 %3627 }
 0xa80   :  { %v3633_v33 = vsel %vm212_vm5, %v3626_v42, %v3628_v39  ;;  %v3851_v59 = vpop.permute.xlu0 %3850  ;;  %v13025_v42 = vld [vmem:[%s14890_s4 + $0x178] sm:$0xf]  ;;  %v11266_v39 = vld [vmem:[%s14890_s4 + $0x404] ss:$16 sps:$4 sm:$0xff]  }
 0xa81   :  { %9912 = vmatmul.mubr.msk.bf16.vlgmr.msra.gmra.mrb[40].mxu1 %vm787_vm10, %v3529_v52  ;;  %9915 = vmatprep.subr.bf16.mxu1 %v3633_v33  ;;  %v9385_v34 = vcombine.low %v13020_v28, %v13025_v42  ;;  %v11260_v52 = vld [vmem:[%s14890_s4 + $0x3e4] ss:$16 sps:$4 sm:$0xff]  }
 0xa82   :  { %9916 = vmatpush3.bf16.msra.mxu1 %v3633_v33  ;;  %9919 = vmatprep.mubr.msk.bf16.mxu1 %vm787_vm10, %v3618_v27  ;;  %v11264_v33 = vld [vmem:[%s14890_s4 + $0x400] ss:$16 sps:$4 sm:$0xff]   ;;  %v11272_v27 = vld [vmem:[%s14890_s4 + $0x424] ss:$16 sps:$4 sm:$0xff]  }
 0xa83   :  { %v3632_v35 = vpop.permute.xlu1 %3631 }
 0xa84   :  { %v3634_v20 = vsel %vm212_vm5, %v3630_v45, %v3632_v35  ;;  %v11258_v45 = vld [vmem:[%s14890_s4 + $0x3e0] ss:$16 sps:$4 sm:$0xff]  }
 0xa85   :  { %9917 = vmatprep.subr.bf16.mxu1 %v3634_v20  ;;  %v11270_v35 = vld [vmem:[%s14890_s4 + $0x420] ss:$16 sps:$4 sm:$0xff]  }
 0xa86   :  { %9918 = vmatpush3.bf16.msra.mxu1 %v3634_v20  ;;  %v11278_v20 = vld [vmem:[%s14890_s4 + $0x444] ss:$16 sps:$4 sm:$0xff]  }
 0xa87   :  { %9923 = vmatprep.subr.bf16.mxu1 %v12760_v57  ;;  %v3620_v6 = vpop.permute.xlu1 %3619 }
 0xa8b   :  { %v3776_v2 = vpop.permute.xlu1 %3775 }
 0xa8d   :  { %9920 = vmatmul.mubr.msk.bf16.vlgmr.msra.gmra.mrb[40].mxu1 %vm787_vm10, %v3620_v6  ;;  %v11276_v6 = vld [vmem:[%s14890_s4 + $0x440] ss:$16 sps:$4 sm:$0xff]  }
 0xa8e   :  { %9924 = vmatpush3.bf16.msra.mxu1 %v12760_v57  ;;  %9927 = vmatprep.mubr.msk.bf16.mxu1 %vm787_vm10, %v12782_v19  ;;  %v3845_v19 = vpop.permute.xlu0 %3844 }
 0xa8f   :  { %9925 = vmatprep.subr.bf16.mxu1 %v12780_v55  ;;  %v3770_v57 = vpop.permute.xlu1 %3769 }
 0xa92   :  { %9926 = vmatpush3.bf16.msra.mxu1 %v12780_v55  ;;  %v3920_v55 = vpop.permute.xlu0 %3919 }
 0xa93   :  { %9931 = vmatprep.subr.bf16.mxu1 %v3774_v41  ;;  %v3853_v36 = vpop.permute.xlu1 %3852 }
 0xa96   :  { %v3916_v0 = vpop.permute.xlu0 %3915 }
 0xa99   :  { %9928 = vmatmul.mubr.msk.bf16.vlgmr.msra.gmra.mrb[40].mxu1 %vm787_vm10, %v12880_v10  ;;  %v3847_v10 = vpop.permute.xlu1 %3846 }
 0xa9a   :  { %9932 = vmatpush3.bf16.msra.mxu1 %v3774_v41  ;;  %9935 = vmatprep.mubr.msk.bf16.mxu1 %vm787_vm10, %v3768_v4  ;;  %v4003_v46 = vpop.permute.xlu0 %4002  ;;  %v11284_v41 = vld [vmem:[%s14890_s4 + $0x464] ss:$16 sps:$4 sm:$0xff]   ;;  %v11282_v4 = vld [vmem:[%s14890_s4 + $0x460] ss:$16 sps:$4 sm:$0xff]  }
 0xa9b   :  { %9933 = vmatprep.subr.bf16.mxu1 %v3776_v2 }
 0xa9d   :  { %v3922_v50 = vpop.permute.xlu1 %3921 }
 0xa9e   :  { %9934 = vmatpush3.bf16.msra.mxu1 %v3776_v2  ;;  %v4269_v2 = vpop.permute.xlu0 %4268 }
 0xa9f   :  { %9939 = vmatprep.subr.bf16.mxu1 %v3851_v59 }
 0xaa1   :  { %v3918_v40 = vpop.permute.xlu1 %3917 }
 0xaa5   :  { %9936 = vmatmul.mubr.msk.bf16.vlgmr.msra.gmra.mrb[40].mxu1 %vm787_vm10, %v3770_v57  ;;  %v4005_v51 = vpop.permute.xlu1 %4004 }
 0xaa6   :  { %9940 = vmatpush3.bf16.msra.mxu1 %v3851_v59  ;;  %9943 = vmatprep.mubr.msk.bf16.mxu1 %vm787_vm10, %v3845_v19 }
 0xaa7   :  { %9941 = vmatprep.subr.bf16.mxu1 %v3853_v36 }
 0xaaa   :  { %9942 = vmatpush3.bf16.msra.mxu1 %v3853_v36 }
 0xaab   :  { %9947 = vmatprep.subr.bf16.mxu1 %v3920_v55 }
 0xab1   :  { %9944 = vmatmul.mubr.msk.bf16.vlgmr.msra.gmra.mrb[40].mxu1 %vm787_vm10, %v3847_v10 }
 0xab2   :  { %9948 = vmatpush3.bf16.msra.mxu1 %v3920_v55  ;;  %9951 = vmatprep.mubr.msk.bf16.mxu1 %vm787_vm10, %v3916_v0 }
 0xab3   :  { %9949 = vmatprep.subr.bf16.mxu1 %v3922_v50 }
 0xab6   :  { %9950 = vmatpush3.bf16.msra.mxu1 %v3922_v50  ;;  %v13081_v50 = vld [vmem:[%s14890_s4 + $0x1e0] sm:$0xf] }
 0xab7   :  { %9955 = vmatprep.subr.bf16.mxu1 %v4003_v46 }
 0xabd   :  { %9952 = vmatmul.mubr.msk.bf16.vlgmr.msra.gmra.mrb[40].mxu1 %vm787_vm10, %v3918_v40 }
 0xabe   :  { %9956 = vmatpush3.bf16.msra.mxu1 %v4003_v46  ;;  %9959 = vmatprep.mubr.msk.bf16.mxu1 %vm787_vm10, %v9384_v7  ;;  %v11248_v7 = vld [vmem:[%s14890_s4 + $0x3a4] ss:$16 sps:$4 sm:$0xff]   ;;  %v13086_v46 = vld [vmem:[%s14890_s4 + $0x1f0] sm:$0xf] }
 0xabf   :  { %9957 = vmatprep.subr.bf16.mxu1 %v4005_v51 }
 0xac2   :  { %9958 = vmatpush3.bf16.msra.mxu1 %v4005_v51  ;;  %v1195_v51 = vpop.permute.xlu1 %1194 }
 0xac3   :  { %4511 = vmatprep.subr.bf16.mxu1 %v11242_v53 }
 0xac6   :  { %v13090_v53 = vpop.permute.xlu1 %4618 }
 0xac9   :  { %9960 = vmatmul.mubr.msk.bf16.vlgmr.msra.gmra.mrb[40].mxu1 %vm787_vm10, %v9385_v34 }
 0xaca   :  { %4512 = vmatpush1.bf16.msra.mxu1 %v11240_v63  ;;  %4543 = vmatprep.mubr.bf16.mxu1 %v15048_v22  ;;  %v13092_v34 = vpop.permute.xlu1 %4687 }
 0xacb   :  { %4513 = vmatprep.subr.bf16.mxu1 %v11248_v7 }
 0xace   :  { %4514 = vmatpush1.bf16.msra.mxu1 %v11246_v61 }
 0xacf   :  { %4515 = vmatprep.subr.bf16.mxu1 %v11254_v3 }
 0xad2   :  { %4516 = vmatpush1.bf16.msra.mxu1 %v11252_v58 }
 0xad3   :  { %4517 = vmatprep.subr.bf16.mxu1 %v11260_v52 }
 0xad6   :  { %4518 = vmatpush1.bf16.msra.mxu1 %v11258_v45 }
 0xad7   :  { %4519 = vmatprep.subr.bf16.mxu1 %v11266_v39 }
 0xada   :  { %4520 = vmatpush1.bf16.msra.mxu1 %v11264_v33 }
 0xadb   :  { %4521 = vmatprep.subr.bf16.mxu1 %v11272_v27 }
 0xade   :  { %4522 = vmatpush1.bf16.msra.mxu1 %v11270_v35  ;;  %v1247_v35 = vadd.f32 %v12168_v56, %v1195_v51 }
 0xadf   :  { %4523 = vmatprep.subr.bf16.mxu1 %v11278_v20  ;;  %v1288_v20 = vadd.f32 %v12240_v13, %v1195_v51 }
 0xae2   :  { %4524 = vmatpush1.bf16.msra.mxu1 %v11276_v6  ;;  %v1249_v6 = vadd.f32 %v12170_v60, %v1195_v51 }
 0xae3   :  { %4525 = vmatprep.subr.bf16.mxu1 %v11284_v41  ;;  %v1290_v41 = vadd.f32 %v12245_v48, %v1195_v51 }
 0xae6   :  { %4526 = vmatpush1.bf16.msra.mxu1 %v11282_v4  ;;  %v1294_v4 = vmax.f32 %v1247_v35, 0.0 }
 0xaed   :  { %v4311_v59 = vpop.f32.mrb[48].mxu0 }
 0xaee   :  { %v4312_v57 = vadd.f32 %v4311_v59, %v4269_v2  ;;  %v9981_v19 = vpop.f32.mrb[49].mxu0  ;;  %v1296_v2 = vmax.f32 %v1288_v20, 0.0 }
 0xaef   :  { %v4314_v36 = vpop.f32.mrb[50].mxu0  ;;  %v10536_v63 = vpop.permute.xlu1 %10535  ;;  %v1295_v19 = vmax.f32 %v1249_v6, 0.0 }
 0xaf0   :  { %v4317_v55 = vmax.f32 %v4312_v57, 0.0  ;;  %v9982_v10 = vpop.f32.mrb[51].mxu0  ;;  %v1297_v36 = vmax.f32 %v1290_v41, 0.0 }
 0xaf2   :  { %v4350_v0 = vpack.c.bf16 %v4317_v55, %v4317_v55 }
 0xaf4   :  { %4544 = vmatmul.mubr.bf16.vlgmr.msra.gmra.mrb[44].mxu1 %v4350_v0  ;;  %4585 = vmatmul.mubr.bf16.vlgmr.msra.gmra.mrb[52].mxu0 %v4350_v0 }
 0xaf5   :  { %5005 = vmatprep.mubr.bf16.mxu1 %v15048_v22  ;;  %5046 = vmatprep.mubr.bf16.mxu0 %v15048_v22 }
 0xb9c   :  { %v13094_v7 = vpop.f32.mrb[40].mxu1 }
 0xb9d   :  { %v4048_v61 = vpop.f32.mrb[41].mxu1 }
 0xb9e   :  { %v11431_v3 = vadd.low.f32.bf16 %v4048_v61, %v10536_v63  ;;  %v13096_v58 = vpop.f32.mrb[42].mxu1 }
 0xb9f   :  { %v4051_v52 = vpop.f32.mrb[43].mxu1 }
 0xba0   :  { %v11432_v45 = vadd.high.f32.bf16 %v4051_v52, %v10536_v63  ;;  %v4091_v39 = vmax.f32 %v11431_v3, 0.0 }
 0xba2   :  { %v4092_v33 = vmax.f32 %v11432_v45, 0.0 }
 0xba4   :  { %v13098_v27 = vpack.c.bf16 %v4092_v33, %v4091_v39 }
 0xba6   :  { %15066 = vst [vmem:[#allocation38_spill] sm:$0xff] %v13098_v27 }
 0xbc7   :  { %v4545_v59 = vpop.f32.mrb[44].mxu1  ;;  %v4586_v57 = vpop.f32.mrb[52].mxu0 }
 0xbc8   :  { %v13104_v55 = vadd.f32 %v4545_v59, %v1294_v4  ;;  %v13106_v10 = vadd.f32 %v4586_v57, %v1296_v2  ;;  %v4547_v0 = vpop.f32.mrb[45].mxu1  ;;  %v4588_v63 = vpop.f32.mrb[53].mxu0  ;;  %v15067_v57 = vld [vmem:[#allocation18_spill] sm:$0xff] }
 0xbc9   :  { %v13108_v61 = vadd.f32 %v4547_v0, %v1295_v19  ;;  %v13110_v56 = vadd.f32 %v4588_v63, %v1297_v36  ;;  %v4549_v13 = vpop.f32.mrb[46].mxu1  ;;  %v4590_v60 = vpop.f32.mrb[54].mxu0  ;;  %v15068_v36 = vld [vmem:[#allocation21_spill] sm:$0xff]  ;;  %v15069_v63 = vld [vmem:[#allocation22_spill] sm:$0xff] }
 0xbca   :  { %v4550_v3 = vpop.f32.mrb[47].mxu1  ;;  %v4591_v48 = vpop.f32.mrb[55].mxu0  ;;  %v4609_v45 = vmul.f32 %v13104_v55, %v11777_v5  ;;  %v4759_v33 = vmul.f32 %v11787_v17, %v13104_v55  ;;  %v4715_v35 = vmul.f32 %v13104_v55, %v11803_v24  ;;  %v4678_v41 = vmul.f32 %v13104_v55, %v11795_v21  ;;  %v15070_v60 = vld [vmem:[#allocation19_spill] sm:$0xff] }
 0xbcb   :  { %v10539_v51 = vpack.i.bf16 %v13108_v61, %v13104_v55  ;;  %v10544_v52 = vpack.i.bf16 %v13106_v10, %v13108_v61  ;;  %v4610_v39 = vmul.f32 %v13108_v61, %v11783_v11  ;;  %v4716_v6 = vmul.f32 %v13108_v61, %v11807_v26  ;;  %v15071_v48 = vld [vmem:[#allocation20_spill] sm:$0xff] }
 0xbcc   :  { %v4679_v4 = vmul.f32 %v13108_v61, %v11799_v23  ;;  %v4796_v19 = vmul.f32 %v15067_v57, %v13104_v55  ;;  %v4797_v0 = vmul.f32 %v13108_v61, %v15068_v36  ;;  %v4798_v13 = vmul.f32 %v13106_v10, %v15069_v63  ;;  %v15087_v63 = vld [vmem:[#allocation37_spill] sm:$0xff] }
 0xbcd   :  { %10540 = vrot.lane.b32.xlu0 %v10539_v51, %s11458_s8  ;;  %10545 = vrot.lane.b32.xlu1 %v10544_v52, %s11460_s20  ;;  %v10549_v20 = vpack.i.bf16 %v4610_v39, %v4609_v45  ;;  %v10559_v2 = vpack.i.bf16 %v4716_v6, %v4715_v35  ;;  %v4760_v3 = vmul.f32 %v13108_v61, %v15070_v60  ;;  %v3328_v52 = vunpack.c.l.bf16 %v13020_v28  ;;  %v15073_v35 = vld [vmem:[#allocation23_spill] sm:$0xff]  ;;  %v15074_v6 = vld [vmem:[#allocation24_spill] sm:$0xff] }
 0xbce   :  { %v10554_v59 = vpack.i.bf16 %v4679_v4, %v4678_v41  ;;  %v4761_v51 = vmul.f32 %v13106_v10, %v15071_v48  ;;  %v3329_v45 = vunpack.c.l.bf16 %v13025_v42  ;;  %v10569_v39 = vpack.i.bf16 %v4798_v13, %v4797_v0  ;;  %v15077_v13 = vld [vmem:[#allocation27_spill] sm:$0xff] }
 0xbcf   :  { %v4866_v41 = vmul.f32 %v13108_v61, %v15074_v6  ;;  %v15085_v6 = vld [vmem:[#allocation35_spill] sm:$0xff] }
 0xbd0   :  { %v10575_v4 = vpack.i.bf16 %v3329_v45, %v3328_v52  ;;  %v10590_v52 = vpack.i.bf16 %v13110_v56, %v13106_v10  ;;  %v15079_v45 = vld [vmem:[#allocation33_spill] sm:$0xff] }
 0xbd1   :  { %4769 = vrot.lane.b32.xlu0 %v4759_v33, %s11446_s26  ;;  %10550 = vrot.lane.b32.xlu1 %v10549_v20, %s15062_s22  ;;  %v10564_v33 = vpack.i.bf16 %v4761_v51, %v4760_v3  ;;  %v4865_v20 = vmul.f32 %v15073_v35, %v13104_v55  ;;  %v4611_v3 = vmul.f32 %v13106_v10, %v15077_v13  ;;  %v15078_v51 = vld [vmem:[#allocation26_spill] sm:$0xff] }
 0xbd3   :  { %v10580_v28 = vpack.i.bf16 %v4866_v41, %v4865_v20  ;;  %v15080_v41 = vld [vmem:[#allocation32_spill] sm:$0xff] }
 0xbd5   :  { %10560 = vrot.lane.b32.xlu0 %v10559_v2, %s11447_s27  ;;  %10555 = vrot.lane.b32.xlu1 %v10554_v59, %s15063_s23  ;;  %v5061_v2 = vunpack.c.l.bf16 %v13081_v50  ;;  %v5062_v59 = vunpack.c.l.bf16 %v13086_v46 }
 0xbd7   :  { %v10585_v42 = vpack.i.bf16 %v5062_v59, %v5061_v2  ;;  %v15081_v2 = vld [vmem:[#allocation29_spill] sm:$0xff] }
 0xbd8   :  { %v4680_v59 = vmul.f32 %v13106_v10, %v15081_v2 }
 0xbd9   :  { %4806 = vrot.lane.b32.xlu0 %v4796_v19, %s15072_s1  ;;  %4838 = vrot.lane.b32.xlu1 %v13104_v55, %s11460_s20  ;;  %v15076_v19 = vld [vmem:[#allocation25_spill] sm:$0xff] }
 0xbda   :  { %v4867_v0 = vmul.f32 %v13106_v10, %v15076_v19  ;;  %v15083_v19 = vld [vmem:[#allocation36_spill] sm:$0xff] }
 0xbdd   :  { %10570 = vrot.lane.b32.xlu0 %v10569_v39, %s15072_s1  ;;  %10565 = vrot.lane.b32.xlu1 %v10564_v33, %s11446_s26  ;;  %v4612_v39 = vmul.f32 %v13110_v56, %v15078_v51  ;;  %v4717_v33 = vmul.f32 %v13106_v10, %v15079_v45 }
 0xbdf   :  { %v10595_v20 = vpack.i.bf16 %v4612_v39, %v4611_v3  ;;  %v4799_v3 = vmul.f32 %v13110_v56, %v15083_v19  ;;  %v15084_v39 = vld [vmem:[#allocation31_spill] sm:$0xff] }
 0xbe1   :  { %10576 = vperm.xlu0 %10574, %v10575_v4   ;;  %10581 = vrot.lane.b32.xlu1 %v10580_v28, %s15075_s12  ;;  %v4718_v4 = vmul.f32 %v13110_v56, %v15080_v41  ;;  %v15082_v28 = vld [vmem:[#allocation28_spill] sm:$0xff]  ;;  %v4762_v41 = vmul.f32 %v13110_v56, %v15084_v39 }
 0xbe2   :  { %v4681_v40 = vmul.f32 %v13110_v56, %v15082_v28 }
 0xbe4   :  { %v10600_v8 = vpack.i.bf16 %v4681_v40, %v4680_v59  ;;  %v15088_v40 = vld [vmem:[#allocation34_spill] sm:$0xff] }
 0xbe5   :  { %10586 = vperm.xlu0 %10574, %v10585_v42   ;;  %4879 = vrot.lane.b32.xlu1 %v4867_v0, %s15075_s12  ;;  %v4795_v42 = vld [vmem:[#allocation3 + $0x28] sm:$0xff]  ;;  %v10605_v0 = vpack.i.bf16 %v4718_v4, %v4717_v33  ;;  %v4868_v33 = vmul.f32 %v13110_v56, %v15087_v63 }
 0xbe6   :  { %v4800_v35 = vmul.f32 %v4795_v42, %v15085_v6  ;;  %v4869_v4 = vmul.f32 %v4795_v42, %v15088_v40 }
 0xbe8   :  { %v10625_v59 = vpack.i.bf16 %v4869_v4, %v4868_v33 }
 0xbe9   :  { %10591 = vrot.lane.b32.xlu0 %v10590_v52, %s11458_s8  ;;  %10596 = vrot.lane.b32.xlu1 %v10595_v20, %s15062_s22  ;;  %v15086_v52 = vld [vmem:[#allocation30_spill] sm:$0xff]  ;;  %v10620_v20 = vpack.i.bf16 %v4800_v35, %v4799_v3 }
 0xbea   :  { %10630 = vset.pattern.permute.xlu0 %v15048_v22  ;;  %v4763_v28 = vmul.f32 %v4795_v42, %v15086_v52 }
 0xbec   :  { %v10610_v51 = vpack.i.bf16 %v4763_v28, %v4762_v41 }
 0xbed   :  { %10606 = vrot.lane.b32.xlu0 %v10605_v0, %s11447_s27  ;;  %10601 = vrot.lane.b32.xlu1 %v10600_v8, %s15063_s23  ;;  %v10615_v0 = vpack.i.bf16 %v4795_v42, %v13110_v56  ;;  %v4651_v8 = vpop.permute.xlu0 %4650 }
 0xbf1   :  { %10621 = vrot.lane.b32.xlu0 %v10620_v20, %s15072_s1  ;;  %10611 = vrot.lane.b32.xlu1 %v10610_v51, %s11446_s26  ;;  %v4725_v6 = vpop.permute.xlu0 %4724 }
 0xbf5   :  { %10626 = vrot.lane.b32.xlu0 %v10625_v59, %s15075_s12  ;;  %10616 = vrot.lane.b32.xlu1 %v10615_v0, %s11460_s20 }
 0xc3f   :  { %v13196_v35 = vpop.permute.xlu0 %10540  ;;  %v13198_v41 = vpop.permute.xlu1 %10545 }
 0xc40   :  { %v14973_v28 = vunpack.i.h.bf16 %v13196_v35  ;;  %v10542_v3 = vunpack.i.l.bf16 %v13196_v35  ;;  %v15094_v17 = vunpack.i.h.bf16 %v13198_v41 }
 0xc42   :  { %v4660_v4 = vsel %vm787_vm10, %v4651_v8, %v10542_v3  ;;  %v4661_v40 = vsel %vm787_vm10, %v10542_v3, %v14973_v28 }
 0xc43   :  { %v4770_v51 = vpop.permute.xlu0 %4769  ;;  %v13202_v20 = vpop.permute.xlu1 %10550 }
 0xc44   :  { %v14974_v33 = vunpack.i.h.bf16 %v13202_v20  ;;  %v10552_v42 = vunpack.i.l.bf16 %v13202_v20 }
 0xc46   :  { %v4628_v59 = vsel %vm15089_vm15, %v13090_v53, %v10552_v42  ;;  %v4629_v0 = vsel %vm15090_vm14, %v10552_v42, %v14974_v33  ;;  %vm15093_vm15 = vcmask 793600   ;;  %vm15095_vm14 = vcmask 785408  }
 0xc47   :  { %v13215_v63 = vpop.permute.xlu0 %10560  ;;  %v13217_v52 = vpop.permute.xlu1 %10555  ;;  %v4934_v19 = vpack.c.bf16 %v4661_v40, %v4629_v0  ;;  %v4933_v39 = vpack.c.bf16 %v4660_v4, %v4628_v59  ;;  %vm15098_vm9 = vmmov %vm15095_vm14 }
 0xc48   :  { %v14976_v36 = vunpack.i.h.bf16 %v13215_v63  ;;  %v10562_v8 = vunpack.i.l.bf16 %v13215_v63  ;;  %v14975_v53 = vunpack.i.h.bf16 %v13217_v52  ;;  %v10557_v26 = vunpack.i.l.bf16 %v13217_v52 }
 0xc49   :  { %4973 = vmatprep.subr.bf16.mxu1 %v4934_v19  ;;  %v10547_v19 = vunpack.i.l.bf16 %v13198_v41 }
 0xc4a   :  { %v4734_v42 = vsel %vm212_vm5, %v4725_v6, %v10562_v8  ;;  %v4697_v3 = vsel %vm15091_vm8, %v13092_v34, %v10557_v26  ;;  %4974 = vmatpush1.bf16.msra.mxu1 %v4933_v39  ;;  %v4698_v40 = vsel %vm15092_vm3, %v10557_v26, %v14975_v53  ;;  %v4735_v4 = vsel %vm212_vm5, %v10562_v8, %v14976_v36  ;;  %vm15096_vm8 = vmmov %vm15093_vm15 }
 0xc4b   :  { %v4807_v59 = vpop.permute.xlu0 %4806  ;;  %v4839_v0 = vpop.permute.xlu1 %4838  ;;  %v4938_v28 = vpack.c.bf16 %v4735_v4, %v4698_v40  ;;  %v4937_v33 = vpack.c.bf16 %v4734_v42, %v4697_v3  ;;  %v4849_v48 = vsel %vm15095_vm14, %v10547_v19, %v15094_v17  ;;  %vm15097_vm3 = vcmask 777216  }
 0xc4d   :  { %4975 = vmatprep.subr.bf16.mxu1 %v4938_v28 }
 0xc4e   :  { %4976 = vmatpush1.bf16.msra.mxu1 %v4937_v33 }
 0xc4f   :  { %v13234_v34 = vpop.permute.xlu0 %10570  ;;  %v13236_v39 = vpop.permute.xlu1 %10565 }
 0xc50   :  { %v14982_v26 = vunpack.i.h.bf16 %v13234_v34  ;;  %v10572_v53 = vunpack.i.l.bf16 %v13234_v34  ;;  %v14983_v8 = vunpack.i.h.bf16 %v13236_v39  ;;  %v10567_v36 = vunpack.i.l.bf16 %v13236_v39 }
 0xc52   :  { %v4779_v42 = vsel %vm231_vm7, %v4770_v51, %v10567_v36  ;;  %v4780_v28 = vsel %vm231_vm7, %v10567_v36, %v14983_v8  ;;  %v4817_v33 = vsel %vm15093_vm15, %v10572_v53, %v14982_v26  ;;  %v4816_v51 = vsel %vm15096_vm8, %v4807_v59, %v10572_v53  ;;  %vm15099_vm15 = vmmov %vm15097_vm3 }
 0xc53   :  { %v10582_v3 = vpop.permute.xlu1 %10581  ;;  %v4942_v40 = vpack.c.bf16 %v4780_v28, %v13108_v61  ;;  %v4941_v4 = vpack.c.bf16 %v4779_v42, %v13104_v55  ;;  %v4946_v60 = vpack.c.bf16 %v4849_v48, %v4817_v33  ;;  %v4848_v26 = vsel %vm15098_vm9, %v4839_v0, %v10547_v19 }
 0xc54   :  { %v10584_v6 = vunpack.i.h.bf16 %v10582_v3  ;;  %v10583_v24 = vunpack.i.l.bf16 %v10582_v3  ;;  %v4945_v61 = vpack.c.bf16 %v4848_v26, %v4816_v51  ;;  %vm15102_vm9 = vcmask 269312  }
 0xc55   :  { %4977 = vmatprep.subr.bf16.mxu1 %v4942_v40  ;;  %vm15103_vm14 = vmmov %vm15102_vm9  ;;  %vm15107_vm8 = vcmask 252928  }
 0xc56   :  { %4978 = vmatpush1.bf16.msra.mxu1 %v4941_v4  ;;  %v4885_v36 = vsel %vm15097_vm3, %v10583_v24, %v10584_v6  ;;  %v13266_v24 = vld [vmem:[%s14890_s4 + $0x1c0] sm:$0xf]  ;;  %vm15109_vm3 = vmmov %vm15107_vm8 }
 0xc57   :  { %v13257_v8 = vpop.permute.xlu1 %4879  ;;  %4979 = vmatprep.subr.bf16.mxu1 %v4946_v60  ;;  %v4949_v28 = vpack.c.bf16 %v4885_v36, %v4885_v36 }
 0xc58   :  { %v4886_v55 = vsel %vm15099_vm15, %v10584_v6, %v13257_v8  ;;  %vm15111_vm15 = vcmask 793600  }
 0xc59   :  { %v4950_v42 = vpack.c.bf16 %v4886_v55, %v4886_v55  ;;  %v4962_v48 = vsel %vm304_vm11, %v4949_v28, 0 }
 0xc5a   :  { %4980 = vmatpush1.bf16.msra.mxu1 %v4945_v61 }
 0xc5b   :  { %9422 = vmatprep.subr.msk.bf16.mxu1 %vm304_vm11, %v4950_v42  ;;  %v10597_v17 = vpop.permute.xlu1 %10596 }
 0xc5c   :  { %v10599_v33 = vunpack.i.h.bf16 %v10597_v17  ;;  %v10598_v3 = vunpack.i.l.bf16 %v10597_v17 }
 0xc5e   :  { %4982 = vmatpush1.bf16.msra.mxu1 %v4962_v48  ;;  %v4631_v28 = vsel %vm15103_vm14, %v10598_v3, %v10599_v33  ;;  %vm15114_vm14 = vmmov %vm15111_vm15 }
 0xc5f   :  { %9983 = vmatprep.subr.bf16.mxu1 %v12842_v62  ;;  %v10602_v53 = vpop.permute.xlu1 %10601 }
 0xc60   :  { %v10577_v60 = vpop.permute.xlu0 %10576  ;;  %v10604_v61 = vunpack.i.h.bf16 %v10602_v53  ;;  %v10603_v42 = vunpack.i.l.bf16 %v10602_v53 }
 0xc61   :  { %9423 = vmatmul.mubr.msk.bf16.vlgmr.msra.gmra.mrb[48].mxu1 %vm300_vm12, %v13266_v24  ;;  %v11433_v59 = vadd.high.f32.bf16 %v13096_v58, %v10577_v60  ;;  %v11434_v0 = vadd.low.f32.bf16 %v13094_v7, %v10577_v60  ;;  %v15101_v58 = vunpack.i.h.bf16 %v13202_v20  ;;  %v15104_v60 = vunpack.i.h.bf16 %v13196_v35 }
 0xc62   :  { %9984 = vmatpush3.bf16.msra.mxu1 %v13098_v27  ;;  %9987 = vmatprep.mubr.msk.bf16.mxu1 %vm11442_vm0, %v12842_v62 }
 0xc63   :  { %9985 = vmatprep.subr.bf16.mxu1 %v12842_v62  ;;  %v4094_v19 = vmax.f32 %v11433_v59, 0.0  ;;  %v4093_v26 = vmax.f32 %v11434_v0, 0.0  ;;  %v10612_v4 = vpop.permute.xlu1 %10611  ;;  %v4630_v7 = vsel %vm15102_vm9, %v15101_v58, %v10598_v3  ;;  %v15106_v3 = vunpack.i.h.bf16 %v13217_v52 }
 0xc64   :  { %v13277_v6 = vpop.permute.xlu0 %10586  ;;  %v10614_v48 = vunpack.i.h.bf16 %v10612_v4  ;;  %v10613_v17 = vunpack.i.l.bf16 %v10612_v4  ;;  %vm15112_vm9 = vcmask 785408  }
 0xc65   :  { %v13279_v40 = vpack.c.bf16 %v4094_v19, %v4093_v26  ;;  %v15105_v19 = vcombine.low %v13081_v50, %v13086_v46  ;;  %v4699_v35 = vsel %vm15107_vm8, %v15106_v3, %v10603_v42  ;;  %v4700_v46 = vsel %vm15109_vm3, %v10603_v42, %v10604_v61 }
 0xc66   :  { %v4782_v58 = vsel %vm231_vm7, %v10613_v17, %v10614_v48  ;;  %v15113_v3 = vunpack.i.h.bf16 %v13234_v34  ;;  %vm15115_vm8 = vcmask 777216  }
 0xc67   :  { %15100 = vst [vmem:[#allocation18_spill] sm:$0xff] %v13279_v40  ;;  %9986 = vmatpush3.bf16.msra.mxu1 %v13279_v40  ;;  %v10617_v4 = vpop.permute.xlu1 %10616  ;;  %vm15116_vm3 = vmmov %vm15115_vm8 }
 0xc68   :  { %v10592_v51 = vpop.permute.xlu0 %10591  ;;  %9997 = vmatprep.subr.bf16.mxu1 %v12842_v62  ;;  %v10618_v52 = vunpack.i.l.bf16 %v10617_v4 }
 0xc69   :  { %v10594_v36 = vunpack.i.h.bf16 %v10592_v51  ;;  %v10593_v55 = vunpack.i.l.bf16 %v10592_v51 }
 0xc6a   :  { %9988 = vmatmul.mubr.msk.bf16.vlgmr.msra.gmra.mrb[52].mxu1 %vm787_vm10, %v15105_v19 }
 0xc6b   :  { %v4662_v59 = vsel %vm787_vm10, %v15104_v60, %v10593_v55  ;;  %v4663_v0 = vsel %vm787_vm10, %v10593_v55, %v10594_v36  ;;  %9999 = vmatprep.mubr.msk.bf16.mxu1 %vm11442_vm0, %v12842_v62  ;;  %v15108_v36 = vunpack.i.h.bf16 %v13215_v63 }
 0xc6c   :  { %v10607_v20 = vpop.permute.xlu0 %10606  ;;  %v4936_v26 = vpack.c.bf16 %v4663_v0, %v4631_v28  ;;  %v4935_v53 = vpack.c.bf16 %v4662_v59, %v4630_v7  ;;  %v10619_v59 = vunpack.i.h.bf16 %v10617_v4  ;;  %v15117_v4 = vunpack.i.h.bf16 %v13198_v41 }
 0xc6d   :  { %v10609_v51 = vunpack.i.h.bf16 %v10607_v20  ;;  %v10608_v33 = vunpack.i.l.bf16 %v10607_v20  ;;  %v15110_v20 = vunpack.i.h.bf16 %v13236_v39 }
 0xc6e   :  { %5014 = vmatprep.subr.bf16.mxu0 %v4936_v26  ;;  %v4944_v26 = vpack.c.bf16 %v4782_v58, %v13110_v56 }
 0xc6f   :  { %v4736_v50 = vsel %vm212_vm5, %v15108_v36, %v10608_v33  ;;  %5015 = vmatpush1.bf16.msra.mxu0 %v4935_v53  ;;  %v4737_v55 = vsel %vm212_vm5, %v10608_v33, %v10609_v51  ;;  %v4781_v63 = vsel %vm231_vm7, %v15110_v20, %v10613_v17  ;;  %v4851_v33 = vsel %vm15112_vm9, %v10618_v52, %v10619_v59 }
 0xc70   :  { %v10622_v7 = vpop.permute.xlu0 %10621  ;;  %v4940_v28 = vpack.c.bf16 %v4737_v55, %v4700_v46  ;;  %v4939_v60 = vpack.c.bf16 %v4736_v50, %v4699_v35  ;;  %v4943_v51 = vpack.c.bf16 %v4781_v63, %v13106_v10  ;;  %v13336_v55 = vld [vmem:[%s14890_s4 + $0x200] sm:$0xff] }
 0xc71   :  { %v10624_v0 = vunpack.i.h.bf16 %v10622_v7  ;;  %v10623_v19 = vunpack.i.l.bf16 %v10622_v7 }
 0xc72   :  { %5016 = vmatprep.subr.bf16.mxu0 %v4940_v28 }
 0xc73   :  { %5017 = vmatpush1.bf16.msra.mxu0 %v4939_v60  ;;  %v4819_v61 = vsel %vm15111_vm15, %v10623_v19, %v10624_v0  ;;  %v4818_v39 = vsel %vm15114_vm14, %v15113_v3, %v10623_v19  ;;  %vm15118_vm15 = vmmov %vm15112_vm9  ;;  %vm15121_vm9 = vcmask 56320   ;;  %vm15124_vm14 = vcmask 916480  }
 0xc74   :  { %v10627_v42 = vpop.permute.xlu0 %10626  ;;  %5018 = vmatprep.subr.bf16.mxu0 %v4944_v26  ;;  %v4948_v35 = vpack.c.bf16 %v4851_v33, %v4819_v61  ;;  %v4850_v36 = vsel %vm15118_vm15, %v15117_v4, %v10618_v52 }
 0xc75   :  { %v10629_v48 = vunpack.i.h.bf16 %v10627_v42  ;;  %v10628_v53 = vunpack.i.l.bf16 %v10627_v42  ;;  %v4947_v50 = vpack.c.bf16 %v4850_v36, %v4818_v39 }
 0xc77   :  { %5019 = vmatpush1.bf16.msra.mxu0 %v4943_v51  ;;  %v4888_v17 = vsel %vm15115_vm8, %v10628_v53, %v10629_v48  ;;  %v4887_v56 = vsel %vm15116_vm3, %v13257_v8, %v10628_v53  ;;  %v13327_v8 = vld [vmem:[#allocation2] sm:$0xff]  ;;  %vm15125_vm8 = vmmov %vm15124_vm14  ;;  %vm15126_vm3 = vcmask 908288  }
 0xc78   :  { %5020 = vmatprep.subr.bf16.mxu0 %v4948_v35  ;;  %v4952_v10 = vpack.c.bf16 %v4888_v17, %v4888_v17  ;;  %v4951_v46 = vpack.c.bf16 %v4887_v56, %v4887_v56  ;;  %v5152_v41 = vpack.c.bf16 %v13327_v8, %v13327_v8  ;;  %v5146_v3 = vmul.f32 %v13327_v8, %v12096_v49  ;;  %vm15127_vm15 = vmmov %vm15126_vm3 }
 0xc79   :  { %v5263_v56 = vmul.f32 %v13327_v8, %v12094_v12 }
 0xc7a   :  { %v4968_v34 = vsel %vm304_vm11, %v4951_v46, 0  ;;  %5161 = vrot.lane.b32.xlu1 %v5152_v41, %s11465_s11  ;;  %v5150_v35 = vpack.c.bf16 %v5146_v3, %v5146_v3 }
 0xc7b   :  { %5021 = vmatpush1.bf16.msra.mxu0 %v4947_v50  ;;  %v5267_v36 = vpack.c.bf16 %v5263_v56, %v5263_v56 }
 0xc7c   :  { %9424 = vmatprep.subr.msk.bf16.mxu0 %vm304_vm11, %v4952_v10 }
 0xc7f   :  { %5023 = vmatpush1.bf16.msra.mxu0 %v4968_v34 }
 0xc80   :  { %9991 = vmatprep.subr.bf16.mxu0 %v12842_v62  ;;  %v13341_v62 = vld [vmem:[%s14890_s4 + $0x210] sm:$0xff] }
 0xc82   :  { %9425 = vmatmul.mubr.msk.bf16.vlgmr.msra.gmra.mrb[56].mxu0 %vm300_vm12, %v13266_v24  ;;  %v13346_v24 = vcombine.low %v13336_v55, %v13341_v62 }
 0xc83   :  { %9993 = vmatprep.mubr.msk.bf16.mxu0 %vm11442_vm0, %v13327_v8 }
 0xc84   :  { %5157 = vrot.lane.b32.xlu1 %v13346_v24, %s11451_s10 }
 0xd34   :  { %v13350_v58 = vpop.f32.mrb[48].mxu1 }
 0xd35   :  { %v13352_v7 = vpop.f32.mrb[49].mxu1 }
 0xd36   :  { %v5011_v28 = vpop.f32.mrb[50].mxu1 }
 0xd37   :  { %v5012_v60 = vpop.f32.mrb[51].mxu1 }
 0xd3d   :  { %v5117_v59 = vpop.f32.mrb[52].mxu1 }
 0xd3e   :  { %v11435_v52 = vadd.low.f32.bf16 %v5117_v59, %v13277_v6  ;;  %v9989_v0 = vpop.f32.mrb[53].mxu1 }
 0xd3f   :  { %v5120_v19 = vpop.f32.mrb[54].mxu1 }
 0xd40   :  { %v5124_v20 = vmax.f32 %v11435_v52, 0.0  ;;  %v11436_v63 = vadd.high.f32.bf16 %v5120_v19, %v13277_v6  ;;  %v9990_v26 = vpop.f32.mrb[55].mxu1 }
 0xd41   :  { %v5162_v26 = vpop.permute.xlu1 %5161 }
 0xd42   :  { %5140 = vst.msk [vmem:[#allocation4 + $0x8] sm:$0xff] %vm787_vm10, %v5124_v20  ;;  %v5125_v61 = vmax.f32 %v11436_v63, 0.0 }
 0xd44   :  { %5141 = vst.msk [vmem:[#allocation4 + $0x18] sm:$0xff] %vm787_vm10, %v5125_v61 }
 0xd49   :  { %v5143_v42 = vld [vmem:[#allocation4 + $0x8] sm:$0xff] }
 0xd4a   :  { %v5147_v51 = vmul.f32 %v5143_v42, %v12096_v49  ;;  %v5264_v17 = vmul.f32 %v5143_v42, %v12094_v12  ;;  %v5435_v41 = vmul.f32 %v5143_v42, %v12098_v31  ;;  %v5596_v52 = vmul.f32 %v5143_v42, %v12122_v32 }
 0xd4b   :  { %v5145_v48 = vld [vmem:[#allocation4 + $0x18] sm:$0xff] }
 0xd4c   :  { %v13358_v53 = vpack.c.bf16 %v5145_v48, %v5143_v42  ;;  %v5149_v33 = vmul.f32 %v5145_v48, %v12096_v49  ;;  %v5266_v39 = vmul.f32 %v5145_v48, %v12094_v12  ;;  %v5325_v49 = vmul.f32 %v13327_v8, %v12114_v9 }
 0xd4d   :  { %v5328_v10 = vmul.f32 %v5145_v48, %v12114_v9  ;;  %v5326_v12 = vmul.f32 %v5143_v42, %v12114_v9  ;;  %v5436_v46 = vmul.f32 %v5145_v48, %v12098_v31  ;;  %v5491_v60 = vmul.f32 %v5145_v48, %v12126_v1 }
 0xd4e   :  { %5163 = vrot.lane.b32.xlu0 %v13358_v53, %s11465_s11  ;;  %v5151_v6 = vpack.c.bf16 %v5149_v33, %v5147_v51  ;;  %v5268_v4 = vpack.c.bf16 %v5266_v39, %v5264_v17  ;;  %v5329_v50 = vpack.c.bf16 %v5325_v49, %v5325_v49  ;;  %v5490_v9 = vmul.f32 %v5143_v42, %v12126_v1 }
 0xd4f   :  { %v5330_v34 = vpack.c.bf16 %v5328_v10, %v5326_v12  ;;  %v5437_v28 = vpack.c.bf16 %v5436_v46, %v5435_v41  ;;  %v5597_v31 = vmul.f32 %v5145_v48, %v12122_v32  ;;  %v5158_v32 = vpop.permute.xlu1 %5157  ;;  %v9437_v41 = vcombine.high %v13336_v55, %v13341_v62 }
 0xd50   :  { %5215 = vrot.lane.b32.xlu1 %v5151_v6, %s11464_s14  ;;  %v5492_v59 = vpack.c.bf16 %v5491_v60, %v5490_v9 }
 0xd51   :  { %v5598_v19 = vpack.c.bf16 %v5597_v31, %v5596_v52 }
 0xd52   :  { %5213 = vrot.lane.b32.xlu0 %v5150_v35, %s11464_s14  ;;  %s15119_s14 = smov 80  }
 0xd54   :  { %5275 = vrot.lane.b32.xlu1 %v5268_v4, %s11463_s13 }
 0xd55   :  { %v13400_v0 = vpop.f32.mrb[56].mxu0 }
 0xd56   :  { %5273 = vrot.lane.b32.xlu0 %v5267_v36, %s11463_s13  ;;  %s15120_s13 = smov 48   ;;  %v13404_v1 = vpop.f32.mrb[57].mxu0 }
 0xd57   :  { %v5052_v20 = vpop.f32.mrb[58].mxu0 }
 0xd58   :  { %5335 = vrot.lane.b32.xlu1 %v5329_v50, %s11447_s27  ;;  %v5053_v63 = vpop.f32.mrb[59].mxu0 }
 0xd5a   :  { %5269 = vrot.lane.b32.xlu0 %v13346_v24, %s11460_s20 }
 0xd5c   :  { %5331 = vrot.lane.b32.xlu1 %v13346_v24, %s15119_s14 }
 0xd5e   :  { %5337 = vrot.lane.b32.xlu0 %v5330_v34, %s11447_s27 }
 0xd60   :  { %5441 = vrot.lane.b32.xlu1 %v5437_v28, %s11446_s26 }
 0xd62   :  { %5387 = vrot.lane.b32.xlu0 %v13346_v24, %s11467_s0 }
 0xd64   :  { %5438 = vrot.lane.b32.xlu1 %v13346_v24, %s15120_s13 }
 0xd66   :  { %5496 = vrot.lane.b32.xlu0 %v5492_v59, %s11462_s9 }
 0xd68   :  { %5547 = vrot.lane.b32.xlu1 %v13358_v53, %s11469_s16 }
 0xd6a   :  { %5493 = vrot.lane.b32.xlu0 %v13346_v24, %s11458_s8 }
 0xd6c   :  { %5545 = vrot.lane.b32.xlu1 %v13346_v24, %s11450_s30 }
 0xd6e   :  { %5603 = vrot.lane.b32.xlu0 %v5598_v19, %s15059_s6 }
 0xd70   :  { %5132 = vrot.lane.b32.xlu1 %v13341_v62, %s11451_s10  ;;  %v11292_v62 = vld [vmem:[%s14890_s4 + $0x4a0] ss:$16 sps:$4 sm:$0xff]  }
 0xd72   :  { %5130 = vrot.lane.b32.xlu0 %v13336_v55, %s11451_s10  ;;  %v11291_v55 = vld [vmem:[%s14890_s4 + $0x480] ss:$16 sps:$4 sm:$0xff]  }
 0xdc0   :  { %v5164_v61 = vpop.permute.xlu0 %5163 }
 0xdc1   :  { %v5165_v42 = vsel %vm1426_vm2, %v5162_v26, %v5164_v61 }
 0xdc2   :  { %v5216_v48 = vpop.permute.xlu1 %5215  ;;  %9992 = vmatpush3.bf16.msra.mxu0 %v5165_v42 }
 0xdc3   :  { %10003 = vmatprep.subr.bf16.mxu0 %v13327_v8 }
 0xdc4   :  { %v5214_v51 = vpop.permute.xlu0 %5213 }
 0xdc5   :  { %v5217_v33 = vsel %vm1479_vm13, %v5214_v51, %v5216_v48  ;;  %9994 = vmatmul.mubr.msk.bf16.vlgmr.msra.gmra.mrb[60].mxu0 %vm79_vm1, %v5158_v32  ;;  %vm15122_vm13 = vcmask 924672  }
 0xdc6   :  { %9998 = vmatpush3.bf16.msra.mxu1 %v5217_v33  ;;  %v5276_v3 = vpop.permute.xlu1 %5275  ;;  %10005 = vmatprep.mubr.msk.bf16.mxu0 %vm11442_vm0, %v13327_v8  ;;  %vm15123_vm2 = vmmov %vm15122_vm13 }
 0xdc7   :  { %10009 = vmatprep.subr.bf16.mxu1 %v13327_v8 }
 0xdc8   :  { %v5274_v6 = vpop.permute.xlu0 %5273 }
 0xdc9   :  { %v5277_v39 = vsel %vm15121_vm9, %v5274_v6, %v5276_v3  ;;  %10000 = vmatmul.mubr.msk.bf16.vlgmr.msra.gmra.mrb[56].mxu1 %vm79_vm1, %v13346_v24  ;;  %vm15128_vm9 = vmmov %vm15126_vm3 }
 0xdca   :  { %v5336_v35 = vpop.permute.xlu1 %5335  ;;  %10004 = vmatpush3.bf16.msra.mxu0 %v5277_v39  ;;  %10011 = vmatprep.mubr.msk.bf16.mxu1 %vm11442_vm0, %v13327_v8 }
 0xdcb   :  { %10015 = vmatprep.subr.bf16.mxu0 %v13327_v8 }
 0xdcc   :  { %v5270_v17 = vpop.permute.xlu0 %5269 }
 0xdcd   :  { %10006 = vmatmul.mubr.msk.bf16.vlgmr.msra.gmra.mrb[64].mxu0 %vm79_vm1, %v5270_v17 }
 0xdce   :  { %v5332_v56 = vpop.permute.xlu1 %5331  ;;  %10016 = vmatpush3.bf16.msra.mxu0 %v13358_v53  ;;  %10017 = vmatprep.mubr.msk.bf16.mxu0 %vm11442_vm0, %v13327_v8 }
 0xdcf   :  { %10027 = vmatprep.subr.bf16.mxu0 %v13327_v8 }
 0xdd0   :  { %v5338_v4 = vpop.permute.xlu0 %5337 }
 0xdd1   :  { %v5339_v24 = vsel %vm212_vm5, %v5336_v35, %v5338_v4 }
 0xdd2   :  { %10010 = vmatpush3.bf16.msra.mxu1 %v5339_v24  ;;  %v5442_v49 = vpop.permute.xlu1 %5441 }
 0xdd3   :  { %10021 = vmatprep.subr.bf16.mxu1 %v13327_v8 }
 0xdd4   :  { %v5388_v36 = vpop.permute.xlu0 %5387 }
 0xdd5   :  { %10012 = vmatmul.mubr.msk.bf16.vlgmr.msra.gmra.mrb[60].mxu1 %vm79_vm1, %v5332_v56  ;;  %10018 = vmatmul.mubr.msk.bf16.vlgmr.msra.gmra.mrb[68].mxu0 %vm79_vm1, %v5388_v36 }
 0xdd6   :  { %10022 = vmatpush3.bf16.msra.mxu1 %v5442_v49  ;;  %v5439_v50 = vpop.permute.xlu1 %5438  ;;  %10023 = vmatprep.mubr.msk.bf16.mxu1 %vm11442_vm0, %v13327_v8 }
 0xdd7   :  { %10029 = vmatprep.mubr.msk.bf16.mxu0 %vm11442_vm0, %v13327_v8  ;;  %10033 = vmatprep.subr.bf16.mxu1 %v13327_v8 }
 0xdd8   :  { %v5497_v53 = vpop.permute.xlu0 %5496 }
 0xdd9   :  { %10028 = vmatpush3.bf16.msra.mxu0 %v5497_v53 }
 0xdda   :  { %v5548_v10 = vpop.permute.xlu1 %5547  ;;  %10039 = vmatprep.subr.bf16.mxu0 %v13327_v8 }
 0xddc   :  { %v5494_v12 = vpop.permute.xlu0 %5493 }
 0xddd   :  { %10024 = vmatmul.mubr.msk.bf16.vlgmr.msra.gmra.mrb[64].mxu1 %vm79_vm1, %v5439_v50  ;;  %10030 = vmatmul.mubr.msk.bf16.vlgmr.msra.gmra.mrb[72].mxu0 %vm79_vm1, %v5494_v12 }
 0xdde   :  { %10034 = vmatpush3.bf16.msra.mxu1 %v5548_v10  ;;  %10035 = vmatprep.mubr.msk.bf16.mxu1 %vm11442_vm0, %v13327_v8  ;;  %v5546_v46 = vpop.permute.xlu1 %5545 }
 0xddf   :  { %10041 = vmatprep.mubr.msk.bf16.mxu0 %vm11442_vm0, %v13327_v8  ;;  %10045 = vmatprep.subr.bf16.mxu1 %v13327_v8 }
 0xde0   :  { %v5604_v34 = vpop.permute.xlu0 %5603 }
 0xde1   :  { %10040 = vmatpush3.bf16.msra.mxu0 %v5604_v34 }
 0xde2   :  { %v5133_v28 = vpop.permute.xlu1 %5132  ;;  %5996 = vmatprep.subr.bf16.mxu0 %v15048_v22 }
 0xde3   :  { %v5135_v60 = vrot.slane %v5133_v28, 4 }
 0xde4   :  { %v5131_v9 = vpop.permute.xlu0 %5130 }
 0xde5   :  { %10036 = vmatmul.mubr.msk.bf16.vlgmr.msra.gmra.mrb[68].mxu1 %vm79_vm1, %v5546_v46  ;;  %10042 = vmatmul.mubr.msk.bf16.vlgmr.msra.gmra.mrb[76].mxu0 %vm79_vm1, %v9437_v41  ;;  %v5134_v59 = vrot.slane %v5131_v9, 4  ;;  %v5139_v31 = vunpack.c.l.bf16 %v5135_v60 }
 0xde6   :  { %10049 = vmatprep.mubr.msk.bf16.mxu1 %vm11442_vm0, %v13327_v8  ;;  %10046 = vmatpush3.bf16.msra.mxu1 %v11291_v55 }
 0xde7   :  { %v5138_v52 = vunpack.c.l.bf16 %v5134_v59  ;;  %10047 = vmatprep.subr.bf16.mxu1 %v13327_v8 }
 0xde9   :  { %v10631_v19 = vpack.i.bf16 %v5139_v31, %v5138_v52 }
 0xdea   :  { %10048 = vmatpush3.bf16.msra.mxu1 %v11292_v62 }
 0xdeb   :  { %10632 = vperm.xlu0 %10630, %v10631_v19   ;;  %10053 = vmatprep.subr.bf16.mxu1 %v13327_v8 }
 0xe98   :  { %v5204_v20 = vpop.f32.mrb[60].mxu0 }
 0xe99   :  { %v9995_v63 = vpop.f32.mrb[61].mxu0 }
 0xe9a   :  { %v5207_v26 = vpop.f32.mrb[62].mxu0 }
 0xe9b   :  { %v9996_v32 = vpop.f32.mrb[63].mxu0 }
 0xe9c   :  { %v5256_v61 = vpop.f32.mrb[56].mxu1 }
 0xe9d   :  { %v5257_v42 = vadd.f32 %v5256_v61, %v5204_v20  ;;  %v10001_v48 = vpop.f32.mrb[57].mxu1 }
 0xe9e   :  { %v5259_v51 = vpop.f32.mrb[58].mxu1 }
 0xe9f   :  { %v5260_v33 = vadd.f32 %v5259_v51, %v5207_v26  ;;  %v10002_v3 = vpop.f32.mrb[59].mxu1 }
 0xea0   :  { %v5316_v6 = vpop.f32.mrb[64].mxu0 }
 0xea1   :  { %v5323_v39 = vadd.f32 %v5316_v6, %v5257_v42  ;;  %v10007_v35 = vpop.f32.mrb[65].mxu0  ;;  %v10633_v42 = vpop.permute.xlu0 %10632 }
 0xea2   :  { %v5319_v17 = vpop.f32.mrb[66].mxu0 }
 0xea3   :  { %v5324_v56 = vadd.f32 %v5319_v17, %v5260_v33  ;;  %v10008_v4 = vpop.f32.mrb[67].mxu0 }
 0xea8   :  { %v5378_v24 = vpop.f32.mrb[60].mxu1  ;;  %v5426_v49 = vpop.f32.mrb[68].mxu0 }
 0xea9   :  { %v5385_v36 = vadd.f32 %v5378_v24, %v5323_v39  ;;  %v10013_v50 = vpop.f32.mrb[61].mxu1  ;;  %v10019_v53 = vpop.f32.mrb[69].mxu0 }
 0xeaa   :  { %v5381_v10 = vpop.f32.mrb[62].mxu1  ;;  %v5429_v12 = vpop.f32.mrb[70].mxu0 }
 0xeab   :  { %v5433_v46 = vadd.f32 %v5426_v49, %v5385_v36  ;;  %v5386_v34 = vadd.f32 %v5381_v10, %v5324_v56  ;;  %v10014_v41 = vpop.f32.mrb[63].mxu1  ;;  %v10020_v28 = vpop.f32.mrb[71].mxu0 }
 0xead   :  { %v5434_v60 = vadd.f32 %v5429_v12, %v5386_v34  ;;  %v13472_v34 = vld [vmem:[%s14890_s4 + $0x230] sm:$0xff] }
 0xeb0   :  { %v5481_v9 = vpop.f32.mrb[64].mxu1  ;;  %v5536_v59 = vpop.f32.mrb[72].mxu0 }
 0xeb1   :  { %v5488_v31 = vadd.f32 %v5481_v9, %v5433_v46  ;;  %v10025_v52 = vpop.f32.mrb[65].mxu1  ;;  %v10031_v19 = vpop.f32.mrb[73].mxu0  ;;  %v13467_v46 = vld [vmem:[%s14890_s4 + $0x220] sm:$0xff] }
 0xeb2   :  { %v5484_v55 = vpop.f32.mrb[66].mxu1  ;;  %v5539_v62 = vpop.f32.mrb[74].mxu0  ;;  %v9443_v41 = vcombine.high %v13467_v46, %v13472_v34 }
 0xeb3   :  { %v5543_v20 = vadd.f32 %v5536_v59, %v5488_v31  ;;  %v5489_v63 = vadd.f32 %v5484_v55, %v5434_v60  ;;  %v10026_v26 = vpop.f32.mrb[67].mxu1  ;;  %v10032_v32 = vpop.f32.mrb[75].mxu0  ;;  %v13482_v31 = vmul.f32 %v13327_v8, %v11544_v16 }
 0xeb4   :  { %9444 = vmatprep.mubr.msk.bf16.mxu0 %vm79_vm1, %v9443_v41 }
 0xeb5   :  { %v5544_v61 = vadd.f32 %v5539_v62, %v5489_v63  ;;  %v13497_v63 = vmul.f32 %v13327_v8, %v11542_v15 }
 0xeb8   :  { %v5587_v48 = vpop.f32.mrb[68].mxu1  ;;  %v5643_v51 = vpop.f32.mrb[76].mxu0 }
 0xeb9   :  { %v5594_v33 = vadd.f32 %v5587_v48, %v5543_v20  ;;  %v10037_v3 = vpop.f32.mrb[69].mxu1  ;;  %v10043_v6 = vpop.f32.mrb[77].mxu0 }
 0xeba   :  { %v5590_v39 = vpop.f32.mrb[70].mxu1  ;;  %v5646_v35 = vpop.f32.mrb[78].mxu0 }
 0xebb   :  { %v5650_v17 = vadd.f32 %v5643_v51, %v5594_v33  ;;  %v5595_v56 = vadd.f32 %v5590_v39, %v5544_v61  ;;  %v10038_v4 = vpop.f32.mrb[71].mxu1  ;;  %v10044_v24 = vpop.f32.mrb[79].mxu0  ;;  %v5850_v51 = vld [vmem:[#allocation5 + $0x10] sm:$0xff] }
 0xebc   :  { %v5854_v39 = vmul.f32 %v5850_v51, %v11551_v25  ;;  %v5880_v24 = vmul.f32 %v5850_v51, %v11560_v30 }
 0xebd   :  { %v11437_v49 = vadd.low.f32.bf16 %v5650_v17, %v10633_v42  ;;  %v5651_v36 = vadd.f32 %v5646_v35, %v5595_v56 }
 0xebf   :  { %v11438_v50 = vadd.high.f32.bf16 %v5651_v36, %v10633_v42  ;;  %v5664_v53 = vmax.f32 %v11437_v49, 0.0  ;;  %v13509_v42 = vmul.f32 %v13327_v8, %v11546_v18 }
 0xec1   :  { %v5665_v10 = vmax.f32 %v11438_v50, 0.0  ;;  %v5852_v50 = vld [vmem:[#allocation5 + $0x28] sm:$0xff] }
 0xec2   :  { %v5856_v41 = vmul.f32 %v5852_v50, %v11551_v25 }
 0xec3   :  { %v5670_v12 = vpack.c.bf16 %v5665_v10, %v5664_v53 }
 0xec5   :  { %10050 = vmatmul.mubr.msk.bf16.vlgmr.msra.gmra.mrb[72].mxu1 %vm787_vm10, %v5670_v12 }
 0xec6   :  { %10055 = vmatprep.mubr.msk.bf16.mxu1 %vm11442_vm0, %v13327_v8 }
 0xf98   :  { %v5720_v28 = vpop.f32.mrb[72].mxu1 }
 0xf99   :  { %v13478_v60 = vadd.f32 %v5720_v28, %v12673_v14  ;;  %v10051_v9 = vpop.f32.mrb[73].mxu1 }
 0xf9a   :  { %v5723_v59 = vpop.f32.mrb[74].mxu1 }
 0xf9b   :  { %v13485_v52 = vadd.f32 %v5723_v59, %v12671_v29  ;;  %v10052_v19 = vpop.f32.mrb[75].mxu1  ;;  %v10636_v55 = vpack.i.bf16 %v13478_v60, %v13327_v8  ;;  %v5750_v62 = vmul.f32 %v13478_v60, %v11544_v16  ;;  %v5798_v14 = vmul.f32 %v13478_v60, %v11542_v15 }
 0xf9c   :  { %v5824_v32 = vmul.f32 %v13478_v60, %v11546_v18  ;;  %v5853_v3 = vmul.f32 %v13478_v60, %v11551_v25  ;;  %v5879_v56 = vmul.f32 %v13478_v60, %v11560_v30  ;;  %v10686_v12 = vpack.i.bf16 %v5850_v51, %v13478_v60 }
 0xf9d   :  { %10637 = vrot.lane.b32.xlu0 %v10636_v55, %s11450_s30  ;;  %v10641_v20 = vpack.i.bf16 %v5750_v62, %v13482_v31  ;;  %v5752_v29 = vmul.f32 %v13485_v52, %v11544_v16  ;;  %v10656_v26 = vpack.i.bf16 %v5798_v14, %v13497_v63  ;;  %v5971_v48 = vpack.c.bf16 %v13485_v52, %v13478_v60 }
 0xf9e   :  { %v10661_v33 = vpack.i.bf16 %v5824_v32, %v13509_v42  ;;  %v10651_v6 = vpack.i.bf16 %v13485_v52, %v13327_v8  ;;  %v5800_v35 = vmul.f32 %v13485_v52, %v11542_v15  ;;  %v10676_v17 = vpack.i.bf16 %v5854_v39, %v5853_v3 }
 0xf9f   :  { %10642 = vrot.lane.b32.xlu1 %v10641_v20, %s11449_s29  ;;  %v10646_v61 = vpack.i.bf16 %v5752_v29, %v13482_v31  ;;  %v5826_v49 = vmul.f32 %v13485_v52, %v11546_v18  ;;  %v10681_v36 = vpack.i.bf16 %v5880_v24, %v5879_v56  ;;  %v5855_v10 = vmul.f32 %v13485_v52, %v11551_v25 }
 0xfa0   :  { %v10666_v4 = vpack.i.bf16 %v5800_v35, %v13497_v63  ;;  %v5927_v28 = vmul.f32 %v13478_v60, %v11570_v38  ;;  %v5928_v59 = vmul.f32 %v5850_v51, %v11570_v38  ;;  %v5881_v19 = vmul.f32 %v13485_v52, %v11560_v30 }
 0xfa1   :  { %10657 = vrot.lane.b32.xlu0 %v10656_v26, %s11448_s28  ;;  %v10671_v53 = vpack.i.bf16 %v5826_v49, %v13509_v42  ;;  %v10691_v9 = vpack.i.bf16 %v5856_v41, %v5855_v10  ;;  %v5882_v62 = vmul.f32 %v5852_v50, %v11560_v30  ;;  %v10701_v20 = vpack.i.bf16 %v5852_v50, %v13485_v52 }
 0xfa2   :  { %v10706_v55 = vpack.i.bf16 %v5928_v59, %v5927_v28  ;;  %v5929_v29 = vmul.f32 %v13485_v52, %v11570_v38  ;;  %v5930_v26 = vmul.f32 %v5852_v50, %v11570_v38 }
 0xfa3   :  { %10647 = vrot.lane.b32.xlu1 %v10646_v61, %s11449_s29  ;;  %v10696_v14 = vpack.i.bf16 %v5882_v62, %v5881_v19 }
 0xfa4   :  { %v10711_v32 = vpack.i.bf16 %v5930_v26, %v5929_v29 }
 0xfa5   :  { %10662 = vrot.lane.b32.xlu0 %v10661_v33, %s11447_s27 }
 0xfa7   :  { %10652 = vrot.lane.b32.xlu1 %v10651_v6, %s11450_s30 }
 0xfa9   :  { %10677 = vrot.lane.b32.xlu0 %v10676_v17, %s11446_s26 }
 0xfab   :  { %10667 = vrot.lane.b32.xlu1 %v10666_v4, %s11448_s28 }
 0xfad   :  { %10682 = vrot.lane.b32.xlu0 %v10681_v36, %s11444_s24 }
 0xfaf   :  { %10672 = vrot.lane.b32.xlu1 %v10671_v53, %s11447_s27 }
 0xfb1   :  { %10687 = vrot.lane.b32.xlu0 %v10686_v12, %s11451_s10 }
 0xfb3   :  { %10692 = vrot.lane.b32.xlu1 %v10691_v9, %s11446_s26 }
 0xfb5   :  { %10707 = vrot.lane.b32.xlu0 %v10706_v55, %s11445_s25 }
 0xfb7   :  { %10697 = vrot.lane.b32.xlu1 %v10696_v14, %s11444_s24 }
 0xfb9   :  { %5733 = vrot.lane.b32.xlu0 %v13467_v46, %s11451_s10 }
 0xfbb   :  { %10702 = vrot.lane.b32.xlu1 %v10701_v20, %s11451_s10 }
 0xfbf   :  { %10712 = vrot.lane.b32.xlu1 %v10711_v32, %s11445_s25 }
 0xfc3   :  { %5735 = vrot.lane.b32.xlu1 %v13472_v34, %s11451_s10 }
0x100f   :  { %v10638_v61 = vpop.permute.xlu0 %10637 }
0x1010   :  { %v10640_v4 = vunpack.i.h.bf16 %v10638_v61  ;;  %v10639_v24 = vunpack.i.l.bf16 %v10638_v61 }
0x1011   :  { %v10643_v51 = vpop.permute.xlu1 %10642 }
0x1012   :  { %v10645_v3 = vunpack.i.h.bf16 %v10643_v51  ;;  %v10644_v6 = vunpack.i.l.bf16 %v10643_v51  ;;  %v5787_v28 = vsel %vm79_vm1, %v10639_v24, %v10640_v4 }
0x1013   :  { %v10658_v33 = vpop.permute.xlu0 %10657 }
0x1014   :  { %v5765_v49 = vsel %vm22_vm4, %v10644_v6, %v10645_v3  ;;  %v10660_v9 = vunpack.i.h.bf16 %v10658_v33  ;;  %v10659_v59 = vunpack.i.l.bf16 %v10658_v33 }
0x1015   :  { %v10648_v39 = vpop.permute.xlu1 %10647 }
0x1016   :  { %v10650_v35 = vunpack.i.h.bf16 %v10648_v39  ;;  %v10649_v17 = vunpack.i.l.bf16 %v10648_v39  ;;  %v5813_v26 = vsel %vm195_vm6, %v10659_v59, %v10660_v9 }
0x1017   :  { %v10663_v56 = vpop.permute.xlu0 %10662 }
0x1018   :  { %v5766_v36 = vsel %vm22_vm4, %v10649_v17, %v10650_v35  ;;  %v10665_v32 = vunpack.i.h.bf16 %v10663_v56  ;;  %v10664_v61 = vunpack.i.l.bf16 %v10663_v56 }
0x1019   :  { %v10653_v50 = vpop.permute.xlu1 %10652  ;;  %v5967_v53 = vpack.c.bf16 %v5766_v36, %v5765_v49 }
0x101a   :  { %v10655_v10 = vunpack.i.h.bf16 %v10653_v50  ;;  %v10654_v12 = vunpack.i.l.bf16 %v10653_v50  ;;  %v5839_v35 = vsel %vm212_vm5, %v10664_v61, %v10665_v32 }
0x101b   :  { %v10678_v41 = vpop.permute.xlu0 %10677  ;;  %5997 = vmatpush1.bf16.msra.mxu0 %v5967_v53 }
0x101c   :  { %v5788_v19 = vsel %vm79_vm1, %v10654_v12, %v10655_v10  ;;  %5998 = vmatprep.subr.bf16.mxu0 %v15048_v22  ;;  %v10680_v50 = vunpack.i.h.bf16 %v10678_v41  ;;  %v10679_v53 = vunpack.i.l.bf16 %v10678_v41 }
0x101d   :  { %v10668_v55 = vpop.permute.xlu1 %10667  ;;  %v5968_v62 = vpack.c.bf16 %v5788_v19, %v5787_v28 }
0x101e   :  { %v10670_v14 = vunpack.i.h.bf16 %v10668_v55  ;;  %v10669_v20 = vunpack.i.l.bf16 %v10668_v55  ;;  %v5869_v19 = vsel %vm231_vm7, %v10679_v53, %v10680_v50 }
0x101f   :  { %v10683_v29 = vpop.permute.xlu0 %10682  ;;  %5999 = vmatpush1.bf16.msra.mxu0 %v5968_v62 }
0x1020   :  { %v5814_v51 = vsel %vm195_vm6, %v10669_v20, %v10670_v14  ;;  %6000 = vmatprep.subr.bf16.mxu0 %v15048_v22  ;;  %v10685_v55 = vunpack.i.h.bf16 %v10683_v29  ;;  %v10684_v62 = vunpack.i.l.bf16 %v10683_v29 }
0x1021   :  { %v10673_v3 = vpop.permute.xlu1 %10672  ;;  %v5969_v33 = vpack.c.bf16 %v5814_v51, %v5813_v26 }
0x1022   :  { %v10675_v6 = vunpack.i.h.bf16 %v10673_v3  ;;  %v10674_v39 = vunpack.i.l.bf16 %v10673_v3  ;;  %v5895_v51 = vsel %vm15123_vm2, %v10684_v62, %v10685_v55 }
0x1023   :  { %6001 = vmatpush1.bf16.msra.mxu0 %v5969_v33  ;;  %v10688_v4 = vpop.permute.xlu0 %10687 }
0x1024   :  { %v5840_v17 = vsel %vm212_vm5, %v10674_v39, %v10675_v6  ;;  %6002 = vmatprep.subr.bf16.mxu0 %v15048_v22  ;;  %v10690_v3 = vunpack.i.h.bf16 %v10688_v4  ;;  %v10689_v33 = vunpack.i.l.bf16 %v10688_v4 }
0x1025   :  { %v10693_v24 = vpop.permute.xlu1 %10692  ;;  %v5970_v49 = vpack.c.bf16 %v5840_v17, %v5839_v35 }
0x1026   :  { %v10695_v36 = vunpack.i.h.bf16 %v10693_v24  ;;  %v10694_v56 = vunpack.i.l.bf16 %v10693_v24  ;;  %v5917_v35 = vsel %vm15125_vm8, %v10689_v33, %v10690_v3 }
0x1027   :  { %6003 = vmatpush1.bf16.msra.mxu0 %v5970_v49  ;;  %v10708_v59 = vpop.permute.xlu0 %10707 }
0x1028   :  { %6004 = vmatprep.subr.bf16.mxu0 %v15048_v22  ;;  %v5870_v12 = vsel %vm231_vm7, %v10694_v56, %v10695_v36  ;;  %v10710_v17 = vunpack.i.h.bf16 %v10708_v59  ;;  %v10709_v24 = vunpack.i.l.bf16 %v10708_v59  ;;  %v6039_v59 = vld [vmem:[%s14890_s4 + $0x240] sm:$0xf] }
0x1029   :  { %v10698_v10 = vpop.permute.xlu1 %10697  ;;  %v5972_v41 = vpack.c.bf16 %v5870_v12, %v5869_v19  ;;  %v6040_v19 = vunpack.c.l.bf16 %v6039_v59 }
0x102a   :  { %v10700_v28 = vunpack.i.h.bf16 %v10698_v10  ;;  %v10699_v9 = vunpack.i.l.bf16 %v10698_v10  ;;  %v5943_v53 = vsel %vm15127_vm15, %v10709_v24, %v10710_v17  ;;  %vm15157_vm15 = vcmask 269312  }
0x102b   :  { %6005 = vmatpush1.bf16.msra.mxu0 %v5971_v48  ;;  %v5734_v61 = vpop.permute.xlu0 %5733  ;;  %6044 = vperm.xlu1 %10721, %v6040_v19  }
0x102c   :  { %6006 = vmatprep.subr.bf16.mxu0 %v15048_v22  ;;  %v5896_v20 = vsel %vm15122_vm13, %v10699_v9, %v10700_v28  ;;  %v5737_v39 = vrot.slane %v5734_v61, 4  ;;  %v9442_v28 = vcombine.low %v13467_v46, %v13472_v34  ;;  %vm15129_vm13 = vmmov %vm15123_vm2 }
0x102d   :  { %v10703_v14 = vpop.permute.xlu1 %10702  ;;  %v5973_v52 = vpack.c.bf16 %v5896_v20, %v5895_v51  ;;  %vm15130_vm2 = vmmov %vm15125_vm8 }
0x102e   :  { %v10705_v26 = vunpack.i.h.bf16 %v10703_v14  ;;  %v10704_v32 = vunpack.i.l.bf16 %v10703_v14  ;;  %v5741_v56 = vunpack.c.l.bf16 %v5737_v39  ;;  %vm15132_vm8 = vmmov %vm15130_vm2 }
0x102f   :  { %6007 = vmatpush1.bf16.msra.mxu0 %v5972_v41  ;;  %10803 = vset.pattern.permute.xlu1 %v15057_v37 }
0x1030   :  { %6008 = vmatprep.subr.bf16.mxu0 %v15048_v22  ;;  %v5918_v48 = vsel %vm15124_vm14, %v10704_v32, %v10705_v26  ;;  %vm15131_vm14 = vmmov %vm15129_vm13 }
0x1031   :  { %v10713_v60 = vpop.permute.xlu1 %10712  ;;  %v5974_v36 = vpack.c.bf16 %v5918_v48, %v5917_v35 }
0x1032   :  { %v10715_v29 = vunpack.i.h.bf16 %v10713_v60  ;;  %v10714_v6 = vunpack.i.l.bf16 %v10713_v60 }
0x1033   :  { %6009 = vmatpush1.bf16.msra.mxu0 %v5973_v52 }
0x1034   :  { %6010 = vmatprep.subr.bf16.mxu0 %v15048_v22  ;;  %v5944_v4 = vsel %vm15126_vm3, %v10714_v6, %v10715_v29 }
0x1035   :  { %v5736_v49 = vpop.permute.xlu1 %5735  ;;  %v5975_v12 = vpack.c.bf16 %v5944_v4, %v5943_v53  ;;  %v13617_v4 = vld [vmem:[#allocation2 + $0x10] sm:$0xff] }
0x1036   :  { %v5738_v50 = vrot.slane %v5736_v49, 4 }
0x1037   :  { %6011 = vmatpush1.bf16.msra.mxu0 %v5974_v36 }
0x1038   :  { %v5742_v10 = vunpack.c.l.bf16 %v5738_v50  ;;  %6012 = vmatprep.subr.bf16.mxu0 %v15048_v22  ;;  %v13623_v50 = vmul.f32 %v13617_v4, %v11560_v30 }
0x103a   :  { %v10716_v9 = vpack.i.bf16 %v5742_v10, %v5741_v56 }
0x103b   :  { %6013 = vmatpush1.bf16.msra.mxu0 %v5975_v12  ;;  %v13631_v12 = vmul.f32 %v13617_v4, %v11551_v25 }
0x103c   :  { %10717 = vperm.xlu0 %10630, %v10716_v9  }
0x103e   :  { %6029 = vmatmul.mubr.bf16.vlgmr.msra.gmra.mrb[80].mxu0 %v9442_v28 }
0x103f   :  { %6659 = vmatprep.mubr.bf16.mxu0 %v15048_v22 }
0x1040   :  { %10762 = vset.pattern.permute.xlu0 %v15057_v37 }
0x10aa   :  { %v6045_v51 = vpop.permute.xlu1 %6044 }
0x10bb   :  { %v10718_v55 = vpop.permute.xlu0 %10717 }
0x1111   :  { %v6030_v62 = vpop.f32.mrb[80].mxu0 }
0x1112   :  { %v11439_v14 = vadd.low.f32.bf16 %v6030_v62, %v10718_v55  ;;  %v6032_v46 = vpop.f32.mrb[81].mxu0  ;;  %v6091_v62 = vld [vmem:[%s14890_s4 + $0x260] sm:$0xf] }
0x1113   :  { %v6033_v34 = vpop.f32.mrb[82].mxu0 }
0x1114   :  { %v11440_v41 = vadd.high.f32.bf16 %v6033_v34, %v10718_v55  ;;  %v6035_v20 = vpop.f32.mrb[83].mxu0  ;;  %v6037_v26 = vmax.f32 %v11439_v14, 0.0  ;;  %v6092_v14 = vunpack.c.l.bf16 %v6091_v62 }
0x1116   :  { %v6038_v32 = vmax.f32 %v11440_v41, 0.0 }
0x1118   :  { %v13594_v61 = vpack.c.bf16 %v6038_v32, %v6037_v26 }
0x111a   :  { %10054 = vmatpush3.bf16.msra.mxu1 %v13594_v61 }
0x111b   :  { %10059 = vmatprep.subr.bf16.mxu1 %v13327_v8 }
0x111d   :  { %10056 = vmatmul.mubr.msk.bf16.vlgmr.msra.gmra.mrb[76].mxu1 %vm79_vm1, %v6039_v59  ;;  %v13639_v59 = vmul.f32 %v13617_v4, %v11570_v38 }
0x111e   :  { %10069 = vmatprep.mubr.msk.bf16.mxu1 %vm11442_vm0, %v13327_v8 }
0x11f0   :  { %v6084_v3 = vpop.f32.mrb[76].mxu1 }
0x11f1   :  { %v6085_v33 = vadd.f32 %v6084_v3, %v6045_v51  ;;  %v10057_v60 = vpop.f32.mrb[77].mxu1 }
0x11f2   :  { %v6087_v52 = vpop.f32.mrb[78].mxu1 }
0x11f3   :  { %v13601_v48 = vmax.f32 %v6085_v33, 0.0  ;;  %v10058_v29 = vpop.f32.mrb[79].mxu1 }
0x11f5   :  { %v10722_v6 = vpack.i.bf16 %v13601_v48, %v13327_v8  ;;  %v6097_v39 = vmul.f32 %v13601_v48, %v11544_v16  ;;  %v6134_v35 = vmul.f32 %v13601_v48, %v11546_v18  ;;  %v6121_v24 = vmul.f32 %v13601_v48, %v11542_v15 }
0x11f6   :  { %v6161_v36 = vmul.f32 %v13601_v48, %v11560_v30  ;;  %v6148_v53 = vmul.f32 %v13601_v48, %v11551_v25  ;;  %v6185_v28 = vmul.f32 %v13601_v48, %v11570_v38  ;;  %v10747_v55 = vpack.i.bf16 %v13617_v4, %v13601_v48 }
0x11f7   :  { %10723 = vrot.lane.b32.xlu1 %v10722_v6, %s11450_s30  ;;  %v10727_v17 = vpack.i.bf16 %v6097_v39, %v13482_v31  ;;  %v10737_v49 = vpack.i.bf16 %v6134_v35, %v13509_v42  ;;  %v10732_v56 = vpack.i.bf16 %v6121_v24, %v13497_v63 }
0x11f8   :  { %v10752_v10 = vpack.i.bf16 %v13623_v50, %v6161_v36  ;;  %v10742_v9 = vpack.i.bf16 %v13631_v12, %v6148_v53  ;;  %v10757_v19 = vpack.i.bf16 %v13639_v59, %v6185_v28 }
0x11f9   :  { %10728 = vrot.lane.b32.xlu0 %v10727_v17, %s11449_s29 }
0x11fb   :  { %10738 = vrot.lane.b32.xlu1 %v10737_v49, %s11447_s27 }
0x11fd   :  { %10733 = vrot.lane.b32.xlu0 %v10732_v56, %s11448_s28 }
0x11ff   :  { %10753 = vrot.lane.b32.xlu1 %v10752_v10, %s11444_s24 }
0x1201   :  { %10743 = vrot.lane.b32.xlu0 %v10742_v9, %s11446_s26 }
0x1203   :  { %10758 = vrot.lane.b32.xlu1 %v10757_v19, %s11445_s25 }
0x1205   :  { %10748 = vrot.lane.b32.xlu0 %v10747_v55, %s11451_s10 }
0x1209   :  { %6212 = vperm.xlu0 %10762, %v6092_v14  }
0x1269   :  { %v10724_v46 = vpop.permute.xlu1 %10723 }
0x126a   :  { %v10726_v34 = vunpack.i.h.bf16 %v10724_v46  ;;  %v10725_v41 = vunpack.i.l.bf16 %v10724_v46 }
0x126b   :  { %v10729_v20 = vpop.permute.xlu0 %10728 }
0x126c   :  { %v10731_v26 = vunpack.i.h.bf16 %v10729_v20  ;;  %v10730_v32 = vunpack.i.l.bf16 %v10729_v20  ;;  %v6115_v3 = vsel %vm79_vm1, %v10725_v41, %v10726_v34 }
0x126d   :  { %v10739_v51 = vpop.permute.xlu1 %10738 }
0x126e   :  { %v6104_v33 = vsel %vm22_vm4, %v10730_v32, %v10731_v26  ;;  %v10741_v60 = vunpack.i.h.bf16 %v10739_v51  ;;  %v10740_v52 = vunpack.i.l.bf16 %v10739_v51 }
0x126f   :  { %v10734_v29 = vpop.permute.xlu0 %10733  ;;  %v6205_v6 = vpack.c.bf16 %v6115_v3, %v6104_v33 }
0x1270   :  { %v10736_v39 = vunpack.i.h.bf16 %v10734_v29  ;;  %v10735_v35 = vunpack.i.l.bf16 %v10734_v29  ;;  %v6141_v24 = vsel %vm212_vm5, %v10740_v52, %v10741_v60 }
0x1271   :  { %v10754_v17 = vpop.permute.xlu1 %10753  ;;  %10060 = vmatpush3.bf16.msra.mxu1 %v6205_v6 }
0x1272   :  { %v6128_v49 = vsel %vm195_vm6, %v10735_v35, %v10736_v39  ;;  %10061 = vmatprep.subr.bf16.mxu1 %v13327_v8  ;;  %v10756_v28 = vunpack.i.h.bf16 %v10754_v17  ;;  %v10755_v19 = vunpack.i.l.bf16 %v10754_v17 }
0x1273   :  { %v10744_v36 = vpop.permute.xlu0 %10743  ;;  %v6206_v56 = vpack.c.bf16 %v6141_v24, %v6128_v49 }
0x1274   :  { %v10746_v53 = vunpack.i.h.bf16 %v10744_v36  ;;  %v10745_v10 = vunpack.i.l.bf16 %v10744_v36  ;;  %v6169_v51 = vsel %vm15129_vm13, %v10755_v19, %v10756_v28 }
0x1275   :  { %v10759_v9 = vpop.permute.xlu1 %10758  ;;  %10062 = vmatpush3.bf16.msra.mxu1 %v6206_v56 }
0x1276   :  { %v6156_v55 = vsel %vm231_vm7, %v10745_v10, %v10746_v53  ;;  %v10761_v14 = vunpack.i.h.bf16 %v10759_v9  ;;  %v10760_v46 = vunpack.i.l.bf16 %v10759_v9  ;;  %10063 = vmatprep.subr.bf16.mxu1 %v13327_v8 }
0x1277   :  { %v10749_v34 = vpop.permute.xlu0 %10748  ;;  %v6207_v41 = vpack.c.bf16 %v6156_v55, %v13601_v48  ;;  %v13693_v55 = vld [vmem:[%s14890_s4 + $0x280] sm:$0xf] }
0x1278   :  { %v10751_v20 = vunpack.i.h.bf16 %v10749_v34  ;;  %v10750_v26 = vunpack.i.l.bf16 %v10749_v34  ;;  %v6193_v32 = vsel %vm15128_vm9, %v10760_v46, %v10761_v14  ;;  %v6263_v14 = vunpack.c.l.bf16 %v13693_v55  ;;  %vm15158_vm9 = vmmov %vm15157_vm15 }
0x1279   :  { %10064 = vmatpush3.bf16.msra.mxu1 %v6207_v41  ;;  %v6209_v60 = vpack.c.bf16 %v6193_v32, %v6193_v32  ;;  %v11297_v41 = vld [vmem:[%s14890_s4 + $0x384] ss:$16 sps:$4 sm:$0xff]   ;;  %v11307_v32 = vld [vmem:[%s14890_s4 + $0x3c0] ss:$16 sps:$4 sm:$0xff]   ;;  %vm15159_vm13 = vmmov %vm15158_vm9 }
0x127a   :  { %v6180_v3 = vsel %vm15130_vm2, %v10750_v26, %v10751_v20  ;;  %10065 = vmatprep.subr.bf16.mxu1 %v13327_v8  ;;  %6627 = vmatprep.subr.bf16.mxu0 %v11297_v41  ;;  %v11301_v20 = vld [vmem:[%s14890_s4 + $0x3a0] ss:$16 sps:$4 sm:$0xff]   ;;  %v11309_v26 = vld [vmem:[%s14890_s4 + $0x3c4] ss:$16 sps:$4 sm:$0xff]   ;;  %vm15160_vm2 = vcmask 252928  }
0x127b   :  { %v6208_v33 = vpack.c.bf16 %v6180_v3, %v6169_v51  ;;  %v6219_v52 = vsel %vm304_vm11, %v6209_v60, 0  ;;  %v11315_v51 = vld [vmem:[%s14890_s4 + $0x3e4] ss:$16 sps:$4 sm:$0xff]   ;;  %v11313_v3 = vld [vmem:[%s14890_s4 + $0x3e0] ss:$16 sps:$4 sm:$0xff]  }
0x127c   :  { %v11327_v60 = vld [vmem:[%s14890_s4 + $0x424] ss:$16 sps:$4 sm:$0xff]  }
0x127d   :  { %10066 = vmatpush3.bf16.msra.mxu1 %v6208_v33  ;;  %v11319_v33 = vld [vmem:[%s14890_s4 + $0x400] ss:$16 sps:$4 sm:$0xff]  }
0x127e   :  { %10067 = vmatprep.subr.bf16.mxu1 %v13327_v8 }
0x1281   :  { %10068 = vmatpush3.bf16.msra.mxu1 %v6219_v52  ;;  %v11325_v52 = vld [vmem:[%s14890_s4 + $0x420] ss:$16 sps:$4 sm:$0xff]  }
0x1282   :  { %10073 = vmatprep.subr.bf16.mxu1 %v13327_v8 }
0x1284   :  { %10070 = vmatmul.mubr.msk.bf16.vlgmr.msra.gmra.mrb[80].mxu1 %vm300_vm12, %v6091_v62 }
0x1285   :  { %10083 = vmatprep.mubr.msk.bf16.mxu1 %vm11442_vm0, %v13327_v8 }
0x1288   :  { %v6213_v29 = vpop.permute.xlu0 %6212 }
0x1357   :  { %v6255_v6 = vpop.f32.mrb[80].mxu1 }
0x1358   :  { %v6256_v39 = vadd.f32 %v6255_v6, %v6213_v29  ;;  %v10071_v35 = vpop.f32.mrb[81].mxu1 }
0x1359   :  { %v6258_v17 = vpop.f32.mrb[82].mxu1 }
0x135a   :  { %v13668_v24 = vmax.f32 %v6256_v39, 0.0  ;;  %v10072_v49 = vpop.f32.mrb[83].mxu1 }
0x135c   :  { %v10763_v36 = vpack.i.bf16 %v13668_v24, %v13327_v8  ;;  %v6292_v56 = vmul.f32 %v13668_v24, %v11542_v15  ;;  %v6268_v62 = vmul.f32 %v13668_v24, %v11544_v16  ;;  %v6319_v10 = vmul.f32 %v13668_v24, %v11551_v25 }
0x135d   :  { %v6305_v8 = vmul.f32 %v13668_v24, %v11546_v18 }
0x135e   :  { %10764 = vrot.lane.b32.xlu1 %v10763_v36, %s11450_s30  ;;  %v10773_v53 = vpack.i.bf16 %v6292_v56, %v13497_v63  ;;  %v10768_v28 = vpack.i.bf16 %v6268_v62, %v13482_v31  ;;  %v10783_v9 = vpack.i.bf16 %v13631_v12, %v6319_v10  ;;  %v6332_v63 = vmul.f32 %v13668_v24, %v11560_v30 }
0x135f   :  { %v10778_v19 = vpack.i.bf16 %v6305_v8, %v13509_v42  ;;  %v10788_v31 = vpack.i.bf16 %v13617_v4, %v13668_v24  ;;  %v6356_v42 = vmul.f32 %v13668_v24, %v11570_v38  ;;  %v11414_v4 = vld [vmem:[%s14890_s4 + $0x1c0] sm:$0xf] }
0x1360   :  { %10774 = vrot.lane.b32.xlu0 %v10773_v53, %s11448_s28  ;;  %v10793_v12 = vpack.i.bf16 %v13623_v50, %v6332_v63  ;;  %v4598_v34 = vunpack.c.l.bf16 %v11414_v4  ;;  %v11295_v50 = vld [vmem:[%s14890_s4 + $0x380] ss:$16 sps:$4 sm:$0xff]  }
0x1361   :  { %v10798_v46 = vpack.i.bf16 %v13639_v59, %v6356_v42  ;;  %v11303_v59 = vld [vmem:[%s14890_s4 + $0x3a4] ss:$16 sps:$4 sm:$0xff]   ;;  %6628 = vmatpush1.bf16.msra.mxu0 %v11295_v50 }
0x1362   :  { %10769 = vrot.lane.b32.xlu1 %v10768_v28, %s11449_s29  ;;  %6629 = vmatprep.subr.bf16.mxu0 %v11303_v59 }
0x1364   :  { %10784 = vrot.lane.b32.xlu0 %v10783_v9, %s11446_s26 }
0x1365   :  { %6630 = vmatpush1.bf16.msra.mxu0 %v11301_v20 }
0x1366   :  { %10779 = vrot.lane.b32.xlu1 %v10778_v19, %s11447_s27  ;;  %6631 = vmatprep.subr.bf16.mxu0 %v11309_v26 }
0x1368   :  { %10789 = vrot.lane.b32.xlu0 %v10788_v31, %s11451_s10 }
0x1369   :  { %6632 = vmatpush1.bf16.msra.mxu0 %v11307_v32 }
0x136a   :  { %10794 = vrot.lane.b32.xlu1 %v10793_v12, %s11444_s24  ;;  %6633 = vmatprep.subr.bf16.mxu0 %v11315_v51 }
0x136c   :  { %6383 = vperm.xlu0 %10762, %v6263_v14  }
0x136d   :  { %6634 = vmatpush1.bf16.msra.mxu0 %v11313_v3 }
0x136e   :  { %10799 = vrot.lane.b32.xlu1 %v10798_v46, %s11445_s25  ;;  %v13750_v46 = vld [vmem:[#allocation2] sm:$0xff] }
0x1372   :  { %4955 = vperm.xlu1 %10803, %v4598_v34  }
0x1376   :  { %10924 = vset.pattern.permute.xlu1 %v15058_v54  ;;  %v11321_v54 = vld [vmem:[%s14890_s4 + $0x404] ss:$16 sps:$4 sm:$0xff]  }
0x1377   :  { %6635 = vmatprep.subr.bf16.mxu0 %v11321_v54 }
0x1378   :  { %6636 = vmatpush1.bf16.msra.mxu0 %v11319_v33 }
0x1379   :  { %6637 = vmatprep.subr.bf16.mxu0 %v11327_v60 }
0x137c   :  { %6638 = vmatpush1.bf16.msra.mxu0 %v11325_v52 }
0x13d0   :  { %v10765_v29 = vpop.permute.xlu1 %10764 }
0x13d1   :  { %v10767_v39 = vunpack.i.h.bf16 %v10765_v29  ;;  %v10766_v35 = vunpack.i.l.bf16 %v10765_v29 }
0x13d2   :  { %v10775_v6 = vpop.permute.xlu0 %10774 }
0x13d3   :  { %v6286_v62 = vsel %vm79_vm1, %v10766_v35, %v10767_v39  ;;  %v10777_v53 = vunpack.i.h.bf16 %v10775_v6  ;;  %v10776_v10 = vunpack.i.l.bf16 %v10775_v6 }
0x13d4   :  { %v10770_v17 = vpop.permute.xlu1 %10769 }
0x13d5   :  { %v10772_v49 = vunpack.i.h.bf16 %v10770_v17  ;;  %v10771_v36 = vunpack.i.l.bf16 %v10770_v17  ;;  %v6299_v14 = vsel %vm195_vm6, %v10776_v10, %v10777_v53  ;;  %v11298_v17 = vld [vmem:[%s14890_s4 + $0x388] ss:$16 sps:$4 sm:$0xff]   ;;  %v11324_v10 = vld [vmem:[%s14890_s4 + $0x40c] ss:$16 sps:$4 sm:$0xff]  }
0x13d6   :  { %v10785_v56 = vpop.permute.xlu0 %10784  ;;  %v11316_v53 = vld [vmem:[%s14890_s4 + $0x3e8] ss:$16 sps:$4 sm:$0xff]  }
0x13d7   :  { %v6275_v28 = vsel %vm22_vm4, %v10771_v36, %v10772_v49  ;;  %v10787_v19 = vunpack.i.h.bf16 %v10785_v56  ;;  %v10786_v63 = vunpack.i.l.bf16 %v10785_v56  ;;  %v11306_v49 = vld [vmem:[%s14890_s4 + $0x3ac] ss:$16 sps:$4 sm:$0xff]   ;;  %v11304_v36 = vld [vmem:[%s14890_s4 + $0x3a8] ss:$16 sps:$4 sm:$0xff]  }
0x13d8   :  { %v10780_v8 = vpop.permute.xlu1 %10779  ;;  %v6376_v9 = vpack.c.bf16 %v6286_v62, %v6275_v28  ;;  %v11312_v56 = vld [vmem:[%s14890_s4 + $0x3cc] ss:$16 sps:$4 sm:$0xff]   ;;  %v11310_v62 = vld [vmem:[%s14890_s4 + $0x3c8] ss:$16 sps:$4 sm:$0xff]  }
0x13d9   :  { %v10782_v31 = vunpack.i.h.bf16 %v10780_v8  ;;  %v10781_v12 = vunpack.i.l.bf16 %v10780_v8  ;;  %v6327_v41 = vsel %vm231_vm7, %v10786_v63, %v10787_v19  ;;  %v11322_v28 = vld [vmem:[%s14890_s4 + $0x408] ss:$16 sps:$4 sm:$0xff]   ;;  %v11330_v8 = vld [vmem:[%s14890_s4 + $0x42c] ss:$16 sps:$4 sm:$0xff]   ;;  %v11331_v19 = vld [vmem:[%s14890_s4 + $0x440] ss:$16 sps:$4 sm:$0xff]  }
0x13da   :  { %10074 = vmatpush3.bf16.msra.mxu1 %v6376_v9  ;;  %v10790_v4 = vpop.permute.xlu0 %10789  ;;  %v6378_v3 = vpack.c.bf16 %v6327_v41, %v13668_v24  ;;  %v11300_v24 = vld [vmem:[%s14890_s4 + $0x38c] ss:$16 sps:$4 sm:$0xff]   ;;  %v11328_v9 = vld [vmem:[%s14890_s4 + $0x428] ss:$16 sps:$4 sm:$0xff]   ;;  %v11333_v63 = vld [vmem:[%s14890_s4 + $0x444] ss:$16 sps:$4 sm:$0xff]  }
0x13db   :  { %v6312_v42 = vsel %vm212_vm5, %v10781_v12, %v10782_v31  ;;  %10075 = vmatprep.subr.bf16.mxu1 %v13750_v46  ;;  %v10792_v26 = vunpack.i.h.bf16 %v10790_v4  ;;  %v10791_v32 = vunpack.i.l.bf16 %v10790_v4  ;;  %v11334_v31 = vld [vmem:[%s14890_s4 + $0x448] ss:$16 sps:$4 sm:$0xff]   ;;  %v11336_v12 = vld [vmem:[%s14890_s4 + $0x44c] ss:$16 sps:$4 sm:$0xff]   ;;  %6639 = vmatprep.subr.bf16.mxu0 %v11333_v63  ;;  %v11337_v4 = vld [vmem:[%s14890_s4 + $0x460] ss:$16 sps:$4 sm:$0xff]  }
0x13dc   :  { %v10795_v34 = vpop.permute.xlu1 %10794  ;;  %v6377_v50 = vpack.c.bf16 %v6312_v42, %v6299_v14  ;;  %v11339_v14 = vld [vmem:[%s14890_s4 + $0x464] ss:$16 sps:$4 sm:$0xff]   ;;  %v11342_v42 = vld [vmem:[%s14890_s4 + $0x46c] ss:$16 sps:$4 sm:$0xff]   ;;  %6640 = vmatpush1.bf16.msra.mxu0 %v11331_v19 }
0x13dd   :  { %v10797_v59 = vunpack.i.h.bf16 %v10795_v34  ;;  %v10796_v20 = vunpack.i.l.bf16 %v10795_v34  ;;  %v6351_v52 = vsel %vm15132_vm8, %v10791_v32, %v10792_v26  ;;  %6641 = vmatprep.subr.bf16.mxu0 %v11339_v14  ;;  %v11340_v34 = vld [vmem:[%s14890_s4 + $0x468] ss:$16 sps:$4 sm:$0xff]   ;;  %vm15162_vm8 = vmmov %vm15158_vm9 }
0x13de   :  { %10076 = vmatpush3.bf16.msra.mxu1 %v6377_v50 }
0x13df   :  { %10077 = vmatprep.subr.bf16.mxu1 %v13750_v46  ;;  %v6340_v54 = vsel %vm15131_vm14, %v10796_v20, %v10797_v59  ;;  %vm15161_vm14 = vmmov %vm15160_vm2 }
0x13e0   :  { %v10800_v51 = vpop.permute.xlu1 %10799  ;;  %v6379_v6 = vpack.c.bf16 %v6351_v52, %v6340_v54  ;;  %6642 = vmatpush1.bf16.msra.mxu0 %v11337_v4 }
0x13e1   :  { %v10802_v33 = vunpack.i.h.bf16 %v10800_v51  ;;  %v10801_v60 = vunpack.i.l.bf16 %v10800_v51 }
0x13e2   :  { %10078 = vmatpush3.bf16.msra.mxu1 %v6378_v3 }
0x13e3   :  { %10079 = vmatprep.subr.bf16.mxu1 %v13750_v46  ;;  %v6364_v29 = vsel %vm15126_vm3, %v10801_v60, %v10802_v33  ;;  %vm15164_vm3 = vcmask 793600  }
0x13e4   :  { %v6380_v39 = vpack.c.bf16 %v6364_v29, %v6364_v29 }
0x13e6   :  { %10080 = vmatpush3.bf16.msra.mxu1 %v6379_v6  ;;  %v6390_v35 = vsel %vm304_vm11, %v6380_v39, 0 }
0x13e7   :  { %10081 = vmatprep.subr.bf16.mxu1 %v13750_v46 }
0x13ea   :  { %10082 = vmatpush3.bf16.msra.mxu1 %v6390_v35 }
0x13eb   :  { %6668 = vmatprep.subr.bf16.mxu1 %v11300_v24  ;;  %v6384_v50 = vpop.permute.xlu0 %6383 }
0x13ed   :  { %10084 = vmatmul.mubr.msk.bf16.vlgmr.msra.gmra.mrb[84].mxu1 %vm300_vm12, %v13693_v55  ;;  %v11318_v55 = vld [vmem:[%s14890_s4 + $0x3ec] ss:$16 sps:$4 sm:$0xff]  }
0x13ee   :  { %6669 = vmatpush1.bf16.msra.mxu1 %v11298_v17  ;;  %6700 = vmatprep.mubr.bf16.mxu1 %v15048_v22 }
0x13ef   :  { %6670 = vmatprep.subr.bf16.mxu1 %v11306_v49 }
0x13f1   :  { %v4956_v33 = vpop.permute.xlu1 %4955 }
0x13f2   :  { %6671 = vmatpush1.bf16.msra.mxu1 %v11304_v36  ;;  %v5008_v60 = vadd.f32 %v13350_v58, %v4956_v33  ;;  %v5049_v52 = vadd.f32 %v13400_v0, %v4956_v33  ;;  %v5010_v29 = vadd.f32 %v13352_v7, %v4956_v33  ;;  %v5051_v6 = vadd.f32 %v13404_v1, %v4956_v33 }
0x13f3   :  { %6672 = vmatprep.subr.bf16.mxu1 %v11312_v56 }
0x13f4   :  { %v5055_v39 = vmax.f32 %v5008_v60, 0.0  ;;  %v5057_v24 = vmax.f32 %v5049_v52, 0.0  ;;  %v5056_v17 = vmax.f32 %v5010_v29, 0.0  ;;  %v5058_v49 = vmax.f32 %v5051_v6, 0.0  ;;  %v15135_v60 = vld [vmem:[#allocation20_spill] sm:$0xff]  ;;  %v15136_v29 = vld [vmem:[#allocation15_spill] sm:$0xff] }
0x13f6   :  { %6673 = vmatpush1.bf16.msra.mxu1 %v11310_v62 }
0x13f7   :  { %6674 = vmatprep.subr.bf16.mxu1 %v11318_v55 }
0x13fa   :  { %6675 = vmatpush1.bf16.msra.mxu1 %v11316_v53 }
0x13fb   :  { %6676 = vmatprep.subr.bf16.mxu1 %v11324_v10 }
0x13fe   :  { %6677 = vmatpush1.bf16.msra.mxu1 %v11322_v28 }
0x13ff   :  { %6678 = vmatprep.subr.bf16.mxu1 %v11330_v8  ;;  %v13844_v8 = vmul.f32 %v13750_v46, %v11730_v43 }
0x1402   :  { %6679 = vmatpush1.bf16.msra.mxu1 %v11328_v9 }
0x1403   :  { %6680 = vmatprep.subr.bf16.mxu1 %v11336_v12 }
0x1406   :  { %6681 = vmatpush1.bf16.msra.mxu1 %v11334_v31  ;;  %v13857_v31 = vmul.f32 %v13750_v46, %v11732_v44 }
0x1407   :  { %6682 = vmatprep.subr.bf16.mxu1 %v11342_v42 }
0x140a   :  { %6683 = vmatpush1.bf16.msra.mxu1 %v11340_v34 }
0x14c0   :  { %v6426_v41 = vpop.f32.mrb[84].mxu1 }
0x14c1   :  { %v6427_v59 = vadd.f32 %v6426_v41, %v6384_v50  ;;  %v10085_v20 = vpop.f32.mrb[85].mxu1 }
0x14c2   :  { %v6429_v26 = vpop.f32.mrb[86].mxu1 }
0x14c3   :  { %v6432_v32 = vmax.f32 %v6427_v59, 0.0  ;;  %v10086_v51 = vpop.f32.mrb[87].mxu1  ;;  %v13880_v59 = vmul.f32 %v13750_v46, %v11735_v47 }
0x14c5   :  { %v6433_v3 = vadd.f32 %v6432_v32, %v13601_v48  ;;  %15133 = vst [vmem:[#allocation39_spill] sm:$0xff] %v13880_v59 }
0x14c7   :  { %v6466_v54 = vpack.c.bf16 %v6433_v3, %v6433_v3 }
0x14c9   :  { %6660 = vmatmul.mubr.bf16.vlgmr.msra.gmra.mrb[84].mxu0 %v6466_v54  ;;  %6701 = vmatmul.mubr.bf16.vlgmr.msra.gmra.mrb[88].mxu1 %v6466_v54  ;;  %v15134_v54 = vld [vmem:[#allocation19_spill] sm:$0xff] }
0x14ca   :  { %7121 = vmatprep.mubr.bf16.mxu0 %v15048_v22  ;;  %7162 = vmatprep.mubr.bf16.mxu1 %v15048_v22 }
0x159c   :  { %v6661_v35 = vpop.f32.mrb[84].mxu0  ;;  %v6702_v48 = vpop.f32.mrb[88].mxu1 }
0x159d   :  { %v13832_v36 = vadd.f32 %v6661_v35, %v5055_v39  ;;  %v13834_v56 = vadd.f32 %v6702_v48, %v5057_v24  ;;  %v6663_v62 = vpop.f32.mrb[85].mxu0  ;;  %v6704_v55 = vpop.f32.mrb[89].mxu1  ;;  %v15137_v39 = vld [vmem:[#allocation16_spill] sm:$0xff]  ;;  %v15138_v35 = vld [vmem:[#allocation17_spill] sm:$0xff] }
0x159e   :  { %v13836_v53 = vadd.f32 %v6663_v62, %v5056_v17  ;;  %v13838_v58 = vadd.f32 %v6704_v55, %v5058_v49  ;;  %v6665_v0 = vpop.f32.mrb[86].mxu0  ;;  %v6706_v7 = vpop.f32.mrb[90].mxu1  ;;  %v15139_v49 = vld [vmem:[#allocation21_spill] sm:$0xff]  ;;  %v15140_v55 = vld [vmem:[#allocation22_spill] sm:$0xff] }
0x159f   :  { %v6666_v10 = vpop.f32.mrb[87].mxu0  ;;  %v6707_v1 = vpop.f32.mrb[91].mxu1  ;;  %v10804_v28 = vpack.i.bf16 %v13834_v56, %v13750_v46  ;;  %v6727_v9 = vmul.f32 %v13834_v56, %v15077_v13  ;;  %v6796_v63 = vmul.f32 %v13834_v56, %v15081_v2  ;;  %v6912_v42 = vmul.f32 %v15067_v57, %v13832_v36 }
0x15a0   :  { %6774 = vrot.lane.b32.xlu0 %v13838_v58, %s11458_s8  ;;  %v10809_v14 = vpack.i.bf16 %v13836_v53, %v13832_v36  ;;  %v6725_v4 = vmul.f32 %v13832_v36, %v11777_v5  ;;  %v6726_v34 = vmul.f32 %v13836_v53, %v11783_v11  ;;  %v10814_v50 = vpack.i.bf16 %v13834_v56, %v13836_v53  ;;  %v15141_v1 = vld [vmem:[#allocation26_spill] sm:$0xff] }
0x15a1   :  { %10805 = vrot.lane.b32.xlu1 %v10804_v28, %s11458_s8  ;;  %v10819_v19 = vpack.i.bf16 %v6727_v9, %v13844_v8  ;;  %v10824_v12 = vpack.i.bf16 %v6796_v63, %v13857_v31  ;;  %v6833_v41 = vmul.f32 %v13834_v56, %v15079_v45  ;;  %v6794_v26 = vmul.f32 %v13832_v36, %v11795_v21  ;;  %v15142_v9 = vld [vmem:[#allocation28_spill] sm:$0xff]  ;;  %v15143_v63 = vld [vmem:[#allocation23_spill] sm:$0xff] }
0x15a2   :  { %v10834_v20 = vpack.i.bf16 %v6726_v34, %v6725_v4  ;;  %v6795_v32 = vmul.f32 %v13836_v53, %v11799_v23  ;;  %v6876_v33 = vmul.f32 %v13836_v53, %v15134_v54  ;;  %v6877_v52 = vmul.f32 %v13834_v56, %v15135_v60  ;;  %v15145_v4 = vld [vmem:[#allocation32_spill] sm:$0xff] }
0x15a3   :  { %v10829_v51 = vpack.i.bf16 %v6833_v41, %v13880_v59  ;;  %v6875_v6 = vmul.f32 %v15136_v29, %v13832_v36  ;;  %v6831_v24 = vmul.f32 %v13832_v36, %v15137_v39  ;;  %v6832_v48 = vmul.f32 %v13836_v53, %v15138_v35 }
0x15a4   :  { %10820 = vrot.lane.b32.xlu0 %v10819_v19, %s15062_s22  ;;  %v10839_v3 = vpack.i.bf16 %v6795_v32, %v6794_v26  ;;  %v10849_v17 = vpack.i.bf16 %v6877_v52, %v6876_v33  ;;  %v6913_v62 = vmul.f32 %v13836_v53, %v15139_v49  ;;  %v6914_v0 = vmul.f32 %v13834_v56, %v15140_v55  ;;  %v15148_v32 = vld [vmem:[#allocation25_spill] sm:$0xff]  ;;  %v15150_v52 = vld [vmem:[#allocation30_spill] sm:$0xff] }
0x15a5   :  { %6954 = vrot.lane.b32.xlu1 %v13832_v36, %s11460_s20  ;;  %v10844_v7 = vpack.i.bf16 %v6832_v48, %v6831_v24  ;;  %v6728_v28 = vmul.f32 %v13838_v58, %v15141_v1  ;;  %v6797_v19 = vmul.f32 %v13838_v58, %v15142_v9  ;;  %v6834_v34 = vmul.f32 %v13838_v58, %v15145_v4  ;;  %v15152_v24 = vld [vmem:[#allocation35_spill] sm:$0xff] }
0x15a6   :  { %v10854_v10 = vpack.i.bf16 %v6914_v0, %v6913_v62  ;;  %v15154_v0 = vld [vmem:[#allocation37_spill] sm:$0xff] }
0x15a8   :  { %10825 = vrot.lane.b32.xlu0 %v10824_v12, %s15063_s23  ;;  %v6981_v12 = vmul.f32 %v15143_v63, %v13832_v36 }
0x15a9   :  { %10810 = vrot.lane.b32.xlu1 %v10809_v14, %s11458_s8  ;;  %v15144_v14 = vld [vmem:[#allocation24_spill] sm:$0xff] }
0x15ac   :  { %6922 = vrot.lane.b32.xlu0 %v6912_v42, %s15072_s1  ;;  %v6982_v42 = vmul.f32 %v13836_v53, %v15144_v14 }
0x15ad   :  { %10815 = vrot.lane.b32.xlu1 %v10814_v50, %s11460_s20  ;;  %v13921_v50 = vld [vmem:[#allocation3 + $0x28] sm:$0xff] }
0x15ae   :  { %15146 = vst [vmem:[#allocation19_spill] sm:$0xff] %v13921_v50  ;;  %v10859_v41 = vpack.i.bf16 %v6982_v42, %v6981_v12  ;;  %v13937_v48 = vmul.f32 %v13921_v50, %v15152_v24  ;;  %v10869_v12 = vpack.i.bf16 %v13921_v50, %v13838_v58 }
0x15b0   :  { %10835 = vrot.lane.b32.xlu0 %v10834_v20, %s15062_s22  ;;  %v15147_v20 = vld [vmem:[#allocation31_spill] sm:$0xff]  ;;  %15153 = vst [vmem:[#allocation15_spill] sm:$0xff] %v13937_v48 }
0x15b1   :  { %10830 = vrot.lane.b32.xlu1 %v10829_v51, %s11447_s27  ;;  %v6878_v26 = vmul.f32 %v13838_v58, %v15147_v20  ;;  %v6983_v51 = vmul.f32 %v13834_v56, %v15148_v32 }
0x15b4   :  { %10840 = vrot.lane.b32.xlu0 %v10839_v3, %s15063_s23  ;;  %v15149_v3 = vld [vmem:[#allocation36_spill] sm:$0xff] }
0x15b5   :  { %6885 = vrot.lane.b32.xlu1 %v6875_v6, %s11446_s26  ;;  %v6915_v33 = vmul.f32 %v13838_v58, %v15149_v3  ;;  %v13932_v6 = vmul.f32 %v13921_v50, %v15150_v52 }
0x15b7   :  { %15151 = vst [vmem:[#allocation20_spill] sm:$0xff] %v13932_v6  ;;  %v10874_v62 = vpack.i.bf16 %v13937_v48, %v6915_v33 }
0x15b8   :  { %10850 = vrot.lane.b32.xlu0 %v10849_v17, %s11446_s26  ;;  %v10864_v17 = vpack.i.bf16 %v13932_v6, %v6878_v26 }
0x15b9   :  { %10845 = vrot.lane.b32.xlu1 %v10844_v7, %s11447_s27  ;;  %v6984_v7 = vmul.f32 %v13838_v58, %v15154_v0 }
0x15bc   :  { %10855 = vrot.lane.b32.xlu0 %v10854_v10, %s15072_s1  ;;  %v15155_v10 = vld [vmem:[#allocation34_spill] sm:$0xff] }
0x15bd   :  { %6742 = vrot.lane.b32.xlu1 %v6728_v28, %s15062_s22  ;;  %v13947_v28 = vmul.f32 %v13921_v50, %v15155_v10 }
0x15bf   :  { %15156 = vst [vmem:[#allocation16_spill] sm:$0xff] %v13947_v28  ;;  %v10879_v42 = vpack.i.bf16 %v13947_v28, %v6984_v7 }
0x15c0   :  { %6811 = vrot.lane.b32.xlu0 %v6797_v19, %s15063_s23  ;;  %v13952_v19 = vld [vmem:[%s14890_s4 + $0x2a0] sm:$0xf] }
0x15c1   :  { %6848 = vrot.lane.b32.xlu1 %v6834_v34, %s11447_s27  ;;  %v6714_v34 = vunpack.c.l.bf16 %v13952_v19 }
0x15c4   :  { %10860 = vrot.lane.b32.xlu0 %v10859_v41, %s15075_s12 }
0x15c5   :  { %6995 = vrot.lane.b32.xlu1 %v6983_v51, %s15075_s12 }
0x15c8   :  { %10865 = vrot.lane.b32.xlu0 %v10864_v17, %s11446_s26 }
0x15c9   :  { %10875 = vrot.lane.b32.xlu1 %v10874_v62, %s15072_s1 }
0x15cc   :  { %10870 = vrot.lane.b32.xlu0 %v10869_v12, %s11460_s20 }
0x15cd   :  { %10880 = vrot.lane.b32.xlu1 %v10879_v42, %s15075_s12 }
0x15d0   :  { %7071 = vperm.xlu0 %10762, %v6714_v34  }
0x15d1   :  { %7196 = vrot.lane.b32.xlu1 %v13844_v8, %s15062_s22 }
0x15d4   :  { %7228 = vrot.lane.b32.xlu0 %v13750_v46, %s11458_s8 }
0x15d5   :  { %7265 = vrot.lane.b32.xlu1 %v13857_v31, %s15063_s23 }
0x15d8   :  { %7302 = vrot.lane.b32.xlu0 %v13880_v59, %s11447_s27 }
0x1612   :  { %v6775_v41 = vpop.permute.xlu0 %6774 }
0x1613   :  { %v10806_v26 = vpop.permute.xlu1 %10805 }
0x1614   :  { %v10807_v40 = vunpack.i.l.bf16 %v10806_v26 }
0x1616   :  { %v10821_v51 = vpop.permute.xlu0 %10820 }
0x1617   :  { %v13968_v33 = vpop.permute.xlu1 %6954  ;;  %v10822_v31 = vunpack.i.l.bf16 %v10821_v51 }
0x161a   :  { %v13970_v17 = vpop.permute.xlu0 %10825 }
0x161b   :  { %v10811_v62 = vpop.permute.xlu1 %10810 }
0x161c   :  { %v10813_v12 = vunpack.i.h.bf16 %v10811_v62  ;;  %v10812_v42 = vunpack.i.l.bf16 %v10811_v62  ;;  %v10808_v62 = vunpack.i.h.bf16 %v10806_v26 }
0x161e   :  { %v13972_v7 = vpop.permute.xlu0 %6922  ;;  %v6776_v52 = vsel %vm787_vm10, %v10807_v40, %v10812_v42  ;;  %v6777_v59 = vsel %vm787_vm10, %v10812_v42, %v10813_v12  ;;  %v10827_v40 = vunpack.i.l.bf16 %v13970_v17 }
0x161f   :  { %v13974_v8 = vpop.permute.xlu1 %10815 }
0x1620   :  { %v10817_v45 = vunpack.i.l.bf16 %v13974_v8 }
0x1622   :  { %v10836_v34 = vpop.permute.xlu0 %10835 }
0x1623   :  { %v10838_v27 = vunpack.i.h.bf16 %v10836_v34  ;;  %v10837_v47 = vunpack.i.l.bf16 %v10836_v34  ;;  %v10831_v10 = vpop.permute.xlu1 %10830  ;;  %v10823_v34 = vunpack.i.h.bf16 %v10821_v51 }
0x1624   :  { %v10832_v42 = vunpack.i.l.bf16 %v10831_v10 }
0x1625   :  { %v6744_v24 = vsel %vm15157_vm15, %v10822_v31, %v10837_v47  ;;  %v6745_v44 = vsel %vm15158_vm9, %v10837_v47, %v10838_v27  ;;  %vm15165_vm15 = vmmov %vm15160_vm2  ;;  %vm15166_vm9 = vcmask 785408  }
0x1626   :  { %v10841_v43 = vpop.permute.xlu0 %10840  ;;  %v7050_v50 = vpack.c.bf16 %v6777_v59, %v6745_v44  ;;  %v7049_v28 = vpack.c.bf16 %v6776_v52, %v6744_v24  ;;  %v10828_v59 = vunpack.i.h.bf16 %v13970_v17 }
0x1627   :  { %v6886_v6 = vpop.permute.xlu1 %6885  ;;  %v10842_v0 = vunpack.i.l.bf16 %v10841_v43  ;;  %v10843_v48 = vunpack.i.h.bf16 %v10841_v43  ;;  %v6779_v43 = vsel %vm787_vm10, %v10808_v62, %v6775_v41  ;;  %v6778_v41 = vsel %vm787_vm10, %v10813_v12, %v10808_v62 }
0x1628   :  { %7089 = vmatprep.subr.bf16.mxu0 %v7050_v50  ;;  %v6746_v50 = vsel %vm15159_vm13, %v10838_v27, %v10823_v34  ;;  %vm15167_vm13 = vmmov %vm15160_vm2 }
0x1629   :  { %7090 = vmatpush1.bf16.msra.mxu0 %v7049_v28  ;;  %v6813_v52 = vsel %vm15160_vm2, %v10827_v40, %v10842_v0  ;;  %v6814_v26 = vsel %vm15161_vm14, %v10842_v0, %v10843_v48  ;;  %v7051_v38 = vpack.c.bf16 %v6778_v41, %v6746_v50  ;;  %vm15168_vm2 = vmmov %vm15164_vm3 }
0x162a   :  { %v13980_v20 = vpop.permute.xlu0 %10850  ;;  %vm15169_vm14 = vmmov %vm15166_vm9 }
0x162b   :  { %v14997_v31 = vunpack.i.h.bf16 %v13980_v20  ;;  %v10852_v47 = vunpack.i.l.bf16 %v13980_v20  ;;  %v10846_v3 = vpop.permute.xlu1 %10845 }
0x162c   :  { %v10848_v9 = vunpack.i.h.bf16 %v10846_v3  ;;  %v10847_v44 = vunpack.i.l.bf16 %v10846_v3 }
0x162d   :  { %v6896_v3 = vsel %vm231_vm7, %v10852_v47, %v14997_v31  ;;  %v6895_v1 = vsel %vm231_vm7, %v6886_v6, %v10852_v47 }
0x162e   :  { %v6850_v24 = vsel %vm212_vm5, %v10832_v42, %v10847_v44  ;;  %v13990_v28 = vpop.permute.xlu0 %10855  ;;  %v6851_v51 = vsel %vm212_vm5, %v10847_v44, %v10848_v9  ;;  %v10818_v42 = vunpack.i.h.bf16 %v13974_v8  ;;  %v10833_v44 = vunpack.i.h.bf16 %v10831_v10 }
0x162f   :  { %v10857_v27 = vunpack.i.l.bf16 %v13990_v28  ;;  %v6743_v2 = vpop.permute.xlu1 %6742  ;;  %v7054_v40 = vpack.c.bf16 %v6851_v51, %v6814_v26  ;;  %v7053_v4 = vpack.c.bf16 %v6850_v24, %v6813_v52  ;;  %v7058_v31 = vpack.c.bf16 %v6896_v3, %v13836_v53 }
0x1630   :  { %v6747_v0 = vsel %vm15162_vm8, %v10823_v34, %v6743_v2  ;;  %v15163_v52 = vunpack.i.h.bf16 %v13990_v28  ;;  %v6852_v62 = vsel %vm212_vm5, %v10848_v9, %v10833_v44  ;;  %v7057_v6 = vpack.c.bf16 %v6895_v1, %v13832_v36 }
0x1631   :  { %v7052_v13 = vpack.c.bf16 %v6779_v43, %v6747_v0  ;;  %7091 = vmatprep.subr.bf16.mxu0 %v7054_v40  ;;  %v6815_v34 = vsel %vm15167_vm13, %v10843_v48, %v10828_v59  ;;  %v6932_v47 = vsel %vm15168_vm2, %v13972_v7, %v10857_v27  ;;  %v6964_v1 = vsel %vm15169_vm14, %v13968_v33, %v10817_v45  ;;  %vm15175_vm13 = vmmov %vm15168_vm2 }
0x1632   :  { %v6812_v17 = vpop.permute.xlu0 %6811  ;;  %7092 = vmatpush1.bf16.msra.mxu0 %v7053_v4  ;;  %v6933_v12 = vsel %vm15164_vm3, %v10857_v27, %v15163_v52  ;;  %v6965_v4 = vsel %vm15166_vm9, %v10817_v45, %v10818_v42  ;;  %v7061_v51 = vpack.c.bf16 %v6964_v1, %v6932_v47  ;;  %vm15170_vm8 = vcmask 777216  }
0x1633   :  { %v6816_v24 = vsel %vm15165_vm15, %v10828_v59, %v6812_v17  ;;  %7093 = vmatprep.subr.bf16.mxu0 %v7058_v31  ;;  %7130 = vmatprep.subr.bf16.mxu1 %v7052_v13  ;;  %v6849_v2 = vpop.permute.xlu1 %6848  ;;  %v7062_v50 = vpack.c.bf16 %v6965_v4, %v6933_v12  ;;  %v7055_v13 = vpack.c.bf16 %v6852_v62, %v6815_v34  ;;  %vm15171_vm3 = vmmov %vm15170_vm8  ;;  %v15172_v33 = vunpack.i.h.bf16 %v13980_v20 }
0x1634   :  { %v6853_v10 = vsel %vm212_vm5, %v10833_v44, %v6849_v2  ;;  %7131 = vmatpush1.bf16.msra.mxu1 %v7051_v38  ;;  %v15173_v34 = vunpack.i.h.bf16 %v13990_v28  ;;  %vm15174_vm15 = vmmov %vm15168_vm2 }
0x1635   :  { %v7056_v9 = vpack.c.bf16 %v6853_v10, %v6816_v24  ;;  %vm15176_vm2 = vmmov %vm15166_vm9 }
0x1636   :  { %v10861_v43 = vpop.permute.xlu0 %10860  ;;  %7094 = vmatpush1.bf16.msra.mxu0 %v7057_v6  ;;  %vm15177_vm14 = vmmov %vm15171_vm3 }
0x1637   :  { %v10863_v31 = vunpack.i.h.bf16 %v10861_v43  ;;  %v10862_v26 = vunpack.i.l.bf16 %v10861_v43  ;;  %7095 = vmatprep.subr.bf16.mxu0 %v7062_v50  ;;  %7132 = vmatprep.subr.bf16.mxu1 %v7056_v9  ;;  %v6996_v38 = vpop.permute.xlu1 %6995 }
0x1638   :  { %7133 = vmatpush1.bf16.msra.mxu1 %v7055_v13 }
0x1639   :  { %v7002_v48 = vsel %vm15170_vm8, %v10863_v31, %v6996_v38  ;;  %v7001_v59 = vsel %vm15171_vm3, %v10862_v26, %v10863_v31  ;;  %vm15178_vm8 = vmmov %vm15171_vm3  ;;  %vm15179_vm3 = vcmask 269312  }
0x163a   :  { %v7066_v7 = vpack.c.bf16 %v7002_v48, %v7002_v48  ;;  %v10866_v3 = vpop.permute.xlu0 %10865  ;;  %7096 = vmatpush1.bf16.msra.mxu0 %v7061_v51  ;;  %v7065_v17 = vpack.c.bf16 %v7001_v59, %v7001_v59 }
0x163b   :  { %v10868_v27 = vunpack.i.h.bf16 %v10866_v3  ;;  %v10867_v40 = vunpack.i.l.bf16 %v10866_v3  ;;  %v10876_v41 = vpop.permute.xlu1 %10875 }
0x163c   :  { %v10877_v0 = vunpack.i.l.bf16 %v10876_v41  ;;  %9480 = vmatprep.subr.msk.bf16.mxu0 %vm304_vm11, %v7066_v7  ;;  %v7078_v45 = vsel %vm304_vm11, %v7065_v17, 0  ;;  %v10878_v52 = vunpack.i.h.bf16 %v10876_v41 }
0x163d   :  { %v6897_v44 = vsel %vm231_vm7, %v15172_v33, %v10867_v40  ;;  %v6898_v12 = vsel %vm231_vm7, %v10867_v40, %v10868_v27 }
0x163e   :  { %v7059_v62 = vpack.c.bf16 %v6897_v44, %v13834_v56  ;;  %v10871_v24 = vpop.permute.xlu0 %10870  ;;  %7098 = vmatpush1.bf16.msra.mxu0 %v7078_v45  ;;  %v7060_v2 = vpack.c.bf16 %v6898_v12, %v13838_v58  ;;  %v6934_v47 = vsel %vm15174_vm15, %v15173_v34, %v10877_v0  ;;  %v6935_v43 = vsel %vm15175_vm13, %v10877_v0, %v10878_v52  ;;  %vm15180_vm15 = vmmov %vm15179_vm3 }
0x163f   :  { %v10873_v6 = vunpack.i.h.bf16 %v10871_v24  ;;  %v10872_v10 = vunpack.i.l.bf16 %v10871_v24  ;;  %v10881_v4 = vpop.permute.xlu1 %10880 }
0x1640   :  { %v10883_v9 = vunpack.i.h.bf16 %v10881_v4  ;;  %v10882_v20 = vunpack.i.l.bf16 %v10881_v4  ;;  %7134 = vmatprep.subr.bf16.mxu1 %v7060_v2 }
0x1641   :  { %v6966_v50 = vsel %vm15166_vm9, %v10818_v42, %v10872_v10  ;;  %9481 = vmatmul.mubr.msk.bf16.vlgmr.msra.gmra.mrb[88].mxu0 %vm300_vm12, %v13952_v19  ;;  %7135 = vmatpush1.bf16.msra.mxu1 %v7059_v62  ;;  %v6967_v13 = vsel %vm15176_vm2, %v10872_v10, %v10873_v6  ;;  %vm15181_vm9 = vcmask 252928  }
0x1642   :  { %v7063_v1 = vpack.c.bf16 %v6966_v50, %v6934_v47  ;;  %v7004_v28 = vsel %vm15177_vm14, %v10882_v20, %v10883_v9  ;;  %v7064_v31 = vpack.c.bf16 %v6967_v13, %v6935_v43  ;;  %v7003_v26 = vsel %vm15178_vm8, %v6996_v38, %v10882_v20  ;;  %7583 = vmatprep.mubr.bf16.mxu0 %v15048_v22  ;;  %vm15182_vm13 = vmmov %vm15181_vm9 }
0x1643   :  { %v7068_v51 = vpack.c.bf16 %v7004_v28, %v7004_v28  ;;  %v7067_v8 = vpack.c.bf16 %v7003_v26, %v7003_v26  ;;  %vm15183_vm14 = vcmask 793600  }
0x1644   :  { %7136 = vmatprep.subr.bf16.mxu1 %v7064_v31  ;;  %vm15184_vm8 = vmmov %vm15183_vm14 }
0x1645   :  { %7137 = vmatpush1.bf16.msra.mxu1 %v7063_v1  ;;  %v7084_v42 = vsel %vm304_vm11, %v7067_v8, 0 }
0x1646   :  { %9482 = vmatprep.subr.msk.bf16.mxu1 %vm304_vm11, %v7068_v51 }
0x1649   :  { %7139 = vmatpush1.bf16.msra.mxu1 %v7084_v42 }
0x164c   :  { %9483 = vmatmul.mubr.msk.bf16.vlgmr.msra.gmra.mrb[92].mxu1 %vm300_vm12, %v13952_v19 }
0x164d   :  { %7624 = vmatprep.mubr.bf16.mxu1 %v15048_v22 }
0x164f   :  { %v14048_v48 = vpop.permute.xlu0 %7071 }
0x1714   :  { %v7123_v59 = vpop.f32.mrb[88].mxu0 }
0x1715   :  { %v7124_v38 = vadd.f32 %v7123_v59, %v14048_v48  ;;  %v7125_v7 = vpop.f32.mrb[89].mxu0 }
0x1716   :  { %v7126_v3 = vadd.f32 %v7125_v7, %v14048_v48  ;;  %v7127_v17 = vpop.f32.mrb[90].mxu0  ;;  %v14110_v7 = vld [vmem:[%s14890_s4 + $0x2e0] sm:$0xf] }
0x1717   :  { %v14052_v27 = vmax.f32 %v7124_v38, 0.0  ;;  %v7128_v40 = vpop.f32.mrb[91].mxu0  ;;  %v7229_v17 = vpop.permute.xlu0 %7228 }
0x1718   :  { %v14054_v41 = vmax.f32 %v7126_v3, 0.0  ;;  %v7642_v3 = vunpack.c.l.bf16 %v14110_v7  ;;  %v7197_v40 = vpop.permute.xlu1 %7196 }
0x1719   :  { %v7187_v0 = vmul.f32 %v14052_v27, %v11777_v5  ;;  %v7256_v44 = vmul.f32 %v14052_v27, %v11795_v21  ;;  %v7337_v12 = vmul.f32 %v15136_v29, %v14052_v27  ;;  %v7293_v62 = vmul.f32 %v14052_v27, %v15137_v39 }
0x171a   :  { %v10884_v19 = vpack.i.bf16 %v14054_v41, %v14052_v27  ;;  %v7188_v45 = vmul.f32 %v14054_v41, %v11783_v11  ;;  %v7257_v52 = vmul.f32 %v14054_v41, %v11799_v23  ;;  %v7294_v24 = vmul.f32 %v14054_v41, %v15138_v35 }
0x171b   :  { %v7374_v50 = vmul.f32 %v15067_v57, %v14052_v27  ;;  %v7338_v1 = vmul.f32 %v14054_v41, %v15134_v54  ;;  %v7375_v26 = vmul.f32 %v14054_v41, %v15139_v49  ;;  %v7443_v8 = vmul.f32 %v15143_v63, %v14052_v27 }
0x171c   :  { %10885 = vrot.lane.b32.xlu0 %v10884_v19, %s11458_s8  ;;  %v10889_v33 = vpack.i.bf16 %v7188_v45, %v7187_v0  ;;  %v10894_v4 = vpack.i.bf16 %v7257_v52, %v7256_v44  ;;  %v10899_v20 = vpack.i.bf16 %v7294_v24, %v7293_v62  ;;  %v7444_v42 = vmul.f32 %v14054_v41, %v15144_v14  ;;  %v7303_v0 = vpop.permute.xlu0 %7302  ;;  %v7266_v19 = vpop.permute.xlu1 %7265 }
0x171e   :  { %10890 = vrot.lane.b32.xlu1 %v10889_v33, %s15062_s22  ;;  %v10919_v38 = vpack.i.bf16 %v7444_v42, %v7443_v8 }
0x171f   :  { %v7164_v2 = vpop.f32.mrb[92].mxu1 }
0x1720   :  { %v7165_v6 = vadd.f32 %v7164_v2, %v14048_v48  ;;  %v14075_v10 = vpop.f32.mrb[93].mxu1  ;;  %7347 = vrot.lane.b32.xlu0 %v7337_v12, %s11446_s26 }
0x1721   :  { %v7168_v34 = vpop.f32.mrb[94].mxu1 }
0x1722   :  { %v14078_v47 = vmax.f32 %v7165_v6, 0.0  ;;  %v7169_v9 = vpop.f32.mrb[95].mxu1  ;;  %10895 = vrot.lane.b32.xlu1 %v10894_v4, %s15063_s23 }
0x1724   :  { %10900 = vrot.lane.b32.xlu0 %v10899_v20, %s11447_s27  ;;  %v7339_v43 = vmul.f32 %v14078_v47, %v15135_v60  ;;  %v10904_v13 = vpack.i.bf16 %v14078_v47, %v14054_v41  ;;  %v7376_v31 = vmul.f32 %v14078_v47, %v15140_v55  ;;  %v7445_v59 = vmul.f32 %v14078_v47, %v15148_v32 }
0x1726   :  { %7384 = vrot.lane.b32.xlu1 %v7374_v50, %s15072_s1  ;;  %v10909_v28 = vpack.i.bf16 %v7339_v43, %v7338_v1  ;;  %v10914_v51 = vpack.i.bf16 %v7376_v31, %v7375_v26 }
0x1728   :  { %10905 = vrot.lane.b32.xlu0 %v10904_v13, %s11460_s20 }
0x172a   :  { %10910 = vrot.lane.b32.xlu1 %v10909_v28, %s11446_s26 }
0x172c   :  { %7416 = vrot.lane.b32.xlu0 %v14052_v27, %s11460_s20 }
0x172e   :  { %10915 = vrot.lane.b32.xlu1 %v10914_v51, %s15072_s1 }
0x1730   :  { %7457 = vrot.lane.b32.xlu0 %v7445_v59, %s15075_s12 }
0x1732   :  { %10920 = vrot.lane.b32.xlu1 %v10919_v38, %s15075_s12 }
0x1736   :  { %7645 = vperm.xlu1 %10924, %v7642_v3  }
0x173a   :  { %11005 = vset.pattern.permute.xlu1 %v15057_v37 }
0x178e   :  { %v14115_v45 = vpop.permute.xlu0 %10885 }
0x178f   :  { %v15006_v33 = vunpack.i.h.bf16 %v14115_v45  ;;  %v10887_v44 = vunpack.i.l.bf16 %v14115_v45 }
0x1790   :  { %v14119_v52 = vpop.permute.xlu1 %10890 }
0x1791   :  { %v15005_v12 = vunpack.i.h.bf16 %v14119_v52  ;;  %v10892_v62 = vunpack.i.l.bf16 %v14119_v52  ;;  %v7238_v2 = vsel %vm787_vm10, %v7229_v17, %v10887_v44  ;;  %v7239_v34 = vsel %vm787_vm10, %v10887_v44, %v15006_v33 }
0x1792   :  { %v7348_v24 = vpop.permute.xlu0 %7347 }
0x1793   :  { %v7206_v6 = vsel %vm15179_vm3, %v7197_v40, %v10892_v62  ;;  %v7207_v4 = vsel %vm15180_vm15, %v10892_v62, %v15005_v12  ;;  %vm15185_vm3 = vmmov %vm15176_vm2  ;;  %vm15186_vm15 = vcmask 777216  }
0x1794   :  { %v7511_v9 = vpack.c.bf16 %v7238_v2, %v7206_v6  ;;  %v14131_v20 = vpop.permute.xlu1 %10895  ;;  %v7512_v50 = vpack.c.bf16 %v7239_v34, %v7207_v4 }
0x1795   :  { %v15003_v43 = vunpack.i.h.bf16 %v14131_v20  ;;  %v10897_v13 = vunpack.i.l.bf16 %v14131_v20 }
0x1796   :  { %v14135_v1 = vpop.permute.xlu0 %10900  ;;  %7551 = vmatprep.subr.bf16.mxu0 %v7512_v50 }
0x1797   :  { %v15004_v28 = vunpack.i.h.bf16 %v14135_v1  ;;  %v10902_v31 = vunpack.i.l.bf16 %v14135_v1  ;;  %7552 = vmatpush1.bf16.msra.mxu0 %v7511_v9  ;;  %v7275_v51 = vsel %vm15181_vm9, %v7266_v19, %v10897_v13  ;;  %v7276_v42 = vsel %vm15182_vm13, %v10897_v13, %v15003_v43  ;;  %vm15187_vm9 = vmmov %vm15186_vm15 }
0x1798   :  { %v7385_v26 = vpop.permute.xlu1 %7384  ;;  %vm15213_vm13 = vcmask 269312  }
0x1799   :  { %v7312_v8 = vsel %vm212_vm5, %v7303_v0, %v10902_v31  ;;  %v7313_v59 = vsel %vm212_vm5, %v10902_v31, %v15004_v28 }
0x179a   :  { %v7515_v38 = vpack.c.bf16 %v7312_v8, %v7275_v51  ;;  %v14147_v3 = vpop.permute.xlu0 %10905  ;;  %v7516_v17 = vpack.c.bf16 %v7313_v59, %v7276_v42 }
0x179b   :  { %v15000_v0 = vunpack.i.h.bf16 %v14147_v3  ;;  %v10907_v62 = vunpack.i.l.bf16 %v14147_v3 }
0x179c   :  { %7553 = vmatprep.subr.bf16.mxu0 %v7516_v17  ;;  %v14149_v40 = vpop.permute.xlu1 %10910 }
0x179d   :  { %v15002_v44 = vunpack.i.h.bf16 %v14149_v40  ;;  %v10912_v19 = vunpack.i.l.bf16 %v14149_v40  ;;  %7554 = vmatpush1.bf16.msra.mxu0 %v7515_v38 }
0x179e   :  { %v7417_v34 = vpop.permute.xlu0 %7416 }
0x179f   :  { %v7357_v2 = vsel %vm231_vm7, %v7348_v24, %v10912_v19  ;;  %v7358_v6 = vsel %vm231_vm7, %v10912_v19, %v15002_v44  ;;  %v7426_v51 = vsel %vm15176_vm2, %v7417_v34, %v10907_v62  ;;  %v14183_v34 = vld [vmem:[%s14890_s4 + $0x2c0] sm:$0xf]  ;;  %vm15214_vm2 = vmmov %vm15213_vm13 }
0x17a0   :  { %v7519_v4 = vpack.c.bf16 %v7357_v2, %v14052_v27  ;;  %v14160_v9 = vpop.permute.xlu1 %10915  ;;  %v7520_v50 = vpack.c.bf16 %v7358_v6, %v14054_v41  ;;  %v7427_v27 = vsel %vm15185_vm3, %v10907_v62, %v15000_v0  ;;  %vm15221_vm3 = vcmask 793600  }
0x17a1   :  { %v15001_v13 = vunpack.i.h.bf16 %v14160_v9  ;;  %v10917_v31 = vunpack.i.l.bf16 %v14160_v9 }
0x17a2   :  { %7555 = vmatprep.subr.bf16.mxu0 %v7520_v50  ;;  %v14173_v19 = vpop.permute.xlu0 %7457 }
0x17a3   :  { %v7394_v24 = vsel %vm15183_vm14, %v7385_v26, %v10917_v31  ;;  %7556 = vmatpush1.bf16.msra.mxu0 %v7519_v4  ;;  %v7395_v8 = vsel %vm15184_vm8, %v10917_v31, %v15001_v13  ;;  %vm15217_vm14 = vcmask 252928  }
0x17a4   :  { %v7523_v42 = vpack.c.bf16 %v7426_v51, %v7394_v24  ;;  %v10921_v41 = vpop.permute.xlu1 %10920  ;;  %v7524_v59 = vpack.c.bf16 %v7427_v27, %v7395_v8  ;;  %vm15218_vm8 = vmmov %vm15217_vm14 }
0x17a5   :  { %v10923_v38 = vunpack.i.h.bf16 %v10921_v41  ;;  %v10922_v17 = vunpack.i.l.bf16 %v10921_v41 }
0x17a6   :  { %7557 = vmatprep.subr.bf16.mxu0 %v7524_v59 }
0x17a7   :  { %v7464_v26 = vsel %vm15186_vm15, %v10923_v38, %v14173_v19  ;;  %7558 = vmatpush1.bf16.msra.mxu0 %v7523_v42  ;;  %v7463_v2 = vsel %vm15187_vm9, %v10922_v17, %v10923_v38  ;;  %v7697_v17 = vmul.f32 %v13750_v46, %v11544_v16  ;;  %vm15222_vm15 = vmmov %vm15187_vm9 }
0x17a8   :  { %v7528_v6 = vpack.c.bf16 %v7464_v26, %v7464_v26  ;;  %v7527_v4 = vpack.c.bf16 %v7463_v2, %v7463_v2  ;;  %vm15223_vm9 = vmmov %vm15221_vm3 }
0x17aa   :  { %9484 = vmatprep.subr.msk.bf16.mxu0 %vm304_vm11, %v7528_v6  ;;  %v7540_v62 = vsel %vm304_vm11, %v7527_v4, 0  ;;  %v7734_v4 = vmul.f32 %v13750_v46, %v11546_v18 }
0x17ab   :  { %7560 = vmatpush1.bf16.msra.mxu0 %v7540_v62 }
0x17ac   :  { %10087 = vmatprep.subr.bf16.mxu0 %v13750_v46 }
0x17ae   :  { %9485 = vmatmul.mubr.msk.bf16.vlgmr.msra.gmra.mrb[92].mxu0 %vm300_vm12, %v14183_v34 }
0x17af   :  { %10088 = vmatpush3.bf16.msra.mxu0 %v13594_v61  ;;  %10089 = vmatprep.mubr.msk.bf16.mxu0 %vm11442_vm0, %v13750_v46 }
0x17b0   :  { %10093 = vmatprep.subr.bf16.mxu0 %v13750_v46 }
0x17b5   :  { %v7646_v8 = vpop.permute.xlu1 %7645 }
0x17b6   :  { %10090 = vmatmul.mubr.msk.bf16.vlgmr.msra.gmra.mrb[96].mxu0 %vm79_vm1, %v14110_v7 }
0x17b7   :  { %10103 = vmatprep.mubr.msk.bf16.mxu0 %vm11442_vm0, %v13750_v46 }
0x1881   :  { %v14196_v50 = vpop.f32.mrb[92].mxu0 }
0x1882   :  { %v14198_v31 = vpop.f32.mrb[93].mxu0 }
0x1883   :  { %v7589_v51 = vpop.f32.mrb[94].mxu0 }
0x1884   :  { %v7590_v24 = vpop.f32.mrb[95].mxu0 }
0x1885   :  { %v7721_v24 = vmul.f32 %v13750_v46, %v11542_v15 }
0x1889   :  { %v7685_v27 = vpop.f32.mrb[96].mxu0 }
0x188a   :  { %v7686_v61 = vadd.f32 %v7685_v27, %v7646_v8  ;;  %v10091_v42 = vpop.f32.mrb[97].mxu0  ;;  %v7761_v8 = vld [vmem:[#allocation2 + $0x10] sm:$0xff]  ;;  %v7167_v27 = vadd.f32 %v14075_v10, %v14048_v48 }
0x188b   :  { %v7688_v41 = vpop.f32.mrb[98].mxu0 }
0x188c   :  { %v14200_v59 = vmax.f32 %v7686_v61, 0.0  ;;  %v10092_v38 = vpop.f32.mrb[99].mxu0 }
0x188e   :  { %v10925_v7 = vpack.i.bf16 %v14200_v59, %v13750_v46  ;;  %v7698_v26 = vmul.f32 %v14200_v59, %v11544_v16  ;;  %v7735_v2 = vmul.f32 %v14200_v59, %v11546_v18  ;;  %v7722_v62 = vmul.f32 %v14200_v59, %v11542_v15  ;;  %v15188_v46 = vld [vmem:[#allocation11_spill] sm:$0xff] }
0x188f   :  { %v7762_v16 = vmul.f32 %v14200_v59, %v11560_v30  ;;  %v7763_v18 = vmul.f32 %v7761_v8, %v11560_v30  ;;  %v7749_v42 = vmul.f32 %v14200_v59, %v11551_v25  ;;  %v7750_v15 = vmul.f32 %v7761_v8, %v11551_v25 }
0x1890   :  { %10926 = vrot.lane.b32.xlu1 %v10925_v7, %s11450_s30  ;;  %v10930_v6 = vpack.i.bf16 %v7698_v26, %v7697_v17  ;;  %v10940_v51 = vpack.i.bf16 %v7735_v2, %v7734_v4  ;;  %v10935_v61 = vpack.i.bf16 %v7722_v62, %v7721_v24  ;;  %v7786_v38 = vmul.f32 %v14200_v59, %v15188_v46  ;;  %v15189_v26 = vld [vmem:[#allocation27_spill] sm:$0xff]  ;;  %v15190_v2 = vld [vmem:[#allocation26_spill] sm:$0xff]  ;;  %v15191_v62 = vld [vmem:[#allocation33_spill] sm:$0xff] }
0x1891   :  { %v10955_v41 = vpack.i.bf16 %v7763_v18, %v7762_v16  ;;  %v14230_v7 = vmax.f32 %v7167_v27, 0.0  ;;  %v10945_v48 = vpack.i.bf16 %v7750_v15, %v7749_v42  ;;  %v7787_v10 = vmul.f32 %v7761_v8, %v15188_v46  ;;  %v15192_v24 = vld [vmem:[#allocation32_spill] sm:$0xff]  ;;  %v15193_v27 = vld [vmem:[#allocation29_spill] sm:$0xff] }
0x1892   :  { %10931 = vrot.lane.b32.xlu0 %v10930_v6, %s11449_s29  ;;  %v10950_v17 = vpack.i.bf16 %v7761_v8, %v14200_v59  ;;  %v7189_v25 = vmul.f32 %v14078_v47, %v15189_v26  ;;  %v15194_v18 = vld [vmem:[#allocation28_spill] sm:$0xff] }
0x1893   :  { %v10960_v30 = vpack.i.bf16 %v7787_v10, %v7786_v38  ;;  %v7190_v6 = vmul.f32 %v14230_v7, %v15190_v2  ;;  %v10970_v4 = vpack.i.bf16 %v14230_v7, %v14078_v47  ;;  %v7296_v16 = vmul.f32 %v14230_v7, %v15192_v24  ;;  %v15195_v15 = vld [vmem:[#allocation36_spill] sm:$0xff] }
0x1894   :  { %10941 = vrot.lane.b32.xlu1 %v10940_v51, %s11447_s27  ;;  %v7295_v51 = vmul.f32 %v14078_v47, %v15191_v62  ;;  %v7259_v42 = vmul.f32 %v14230_v7, %v15194_v18  ;;  %v7377_v46 = vmul.f32 %v14230_v7, %v15195_v15 }
0x1895   :  { %v10965_v8 = vpack.i.bf16 %v7190_v6, %v7189_v25  ;;  %v15198_v25 = vld [vmem:[#allocation37_spill] sm:$0xff] }
0x1896   :  { %10936 = vrot.lane.b32.xlu0 %v10935_v61, %s11448_s28  ;;  %v7258_v61 = vmul.f32 %v14078_v47, %v15193_v27  ;;  %v7446_v6 = vmul.f32 %v14230_v7, %v15198_v25 }
0x1898   :  { %10956 = vrot.lane.b32.xlu1 %v10955_v41, %s11444_s24  ;;  %v10980_v41 = vpack.i.bf16 %v7296_v16, %v7295_v51  ;;  %v10975_v38 = vpack.i.bf16 %v7259_v42, %v7258_v61  ;;  %v15200_v16 = vld [vmem:[#allocation16_spill] sm:$0xff]  ;;  %v15201_v42 = vld [vmem:[#allocation19_spill] sm:$0xff] }
0x1899   :  { %v14270_v61 = vld [vmem:[%s14890_s4 + $0x300] sm:$0xf] }
0x189a   :  { %10946 = vrot.lane.b32.xlu0 %v10945_v48, %s11446_s26  ;;  %v15196_v48 = vld [vmem:[#allocation31_spill] sm:$0xff] }
0x189b   :  { %v7340_v10 = vmul.f32 %v14230_v7, %v15196_v48 }
0x189c   :  { %10961 = vrot.lane.b32.xlu1 %v10960_v30, %s11445_s25  ;;  %v15197_v30 = vld [vmem:[#allocation15_spill] sm:$0xff] }
0x189e   :  { %10951 = vrot.lane.b32.xlu0 %v10950_v17, %s11451_s10  ;;  %v10990_v17 = vpack.i.bf16 %v15197_v30, %v7377_v46  ;;  %v7176_v46 = vunpack.c.l.bf16 %v14183_v34  ;;  %v15202_v30 = vld [vmem:[#allocation12_spill] sm:$0xff] }
0x18a0   :  { %10971 = vrot.lane.b32.xlu1 %v10970_v4, %s11458_s8  ;;  %v15199_v4 = vld [vmem:[#allocation20_spill] sm:$0xff] }
0x18a1   :  { %v10985_v51 = vpack.i.bf16 %v15199_v4, %v7340_v10  ;;  %v14278_v10 = vld [vmem:[#allocation2] sm:$0xff]  ;;  %v15205_v4 = vld [vmem:[#allocation39_spill] sm:$0xff] }
0x18a2   :  { %10966 = vrot.lane.b32.xlu0 %v10965_v8, %s15062_s22  ;;  %v11000_v8 = vpack.i.bf16 %v15200_v16, %v7446_v6  ;;  %v15204_v6 = vmov 32  }
0x18a4   :  { %10981 = vrot.lane.b32.xlu1 %v10980_v41, %s11447_s27  ;;  %v10995_v41 = vpack.i.bf16 %v15201_v42, %v14230_v7 }
0x18a6   :  { %10976 = vrot.lane.b32.xlu0 %v10975_v38, %s15063_s23  ;;  %v7693_v38 = vunpack.c.l.bf16 %v14270_v61 }
0x18a8   :  { %10991 = vrot.lane.b32.xlu1 %v10990_v17, %s15072_s1  ;;  %v14284_v17 = vmul.f32 %v14278_v10, %v15202_v30 }
0x18aa   :  { %10986 = vrot.lane.b32.xlu0 %v10985_v51, %s11446_s26  ;;  %15203 = vst [vmem:[#allocation17_spill] sm:$0xff] %v14284_v17  ;;  %v15206_v51 = vld [vmem:[#allocation13_spill] sm:$0xff] }
0x18ab   :  { %v14293_v16 = vmul.f32 %v14278_v10, %v15206_v51 }
0x18ac   :  { %11001 = vrot.lane.b32.xlu1 %v11000_v8, %s15075_s12 }
0x18ad   :  { %15207 = vst [vmem:[#allocation21_spill] sm:$0xff] %v14293_v16 }
0x18ae   :  { %10996 = vrot.lane.b32.xlu0 %v10995_v41, %s11460_s20 }
0x18b0   :  { %7533 = vperm.xlu1 %11005, %v7176_v46  }
0x18b2   :  { %7813 = vperm.xlu0 %10762, %v7693_v38  }
0x18b4   :  { %8195 = vrot.lane.b32.xlu1 %v14278_v10, %s11458_s8 }
0x18b6   :  { %8163 = vrot.lane.b32.xlu0 %v14284_v17, %s15062_s22 }
0x18b7   :  { %11086 = vset.pattern.permute.xlu0 %v15204_v6 }
0x18b8   :  { %8269 = vrot.lane.b32.xlu1 %v15205_v4, %s11447_s27 }
0x18ba   :  { %8232 = vrot.lane.b32.xlu0 %v14293_v16, %s15063_s23 }
0x1902   :  { %v10927_v8 = vpop.permute.xlu1 %10926 }
0x1903   :  { %v10929_v42 = vunpack.i.h.bf16 %v10927_v8  ;;  %v10928_v41 = vunpack.i.l.bf16 %v10927_v8 }
0x1904   :  { %v10932_v46 = vpop.permute.xlu0 %10931 }
0x1905   :  { %v10934_v38 = vunpack.i.h.bf16 %v10932_v46  ;;  %v10933_v30 = vunpack.i.l.bf16 %v10932_v46  ;;  %v7716_v13 = vsel %vm79_vm1, %v10928_v41, %v10929_v42  ;;  %vm15208_vm1 = vcmask 908288  }
0x1906   :  { %v10942_v0 = vpop.permute.xlu1 %10941 }
0x1907   :  { %v7705_v6 = vsel %vm22_vm4, %v10933_v30, %v10934_v38  ;;  %v10944_v44 = vunpack.i.h.bf16 %v10942_v0  ;;  %v10943_v4 = vunpack.i.l.bf16 %v10942_v0  ;;  %vm15209_vm4 = vcmask 924672  }
0x1908   :  { %v7806_v43 = vpack.c.bf16 %v7716_v13, %v7705_v6  ;;  %v10937_v28 = vpop.permute.xlu0 %10936 }
0x1909   :  { %v10939_v51 = vunpack.i.h.bf16 %v10937_v28  ;;  %v10938_v12 = vunpack.i.l.bf16 %v10937_v28  ;;  %v7742_v16 = vsel %vm212_vm5, %v10943_v4, %v10944_v44 }
0x190a   :  { %v10957_v33 = vpop.permute.xlu1 %10956  ;;  %10094 = vmatpush3.bf16.msra.mxu0 %v7806_v43 }
0x190b   :  { %v7729_v8 = vsel %vm195_vm6, %v10938_v12, %v10939_v51  ;;  %10095 = vmatprep.subr.bf16.mxu0 %v14278_v10  ;;  %v10959_v41 = vunpack.i.h.bf16 %v10957_v33  ;;  %v10958_v0 = vunpack.i.l.bf16 %v10957_v33  ;;  %vm15210_vm6 = vcmask 916480  }
0x190c   :  { %v7807_v46 = vpack.c.bf16 %v7742_v16, %v7729_v8  ;;  %v10947_v37 = vpop.permute.xlu0 %10946 }
0x190d   :  { %v10949_v17 = vunpack.i.h.bf16 %v10947_v37  ;;  %v10948_v42 = vunpack.i.l.bf16 %v10947_v37  ;;  %v7770_v37 = vsel %vm15209_vm4, %v10958_v0, %v10959_v41  ;;  %v15212_v41 = vunpack.i.h.bf16 %v14119_v52 }
0x190e   :  { %v10962_v38 = vpop.permute.xlu1 %10961  ;;  %10096 = vmatpush3.bf16.msra.mxu0 %v7807_v46  ;;  %v15215_v52 = vunpack.i.h.bf16 %v14135_v1  ;;  %v11354_v1 = vld [vmem:[%s14890_s4 + $0x3ac] ss:$16 sps:$4 sm:$0xff]  }
0x190f   :  { %v7757_v13 = vsel %vm231_vm7, %v10948_v42, %v10949_v17  ;;  %v10964_v30 = vunpack.i.h.bf16 %v10962_v38  ;;  %v10963_v28 = vunpack.i.l.bf16 %v10962_v38  ;;  %10097 = vmatprep.subr.bf16.mxu0 %v14278_v10 }
0x1910   :  { %v7808_v43 = vpack.c.bf16 %v7757_v13, %v14200_v59  ;;  %v10952_v44 = vpop.permute.xlu0 %10951  ;;  %v15211_v13 = vunpack.i.h.bf16 %v14115_v45  ;;  %v11348_v45 = vld [vmem:[%s14890_s4 + $0x38c] ss:$16 sps:$4 sm:$0xff]  }
0x1911   :  { %v10954_v12 = vunpack.i.h.bf16 %v10952_v44  ;;  %v10953_v6 = vunpack.i.l.bf16 %v10952_v44  ;;  %v7794_v4 = vsel %vm15208_vm1, %v10963_v28, %v10964_v30  ;;  %vm15225_vm1 = vcmask 785408  }
0x1912   :  { %10098 = vmatpush3.bf16.msra.mxu0 %v7808_v43  ;;  %v10972_v16 = vpop.permute.xlu1 %10971  ;;  %v7810_v59 = vpack.c.bf16 %v7794_v4, %v7794_v4  ;;  %vm15226_vm4 = vmmov %vm15225_vm1 }
0x1913   :  { %v7781_v51 = vsel %vm15210_vm6, %v10953_v6, %v10954_v12  ;;  %v10974_v33 = vunpack.i.h.bf16 %v10972_v16  ;;  %v10973_v8 = vunpack.i.l.bf16 %v10972_v16  ;;  %10099 = vmatprep.subr.bf16.mxu0 %v14278_v10  ;;  %vm15227_vm6 = vmmov %vm15222_vm15 }
0x1914   :  { %v7809_v17 = vpack.c.bf16 %v7781_v51, %v7770_v37  ;;  %v10967_v46 = vpop.permute.xlu0 %10966 }
0x1915   :  { %v10969_v42 = vunpack.i.h.bf16 %v10967_v46  ;;  %v10968_v38 = vunpack.i.l.bf16 %v10967_v46  ;;  %v7240_v43 = vsel %vm787_vm10, %v15211_v13, %v10973_v8  ;;  %v7241_v30 = vsel %vm787_vm10, %v10973_v8, %v10974_v33 }
0x1916   :  { %10100 = vmatpush3.bf16.msra.mxu0 %v7809_v17  ;;  %v10982_v44 = vpop.permute.xlu1 %10981  ;;  %v7820_v33 = vsel %vm304_vm11, %v7810_v59, 0 }
0x1917   :  { %v7208_v0 = vsel %vm15213_vm13, %v15212_v41, %v10968_v38  ;;  %v10984_v28 = vunpack.i.h.bf16 %v10982_v44  ;;  %v10983_v12 = vunpack.i.l.bf16 %v10982_v44  ;;  %10101 = vmatprep.subr.bf16.mxu0 %v14278_v10  ;;  %v7209_v6 = vsel %vm15214_vm2, %v10968_v38, %v10969_v42  ;;  %v11346_v42 = vld [vmem:[%s14890_s4 + $0x388] ss:$16 sps:$4 sm:$0xff]   ;;  %vm15235_vm13 = vmmov %vm15214_vm2 }
0x1918   :  { %v7513_v16 = vpack.c.bf16 %v7240_v43, %v7208_v0  ;;  %v10977_v4 = vpop.permute.xlu0 %10976  ;;  %v7514_v37 = vpack.c.bf16 %v7241_v30, %v7209_v6  ;;  %v15216_v38 = vunpack.i.h.bf16 %v14131_v20 }
0x1919   :  { %v10979_v51 = vunpack.i.h.bf16 %v10977_v4  ;;  %v10978_v17 = vunpack.i.l.bf16 %v10977_v4  ;;  %v7314_v8 = vsel %vm212_vm5, %v15215_v52, %v10983_v12  ;;  %v7315_v59 = vsel %vm212_vm5, %v10983_v12, %v10984_v28  ;;  %v11352_v28 = vld [vmem:[%s14890_s4 + $0x3a8] ss:$16 sps:$4 sm:$0xff]  }
0x191a   :  { %10102 = vmatpush3.bf16.msra.mxu0 %v7820_v33  ;;  %v10992_v46 = vpop.permute.xlu1 %10991  ;;  %7592 = vmatprep.subr.bf16.mxu1 %v7514_v37  ;;  %v15219_v12 = vunpack.i.h.bf16 %v14149_v40 }
0x191b   :  { %v7277_v13 = vsel %vm15217_vm14, %v15216_v38, %v10978_v17  ;;  %7593 = vmatpush1.bf16.msra.mxu1 %v7513_v16  ;;  %v7278_v43 = vsel %vm15218_vm8, %v10978_v17, %v10979_v51  ;;  %8097 = vmatprep.subr.bf16.mxu0 %v11348_v45  ;;  %v10994_v20 = vunpack.i.h.bf16 %v10992_v46  ;;  %v10993_v4 = vunpack.i.l.bf16 %v10992_v46  ;;  %vm15236_vm14 = vmmov %vm15218_vm8 }
0x191c   :  { %v7517_v44 = vpack.c.bf16 %v7314_v8, %v7277_v13  ;;  %v10987_v30 = vpop.permute.xlu0 %10986  ;;  %v7518_v41 = vpack.c.bf16 %v7315_v59, %v7278_v43 }
0x191d   :  { %v10989_v0 = vunpack.i.h.bf16 %v10987_v30  ;;  %v10988_v6 = vunpack.i.l.bf16 %v10987_v30  ;;  %10104 = vmatmul.mubr.msk.bf16.vlgmr.msra.gmra.mrb[100].mxu0 %vm300_vm12, %v14270_v61  ;;  %v11360_v61 = vld [vmem:[%s14890_s4 + $0x3cc] ss:$16 sps:$4 sm:$0xff]   ;;  %v7397_v43 = vsel %vm15223_vm9, %v10993_v4, %v10994_v20  ;;  %v11345_v20 = vld [vmem:[%s14890_s4 + $0x384] ss:$16 sps:$4 sm:$0xff]  }
0x191e   :  { %v11002_v16 = vpop.permute.xlu1 %11001  ;;  %7594 = vmatprep.subr.bf16.mxu1 %v7518_v41  ;;  %8098 = vmatpush1.bf16.msra.mxu0 %v11346_v42  ;;  %v15220_v42 = vunpack.i.h.bf16 %v14160_v9 }
0x191f   :  { %v7359_v45 = vsel %vm231_vm7, %v15219_v12, %v10988_v6  ;;  %v11004_v37 = vunpack.i.h.bf16 %v11002_v16  ;;  %v11003_v51 = vunpack.i.l.bf16 %v11002_v16  ;;  %7595 = vmatpush1.bf16.msra.mxu1 %v7517_v44  ;;  %v7360_v17 = vsel %vm231_vm7, %v10988_v6, %v10989_v0  ;;  %8099 = vmatprep.subr.bf16.mxu0 %v11354_v1  ;;  %v11366_v44 = vld [vmem:[%s14890_s4 + $0x3ec] ss:$16 sps:$4 sm:$0xff]   ;;  %v11370_v16 = vld [vmem:[%s14890_s4 + $0x408] ss:$16 sps:$4 sm:$0xff]  }
0x1920   :  { %v7521_v33 = vpack.c.bf16 %v7359_v45, %v14078_v47  ;;  %v10997_v52 = vpop.permute.xlu0 %10996  ;;  %v7522_v8 = vpack.c.bf16 %v7360_v17, %v14230_v7  ;;  %8129 = vmatprep.mubr.bf16.mxu0 %v15048_v22  ;;  %v7396_v38 = vsel %vm15221_vm3, %v15220_v42, %v10993_v4  ;;  %v11358_v47 = vld [vmem:[%s14890_s4 + $0x3c8] ss:$16 sps:$4 sm:$0xff]   ;;  %v15224_v7 = vunpack.i.h.bf16 %v14147_v3  ;;  %v11378_v12 = vld [vmem:[%s14890_s4 + $0x42c] ss:$16 sps:$4 sm:$0xff]   ;;  %v11351_v45 = vld [vmem:[%s14890_s4 + $0x3a4] ss:$16 sps:$4 sm:$0xff]  }
0x1921   :  { %v10999_v40 = vunpack.i.h.bf16 %v10997_v52  ;;  %v10998_v46 = vunpack.i.l.bf16 %v10997_v52  ;;  %v7466_v13 = vsel %vm15222_vm15, %v11003_v51, %v11004_v37  ;;  %v7465_v9 = vsel %vm15227_vm6, %v14173_v19, %v11003_v51  ;;  %v11364_v3 = vld [vmem:[%s14890_s4 + $0x3e8] ss:$16 sps:$4 sm:$0xff]   ;;  %v11372_v19 = vld [vmem:[%s14890_s4 + $0x40c] ss:$16 sps:$4 sm:$0xff]   ;;  %v11349_v51 = vld [vmem:[%s14890_s4 + $0x3a0] ss:$16 sps:$4 sm:$0xff]  }
0x1922   :  { %7596 = vmatprep.subr.bf16.mxu1 %v7522_v8  ;;  %8100 = vmatpush1.bf16.msra.mxu0 %v11352_v28  ;;  %v7530_v0 = vpack.c.bf16 %v7466_v13, %v7466_v13  ;;  %v7529_v6 = vpack.c.bf16 %v7465_v9, %v7465_v9  ;;  %v11343_v28 = vld [vmem:[%s14890_s4 + $0x380] ss:$16 sps:$4 sm:$0xff]   ;;  %v11376_v37 = vld [vmem:[%s14890_s4 + $0x428] ss:$16 sps:$4 sm:$0xff]   ;;  %v11384_v17 = vld [vmem:[%s14890_s4 + $0x44c] ss:$16 sps:$4 sm:$0xff]  }
0x1923   :  { %v7428_v59 = vsel %vm15225_vm1, %v15224_v7, %v10998_v46  ;;  %7597 = vmatpush1.bf16.msra.mxu1 %v7521_v33  ;;  %v7429_v1 = vsel %vm15226_vm4, %v10998_v46, %v10999_v40  ;;  %8101 = vmatprep.subr.bf16.mxu0 %v11360_v61  ;;  %v11382_v61 = vld [vmem:[%s14890_s4 + $0x448] ss:$16 sps:$4 sm:$0xff]   ;;  %v11355_v33 = vld [vmem:[%s14890_s4 + $0x3c0] ss:$16 sps:$4 sm:$0xff]   ;;  %v11363_v52 = vld [vmem:[%s14890_s4 + $0x3e4] ss:$16 sps:$4 sm:$0xff]  }
0x1924   :  { %v7525_v30 = vpack.c.bf16 %v7428_v59, %v7396_v38  ;;  %v7526_v41 = vpack.c.bf16 %v7429_v1, %v7397_v43  ;;  %v7546_v4 = vsel %vm304_vm11, %v7529_v6, 0  ;;  %v11361_v8 = vld [vmem:[%s14890_s4 + $0x3e0] ss:$16 sps:$4 sm:$0xff]   ;;  %v11369_v40 = vld [vmem:[%s14890_s4 + $0x404] ss:$16 sps:$4 sm:$0xff]   ;;  %vm15237_vm3 = vmmov %vm15225_vm1 }
0x1925   :  { %v11367_v46 = vld [vmem:[%s14890_s4 + $0x400] ss:$16 sps:$4 sm:$0xff]   ;;  %v11375_v42 = vld [vmem:[%s14890_s4 + $0x424] ss:$16 sps:$4 sm:$0xff]   ;;  %v11388_v59 = vld [vmem:[%s14890_s4 + $0x468] ss:$16 sps:$4 sm:$0xff]  }
0x1926   :  { %7598 = vmatprep.subr.bf16.mxu1 %v7526_v41  ;;  %8102 = vmatpush1.bf16.msra.mxu0 %v11358_v47  ;;  %v11373_v38 = vld [vmem:[%s14890_s4 + $0x420] ss:$16 sps:$4 sm:$0xff]   ;;  %v11381_v13 = vld [vmem:[%s14890_s4 + $0x444] ss:$16 sps:$4 sm:$0xff]   ;;  %v11390_v1 = vld [vmem:[%s14890_s4 + $0x46c] ss:$16 sps:$4 sm:$0xff]  }
0x1927   :  { %7599 = vmatpush1.bf16.msra.mxu1 %v7525_v30  ;;  %8103 = vmatprep.subr.bf16.mxu0 %v11366_v44  ;;  %v11379_v43 = vld [vmem:[%s14890_s4 + $0x440] ss:$16 sps:$4 sm:$0xff]   ;;  %v11387_v7 = vld [vmem:[%s14890_s4 + $0x464] ss:$16 sps:$4 sm:$0xff]   ;;  %vm15238_vm15 = vmmov %vm15223_vm9 }
0x1928   :  { %9486 = vmatprep.subr.msk.bf16.mxu1 %vm304_vm11, %v7530_v0  ;;  %v11385_v47 = vld [vmem:[%s14890_s4 + $0x460] ss:$16 sps:$4 sm:$0xff]   ;;  %vm15239_vm4 = vmmov %vm15227_vm6 }
0x1929   :  { %vm15240_vm6 = vmmov %vm15239_vm4 }
0x192a   :  { %8104 = vmatpush1.bf16.msra.mxu0 %v11364_v3 }
0x192b   :  { %7601 = vmatpush1.bf16.msra.mxu1 %v7546_v4  ;;  %8105 = vmatprep.subr.bf16.mxu0 %v11372_v19 }
0x192c   :  { %8056 = vmatprep.subr.bf16.mxu1 %v11345_v20 }
0x192e   :  { %9487 = vmatmul.mubr.msk.bf16.vlgmr.msra.gmra.mrb[96].mxu1 %vm300_vm12, %v14183_v34  ;;  %8106 = vmatpush1.bf16.msra.mxu0 %v11370_v16  ;;  %v11357_v34 = vld [vmem:[%s14890_s4 + $0x3c4] ss:$16 sps:$4 sm:$0xff]  }
0x192f   :  { %8057 = vmatpush1.bf16.msra.mxu1 %v11343_v28  ;;  %8107 = vmatprep.subr.bf16.mxu0 %v11378_v12  ;;  %v7534_v12 = vpop.permute.xlu1 %7533 }
0x1930   :  { %8058 = vmatprep.subr.bf16.mxu1 %v11351_v45  ;;  %8088 = vmatprep.mubr.bf16.mxu1 %v15048_v22 }
0x1931   :  { %v7814_v9 = vpop.permute.xlu0 %7813 }
0x1932   :  { %8108 = vmatpush1.bf16.msra.mxu0 %v11376_v37  ;;  %v7586_v37 = vadd.f32 %v14196_v50, %v7534_v12 }
0x1933   :  { %8059 = vmatpush1.bf16.msra.mxu1 %v11349_v51  ;;  %8109 = vmatprep.subr.bf16.mxu0 %v11384_v17  ;;  %v7588_v17 = vadd.f32 %v14198_v31, %v7534_v12 }
0x1934   :  { %8060 = vmatprep.subr.bf16.mxu1 %v11357_v34 }
0x1936   :  { %8110 = vmatpush1.bf16.msra.mxu0 %v11382_v61  ;;  %v7633_v61 = vmax.f32 %v7586_v37, 0.0 }
0x1937   :  { %8061 = vmatpush1.bf16.msra.mxu1 %v11355_v33  ;;  %8111 = vmatprep.subr.bf16.mxu0 %v11390_v1 }
0x1938   :  { %8062 = vmatprep.subr.bf16.mxu1 %v11363_v52  ;;  %v7634_v52 = vmax.f32 %v7588_v17, 0.0 }
0x193a   :  { %8112 = vmatpush1.bf16.msra.mxu0 %v11388_v59 }
0x193b   :  { %8063 = vmatpush1.bf16.msra.mxu1 %v11361_v8  ;;  %v7637_v8 = vadd.f32 %v7633_v61, %v13832_v36 }
0x193c   :  { %8064 = vmatprep.subr.bf16.mxu1 %v11369_v40 }
0x193f   :  { %8065 = vmatpush1.bf16.msra.mxu1 %v11367_v46 }
0x1940   :  { %8066 = vmatprep.subr.bf16.mxu1 %v11375_v42 }
0x1943   :  { %8067 = vmatpush1.bf16.msra.mxu1 %v11373_v38  ;;  %v7638_v38 = vadd.f32 %v7634_v52, %v13836_v53 }
0x1944   :  { %8068 = vmatprep.subr.bf16.mxu1 %v11381_v13 }
0x1947   :  { %8069 = vmatpush1.bf16.msra.mxu1 %v11379_v43 }
0x1948   :  { %8070 = vmatprep.subr.bf16.mxu1 %v11387_v7 }
0x194b   :  { %8071 = vmatpush1.bf16.msra.mxu1 %v11385_v47 }
0x19f0   :  { %v7856_v44 = vpop.f32.mrb[100].mxu0 }
0x19f1   :  { %v7857_v30 = vadd.f32 %v7856_v44, %v7814_v9  ;;  %v10105_v41 = vpop.f32.mrb[101].mxu0 }
0x19f2   :  { %v7859_v0 = vpop.f32.mrb[102].mxu0 }
0x19f3   :  { %v7862_v6 = vmax.f32 %v7857_v30, 0.0  ;;  %v10106_v3 = vpop.f32.mrb[103].mxu0 }
0x19f5   :  { %v7895_v19 = vpack.c.bf16 %v7862_v6, %v7862_v6 }
0x19f7   :  { %8089 = vmatmul.mubr.bf16.vlgmr.msra.gmra.mrb[100].mxu1 %v7895_v19  ;;  %8130 = vmatmul.mubr.bf16.vlgmr.msra.gmra.mrb[104].mxu0 %v7895_v19 }
0x19f8   :  { %8550 = vmatprep.mubr.bf16.mxu1 %v15048_v22  ;;  %8591 = vmatprep.mubr.bf16.mxu0 %v15048_v22 }
0x1a01   :  { %v7626_v20 = vpop.f32.mrb[96].mxu1 }
0x1a02   :  { %v7628_v4 = vpop.f32.mrb[97].mxu1  ;;  %v7627_v45 = vadd.f32 %v7626_v20, %v7534_v12 }
0x1a03   :  { %v7630_v16 = vpop.f32.mrb[98].mxu1  ;;  %v7629_v51 = vadd.f32 %v7628_v4, %v7534_v12 }
0x1a04   :  { %v7631_v28 = vpop.f32.mrb[99].mxu1  ;;  %v7635_v34 = vmax.f32 %v7627_v45, 0.0 }
0x1a05   :  { %v7636_v33 = vmax.f32 %v7629_v51, 0.0 }
0x1a06   :  { %v7639_v40 = vadd.f32 %v7635_v34, %v13834_v56 }
0x1a07   :  { %v7640_v13 = vadd.f32 %v7636_v33, %v13838_v58 }
0x1aca   :  { %v8090_v46 = vpop.f32.mrb[100].mxu1  ;;  %v8131_v42 = vpop.f32.mrb[104].mxu0 }
0x1acb   :  { %v14456_v43 = vadd.f32 %v8090_v46, %v7637_v8  ;;  %v14458_v50 = vadd.f32 %v8131_v42, %v7639_v40  ;;  %v8092_v47 = vpop.f32.mrb[101].mxu1  ;;  %v8133_v31 = vpop.f32.mrb[105].mxu0 }
0x1acc   :  { %v14460_v7 = vadd.f32 %v8092_v47, %v7638_v38  ;;  %v14462_v59 = vadd.f32 %v8133_v31, %v7640_v13  ;;  %v8094_v1 = vpop.f32.mrb[102].mxu1  ;;  %v8135_v36 = vpop.f32.mrb[106].mxu0 }
0x1acd   :  { %v8095_v9 = vpop.f32.mrb[103].mxu1  ;;  %v8136_v56 = vpop.f32.mrb[107].mxu0  ;;  %v8154_v44 = vmul.f32 %v14456_v43, %v11777_v5  ;;  %v8223_v41 = vmul.f32 %v14456_v43, %v11795_v21  ;;  %v8304_v6 = vmul.f32 %v15136_v29, %v14456_v43  ;;  %v8260_v3 = vmul.f32 %v14456_v43, %v15137_v39 }
0x1ace   :  { %v11006_v53 = vpack.i.bf16 %v14460_v7, %v14456_v43  ;;  %v8155_v58 = vmul.f32 %v14460_v7, %v11783_v11  ;;  %v8224_v0 = vmul.f32 %v14460_v7, %v11799_v23  ;;  %v8261_v19 = vmul.f32 %v14460_v7, %v15138_v35  ;;  %v14529_v56 = vld [vmem:[#allocation3 + $0x28] sm:$0xff] }
0x1acf   :  { %v8341_v16 = vmul.f32 %v15067_v57, %v14456_v43  ;;  %v8305_v28 = vmul.f32 %v14460_v7, %v15134_v54  ;;  %v8306_v12 = vmul.f32 %v14458_v50, %v15135_v60  ;;  %v11026_v45 = vpack.i.bf16 %v14458_v50, %v14460_v7 }
0x1ad0   :  { %11007 = vrot.lane.b32.xlu1 %v11006_v53, %s11458_s8  ;;  %v11011_v30 = vpack.i.bf16 %v8155_v58, %v8154_v44  ;;  %v11016_v20 = vpack.i.bf16 %v8224_v0, %v8223_v41  ;;  %v11021_v4 = vpack.i.bf16 %v8261_v19, %v8260_v3  ;;  %v8342_v51 = vmul.f32 %v14460_v7, %v15139_v49  ;;  %v15228_v53 = vld [vmem:[#allocation35_spill] sm:$0xff]  ;;  %v15229_v0 = vld [vmem:[#allocation30_spill] sm:$0xff] }
0x1ad1   :  { %v11031_v37 = vpack.i.bf16 %v8306_v12, %v8305_v28  ;;  %v8343_v17 = vmul.f32 %v14458_v50, %v15140_v55  ;;  %v8410_v61 = vmul.f32 %v15143_v63, %v14456_v43  ;;  %v8411_v33 = vmul.f32 %v14460_v7, %v15144_v14  ;;  %v14562_v12 = vld [vmem:[%s14890_s4 + $0x340] sm:$0xf] }
0x1ad2   :  { %11012 = vrot.lane.b32.xlu0 %v11011_v30, %s15062_s22  ;;  %v8412_v52 = vmul.f32 %v14458_v50, %v15148_v32  ;;  %v8156_v40 = vmul.f32 %v14458_v50, %v15189_v26  ;;  %v8157_v46 = vmul.f32 %v14462_v59, %v15190_v2  ;;  %v11046_v42 = vpack.i.bf16 %v14462_v59, %v14458_v50 }
0x1ad3   :  { %v11036_v34 = vpack.i.bf16 %v8343_v17, %v8342_v51  ;;  %v11041_v8 = vpack.i.bf16 %v8411_v33, %v8410_v61  ;;  %v8262_v38 = vmul.f32 %v14458_v50, %v15191_v62  ;;  %v8263_v13 = vmul.f32 %v14462_v59, %v15192_v24  ;;  %v15231_v17 = vld [vmem:[#allocation17_spill] sm:$0xff]  ;;  %v15234_v33 = vld [vmem:[#allocation14_spill] sm:$0xff] }
0x1ad4   :  { %8314 = vrot.lane.b32.xlu1 %v8304_v6, %s11446_s26  ;;  %v11051_v47 = vpack.i.bf16 %v8157_v46, %v8156_v40  ;;  %v8225_v31 = vmul.f32 %v14458_v50, %v15193_v27  ;;  %v8226_v1 = vmul.f32 %v14462_v59, %v15194_v18  ;;  %v8344_v9 = vmul.f32 %v14462_v59, %v15195_v15  ;;  %v15233_v61 = vld [vmem:[#allocation21_spill] sm:$0xff]  ;;  %v8164_v40 = vpop.permute.xlu0 %8163 }
0x1ad5   :  { %v11061_v36 = vpack.i.bf16 %v8263_v13, %v8262_v38  ;;  %v14534_v58 = vmul.f32 %v14529_v56, %v15228_v53  ;;  %v8307_v30 = vmul.f32 %v14462_v59, %v15196_v48  ;;  %v14542_v6 = vmul.f32 %v14529_v56, %v15229_v0 }
0x1ad6   :  { %11017 = vrot.lane.b32.xlu0 %v11016_v20, %s15063_s23  ;;  %v11056_v44 = vpack.i.bf16 %v8226_v1, %v8225_v31  ;;  %v8413_v3 = vmul.f32 %v14462_v59, %v15198_v25  ;;  %v15230_v20 = vld [vmem:[#allocation34_spill] sm:$0xff]  ;;  %v8605_v51 = vunpack.c.l.bf16 %v14562_v12 }
0x1ad7   :  { %v11076_v41 = vpack.i.bf16 %v14534_v58, %v8344_v9  ;;  %v11066_v19 = vpack.i.bf16 %v14542_v6, %v8307_v30 }
0x1ad8   :  { %11022 = vrot.lane.b32.xlu1 %v11021_v4, %s11447_s27  ;;  %v14550_v4 = vmul.f32 %v14529_v56, %v15230_v20 }
0x1ada   :  { %8351 = vrot.lane.b32.xlu0 %v8341_v16, %s15072_s1  ;;  %v14555_v16 = vld [vmem:[%s14890_s4 + $0x320] sm:$0xf]  ;;  %v11081_v28 = vpack.i.bf16 %v14550_v4, %v8413_v3 }
0x1adc   :  { %11027 = vrot.lane.b32.xlu1 %v11026_v45, %s11460_s20  ;;  %v11071_v45 = vpack.i.bf16 %v14529_v56, %v14462_v59 }
0x1ade   :  { %11032 = vrot.lane.b32.xlu0 %v11031_v37, %s11446_s26  ;;  %v8143_v37 = vunpack.c.l.bf16 %v14555_v16 }
0x1ae0   :  { %8383 = vrot.lane.b32.xlu1 %v14456_v43, %s11460_s20 }
0x1ae2   :  { %11037 = vrot.lane.b32.xlu0 %v11036_v34, %s15072_s1  ;;  %v15232_v34 = vmov 72  }
0x1ae4   :  { %8424 = vrot.lane.b32.xlu1 %v8412_v52, %s15075_s12  ;;  %v8910_v52 = vmul.f32 %v14278_v10, %v15234_v33 }
0x1ae6   :  { %11042 = vrot.lane.b32.xlu0 %v11041_v8, %s15075_s12  ;;  %v8196_v8 = vpop.permute.xlu1 %8195 }
0x1ae8   :  { %11047 = vrot.lane.b32.xlu1 %v11046_v42, %s11458_s8  ;;  %v8233_v42 = vpop.permute.xlu0 %8232 }
0x1aea   :  { %11052 = vrot.lane.b32.xlu0 %v11051_v47, %s15062_s22  ;;  %v8270_v46 = vpop.permute.xlu1 %8269 }
0x1aec   :  { %11062 = vrot.lane.b32.xlu1 %v11061_v36, %s11447_s27 }
0x1aee   :  { %11057 = vrot.lane.b32.xlu0 %v11056_v44, %s15063_s23 }
0x1af0   :  { %11077 = vrot.lane.b32.xlu1 %v11076_v41, %s15072_s1 }
0x1af2   :  { %11067 = vrot.lane.b32.xlu0 %v11066_v19, %s11446_s26 }
0x1af4   :  { %11082 = vrot.lane.b32.xlu1 %v11081_v28, %s15075_s12 }
0x1af6   :  { %11072 = vrot.lane.b32.xlu0 %v11071_v45, %s11460_s20 }
0x1af8   :  { %8500 = vperm.xlu1 %11005, %v8143_v37  }
0x1afa   :  { %8608 = vperm.xlu0 %11086, %v8605_v51  }
0x1afc   :  { %8814 = vrot.lane.b32.xlu1 %v15231_v17, %s15062_s22 }
0x1afe   :  { %8846 = vrot.lane.b32.xlu0 %v14278_v10, %s11458_s8 }
0x1aff   :  { %11167 = vset.pattern.permute.xlu0 %v15232_v34 }
0x1b00   :  { %8883 = vrot.lane.b32.xlu1 %v15233_v61, %s15063_s23 }
0x1b02   :  { %8920 = vrot.lane.b32.xlu0 %v8910_v52, %s11447_s27 }
0x1b42   :  { %v14580_v38 = vpop.permute.xlu1 %11007 }
0x1b43   :  { %v11010_v13 = vunpack.i.h.bf16 %v14580_v38  ;;  %v11009_v47 = vunpack.i.l.bf16 %v14580_v38 }
0x1b44   :  { %v14584_v31 = vpop.permute.xlu0 %11012 }
0x1b45   :  { %v11015_v1 = vunpack.i.h.bf16 %v14584_v31  ;;  %v11014_v36 = vunpack.i.l.bf16 %v14584_v31  ;;  %v8205_v44 = vsel %vm787_vm10, %v8196_v8, %v11009_v47  ;;  %v8206_v41 = vsel %vm787_vm10, %v11009_v47, %v11010_v13 }
0x1b46   :  { %v8315_v9 = vpop.permute.xlu1 %8314 }
0x1b47   :  { %v8173_v53 = vsel %vm15235_vm13, %v8164_v40, %v11014_v36  ;;  %v8174_v30 = vsel %vm15214_vm2, %v11014_v36, %v11015_v1  ;;  %vm15241_vm13 = vmmov %vm15214_vm2 }
0x1b48   :  { %v8478_v0 = vpack.c.bf16 %v8205_v44, %v8173_v53  ;;  %v14596_v3 = vpop.permute.xlu0 %11017  ;;  %v8479_v19 = vpack.c.bf16 %v8206_v41, %v8174_v30 }
0x1b49   :  { %v15012_v20 = vunpack.i.h.bf16 %v14596_v3  ;;  %v11019_v28 = vunpack.i.l.bf16 %v14596_v3 }
0x1b4a   :  { %v14600_v45 = vpop.permute.xlu1 %11022  ;;  %8518 = vmatprep.subr.bf16.mxu1 %v8479_v19 }
0x1b4b   :  { %v15013_v37 = vunpack.i.h.bf16 %v14600_v45  ;;  %v11024_v51 = vunpack.i.l.bf16 %v14600_v45  ;;  %8519 = vmatpush1.bf16.msra.mxu1 %v8478_v0  ;;  %v8242_v34 = vsel %vm15236_vm14, %v8233_v42, %v11019_v28  ;;  %v8243_v33 = vsel %vm15218_vm8, %v11019_v28, %v15012_v20  ;;  %vm15244_vm14 = vmmov %vm15218_vm8 }
0x1b4c   :  { %v8352_v17 = vpop.permute.xlu0 %8351 }
0x1b4d   :  { %v8279_v61 = vsel %vm212_vm5, %v8270_v46, %v11024_v51  ;;  %v8280_v52 = vsel %vm212_vm5, %v11024_v51, %v15013_v37 }
0x1b4e   :  { %v8482_v8 = vpack.c.bf16 %v8279_v61, %v8242_v34  ;;  %v14612_v40 = vpop.permute.xlu1 %11027  ;;  %v8483_v47 = vpack.c.bf16 %v8280_v52, %v8243_v33 }
0x1b4f   :  { %v11030_v53 = vunpack.i.h.bf16 %v14612_v40  ;;  %v11029_v30 = vunpack.i.l.bf16 %v14612_v40  ;;  %v11391_v40 = vld [vmem:[%s14890_s4 + $0x4e0] ss:$16 sps:$4 sm:$0xff]  }
0x1b50   :  { %8520 = vmatprep.subr.bf16.mxu1 %v8483_v47  ;;  %v14614_v36 = vpop.permute.xlu0 %11032 }
0x1b51   :  { %v15010_v44 = vunpack.i.h.bf16 %v14614_v36  ;;  %v11034_v42 = vunpack.i.l.bf16 %v14614_v36  ;;  %8521 = vmatpush1.bf16.msra.mxu1 %v8482_v8 }
0x1b52   :  { %v8384_v46 = vpop.permute.xlu1 %8383 }
0x1b53   :  { %v8324_v41 = vsel %vm231_vm7, %v8315_v9, %v11034_v42  ;;  %v8325_v0 = vsel %vm231_vm7, %v11034_v42, %v15010_v44  ;;  %v8393_v52 = vsel %vm15237_vm3, %v8384_v46, %v11029_v30  ;;  %vm15250_vm3 = vmmov %vm15239_vm4 }
0x1b54   :  { %v8486_v19 = vpack.c.bf16 %v8324_v41, %v14456_v43  ;;  %v14625_v28 = vpop.permute.xlu0 %11037  ;;  %v8487_v51 = vpack.c.bf16 %v8325_v0, %v14460_v7  ;;  %v8394_v7 = vsel %vm15225_vm1, %v11029_v30, %v11030_v53 }
0x1b55   :  { %v15011_v34 = vunpack.i.h.bf16 %v14625_v28  ;;  %v11039_v61 = vunpack.i.l.bf16 %v14625_v28 }
0x1b56   :  { %v14630_v33 = vpop.permute.xlu1 %8424  ;;  %8522 = vmatprep.subr.bf16.mxu1 %v8487_v51 }
0x1b57   :  { %v8361_v9 = vsel %vm15238_vm15, %v8352_v17, %v11039_v61  ;;  %8523 = vmatpush1.bf16.msra.mxu1 %v8486_v19  ;;  %v8362_v43 = vsel %vm15223_vm9, %v11039_v61, %v15011_v34 }
0x1b58   :  { %v8490_v8 = vpack.c.bf16 %v8393_v52, %v8361_v9  ;;  %v11043_v47 = vpop.permute.xlu0 %11042  ;;  %v8491_v42 = vpack.c.bf16 %v8394_v7, %v8362_v43 }
0x1b59   :  { %v11045_v41 = vunpack.i.h.bf16 %v11043_v47  ;;  %v11044_v0 = vunpack.i.l.bf16 %v11043_v47 }
0x1b5a   :  { %8524 = vmatprep.subr.bf16.mxu1 %v8491_v42  ;;  %v11048_v51 = vpop.permute.xlu1 %11047 }
0x1b5b   :  { %v8431_v46 = vsel %vm15239_vm4, %v11045_v41, %v14630_v33  ;;  %v11050_v17 = vunpack.i.h.bf16 %v11048_v51  ;;  %v11049_v19 = vunpack.i.l.bf16 %v11048_v51  ;;  %8525 = vmatpush1.bf16.msra.mxu1 %v8490_v8  ;;  %v8430_v44 = vsel %vm15240_vm6, %v11044_v0, %v11045_v41  ;;  %vm15253_vm4 = vmmov %vm15250_vm3 }
0x1b5c   :  { %v8495_v61 = vpack.c.bf16 %v8431_v46, %v8431_v46  ;;  %v11053_v34 = vpop.permute.xlu0 %11052  ;;  %v8494_v20 = vpack.c.bf16 %v8430_v44, %v8430_v44  ;;  %v15245_v46 = vld [vmem:[#allocation38_spill] sm:$0xff]  ;;  %vm15254_vm6 = vmmov %vm15214_vm2 }
0x1b5d   :  { %v11055_v37 = vunpack.i.h.bf16 %v11053_v34  ;;  %v11054_v30 = vunpack.i.l.bf16 %v11053_v34  ;;  %v8207_v52 = vsel %vm787_vm10, %v11010_v13, %v11049_v19  ;;  %v8208_v7 = vsel %vm787_vm10, %v11049_v19, %v11050_v17 }
0x1b5e   :  { %9522 = vmatprep.subr.msk.bf16.mxu1 %vm304_vm11, %v8495_v61  ;;  %v11063_v9 = vpop.permute.xlu1 %11062  ;;  %v8507_v43 = vsel %vm304_vm11, %v8494_v20, 0  ;;  %v15242_v20 = vunpack.i.h.bf16 %v14600_v45 }
0x1b5f   :  { %v8175_v8 = vsel %vm15241_vm13, %v11015_v1, %v11054_v30  ;;  %v11065_v47 = vunpack.i.h.bf16 %v11063_v9  ;;  %v11064_v42 = vunpack.i.l.bf16 %v11063_v9  ;;  %8527 = vmatpush1.bf16.msra.mxu1 %v8507_v43  ;;  %v8176_v44 = vsel %vm15214_vm2, %v11054_v30, %v11055_v37  ;;  %vm15255_vm13 = vmmov %vm15214_vm2 }
0x1b60   :  { %v8480_v34 = vpack.c.bf16 %v8207_v52, %v8175_v8  ;;  %v11058_v38 = vpop.permute.xlu0 %11057  ;;  %10107 = vmatprep.subr.bf16.mxu1 %v14278_v10  ;;  %v8481_v13 = vpack.c.bf16 %v8208_v7, %v8176_v44  ;;  %v15243_v1 = vunpack.i.h.bf16 %v14596_v3  ;;  %v15246_v8 = vunpack.i.h.bf16 %v14614_v36 }
0x1b61   :  { %v11060_v41 = vunpack.i.h.bf16 %v11058_v38  ;;  %v11059_v0 = vunpack.i.l.bf16 %v11058_v38  ;;  %v8281_v51 = vsel %vm212_vm5, %v15242_v20, %v11064_v42  ;;  %v8282_v19 = vsel %vm212_vm5, %v11064_v42, %v11065_v47  ;;  %v15247_v42 = vld [vmem:[#allocation18_spill] sm:$0xff] }
0x1b62   :  { %9523 = vmatmul.mubr.msk.bf16.vlgmr.msra.gmra.mrb[104].mxu1 %vm300_vm12, %v14555_v16  ;;  %v11078_v31 = vpop.permute.xlu1 %11077  ;;  %8559 = vmatprep.subr.bf16.mxu0 %v8481_v13 }
0x1b63   :  { %v8244_v37 = vsel %vm15244_vm14, %v15243_v1, %v11059_v0  ;;  %8560 = vmatpush1.bf16.msra.mxu0 %v8480_v34  ;;  %10108 = vmatpush3.bf16.msra.mxu1 %v15245_v46  ;;  %v8245_v17 = vsel %vm15218_vm8, %v11059_v0, %v11060_v41  ;;  %v11080_v3 = vunpack.i.h.bf16 %v11078_v31  ;;  %v11079_v43 = vunpack.i.l.bf16 %v11078_v31  ;;  %vm15256_vm14 = vmmov %vm15214_vm2 }
0x1b64   :  { %v8484_v61 = vpack.c.bf16 %v8281_v51, %v8244_v37  ;;  %v11068_v45 = vpop.permute.xlu0 %11067  ;;  %10109 = vmatprep.subr.bf16.mxu1 %v14278_v10  ;;  %v8485_v30 = vpack.c.bf16 %v8282_v19, %v8245_v17  ;;  %10111 = vmatprep.mubr.msk.bf16.mxu1 %vm11442_vm0, %v14278_v10  ;;  %v15248_v51 = vunpack.i.h.bf16 %v14625_v28  ;;  %vm15249_vm0 = vmmov %vm15223_vm9 }
0x1b65   :  { %v11070_v52 = vunpack.i.h.bf16 %v11068_v45  ;;  %v11069_v9 = vunpack.i.l.bf16 %v11068_v45  ;;  %vm15251_vm15 = vmmov %vm15249_vm0  ;;  %v11399_v45 = vld [vmem:[%s14890_s4 + $0x504] ss:$16 sps:$4 sm:$0xff]  }
0x1b66   :  { %v11083_v7 = vpop.permute.xlu1 %11082  ;;  %8561 = vmatprep.subr.bf16.mxu0 %v8485_v30  ;;  %v8363_v36 = vsel %vm15249_vm0, %v15248_v51, %v11079_v43  ;;  %v8364_v1 = vsel %vm15251_vm15, %v11079_v43, %v11080_v3  ;;  %vm15252_vm9 = vmmov %vm15225_vm1  ;;  %v11400_v30 = vld [vmem:[%s14890_s4 + $0x508] ss:$16 sps:$4 sm:$0xff]  }
0x1b67   :  { %v8326_v44 = vsel %vm231_vm7, %v15246_v8, %v11069_v9  ;;  %v11085_v34 = vunpack.i.h.bf16 %v11083_v7  ;;  %v11084_v47 = vunpack.i.l.bf16 %v11083_v7  ;;  %8562 = vmatpush1.bf16.msra.mxu0 %v8484_v61  ;;  %10110 = vmatpush3.bf16.msra.mxu1 %v15247_v42  ;;  %v8327_v38 = vsel %vm231_vm7, %v11069_v9, %v11070_v52  ;;  %v11396_v61 = vld [vmem:[%s14890_s4 + $0x4ec] ss:$16 sps:$4 sm:$0xff]   ;;  %vm15257_vm0 = vmmov %vm15218_vm8 }
0x1b68   :  { %v8488_v13 = vpack.c.bf16 %v8326_v44, %v14458_v50  ;;  %v11073_v10 = vpop.permute.xlu0 %11072  ;;  %v8489_v41 = vpack.c.bf16 %v8327_v38, %v14462_v59  ;;  %v11402_v52 = vld [vmem:[%s14890_s4 + $0x50c] ss:$16 sps:$4 sm:$0xff]  }
0x1b69   :  { %v11075_v0 = vunpack.i.h.bf16 %v11073_v10  ;;  %v11074_v20 = vunpack.i.l.bf16 %v11073_v10  ;;  %v8433_v31 = vsel %vm15250_vm3, %v11084_v47, %v11085_v34  ;;  %v8432_v28 = vsel %vm15253_vm4, %v14630_v33, %v11084_v47  ;;  %v11394_v33 = vld [vmem:[%s14890_s4 + $0x4e8] ss:$16 sps:$4 sm:$0xff]   ;;  %vm15259_vm3 = vmmov %vm15257_vm0 }
0x1b6a   :  { %8563 = vmatprep.subr.bf16.mxu0 %v8489_v41  ;;  %10112 = vmatmul.mubr.msk.bf16.vlgmr.msra.gmra.mrb[108].mxu1 %vm787_vm10, %v14562_v12  ;;  %v8497_v17 = vpack.c.bf16 %v8433_v31, %v8433_v31  ;;  %v8496_v19 = vpack.c.bf16 %v8432_v28, %v8432_v28 }
0x1b6b   :  { %v8395_v50 = vsel %vm15252_vm9, %v11030_v53, %v11074_v20  ;;  %8564 = vmatpush1.bf16.msra.mxu0 %v8488_v13  ;;  %v8396_v59 = vsel %vm15225_vm1, %v11074_v20, %v11075_v0  ;;  %8739 = vmatprep.mubr.bf16.mxu1 %v15048_v22  ;;  %v11393_v53 = vld [vmem:[%s14890_s4 + $0x4e4] ss:$16 sps:$4 sm:$0xff]   ;;  %vm15261_vm9 = vmmov %vm15225_vm1 }
0x1b6c   :  { %v8492_v37 = vpack.c.bf16 %v8395_v50, %v8363_v36  ;;  %v8493_v46 = vpack.c.bf16 %v8396_v59, %v8364_v1  ;;  %v8513_v12 = vsel %vm304_vm11, %v8496_v19, 0  ;;  %8707 = vmatprep.subr.bf16.mxu1 %v11393_v53 }
0x1b6d   :  { %8708 = vmatpush1.bf16.msra.mxu1 %v11391_v40 }
0x1b6e   :  { %8565 = vmatprep.subr.bf16.mxu0 %v8493_v46  ;;  %8709 = vmatprep.subr.bf16.mxu1 %v11399_v45 }
0x1b6f   :  { %8566 = vmatpush1.bf16.msra.mxu0 %v8492_v37 }
0x1b70   :  { %9524 = vmatprep.subr.msk.bf16.mxu0 %vm304_vm11, %v8497_v17 }
0x1b73   :  { %8568 = vmatpush1.bf16.msra.mxu0 %v8513_v12 }
0x1b74   :  { %8748 = vmatprep.subr.bf16.mxu0 %v11396_v61 }
0x1b76   :  { %9525 = vmatmul.mubr.msk.bf16.vlgmr.msra.gmra.mrb[108].mxu0 %vm300_vm12, %v14555_v16  ;;  %v11397_v16 = vld [vmem:[%s14890_s4 + $0x500] ss:$16 sps:$4 sm:$0xff]  }
0x1b77   :  { %8780 = vmatprep.mubr.bf16.mxu0 %v15048_v22  ;;  %8749 = vmatpush1.bf16.msra.mxu0 %v11394_v33  ;;  %v8501_v36 = vpop.permute.xlu1 %8500 }
0x1b78   :  { %8750 = vmatprep.subr.bf16.mxu0 %v11402_v52  ;;  %8710 = vmatpush1.bf16.msra.mxu1 %v11397_v16 }
0x1b79   :  { %v8609_v8 = vpop.permute.xlu0 %8608 }
0x1b7b   :  { %8751 = vmatpush1.bf16.msra.mxu0 %v11400_v30 }
0x1c35   :  { %v8552_v9 = vpop.f32.mrb[104].mxu1 }
0x1c36   :  { %v8554_v3 = vpop.f32.mrb[105].mxu1  ;;  %v8553_v31 = vadd.f32 %v8552_v9, %v8501_v36 }
0x1c37   :  { %v8556_v43 = vpop.f32.mrb[106].mxu1  ;;  %v8555_v50 = vadd.f32 %v8554_v3, %v8501_v36 }
0x1c38   :  { %v8557_v7 = vpop.f32.mrb[107].mxu1  ;;  %v8600_v28 = vmax.f32 %v8553_v31, 0.0 }
0x1c39   :  { %v8601_v46 = vmax.f32 %v8555_v50, 0.0 }
0x1c3d   :  { %v8648_v44 = vpop.f32.mrb[108].mxu1 }
0x1c3e   :  { %v8649_v34 = vadd.f32 %v8648_v44, %v8609_v8  ;;  %v10113_v47 = vpop.f32.mrb[109].mxu1 }
0x1c3f   :  { %v8651_v42 = vpop.f32.mrb[110].mxu1 }
0x1c40   :  { %v8654_v38 = vmax.f32 %v8649_v34, 0.0  ;;  %v10114_v13 = vpop.f32.mrb[111].mxu1 }
0x1c42   :  { %v8663_v10 = vpack.c.bf16 %v8654_v38, %v8654_v38 }
0x1c44   :  { %9535 = vmatmul.mubr.msk.bf16.vlgmr.msra.gmra.mrb[112].mxu1 %vm787_vm10, %v8663_v10  ;;  %9536 = vmatmul.mubr.msk.bf16.vlgmr.msra.gmra.mrb[112].mxu0 %vm787_vm10, %v8663_v10 }
0x1c45   :  { %9201 = vmatprep.mubr.bf16.mxu1 %v15048_v22  ;;  %9242 = vmatprep.mubr.bf16.mxu0 %v15048_v22 }
0x1c49   :  { %v8593_v41 = vpop.f32.mrb[108].mxu0 }
0x1c4a   :  { %v8595_v0 = vpop.f32.mrb[109].mxu0  ;;  %v8594_v1 = vadd.f32 %v8593_v41, %v8501_v36 }
0x1c4b   :  { %v8597_v20 = vpop.f32.mrb[110].mxu0  ;;  %v8596_v59 = vadd.f32 %v8595_v0, %v8501_v36 }
0x1c4c   :  { %v8598_v51 = vpop.f32.mrb[111].mxu0  ;;  %v8602_v37 = vmax.f32 %v8594_v1, 0.0 }
0x1c4d   :  { %v8603_v17 = vmax.f32 %v8596_v59, 0.0 }
0x1d17   :  { %v8741_v19 = vpop.f32.mrb[112].mxu1  ;;  %v8782_v12 = vpop.f32.mrb[112].mxu0 }
0x1d18   :  { %v14722_v40 = vadd.f32 %v8741_v19, %v8600_v28  ;;  %v14724_v53 = vadd.f32 %v8782_v12, %v8602_v37  ;;  %v8743_v22 = vpop.f32.mrb[113].mxu1  ;;  %v8784_v33 = vpop.f32.mrb[113].mxu0 }
0x1d19   :  { %v14726_v61 = vadd.f32 %v8743_v22, %v8601_v46  ;;  %v14728_v16 = vadd.f32 %v8784_v33, %v8603_v17  ;;  %v8745_v45 = vpop.f32.mrb[114].mxu1  ;;  %v8786_v30 = vpop.f32.mrb[114].mxu0 }
0x1d1a   :  { %v8746_v52 = vpop.f32.mrb[115].mxu1  ;;  %v8787_v9 = vpop.f32.mrb[115].mxu0  ;;  %9034 = vrot.lane.b32.xlu1 %v14722_v40, %s11460_s20  ;;  %v8992_v44 = vmul.f32 %v15067_v57, %v14722_v40  ;;  %v8807_v34 = vmul.f32 %v14724_v53, %v15189_v26  ;;  %v8955_v42 = vmul.f32 %v15136_v29, %v14722_v40  ;;  %v8805_v38 = vmul.f32 %v14722_v40, %v11777_v5 }
0x1d1b   :  { %v11092_v3 = vpack.i.bf16 %v14728_v16, %v14724_v53  ;;  %v11087_v43 = vpack.i.bf16 %v14726_v61, %v14722_v40  ;;  %v11097_v7 = vpack.i.bf16 %v14724_v53, %v14726_v61  ;;  %v11102_v8 = vpack.i.bf16 %v14529_v56, %v14728_v16 }
0x1d1c   :  { %v8808_v47 = vmul.f32 %v14728_v16, %v15190_v2  ;;  %v8806_v56 = vmul.f32 %v14726_v61, %v11783_v11  ;;  %v8876_v26 = vmul.f32 %v14724_v53, %v15193_v27  ;;  %v8877_v2 = vmul.f32 %v14728_v16, %v15194_v18 }
0x1d1d   :  { %11093 = vrot.lane.b32.xlu0 %v11092_v3, %s11458_s8  ;;  %v8874_v29 = vmul.f32 %v14722_v40, %v11795_v21  ;;  %v8875_v5 = vmul.f32 %v14726_v61, %v11799_v23  ;;  %v8913_v10 = vmul.f32 %v14724_v53, %v15191_v62  ;;  %v8914_v27 = vmul.f32 %v14728_v16, %v15192_v24 }
0x1d1e   :  { %11088 = vrot.lane.b32.xlu1 %v11087_v43, %s11458_s8  ;;  %v11112_v57 = vpack.i.bf16 %v8808_v47, %v8807_v34  ;;  %v11107_v13 = vpack.i.bf16 %v8806_v56, %v8805_v38  ;;  %v11122_v11 = vpack.i.bf16 %v8877_v2, %v8876_v26  ;;  %v8911_v18 = vmul.f32 %v14722_v40, %v15137_v39 }
0x1d1f   :  { %v11117_v41 = vpack.i.bf16 %v8875_v5, %v8874_v29  ;;  %v8912_v21 = vmul.f32 %v14726_v61, %v15138_v35  ;;  %v11132_v23 = vpack.i.bf16 %v8914_v27, %v8913_v10  ;;  %v8958_v0 = vmul.f32 %v14728_v16, %v15196_v48 }
0x1d20   :  { %v8956_v62 = vmul.f32 %v14726_v61, %v15134_v54  ;;  %v8957_v24 = vmul.f32 %v14724_v53, %v15135_v60  ;;  %v8993_v35 = vmul.f32 %v14726_v61, %v15139_v49  ;;  %v8994_v51 = vmul.f32 %v14724_v53, %v15140_v55 }
0x1d21   :  { %11098 = vrot.lane.b32.xlu0 %v11097_v7, %s11460_s20  ;;  %v11127_v20 = vpack.i.bf16 %v8912_v21, %v8911_v18  ;;  %v11142_v39 = vpack.i.bf16 %v14542_v6, %v8958_v0  ;;  %v8995_v36 = vmul.f32 %v14728_v16, %v15195_v15  ;;  %v9061_v60 = vmul.f32 %v15143_v63, %v14722_v40  ;;  %v14809_v63 = vld [vmem:[%s14890_s4 + $0x360] sm:$0xf] }
0x1d22   :  { %11103 = vrot.lane.b32.xlu1 %v11102_v8, %s11460_s20  ;;  %v11137_v48 = vpack.i.bf16 %v8957_v24, %v8956_v62  ;;  %v11147_v54 = vpack.i.bf16 %v8994_v51, %v8993_v35  ;;  %v9062_v6 = vmul.f32 %v14726_v61, %v15144_v14  ;;  %v9063_v55 = vmul.f32 %v14724_v53, %v15148_v32  ;;  %v8815_v32 = vpop.permute.xlu1 %8814 }
0x1d23   :  { %v11152_v49 = vpack.i.bf16 %v14534_v58, %v8995_v36  ;;  %v9064_v31 = vmul.f32 %v14728_v16, %v15198_v25  ;;  %v8794_v14 = vunpack.c.l.bf16 %v14809_v63  ;;  %v8847_v25 = vpop.permute.xlu0 %8846 }
0x1d24   :  { %v11157_v15 = vpack.i.bf16 %v9062_v6, %v9061_v60 }
0x1d25   :  { %9002 = vrot.lane.b32.xlu0 %v8992_v44, %s15072_s1  ;;  %v11162_v1 = vpack.i.bf16 %v9064_v31, %v9063_v55 }
0x1d26   :  { %8965 = vrot.lane.b32.xlu1 %v8955_v42, %s11446_s26  ;;  %v8884_v58 = vpop.permute.xlu1 %8883 }
0x1d27   :  { %v8921_v50 = vpop.permute.xlu0 %8920 }
0x1d29   :  { %11113 = vrot.lane.b32.xlu0 %v11112_v57, %s15062_s22 }
0x1d2a   :  { %11108 = vrot.lane.b32.xlu1 %v11107_v13, %s15062_s22 }
0x1d2d   :  { %11123 = vrot.lane.b32.xlu0 %v11122_v11, %s15063_s23 }
0x1d2e   :  { %11118 = vrot.lane.b32.xlu1 %v11117_v41, %s15063_s23 }
0x1d31   :  { %11133 = vrot.lane.b32.xlu0 %v11132_v23, %s11447_s27 }
0x1d32   :  { %11128 = vrot.lane.b32.xlu1 %v11127_v20, %s11447_s27 }
0x1d35   :  { %11143 = vrot.lane.b32.xlu0 %v11142_v39, %s11446_s26 }
0x1d36   :  { %11138 = vrot.lane.b32.xlu1 %v11137_v48, %s11446_s26 }
0x1d39   :  { %11148 = vrot.lane.b32.xlu0 %v11147_v54, %s15072_s1 }
0x1d3a   :  { %11153 = vrot.lane.b32.xlu1 %v11152_v49, %s15072_s1 }
0x1d3d   :  { %11158 = vrot.lane.b32.xlu0 %v11157_v15, %s15075_s12 }
0x1d3e   :  { %11163 = vrot.lane.b32.xlu1 %v11162_v1, %s15075_s12 }
0x1d41   :  { %9079 = vrot.lane.b32.xlu0 %v14550_v4, %s15075_s12 }
0x1d42   :  { %9151 = vperm.xlu1 %11005, %v8794_v14  }
0x1d8c   :  { %v14816_v59 = vpop.permute.xlu1 %9034 }
0x1d8f   :  { %v11094_v28 = vpop.permute.xlu0 %11093 }
0x1d90   :  { %v11089_v37 = vpop.permute.xlu1 %11088  ;;  %v11096_v22 = vunpack.i.h.bf16 %v11094_v28  ;;  %v11095_v33 = vunpack.i.l.bf16 %v11094_v28 }
0x1d91   :  { %v11091_v4 = vunpack.i.h.bf16 %v11089_v37  ;;  %v11090_v45 = vunpack.i.l.bf16 %v11089_v37 }
0x1d92   :  { %v8859_v47 = vsel %vm787_vm10, %v11095_v33, %v11096_v22 }
0x1d93   :  { %v14818_v46 = vpop.permute.xlu0 %11098  ;;  %v8856_v8 = vsel %vm787_vm10, %v8847_v25, %v11090_v45  ;;  %v8858_v44 = vsel %vm787_vm10, %v11091_v4, %v11095_v33  ;;  %v8857_v5 = vsel %vm787_vm10, %v11090_v45, %v11091_v4  ;;  %vm15258_vm10 = vmmov %vm15257_vm0 }
0x1d94   :  { %v14820_v17 = vpop.permute.xlu1 %11103  ;;  %v11101_v25 = vunpack.i.h.bf16 %v14818_v46  ;;  %v11100_v22 = vunpack.i.l.bf16 %v14818_v46 }
0x1d95   :  { %v11105_v33 = vunpack.i.l.bf16 %v14820_v17 }
0x1d97   :  { %v14822_v19 = vpop.permute.xlu0 %9002 }
0x1d98   :  { %v14824_v12 = vpop.permute.xlu1 %8965 }
0x1d9b   :  { %v11114_v30 = vpop.permute.xlu0 %11113 }
0x1d9c   :  { %v11116_v52 = vunpack.i.h.bf16 %v11114_v30  ;;  %v11115_v9 = vunpack.i.l.bf16 %v11114_v30  ;;  %v11109_v3 = vpop.permute.xlu1 %11108 }
0x1d9d   :  { %v11111_v43 = vunpack.i.h.bf16 %v11109_v3  ;;  %v11110_v7 = vunpack.i.l.bf16 %v11109_v3 }
0x1d9e   :  { %v8827_v34 = vsel %vm15254_vm6, %v11115_v9, %v11116_v52 }
0x1d9f   :  { %v8824_v42 = vsel %vm15255_vm13, %v8815_v32, %v11110_v7  ;;  %v8826_v38 = vsel %vm15214_vm2, %v11111_v43, %v11115_v9  ;;  %v11124_v56 = vpop.permute.xlu0 %11123  ;;  %v9132_v57 = vpack.c.bf16 %v8859_v47, %v8827_v34  ;;  %v8825_v26 = vsel %vm15256_vm14, %v11110_v7, %v11111_v43 }
0x1da0   :  { %v9129_v2 = vpack.c.bf16 %v8856_v8, %v8824_v42  ;;  %v9131_v13 = vpack.c.bf16 %v8858_v44, %v8826_v38  ;;  %v11119_v29 = vpop.permute.xlu1 %11118  ;;  %v11126_v11 = vunpack.i.h.bf16 %v11124_v56  ;;  %v11125_v10 = vunpack.i.l.bf16 %v11124_v56 }
0x1da1   :  { %9210 = vmatprep.subr.bf16.mxu0 %v9132_v57  ;;  %v9130_v27 = vpack.c.bf16 %v8857_v5, %v8825_v26  ;;  %v11121_v41 = vunpack.i.h.bf16 %v11119_v29  ;;  %v11120_v18 = vunpack.i.l.bf16 %v11119_v29  ;;  %v9045_v42 = vsel %vm15261_vm9, %v11100_v22, %v11101_v25 }
0x1da2   :  { %9211 = vmatpush1.bf16.msra.mxu0 %v9131_v13  ;;  %v8896_v39 = vsel %vm15218_vm8, %v11125_v10, %v11126_v11  ;;  %vm15267_vm2 = vcmask 777216  }
0x1da3   :  { %9169 = vmatprep.subr.bf16.mxu1 %v9130_v27  ;;  %v11134_v21 = vpop.permute.xlu0 %11133  ;;  %v8893_v35 = vsel %vm15257_vm0, %v8884_v58, %v11120_v18  ;;  %v8895_v51 = vsel %vm15258_vm10, %v11121_v41, %v11125_v10  ;;  %v8894_v36 = vsel %vm15259_vm3, %v11120_v18, %v11121_v41  ;;  %vm15268_vm14 = vmmov %vm15267_vm2 }
0x1da4   :  { %9170 = vmatpush1.bf16.msra.mxu1 %v9129_v2  ;;  %v11136_v23 = vunpack.i.h.bf16 %v11134_v21  ;;  %v11135_v0 = vunpack.i.l.bf16 %v11134_v21  ;;  %v11129_v20 = vpop.permute.xlu1 %11128  ;;  %vm15269_vm8 = vmmov %vm15267_vm2 }
0x1da5   :  { %v11131_v62 = vunpack.i.h.bf16 %v11129_v20  ;;  %v11130_v24 = vunpack.i.l.bf16 %v11129_v20  ;;  %vm15270_vm0 = vmmov %vm15267_vm2 }
0x1da6   :  { %v8933_v48 = vsel %vm212_vm5, %v11135_v0, %v11136_v23 }
0x1da7   :  { %v8930_v54 = vsel %vm212_vm5, %v8921_v50, %v11130_v24  ;;  %v8932_v60 = vsel %vm212_vm5, %v11131_v62, %v11135_v0  ;;  %v11144_v6 = vpop.permute.xlu0 %11143  ;;  %v9136_v49 = vpack.c.bf16 %v8933_v48, %v8896_v39  ;;  %v8931_v55 = vsel %vm212_vm5, %v11130_v24, %v11131_v62  ;;  %vm15260_vm5 = vmmov %vm15225_vm1 }
0x1da8   :  { %v9133_v31 = vpack.c.bf16 %v8930_v54, %v8893_v35  ;;  %v9135_v15 = vpack.c.bf16 %v8932_v60, %v8895_v51  ;;  %v11146_v1 = vunpack.i.h.bf16 %v11144_v6  ;;  %v11145_v14 = vunpack.i.l.bf16 %v11144_v6  ;;  %v11139_v32 = vpop.permute.xlu1 %11138  ;;  %vm15266_vm13 = vmmov %vm15260_vm5 }
0x1da9   :  { %v11141_v58 = vunpack.i.h.bf16 %v11139_v32  ;;  %v11140_v28 = vunpack.i.l.bf16 %v11139_v32  ;;  %9212 = vmatprep.subr.bf16.mxu0 %v9136_v49  ;;  %v9134_v37 = vpack.c.bf16 %v8931_v55, %v8894_v36  ;;  %v11106_v50 = vunpack.i.h.bf16 %v14820_v17 }
0x1daa   :  { %9213 = vmatpush1.bf16.msra.mxu0 %v9135_v15  ;;  %v8978_v4 = vsel %vm231_vm7, %v11145_v14, %v11146_v1  ;;  %v9046_v47 = vsel %vm15260_vm5, %v11101_v25, %v11105_v33  ;;  %v9044_v11 = vsel %vm15266_vm13, %v14816_v59, %v11100_v22 }
0x1dab   :  { %v8975_v45 = vsel %vm231_vm7, %v14824_v12, %v11140_v28  ;;  %v8977_v30 = vsel %vm231_vm7, %v11141_v58, %v11145_v14  ;;  %9171 = vmatprep.subr.bf16.mxu1 %v9134_v37  ;;  %v11149_v52 = vpop.permute.xlu0 %11148  ;;  %v9140_v9 = vpack.c.bf16 %v8978_v4, %v14728_v16  ;;  %v8976_v3 = vsel %vm231_vm7, %v11140_v28, %v11141_v58  ;;  %vm15262_vm7 = vmmov %vm15225_vm1 }
0x1dac   :  { %v9137_v46 = vpack.c.bf16 %v8975_v45, %v14722_v40  ;;  %v9139_v43 = vpack.c.bf16 %v8977_v30, %v14724_v53  ;;  %9172 = vmatpush1.bf16.msra.mxu1 %v9133_v31  ;;  %v11151_v17 = vunpack.i.h.bf16 %v11149_v52  ;;  %v11150_v7 = vunpack.i.l.bf16 %v11149_v52  ;;  %v11154_v8 = vpop.permute.xlu1 %11153  ;;  %vm15263_vm1 = vmmov %vm15251_vm15 }
0x1dad   :  { %v11156_v44 = vunpack.i.h.bf16 %v11154_v8  ;;  %v11155_v34 = vunpack.i.l.bf16 %v11154_v8  ;;  %9214 = vmatprep.subr.bf16.mxu0 %v9140_v9  ;;  %v9138_v12 = vpack.c.bf16 %v8976_v3, %v14726_v61  ;;  %v9047_v40 = vsel %vm15262_vm7, %v11105_v33, %v11106_v50  ;;  %vm15264_vm4 = vmmov %vm15263_vm1 }
0x1dae   :  { %9215 = vmatpush1.bf16.msra.mxu0 %v9139_v43  ;;  %v9013_v16 = vsel %vm15251_vm15, %v11150_v7, %v11151_v17  ;;  %v9012_v53 = vsel %vm15263_vm1, %v14822_v19, %v11150_v7  ;;  %vm15265_vm6 = vmmov %vm15263_vm1 }
0x1daf   :  { %v9014_v38 = vsel %vm15264_vm4, %v11151_v17, %v11155_v34  ;;  %9173 = vmatprep.subr.bf16.mxu1 %v9138_v12  ;;  %v11159_v56 = vpop.permute.xlu0 %11158  ;;  %v9142_v57 = vpack.c.bf16 %v9045_v42, %v9013_v16  ;;  %v9015_v26 = vsel %vm15265_vm6, %v11155_v34, %v11156_v44  ;;  %v9141_v19 = vpack.c.bf16 %v9044_v11, %v9012_v53 }
0x1db0   :  { %v9143_v61 = vpack.c.bf16 %v9046_v47, %v9014_v38  ;;  %9174 = vmatpush1.bf16.msra.mxu1 %v9137_v46  ;;  %v11161_v2 = vunpack.i.h.bf16 %v11159_v56  ;;  %v11160_v13 = vunpack.i.l.bf16 %v11159_v56  ;;  %v11164_v29 = vpop.permute.xlu1 %11163  ;;  %v9144_v5 = vpack.c.bf16 %v9047_v40, %v9015_v26 }
0x1db1   :  { %v11166_v10 = vunpack.i.h.bf16 %v11164_v29  ;;  %v11165_v27 = vunpack.i.l.bf16 %v11164_v29  ;;  %9175 = vmatprep.subr.bf16.mxu1 %v9142_v57 }
0x1db2   :  { %9216 = vmatprep.subr.bf16.mxu0 %v9144_v5  ;;  %v9081_v41 = vsel %vm15267_vm2, %v11160_v13, %v11161_v2 }
0x1db3   :  { %v9082_v18 = vsel %vm15268_vm14, %v11161_v2, %v11165_v27  ;;  %v9080_v21 = vpop.permute.xlu0 %9079  ;;  %9217 = vmatpush1.bf16.msra.mxu0 %v9143_v61  ;;  %v9145_v23 = vpack.c.bf16 %v9081_v41, %v9081_v41  ;;  %v9083_v0 = vsel %vm15269_vm8, %v11165_v27, %v11166_v10 }
0x1db4   :  { %v9146_v20 = vpack.c.bf16 %v9082_v18, %v9082_v18  ;;  %v9084_v62 = vsel %vm15270_vm0, %v11166_v10, %v9080_v21  ;;  %9176 = vmatpush1.bf16.msra.mxu1 %v9141_v19  ;;  %v9147_v24 = vpack.c.bf16 %v9083_v0, %v9083_v0 }
0x1db5   :  { %v9148_v59 = vpack.c.bf16 %v9084_v62, %v9084_v62  ;;  %v9158_v39 = vsel %vm304_vm11, %v9145_v23, 0 }
0x1db6   :  { %9537 = vmatprep.subr.msk.bf16.mxu1 %vm304_vm11, %v9146_v20  ;;  %v9164_v35 = vsel %vm304_vm11, %v9147_v24, 0 }
0x1db7   :  { %9539 = vmatprep.subr.msk.bf16.mxu0 %vm304_vm11, %v9148_v59 }
0x1db8   :  { %9178 = vmatpush1.bf16.msra.mxu1 %v9158_v39  ;;  %9219 = vmatpush1.bf16.msra.mxu0 %v9164_v35 }
0x1dbb   :  { %9538 = vmatmul.mubr.msk.bf16.vlgmr.msra.gmra.mrb[116].mxu1 %vm300_vm12, %v14809_v63  ;;  %9540 = vmatmul.mubr.msk.bf16.vlgmr.msra.gmra.mrb[116].mxu0 %vm300_vm12, %v14809_v63 }
0x1dc1   :  { %v9152_v51 = vpop.permute.xlu1 %9151 }
0x1e8e   :  { %v9203_v48 = vpop.f32.mrb[116].mxu1  ;;  %v9244_v36 = vpop.f32.mrb[116].mxu0 }
0x1e8f   :  { %v9204_v54 = vadd.f32 %v9203_v48, %v9152_v51  ;;  %v9205_v60 = vpop.f32.mrb[117].mxu1  ;;  %v9245_v6 = vadd.f32 %v9244_v36, %v9152_v51  ;;  %v9246_v49 = vpop.f32.mrb[117].mxu0 }
0x1e90   :  { %v9206_v55 = vadd.f32 %v9205_v60, %v9152_v51  ;;  %v9247_v31 = vadd.f32 %v9246_v49, %v9152_v51  ;;  %v9207_v15 = vpop.f32.mrb[118].mxu1  ;;  %v9248_v1 = vpop.f32.mrb[118].mxu0 }
0x1e91   :  { %v9251_v14 = vmax.f32 %v9204_v54, 0.0  ;;  %v9253_v32 = vmax.f32 %v9245_v6, 0.0  ;;  %v9208_v25 = vpop.f32.mrb[119].mxu1  ;;  %v9249_v58 = vpop.f32.mrb[119].mxu0 }
0x1e92   :  { %v9252_v28 = vmax.f32 %v9206_v55, 0.0  ;;  %v9254_v37 = vmax.f32 %v9247_v31, 0.0 }
0x1e93   :  { %9255 = vst [vmem:[%s14894_s5] sm:$0xff] %v9251_v14  ;;  %9257 = vst [vmem:[%s14894_s5 + $0x10] sm:$0xff] %v9253_v32 }
0x1e94   :  { %9256 = vst [vmem:[%s14894_s5 + $0x8] sm:$0xff] %v9252_v28  ;;  %9258 = vst [vmem:[%s14894_s5 + $0x18] sm:$0xff] %v9254_v37 }

</bundles_post_ra>
